<compile_context>
chip_gen: v5e
topology: v5e:2x2
jax: 0.10.0
libtpu: 0.0.40
codegen_flags: <defaults>
</compile_context>

<pallas_src>
import jax
import jax.numpy as jnp
import numpy as np
from jax.experimental import pallas as pl
from jax.experimental.pallas import tpu as pltpu


def _round_up(x, m):
    return ((x + m - 1) // m) * m


def _bottleneck_kernel(xs_ref, xa_ref, wsd_ref, wae_ref, wsq_ref, beff_ref, o_ref):
    # h = speech_decoder(speech) + asr_encoder(asr)      (biases folded into beff)
    h = jnp.dot(xs_ref[...], wsd_ref[...], preferred_element_type=jnp.float32)
    h = h + jnp.dot(xa_ref[...], wae_ref[...], preferred_element_type=jnp.float32)
    # sequence_decoder(h): cast back to the MXU dtype, keep f32 accumulation.
    out = jnp.dot(h.astype(wsq_ref.dtype), wsq_ref[...],
                  preferred_element_type=jnp.float32)
    o_ref[...] = (out + beff_ref[...]).astype(o_ref.dtype)


def simple_bottleneck_forward(speech_feats, asr_feats, params, *,
                              tile_rows=256, compute_dtype=jnp.bfloat16):
    """speech_feats: [B, T, bottleneck_dim], asr_feats: [B, T, asr_dim] -> [B, T, out_dim]."""
    B, T, d_bn = speech_feats.shape
    Ba, Ta, d_asr = asr_feats.shape
    assert (B, T) == (Ba, Ta)
    d_out = params["w_seq"].shape[1]
    out_dtype = speech_feats.dtype

    N = B * T
    # bf16 packs 16 rows per sublane group, f32 packs 8.
    row_align = 16 if jnp.dtype(compute_dtype).itemsize < 4 else 8

    xs = speech_feats.reshape(N, d_bn).astype(compute_dtype)
    xa = asr_feats.reshape(N, d_asr).astype(compute_dtype)

    # Large row tile (kernel is memory-bound); prefer >=2 grid steps for v7x megacore.
    tm = min(tile_rows, _round_up(N, row_align))
    tm = max(row_align, (tm // row_align) * row_align)
    if _round_up(N, tm) // tm < 2 and N > row_align:
        tm = max(row_align, _round_up(-(-N // 2), row_align))
    Np = _round_up(N, tm)
    if Np != N:  # handle general B*T: pad rows, slice result afterwards
        pad = Np - N
        xs = jnp.pad(xs, ((0, pad), (0, 0)))
        xa = jnp.pad(xa, ((0, pad), (0, 0)))

    # Weights (stored [in, out]) cast to the MXU compute dtype.
    wsd = params["w_sd"].astype(compute_dtype)
    wae = params["w_ae"].astype(compute_dtype)
    wsq = params["w_seq"].astype(compute_dtype)
    # Fold all three biases into one f32 epilogue vector.
    b_eff = (
        (params["b_sd"].astype(jnp.float32) + params["b_ae"].astype(jnp.float32))
        @ params["w_seq"].astype(jnp.float32)
        + params["b_seq"].astype(jnp.float32)
    ).reshape(1, d_out)

    # Rough VMEM budget: double-buffered streamed tiles + resident weights, with headroom.
    act_b = jnp.dtype(compute_dtype).itemsize
    out_b = jnp.dtype(out_dtype).itemsize
    tiles_bytes = tm * (d_bn + d_asr) * act_b + tm * d_out * out_b
    weight_bytes = (d_bn + d_asr + d_out) * d_out * act_b + d_out * 4
    vmem_limit = int(min(max(2 * (2 * tiles_bytes + weight_bytes), 32 << 20), 64 << 20))

    out = pl.pallas_call(
        _bottleneck_kernel,
        out_shape=jax.ShapeDtypeStruct((Np, d_out), out_dtype),
        grid_spec=pltpu.PrefetchScalarGridSpec(
            num_scalar_prefetch=0,
            grid=(Np // tm,),
            in_specs=[
                pl.BlockSpec((tm, d_bn), lambda i: (i, 0)),     # speech rows (streamed)
                pl.BlockSpec((tm, d_asr), lambda i: (i, 0)),    # asr rows (streamed)
                pl.BlockSpec((d_bn, d_out), lambda i: (0, 0)),  # W speech_decoder (resident)
                pl.BlockSpec((d_asr, d_out), lambda i: (0, 0)),  # W asr_encoder (resident)
                pl.BlockSpec((d_out, d_out), lambda i: (0, 0)),  # W sequence_decoder (resident)
                pl.BlockSpec((1, d_out), lambda i: (0, 0)),      # folded bias (f32)
            ],
            out_specs=pl.BlockSpec((tm, d_out), lambda i: (i, 0)),
        ),
        compiler_params=pltpu.CompilerParams(
            dimension_semantics=("parallel",),
            vmem_limit_bytes=vmem_limit,
        ),
    )(xs, xa, wsd, wae, wsq, b_eff)

    # TODO(synk): for very large d_out (>~2-4K) add a second grid axis tiling w_seq /
    # output columns so resident weights stay within v7x's 64 MiB VMEM.
    return out[:N].reshape(B, T, d_out)


def init_params(key, in_dim, bottleneck_dim, asr_dim, out_dim, dtype=jnp.float32):
    """PyTorch-Linear-style init (uniform +/- 1/sqrt(fan_in)); weights stored [in, out]."""
    def linear(k, fan_in, fan_out):
        kw, kb = jax.random.split(k)
        bound = 1.0 / np.sqrt(fan_in)
        w = jax.random.uniform(kw, (fan_in, fan_out), dtype, -bound, bound)
        b = jax.random.uniform(kb, (fan_out,), dtype, -bound, bound)
        return w, b

    k_se, k_sd, k_ae, k_sq = jax.random.split(key, 4)
    w_se, b_se = linear(k_se, in_dim, bottleneck_dim)     # speech_encoder (dead-code path)
    w_sd, b_sd = linear(k_sd, bottleneck_dim, out_dim)    # speech_decoder
    w_ae, b_ae = linear(k_ae, asr_dim, out_dim)           # asr_encoder
    w_seq, b_seq = linear(k_sq, out_dim, out_dim)         # sequence_decoder
    return {
        "w_se": w_se, "b_se": b_se,
        "w_sd": w_sd, "b_sd": b_sd,
        "w_ae": w_ae, "b_ae": b_ae,
        "w_seq": w_seq, "b_seq": b_seq,
    }


def reference_forward(speech_feats, asr_feats, params):
    # Mirrors the PyTorch forward in f32 (dead speech_encoder assignment omitted).
    bottlenecked = speech_feats @ params["w_sd"] + params["b_sd"]
    asr_enc = asr_feats @ params["w_ae"] + params["b_ae"]
    return (bottlenecked + asr_enc) @ params["w_seq"] + params["b_seq"]


if __name__ == "__main__":
    # Module-consistent dims (bottleneck=32, asr=512, out=768 => lane-dense 128-multiples
    # for the streamed/out dims), small batch/seq.
    B, T = 2, 128
    in_dim = 768            # speech_encoder input dim (dead-code path, unused)
    bottleneck_dim = 32
    asr_dim = 512
    out_dim = 768

    key = jax.random.PRNGKey(0)
    k_p, k_s, k_a = jax.random.split(key, 3)
    params = init_params(k_p, in_dim, bottleneck_dim, asr_dim, out_dim)

    speech_feats = jax.random.normal(k_s, (B, T, bottleneck_dim), jnp.float32)
    asr_feats = jax.random.normal(k_a, (B, T, asr_dim), jnp.float32)

    ref = np.asarray(reference_forward(speech_feats, asr_feats, params))

    # f32 compute path.
    out_f32 = jax.block_until_ready(
        simple_bottleneck_forward(speech_feats, asr_feats, params,
                                  compute_dtype=jnp.float32))
    np.testing.assert_allclose(np.asarray(out_f32), ref, rtol=2e-2, atol=2e-2)

    # Default optimized path: bf16 MXU inputs, f32 accumulation/epilogue.
    out_bf16 = jax.block_until_ready(
        simple_bottleneck_forward(speech_feats, asr_feats, params))
    np.testing.assert_allclose(np.asarray(out_bf16), ref, rtol=2e-2, atol=2e-2)

    print("KERNEL_OK")
</pallas_src>

<mosaic_0001>
module attributes {stable_mosaic.version = 11 : i64} {
  func.func @_bottleneck_kernel(%arg0: i32, %arg1: memref<128x32xf32, #tpu.memory_space<vmem>>, %arg2: memref<128x512xf32, #tpu.memory_space<vmem>>, %arg3: memref<32x768xf32, #tpu.memory_space<vmem>>, %arg4: memref<512x768xf32, #tpu.memory_space<vmem>>, %arg5: memref<768x768xf32, #tpu.memory_space<vmem>>, %arg6: memref<1x768xf32, #tpu.memory_space<vmem>>, %arg7: memref<128x768xf32, #tpu.memory_space<vmem>>) attributes {dimension_semantics = [#tpu.dimension_semantics<parallel>], iteration_bounds = array<i64: 2>, scalar_prefetch = 0 : i64, scratch_operands = 0 : i64, tpu.core_type = #tpu.core_type<tc>, window_params = [{transform_indices = @transform_0, window_bounds = array<i64: 128, 32>}, {transform_indices = @transform_1, window_bounds = array<i64: 128, 512>}, {pipeline_mode = #tpu.pipeline_mode<synchronous>, transform_indices = @transform_2, window_bounds = array<i64: 32, 768>}, {pipeline_mode = #tpu.pipeline_mode<synchronous>, transform_indices = @transform_3, window_bounds = array<i64: 512, 768>}, {pipeline_mode = #tpu.pipeline_mode<synchronous>, transform_indices = @transform_4, window_bounds = array<i64: 768, 768>}, {pipeline_mode = #tpu.pipeline_mode<synchronous>, transform_indices = @transform_5, window_bounds = array<i64: 1, 768>}, {transform_indices = @transform_6, window_bounds = array<i64: 128, 768>}]} {
    %c0 = arith.constant 0 : index
    %c0_0 = arith.constant 0 : index
    %0 = vector.load %arg1[%c0, %c0_0] : memref<128x32xf32, #tpu.memory_space<vmem>>, vector<128x32xf32>
    %c0_1 = arith.constant 0 : index
    %c0_2 = arith.constant 0 : index
    %1 = vector.load %arg3[%c0_1, %c0_2] : memref<32x768xf32, #tpu.memory_space<vmem>>, vector<32x768xf32>
    %cst = arith.constant dense<0.000000e+00> : vector<128x768xf32>
    %2 = tpu.matmul %0, %1, %cst {dimension_numbers = #tpu.dot_dimension_numbers<[1], [0], [0], [1], [0, 0, 1, 1], [], []>} : vector<128x32xf32>, vector<32x768xf32>, vector<128x768xf32> -> vector<128x768xf32>
    %c0_3 = arith.constant 0 : index
    %c0_4 = arith.constant 0 : index
    %3 = vector.load %arg2[%c0_3, %c0_4] : memref<128x512xf32, #tpu.memory_space<vmem>>, vector<128x512xf32>
    %c0_5 = arith.constant 0 : index
    %c0_6 = arith.constant 0 : index
    %4 = vector.load %arg4[%c0_5, %c0_6] : memref<512x768xf32, #tpu.memory_space<vmem>>, vector<512x768xf32>
    %cst_7 = arith.constant dense<0.000000e+00> : vector<128x768xf32>
    %5 = tpu.matmul %3, %4, %cst_7 {dimension_numbers = #tpu.dot_dimension_numbers<[1], [0], [0], [1], [0, 0, 1, 1], [], []>} : vector<128x512xf32>, vector<512x768xf32>, vector<128x768xf32> -> vector<128x768xf32>
    %6 = arith.addf %2, %5 : vector<128x768xf32>
    %c0_8 = arith.constant 0 : index
    %c0_9 = arith.constant 0 : index
    %7 = vector.load %arg5[%c0_8, %c0_9] : memref<768x768xf32, #tpu.memory_space<vmem>>, vector<768x768xf32>
    %cst_10 = arith.constant dense<0.000000e+00> : vector<128x768xf32>
    %8 = tpu.matmul %6, %7, %cst_10 {dimension_numbers = #tpu.dot_dimension_numbers<[1], [0], [0], [1], [0, 0, 1, 1], [], []>} : vector<128x768xf32>, vector<768x768xf32>, vector<128x768xf32> -> vector<128x768xf32>
    %c0_11 = arith.constant 0 : index
    %c0_12 = arith.constant 0 : index
    %9 = vector.load %arg6[%c0_11, %c0_12] : memref<1x768xf32, #tpu.memory_space<vmem>>, vector<1x768xf32>
    %10 = vector.broadcast %9 : vector<1x768xf32> to vector<128x768xf32>
    %11 = arith.addf %8, %10 : vector<128x768xf32>
    %c0_13 = arith.constant 0 : index
    %c0_14 = arith.constant 0 : index
    %12 = vector.load %arg7[%c0_13, %c0_14] : memref<128x768xf32, #tpu.memory_space<vmem>>, vector<128x768xf32>
    tpu.vector_store %arg7[%c0_13, %c0_14], %11 {strides = array<i32>} : memref<128x768xf32, #tpu.memory_space<vmem>>, vector<128x768xf32>,
    return
  }
  func.func @transform_0(%arg0: i32) -> (i32, i32) {
    %c0_i32 = arith.constant 0 : i32
    %c0_i32_0 = arith.constant 0 : i32
    return %arg0, %c0_i32 : i32, i32
  }
  func.func @transform_1(%arg0: i32) -> (i32, i32) {
    %c0_i32 = arith.constant 0 : i32
    %c0_i32_0 = arith.constant 0 : i32
    return %arg0, %c0_i32 : i32, i32
  }
  func.func @transform_2(%arg0: i32) -> (i32, i32) {
    %c0_i32 = arith.constant 0 : i32
    %c0_i32_0 = arith.constant 0 : i32
    %c0_i32_1 = arith.constant 0 : i32
    return %c0_i32, %c0_i32_0 : i32, i32
  }
  func.func @transform_3(%arg0: i32) -> (i32, i32) {
    %c0_i32 = arith.constant 0 : i32
    %c0_i32_0 = arith.constant 0 : i32
    %c0_i32_1 = arith.constant 0 : i32
    return %c0_i32, %c0_i32_0 : i32, i32
  }
  func.func @transform_4(%arg0: i32) -> (i32, i32) {
    %c0_i32 = arith.constant 0 : i32
    %c0_i32_0 = arith.constant 0 : i32
    %c0_i32_1 = arith.constant 0 : i32
    return %c0_i32, %c0_i32_0 : i32, i32
  }
  func.func @transform_5(%arg0: i32) -> (i32, i32) {
    %c0_i32 = arith.constant 0 : i32
    %c0_i32_0 = arith.constant 0 : i32
    %c0_i32_1 = arith.constant 0 : i32
    return %c0_i32, %c0_i32_0 : i32, i32
  }
  func.func @transform_6(%arg0: i32) -> (i32, i32) {
    %c0_i32 = arith.constant 0 : i32
    %c0_i32_0 = arith.constant 0 : i32
    return %arg0, %c0_i32 : i32, i32
  }
}

</mosaic_0001>

<bundles_post_ra>
// kernel: tpu_custom_call.1
= control target key start
LH: loop header
LB: loop body
LE: loop exit
PB: predicated region body
PF: predicated region fallthrough
CT: control target
= control target key end

     0   :  { %11 = vsyncpa [#allocation3], 0  ;;  %s10412_s0 = inlined_call_operand.vmem [shape: f32[256,32], index: 0, kind: input, shape index: {}]   ;;  %s10413_s1 = inlined_call_operand.hbm [shape: f32[256,512], index: 1, kind: input, shape index: {}]   ;;  %s10414_s2 = inlined_call_operand.hbm [shape: f32[32,768], index: 2, kind: input, shape index: {}]   ;;  %s10415_s3 = inlined_call_operand.hbm [shape: f32[512,768], index: 3, kind: input, shape index: {}]   ;;  %s10416_s4 = inlined_call_operand.hbm [shape: f32[768,768], index: 4, kind: input, shape index: {}]   ;;  %s10417_s5 = inlined_call_operand.hbm [shape: f32[1,768], index: 5, kind: input, shape index: {}]   ;;  %s10418_s6 = inlined_call_operand.hbm [shape: f32[256,768], index: 6, kind: output, shape index: {}]  }
   0x1   :  { %13 = vsyncpa [#allocation3 + $0x1], 0 }
   0x2   :  { %14 = vsyncpa [#allocation6], 0 }
   0x3   :  { %15 = vsyncpa [#allocation9], 0 }
   0x4   :  { %16 = vsyncpa [#allocation4], 0 }
   0x5   :  { %18 = vsyncpa [#allocation4 + $0x1], 0  ;;  %s6665_s21 = smov 0   ;;  %s6667_s22 = smov 0  }
   0x6   :  { %s6669_s23 = smov 0   ;;  %s6671_s24 = smov 0  }
   0x7 LB: > { %s6686_s25 = sadd.s32 4294967295, %s6618_s24   ;;  %s6014_s26 = sadd.s32 4294967294, %s6618_s24   ;;  %s6618_s24 = sphi %s6671_s24, %s11417_s24   ;;  %s6614_s23 = sphi %s6669_s23, %s11416_s23   ;;  %s6610_s22 = sphi %s6667_s22, %s11415_s22   ;;  %s6606_s21 = sphi %s6665_s21, %s11414_s21  }
   0x8   : > { %p70_p0 = scmp.ne.s32.totalorder %s6610_s22, %s6606_s21  ;;  %p71_p1 = scmp.eq.s32.totalorder %s6686_s25, 0 }
   0x9   : > { %p178_p2 = scmp.eq.s32.totalorder %s6686_s25, 1  ;;  %p184_p3 = scmp.eq.s32.totalorder %s6014_s26, 1 }
   0xa   : > { %p6695_p4 = por %p71_p1, %p70_p0  ;;  %p6015_p5 = scmp.ge.s32.totalorder %s6618_s24, 1 }
   0xb   : > { %p6700_p6 = por %p184_p3, %p70_p0  ;;  %p191_p7 = scmp.lt.s32.totalorder %s6618_s24, 3 }
   0xc   : > { %s202_s7 = sshll.u32 %s10414_s2, 4  ;;  %s6620_s9 = smov [#allocation5]   ;;  %s203_s7 = int_to_ptr.hbm [resolvable:$true] %s202_s7 }
   0xd   : > { %p6708_p8 = pnand %p6015_p5, %p191_p7  ;;  %s204_s10 = sshll.u32 %s6620_s9, 4  ;;  %s205_s10 = int_to_ptr.vmem [resolvable:$true] %s204_s10 }
   0xe   : > { %s230_s14 = sshll.u32 %s10416_s4, 4  ;;  %s6621_s15 = smov 768   ;;  %s231_s14 = int_to_ptr.hbm [resolvable:$true] %s230_s14 }
   0xf   : > { %p6190_p9 = pneg %p6708_p8  ;;  %s6622_s16 = smov 48  }
  0x10   : > { %s6623_s17 = smov [#allocation8]   ;;  %s216_s26 = sshll.u32 %s10415_s3, 4  ;;  %s217_s26 = int_to_ptr.hbm [resolvable:$true] %s216_s26 }
  0x11   : > { %p6716_p10 = pnand %p6190_p9, %p71_p1  ;;  %s232_s18 = sshll.u32 %s6623_s17, 4  ;;  %s233_s18 = int_to_ptr.vmem [resolvable:$true] %s232_s18 }
  0x12   : > { %s6624_s9 = smov [#allocation7]   ;;  %s6625_s12 = smov [#allocation10]  }
  0x13   : > { %6193 = dma.hbm_to_vmem [thread:$0]  (!%p6716_p10), %s203_s7, 3072, %s205_s10, [#allocation6], %s6621_s15, %s6621_s15, %s6622_s16  }
  0x14   : > { %6199 = dma.hbm_to_vmem [thread:$0]  (!%p6716_p10), %s231_s14, 73728, %s233_s18, [#allocation9], %s6621_s15, %s6621_s15, %s6622_s16  }
  0x15   : > { %s245_s7 = sshll.u32 %s10417_s5, 4  ;;  %s218_s10 = sshll.u32 %s6624_s9, 4  ;;  %s246_s7 = int_to_ptr.hbm [resolvable:$true] %s245_s7  ;;  %s219_s10 = int_to_ptr.vmem [resolvable:$true] %s218_s10 }
  0x16   : > { %6196 = dma.hbm_to_vmem [thread:$0]  (!%p6716_p10), %s217_s26, 49152, %s219_s10, [#allocation6], %s6621_s15, %s6621_s15, %s6622_s16  }
  0x17   : > { %s247_s13 = sshll.u32 %s6625_s12, 4  ;;  %s6739_s14 = sadd.s32 1, %s6618_s24   ;;  %s248_s13 = int_to_ptr.vmem [resolvable:$true] %s247_s13 }
  0x18   : > { %6202 = dma.hbm_to_vmem [thread:$0]  (!%p6716_p10), %s246_s7, 96, %s248_s13, [#allocation9]  }
  0x19   : > { %s57_s17 = sadd.s32 1, %s6614_s23  ;;  %s54_s18 = ssub.s32 %s6618_s24, %s6739_s14 }
  0x1a   : > { %p64_p12 = scmp.ne.s32.totalorder %s6614_s23, %s6610_s22  ;;  %p55_p13 = scmp.eq.s32.totalorder %s54_s18, 0 }
  0x1b   : > { %p65_p0 = scmp.eq.s32.totalorder %s6618_s24, 0  ;;  %p6215_p5 = scmp.lt.s32.totalorder %s6618_s24, 2 }
  0x1c   : > { %p6749_p3 = por %p178_p2, %p64_p12  ;;  %s267_s16 = sand.u32 1, %s6614_s23  }
  0x1d   : > { %s6755_s15 = scalar_select %p55_p13, %s6614_s23, %s57_s17  }
  0x1e   : > { %p66_p7 = por %p65_p0, %p64_p12  ;;  %s6021_s11 = sshll.u32 %s267_s16, 9 }
  0x1f   : > { %s6135_s20 = sshll.u32 %s6618_s24, 9  ;;  %s271_s7 = scalar_lea.vmem [#allocation2], %s6021_s11 }
  0x20   : > { %s277_s30 = scalar_lea.hbm %s10413_s1, %s6135_s20  ;;  %s280_s9 = sshll.u32 %s271_s7, 4  ;;  %s281_s9 = int_to_ptr.vmem [resolvable:$true] %s280_s9 }
  0x21   : > { %s278_s10 = sshll.u32 %s277_s30, 4  ;;  %p6762_p2 = pnand %p6215_p5, %p66_p7  ;;  %s279_s10 = int_to_ptr.hbm [resolvable:$true] %s278_s10 }
  0x22   : > { %s268_s13 = scalar_lea.sflag [#allocation3], %s267_s16  ;;  %s6514_s17 = sshra.s32 %s279_s10, 4  ;;  %s6515_s17 = int_to_ptr.hbm [resolvable:$true] %s6514_s17 }
  0x23   : > { %s6516_s18 = scalar_lea.hbm %s6515_s17, 512  ;;  %p6518_p10 = pneg %p6762_p2 }
  0x24   : > { %p6517_p9 = scmp.ne.s32.totalorder %s6515_s17, %s6516_s18  ;;  %s6521_s26 = scalar_lea.hbm %s10413_s1, 1024 }
  0x25   : > { %p6522_p0 = scmp.lt.s32.totalorder %s6515_s17, %s10413_s1  ;;  %p6523_p5 = scmp.lt.s32.totalorder %s6521_s26, %s6516_s18 }
  0x26   : > { %p6519_p12 = pnand %p6518_p10, %p6517_p9 }
  0x27   : > { %p6524_p7 = por %p6523_p5, %p6522_p0 }
  0x28   : > { %p6520_p13 = pneg %p6519_p12 }
  0x2a   : > { %p6525_p11 = pnand %p6524_p7, %p6520_p13 }
  0x2c   : > { %6528 = shalt.err (!%p6525_p11)
}
  0x2d   : > { %s6626_s16 = smov 512   ;;  %s6627_s7 = smov 32  }
  0x2e   : > { %6206 = dma.hbm_to_vmem [thread:$0]  (!%p6762_p2), %s279_s10, 8192, %s281_s9, %s268_s13, %s6626_s16, %s6626_s16, %s6627_s7  }
  0x2f   : > { %292 = sbr.rel (%p6708_p8) target bundleno = 2341 (0x925), region = 44 }
  0x34   : > { %s6779_s20 = sand.u32 1, %s6610_s22  }
  0x35   : > { %s6026_s11 = sshll.u32 %s6779_s20, 9  ;;  %s295_s17 = scalar_lea.sflag [#allocation3], %s6779_s20 }
  0x36   : > { %s6783_s18 = scalar_lea.vmem [#allocation2], %s6026_s11 }
  0x37   : > { %6589 = dma.done.wait (%p6695_p4), %s295_s17, 8192  }
  0x38   : > { %6591 = vsyncadd (%p6695_p4), %s295_s17, 4294959104 }
  0x39   : > { %6593 = dma.done.wait (%p71_p1), [#allocation6], 52224  }
  0x3a   : > { %6595 = vsyncadd (%p71_p1), [#allocation6], 4294915072 }
  0x3b   : > { %6597 = dma.done.wait (%p71_p1), [#allocation9], 73824  }
  0x3c   : > { %6599 = vsyncadd (%p71_p1), [#allocation9], 4294893472  ;;  %v555_v0 = vld [vmem:[#allocation7 + $0x2d0] sm:$0xff]  ;;  %v549_v2 = vld [vmem:[#allocation7 + $0x2a0] sm:$0xff]  ;;  %s6031_s27 = sshll.u32 %s6686_s25, 4  ;;  %vm2409_vm0 = vcmask 261120  }
  0x3d   : > { %v651_v1 = vld [vmem:[#allocation7 + $0x5d0] sm:$0xff]  ;;  %849 = vmatpush.msra.mxu0 %v555_v0  ;;  %6136 = vmatpush.msra.mxu2 %v555_v0  ;;  %v645_v3 = vld [vmem:[#allocation7 + $0x5a0] sm:$0xff]  ;;  %v6804_v34 = vld [vmem:[%s6783_s18 + $0x8] sm:$0xff]  ;;  %p354_p1 = scmp.lt.s32.totalorder %s6031_s27, 31  ;;  %s6168_s13 = smul.u32 768, %s6779_s20 }
  0x3e   : > { %914 = vmatpush.msra.mxu1 %v651_v1  ;;  %6152 = vmatpush.msra.mxu3 %v651_v1  ;;  %v543_v4 = vld [vmem:[#allocation7 + $0x270] sm:$0xff]  ;;  %v537_v6 = vld [vmem:[#allocation7 + $0x240] sm:$0xff]  ;;  %v6807_v35 = vld [vmem:[%s6783_s18 + $0x108] sm:$0xff]  ;;  %s6169_s29 = smul.u32 768, %s6686_s25  ;;  %s5875_s25 = scalar_lea.sflag [#allocation4], %s6779_s20 }
  0x3f   : > { %850 = vmatpush.msra.mxu0 %v549_v2  ;;  %6137 = vmatpush.msra.mxu2 %v549_v2  ;;  %v639_v5 = vld [vmem:[#allocation7 + $0x570] sm:$0xff]  ;;  %v633_v7 = vld [vmem:[#allocation7 + $0x540] sm:$0xff]  ;;  %v556_v38 = vld [vmem:[#allocation7 + $0x2d8] sm:$0xff]  ;;  %s11419_s27 = smov (!%p354_p1, %s6031_s27), 31  ;;  %s9367_s26 = scalar_lea.vmem [#allocation11], %s6168_s13 }
  0x40   : > { %915 = vmatpush.msra.mxu1 %v645_v3  ;;  %6153 = vmatpush.msra.mxu3 %v645_v3  ;;  %v531_v8 = vld [vmem:[#allocation7 + $0x210] sm:$0xff]  ;;  %v525_v10 = vld [vmem:[#allocation7 + $0x1e0] sm:$0xff]  ;;  %v652_v39 = vld [vmem:[#allocation7 + $0x5d8] sm:$0xff]  ;;  %s6032_s8 = sshll.u32 %s11419_s27, 3  ;;  %s5887_s7 = scalar_lea.hbm %s10418_s6, %s6169_s29 }
  0x41   : > { %851 = vmatpush.msra.mxu0 %v543_v4  ;;  %6138 = vmatpush.msra.mxu2 %v543_v4  ;;  %v627_v9 = vld [vmem:[#allocation7 + $0x510] sm:$0xff]  ;;  %v621_v11 = vld [vmem:[#allocation7 + $0x4e0] sm:$0xff]  ;;  %v550_v42 = vld [vmem:[#allocation7 + $0x2a8] sm:$0xff]  ;;  %s8231_s12 = scalar_lea.vmem %s10412_s0, %s6032_s8  ;;  %s5888_s11 = sshll.u32 %s9367_s26, 4  ;;  %s5889_s11 = int_to_ptr.vmem [resolvable:$true] %s5888_s11 }
  0x42   : > { %916 = vmatpush.msra.mxu1 %v639_v5  ;;  %6154 = vmatpush.msra.mxu3 %v639_v5  ;;  %v519_v12 = vld [vmem:[#allocation7 + $0x1b0] sm:$0xff]  ;;  %v513_v14 = vld [vmem:[#allocation7 + $0x180] sm:$0xff]  ;;  %v646_v43 = vld [vmem:[#allocation7 + $0x5a8] sm:$0xff]  ;;  %s5890_s17 = sshll.u32 %s5887_s7, 4  ;;  %s6564_s10 = scalar_lea.hbm %s10418_s6, 1536  ;;  %s5891_s17 = int_to_ptr.hbm [resolvable:$true] %s5890_s17 }
  0x43   : > { %852 = vmatpush.msra.mxu0 %v537_v6  ;;  %6139 = vmatpush.msra.mxu2 %v537_v6  ;;  %v615_v13 = vld [vmem:[#allocation7 + $0x4b0] sm:$0xff]  ;;  %v609_v15 = vld [vmem:[#allocation7 + $0x480] sm:$0xff]  ;;  %v544_v46 = vld [vmem:[#allocation7 + $0x278] sm:$0xff] }
  0x44   : > { %917 = vmatpush.msra.mxu1 %v633_v7  ;;  %6155 = vmatpush.msra.mxu3 %v633_v7  ;;  %v507_v16 = vld [vmem:[#allocation7 + $0x150] sm:$0xff]  ;;  %v501_v18 = vld [vmem:[#allocation7 + $0x120] sm:$0xff]  ;;  %v640_v47 = vld [vmem:[#allocation7 + $0x578] sm:$0xff] }
  0x45   : > { %853 = vmatpush.msra.mxu0 %v531_v8  ;;  %6140 = vmatpush.msra.mxu2 %v531_v8  ;;  %v603_v17 = vld [vmem:[#allocation7 + $0x450] sm:$0xff]  ;;  %v597_v19 = vld [vmem:[#allocation7 + $0x420] sm:$0xff]  ;;  %v6820_v50 = vld [vmem:[%s6783_s18 + $0x28] sm:$0xff] }
  0x46   : > { %918 = vmatpush.msra.mxu1 %v627_v9  ;;  %6156 = vmatpush.msra.mxu3 %v627_v9  ;;  %v495_v20 = vld [vmem:[#allocation7 + $0xf0] sm:$0xff]  ;;  %v489_v22 = vld [vmem:[#allocation7 + $0xc0] sm:$0xff]  ;;  %v6823_v51 = vld [vmem:[%s6783_s18 + $0x128] sm:$0xff] }
  0x47   : > { %854 = vmatpush.msra.mxu0 %v525_v10  ;;  %6141 = vmatpush.msra.mxu2 %v525_v10  ;;  %v591_v21 = vld [vmem:[#allocation7 + $0x3f0] sm:$0xff]  ;;  %v585_v23 = vld [vmem:[#allocation7 + $0x3c0] sm:$0xff]  ;;  %v538_v54 = vld [vmem:[#allocation7 + $0x248] sm:$0xff] }
  0x48   : > { %919 = vmatpush.msra.mxu1 %v621_v11  ;;  %6157 = vmatpush.msra.mxu3 %v621_v11  ;;  %v483_v24 = vld [vmem:[#allocation7 + $0x90] sm:$0xff]  ;;  %v477_v26 = vld [vmem:[#allocation7 + $0x60] sm:$0xff]  ;;  %v634_v55 = vld [vmem:[#allocation7 + $0x548] sm:$0xff] }
  0x49   : > { %855 = vmatpush.msra.mxu0 %v519_v12  ;;  %6142 = vmatpush.msra.mxu2 %v519_v12  ;;  %v579_v25 = vld [vmem:[#allocation7 + $0x390] sm:$0xff]  ;;  %v573_v27 = vld [vmem:[#allocation7 + $0x360] sm:$0xff]  ;;  %v532_v58 = vld [vmem:[#allocation7 + $0x218] sm:$0xff] }
  0x4a   : > { %920 = vmatpush.msra.mxu1 %v615_v13  ;;  %6158 = vmatpush.msra.mxu3 %v615_v13  ;;  %v471_v28 = vld [vmem:[#allocation7 + $0x30] sm:$0xff]  ;;  %v465_v30 = vld [vmem:[#allocation7] sm:$0xff]  ;;  %v628_v59 = vld [vmem:[#allocation7 + $0x518] sm:$0xff] }
  0x4b   : > { %856 = vmatpush.msra.mxu0 %v513_v14  ;;  %6143 = vmatpush.msra.mxu2 %v513_v14  ;;  %v567_v29 = vld [vmem:[#allocation7 + $0x330] sm:$0xff]  ;;  %v561_v31 = vld [vmem:[#allocation7 + $0x300] sm:$0xff]  ;;  %v526_v62 = vld [vmem:[#allocation7 + $0x1e8] sm:$0xff] }
  0x4c   : > { %921 = vmatpush.msra.mxu1 %v609_v15  ;;  %6159 = vmatpush.msra.mxu3 %v609_v15  ;;  %v6798_v32 = vld [vmem:[%s6783_s18] sm:$0xff]  ;;  %v747_v36 = vld [vmem:[#allocation7 + $0x8d0] sm:$0xff]  ;;  %v622_v63 = vld [vmem:[#allocation7 + $0x4e8] sm:$0xff] }
  0x4d   : > { %857 = vmatpush.msra.mxu0 %v507_v16  ;;  %6144 = vmatpush.msra.mxu2 %v507_v16  ;;  %v6801_v33 = vld [vmem:[%s6783_s18 + $0x100] sm:$0xff]  ;;  %v843_v37 = vld [vmem:[#allocation7 + $0xbd0] sm:$0xff]  ;;  %v6836_v2 = vld [vmem:[%s6783_s18 + $0x48] sm:$0xff] }
  0x4e   : > { %922 = vmatpush.msra.mxu1 %v603_v17  ;;  %6160 = vmatpush.msra.mxu3 %v603_v17  ;;  %v741_v40 = vld [vmem:[#allocation7 + $0x8a0] sm:$0xff]  ;;  %v735_v44 = vld [vmem:[#allocation7 + $0x870] sm:$0xff]  ;;  %v6839_v3 = vld [vmem:[%s6783_s18 + $0x148] sm:$0xff] }
  0x4f   : > { %858 = vmatpush.msra.mxu0 %v501_v18  ;;  %6145 = vmatpush.msra.mxu2 %v501_v18  ;;  %v837_v41 = vld [vmem:[#allocation7 + $0xba0] sm:$0xff]  ;;  %v831_v45 = vld [vmem:[#allocation7 + $0xb70] sm:$0xff]  ;;  %v520_v6 = vld [vmem:[#allocation7 + $0x1b8] sm:$0xff] }
  0x50   : > { %923 = vmatpush.msra.mxu1 %v597_v19  ;;  %6161 = vmatpush.msra.mxu3 %v597_v19  ;;  %v6814_v48 = vld [vmem:[%s6783_s18 + $0x20] sm:$0xff]  ;;  %v723_v56 = vld [vmem:[#allocation7 + $0x810] sm:$0xff]  ;;  %v616_v7 = vld [vmem:[#allocation7 + $0x4b8] sm:$0xff] }
  0x51   : > { %859 = vmatpush.msra.mxu0 %v495_v20  ;;  %6146 = vmatpush.msra.mxu2 %v495_v20  ;;  %v6817_v49 = vld [vmem:[%s6783_s18 + $0x120] sm:$0xff]  ;;  %v819_v57 = vld [vmem:[#allocation7 + $0xb10] sm:$0xff]  ;;  %v514_v10 = vld [vmem:[#allocation7 + $0x188] sm:$0xff] }
  0x52   : > { %924 = vmatpush.msra.mxu1 %v591_v21  ;;  %6162 = vmatpush.msra.mxu3 %v591_v21  ;;  %v729_v52 = vld [vmem:[#allocation7 + $0x840] sm:$0xff]  ;;  %v711_v4 = vld [vmem:[#allocation7 + $0x7b0] sm:$0xff]  ;;  %v610_v11 = vld [vmem:[#allocation7 + $0x488] sm:$0xff] }
  0x53   : > { %860 = vmatpush.msra.mxu0 %v489_v22  ;;  %6147 = vmatpush.msra.mxu2 %v489_v22  ;;  %v825_v53 = vld [vmem:[#allocation7 + $0xb40] sm:$0xff]  ;;  %v807_v5 = vld [vmem:[#allocation7 + $0xab0] sm:$0xff]  ;;  %v508_v14 = vld [vmem:[#allocation7 + $0x158] sm:$0xff] }
  0x54   : > { %925 = vmatpush.msra.mxu1 %v585_v23  ;;  %6163 = vmatpush.msra.mxu3 %v585_v23  ;;  %v717_v60 = vld [vmem:[#allocation7 + $0x7e0] sm:$0xff]  ;;  %v699_v12 = vld [vmem:[#allocation7 + $0x750] sm:$0xff]  ;;  %v604_v15 = vld [vmem:[#allocation7 + $0x458] sm:$0xff] }
  0x55   : > { %861 = vmatpush.msra.mxu0 %v483_v24  ;;  %6148 = vmatpush.msra.mxu2 %v483_v24  ;;  %v813_v61 = vld [vmem:[#allocation7 + $0xae0] sm:$0xff]  ;;  %v795_v13 = vld [vmem:[#allocation7 + $0xa50] sm:$0xff]  ;;  %v6852_v18 = vld [vmem:[%s6783_s18 + $0x68] sm:$0xff] }
  0x56   : > { %926 = vmatpush.msra.mxu1 %v579_v25  ;;  %6164 = vmatpush.msra.mxu3 %v579_v25  ;;  %v6830_v0 = vld [vmem:[%s6783_s18 + $0x40] sm:$0xff]  ;;  %v6855_v19 = vld [vmem:[%s6783_s18 + $0x168] sm:$0xff]  ;;  %v687_v24 = vld [vmem:[#allocation7 + $0x6f0] sm:$0xff] }
  0x57   : > { %862 = vmatpush.msra.mxu0 %v477_v26  ;;  %6149 = vmatpush.msra.mxu2 %v477_v26  ;;  %v6833_v1 = vld [vmem:[%s6783_s18 + $0x140] sm:$0xff]  ;;  %v502_v22 = vld [vmem:[#allocation7 + $0x128] sm:$0xff]  ;;  %v783_v25 = vld [vmem:[#allocation7 + $0x9f0] sm:$0xff] }
  0x58   : > { %927 = vmatpush.msra.mxu1 %v573_v27  ;;  %6165 = vmatpush.msra.mxu3 %v573_v27  ;;  %v705_v8 = vld [vmem:[#allocation7 + $0x780] sm:$0xff]  ;;  %v598_v23 = vld [vmem:[#allocation7 + $0x428] sm:$0xff]  ;;  %v496_v26 = vld [vmem:[#allocation7 + $0xf8] sm:$0xff] }
  0x59   : > { %863 = vmatpush.msra.mxu0 %v471_v28  ;;  %6150 = vmatpush.msra.mxu2 %v471_v28  ;;  %v801_v9 = vld [vmem:[#allocation7 + $0xa80] sm:$0xff]  ;;  %v592_v27 = vld [vmem:[#allocation7 + $0x3f8] sm:$0xff] }
  0x5a   : > { %928 = vmatpush.msra.mxu1 %v567_v29  ;;  %6166 = vmatpush.msra.mxu3 %v567_v29  ;;  %v6846_v16 = vld [vmem:[%s6783_s18 + $0x60] sm:$0xff] }
  0x5b   : > { %864 = vmatpush.msra.mxu0 %v465_v30  ;;  %6151 = vmatpush.msra.mxu2 %v465_v30  ;;  %v6849_v17 = vld [vmem:[%s6783_s18 + $0x160] sm:$0xff]  ;;  %v490_v30 = vld [vmem:[#allocation7 + $0xc8] sm:$0xff] }
  0x5c   : > { %929 = vmatpush.msra.mxu1 %v561_v31  ;;  %6167 = vmatpush.msra.mxu3 %v561_v31  ;;  %v693_v20 = vld [vmem:[#allocation7 + $0x720] sm:$0xff]  ;;  %v586_v31 = vld [vmem:[#allocation7 + $0x3c8] sm:$0xff] }
  0x5d   : > { %865 = vmatmul.f32.vlgmr.msra.gmra.mxu0 %v6798_v32  ;;  %889 = vmatmul.f32.vlgmr.msra.gmra.mxu2 %v6801_v33  ;;  %v789_v21 = vld [vmem:[#allocation7 + $0xa20] sm:$0xff] }
  0x5e   : > { %930 = vmatmul.f32.vlgmr.msra.gmra.mxu1 %v6804_v34  ;;  %954 = vmatmul.f32.vlgmr.msra.gmra.mxu3 %v6807_v35  ;;  %v681_v28 = vld [vmem:[#allocation7 + $0x6c0] sm:$0xff] }
  0x5f   : > { %979 = vmatpush.msrb.mxu2 %v747_v36  ;;  %1044 = vmatpush.msrb.mxu3 %v843_v37  ;;  %v777_v29 = vld [vmem:[#allocation7 + $0x9c0] sm:$0xff] }
  0x60   : > { %1109 = vmatpush.msrb.mxu0 %v556_v38  ;;  %1174 = vmatpush.msrb.mxu1 %v652_v39  ;;  %v6862_v36 = vld [vmem:[%s6783_s18 + $0x80] sm:$0xff]  ;;  %v6868_v38 = vld [vmem:[%s6783_s18 + $0x88] sm:$0xff] }
  0x61   : > { %980 = vmatpush.msrb.mxu2 %v741_v40  ;;  %1045 = vmatpush.msrb.mxu3 %v837_v41  ;;  %v6865_v37 = vld [vmem:[%s6783_s18 + $0x180] sm:$0xff]  ;;  %v6871_v39 = vld [vmem:[%s6783_s18 + $0x188] sm:$0xff]  ;;  %v675_v40 = vld [vmem:[#allocation7 + $0x690] sm:$0xff] }
  0x62   : > { %1110 = vmatpush.msrb.mxu0 %v550_v42  ;;  %1175 = vmatpush.msrb.mxu1 %v646_v43  ;;  %v771_v41 = vld [vmem:[#allocation7 + $0x990] sm:$0xff]  ;;  %v484_v42 = vld [vmem:[#allocation7 + $0x98] sm:$0xff] }
  0x63   : > { %981 = vmatpush.msrb.mxu2 %v735_v44  ;;  %1046 = vmatpush.msrb.mxu3 %v831_v45  ;;  %v580_v43 = vld [vmem:[#allocation7 + $0x398] sm:$0xff]  ;;  %v669_v44 = vld [vmem:[#allocation7 + $0x660] sm:$0xff] }
  0x64   : > { %1111 = vmatpush.msrb.mxu0 %v544_v46  ;;  %1176 = vmatpush.msrb.mxu1 %v640_v47  ;;  %v765_v45 = vld [vmem:[#allocation7 + $0x960] sm:$0xff]  ;;  %v478_v46 = vld [vmem:[#allocation7 + $0x68] sm:$0xff] }
  0x65   : > { %868 = vmatmul.f32.gmra.mxu0 %v6814_v48  ;;  %892 = vmatmul.f32.gmra.mxu2 %v6817_v49  ;;  %v574_v47 = vld [vmem:[#allocation7 + $0x368] sm:$0xff] }
  0x66   : > { %933 = vmatmul.f32.gmra.mxu1 %v6820_v50  ;;  %957 = vmatmul.f32.gmra.mxu3 %v6823_v51 }
  0x67   : > { %982 = vmatpush.msrb.mxu2 %v729_v52  ;;  %1047 = vmatpush.msrb.mxu3 %v825_v53  ;;  %v663_v52 = vld [vmem:[#allocation7 + $0x630] sm:$0xff] }
  0x68   : > { %1112 = vmatpush.msrb.mxu0 %v538_v54  ;;  %1177 = vmatpush.msrb.mxu1 %v634_v55  ;;  %v759_v53 = vld [vmem:[#allocation7 + $0x930] sm:$0xff]  ;;  %v472_v54 = vld [vmem:[#allocation7 + $0x38] sm:$0xff] }
  0x69   : > { %983 = vmatpush.msrb.mxu2 %v723_v56  ;;  %1048 = vmatpush.msrb.mxu3 %v819_v57  ;;  %v568_v55 = vld [vmem:[#allocation7 + $0x338] sm:$0xff]  ;;  %v6878_v56 = vld [vmem:[%s6783_s18 + $0xa0] sm:$0xff] }
  0x6a   : > { %1113 = vmatpush.msrb.mxu0 %v532_v58  ;;  %1178 = vmatpush.msrb.mxu1 %v628_v59  ;;  %v6881_v57 = vld [vmem:[%s6783_s18 + $0x1a0] sm:$0xff]  ;;  %v6884_v58 = vld [vmem:[%s6783_s18 + $0xa8] sm:$0xff] }
  0x6b   : > { %984 = vmatpush.msrb.mxu2 %v717_v60  ;;  %1049 = vmatpush.msrb.mxu3 %v813_v61  ;;  %v6887_v59 = vld [vmem:[%s6783_s18 + $0x1a8] sm:$0xff]  ;;  %v657_v60 = vld [vmem:[#allocation7 + $0x600] sm:$0xff] }
  0x6c   : > { %1114 = vmatpush.msrb.mxu0 %v526_v62  ;;  %1179 = vmatpush.msrb.mxu1 %v622_v63  ;;  %v753_v61 = vld [vmem:[#allocation7 + $0x900] sm:$0xff]  ;;  %v466_v62 = vld [vmem:[#allocation7 + $0x8] sm:$0xff] }
  0x6d   : > { %871 = vmatmul.f32.gmra.mxu0 %v6830_v0  ;;  %895 = vmatmul.f32.gmra.mxu2 %v6833_v1  ;;  %v562_v63 = vld [vmem:[#allocation7 + $0x308] sm:$0xff] }
  0x6e   : > { %936 = vmatmul.f32.gmra.mxu1 %v6836_v2  ;;  %960 = vmatmul.f32.gmra.mxu3 %v6839_v3 }
  0x6f   : > { %985 = vmatpush.msrb.mxu2 %v711_v4  ;;  %1050 = vmatpush.msrb.mxu3 %v807_v5  ;;  %v748_v4 = vld [vmem:[#allocation7 + $0x8d8] sm:$0xff] }
  0x70   : > { %1115 = vmatpush.msrb.mxu0 %v520_v6  ;;  %1180 = vmatpush.msrb.mxu1 %v616_v7  ;;  %v844_v5 = vld [vmem:[#allocation7 + $0xbd8] sm:$0xff]  ;;  %v557_v6 = vld [vmem:[#allocation7 + $0x2e0] sm:$0xff] }
  0x71   : > { %986 = vmatpush.msrb.mxu2 %v705_v8  ;;  %1051 = vmatpush.msrb.mxu3 %v801_v9  ;;  %v653_v7 = vld [vmem:[#allocation7 + $0x5e0] sm:$0xff]  ;;  %v742_v8 = vld [vmem:[#allocation7 + $0x8a8] sm:$0xff] }
  0x72   : > { %1116 = vmatpush.msrb.mxu0 %v514_v10  ;;  %1181 = vmatpush.msrb.mxu1 %v610_v11  ;;  %v838_v9 = vld [vmem:[#allocation7 + $0xba8] sm:$0xff]  ;;  %v6894_v10 = vld [vmem:[%s6783_s18 + $0xc0] sm:$0xff] }
  0x73   : > { %987 = vmatpush.msrb.mxu2 %v699_v12  ;;  %1052 = vmatpush.msrb.mxu3 %v795_v13  ;;  %v6897_v11 = vld [vmem:[%s6783_s18 + $0x1c0] sm:$0xff]  ;;  %v6900_v12 = vld [vmem:[%s6783_s18 + $0xc8] sm:$0xff] }
  0x74   : > { %1117 = vmatpush.msrb.mxu0 %v508_v14  ;;  %1182 = vmatpush.msrb.mxu1 %v604_v15  ;;  %v6903_v13 = vld [vmem:[%s6783_s18 + $0x1c8] sm:$0xff]  ;;  %v736_v14 = vld [vmem:[#allocation7 + $0x878] sm:$0xff] }
  0x75   : > { %874 = vmatmul.f32.gmra.mxu0 %v6846_v16  ;;  %898 = vmatmul.f32.gmra.mxu2 %v6849_v17  ;;  %v832_v15 = vld [vmem:[#allocation7 + $0xb78] sm:$0xff] }
  0x76   : > { %939 = vmatmul.f32.gmra.mxu1 %v6852_v18  ;;  %963 = vmatmul.f32.gmra.mxu3 %v6855_v19 }
  0x77   : > { %988 = vmatpush.msrb.mxu2 %v693_v20  ;;  %1053 = vmatpush.msrb.mxu3 %v789_v21  ;;  %v551_v20 = vld [vmem:[#allocation7 + $0x2b0] sm:$0xff] }
  0x78   : > { %1118 = vmatpush.msrb.mxu0 %v502_v22  ;;  %1183 = vmatpush.msrb.mxu1 %v598_v23  ;;  %v647_v21 = vld [vmem:[#allocation7 + $0x5b0] sm:$0xff]  ;;  %v6910_v22 = vld [vmem:[%s6783_s18 + $0xe0] sm:$0xff] }
  0x79   : > { %989 = vmatpush.msrb.mxu2 %v687_v24  ;;  %1054 = vmatpush.msrb.mxu3 %v783_v25  ;;  %v6913_v23 = vld [vmem:[%s6783_s18 + $0x1e0] sm:$0xff]  ;;  %v6916_v24 = vld [vmem:[%s6783_s18 + $0xe8] sm:$0xff] }
  0x7a   : > { %1119 = vmatpush.msrb.mxu0 %v496_v26  ;;  %1184 = vmatpush.msrb.mxu1 %v592_v27  ;;  %v6919_v25 = vld [vmem:[%s6783_s18 + $0x1e8] sm:$0xff] }
  0x7b   : > { %990 = vmatpush.msrb.mxu2 %v681_v28  ;;  %1055 = vmatpush.msrb.mxu3 %v777_v29  ;;  %v730_v26 = vld [vmem:[#allocation7 + $0x848] sm:$0xff]  ;;  %v545_v28 = vld [vmem:[#allocation7 + $0x280] sm:$0xff] }
  0x7c   : > { %1120 = vmatpush.msrb.mxu0 %v490_v30  ;;  %1185 = vmatpush.msrb.mxu1 %v586_v31  ;;  %v826_v27 = vld [vmem:[#allocation7 + $0xb48] sm:$0xff]  ;;  %v641_v29 = vld [vmem:[#allocation7 + $0x580] sm:$0xff]  ;;  %v6926_v30 = vld [vmem:[%s6783_s18 + $0x10] sm:$0xff] }
  0x7d   : > { %877 = vmatmul.f32.gmra.mxu0 %v6862_v36  ;;  %901 = vmatmul.f32.gmra.mxu2 %v6865_v37  ;;  %v6929_v31 = vld [vmem:[%s6783_s18 + $0x18] sm:$0xff] }
  0x7e   : > { %942 = vmatmul.f32.gmra.mxu1 %v6868_v38  ;;  %966 = vmatmul.f32.gmra.mxu3 %v6871_v39 }
  0x7f   : > { %991 = vmatpush.msrb.mxu2 %v675_v40  ;;  %1056 = vmatpush.msrb.mxu3 %v771_v41  ;;  %v724_v40 = vld [vmem:[#allocation7 + $0x818] sm:$0xff] }
  0x80   : > { %1121 = vmatpush.msrb.mxu0 %v484_v42  ;;  %1186 = vmatpush.msrb.mxu1 %v580_v43  ;;  %v820_v41 = vld [vmem:[#allocation7 + $0xb18] sm:$0xff]  ;;  %v539_v42 = vld [vmem:[#allocation7 + $0x250] sm:$0xff] }
  0x81   : > { %992 = vmatpush.msrb.mxu2 %v669_v44  ;;  %1057 = vmatpush.msrb.mxu3 %v765_v45  ;;  %v635_v43 = vld [vmem:[#allocation7 + $0x550] sm:$0xff]  ;;  %v6939_v45 = vld [vmem:[%s6783_s18 + $0x38] sm:$0xff] }
  0x82   : > { %1122 = vmatpush.msrb.mxu0 %v478_v46  ;;  %1187 = vmatpush.msrb.mxu1 %v574_v47  ;;  %v6936_v44 = vld [vmem:[%s6783_s18 + $0x30] sm:$0xff]  ;;  %v718_v46 = vld [vmem:[#allocation7 + $0x7e8] sm:$0xff] }
  0x83   : > { %993 = vmatpush.msrb.mxu2 %v663_v52  ;;  %1058 = vmatpush.msrb.mxu3 %v759_v53  ;;  %v814_v47 = vld [vmem:[#allocation7 + $0xae8] sm:$0xff]  ;;  %v533_v52 = vld [vmem:[#allocation7 + $0x220] sm:$0xff] }
  0x84   : > { %1123 = vmatpush.msrb.mxu0 %v472_v54  ;;  %1188 = vmatpush.msrb.mxu1 %v568_v55  ;;  %v629_v53 = vld [vmem:[#allocation7 + $0x520] sm:$0xff]  ;;  %v6946_v54 = vld [vmem:[%s6783_s18 + $0x50] sm:$0xff]  ;;  %v6949_v55 = vld [vmem:[%s6783_s18 + $0x58] sm:$0xff] }
  0x85   : > { %880 = vmatmul.f32.gmra.mxu0 %v6878_v56  ;;  %904 = vmatmul.f32.gmra.mxu2 %v6881_v57 }
  0x86   : > { %945 = vmatmul.f32.gmra.mxu1 %v6884_v58  ;;  %969 = vmatmul.f32.gmra.mxu3 %v6887_v59 }
  0x87   : > { %994 = vmatpush.msrb.mxu2 %v657_v60  ;;  %1059 = vmatpush.msrb.mxu3 %v753_v61  ;;  %v712_v60 = vld [vmem:[#allocation7 + $0x7b8] sm:$0xff] }
  0x88   : > { %1124 = vmatpush.msrb.mxu0 %v466_v62  ;;  %1189 = vmatpush.msrb.mxu1 %v562_v63  ;;  %v808_v61 = vld [vmem:[#allocation7 + $0xab8] sm:$0xff]  ;;  %v527_v62 = vld [vmem:[#allocation7 + $0x1f0] sm:$0xff] }
  0x89   : > { %1239 = vmatpush.msra.mxu2 %v748_v4  ;;  %1304 = vmatpush.msra.mxu3 %v844_v5  ;;  %v623_v63 = vld [vmem:[#allocation7 + $0x4f0] sm:$0xff]  ;;  %v6959_v5 = vld [vmem:[%s6783_s18 + $0x78] sm:$0xff] }
  0x8a   : > { %1369 = vmatpush.msra.mxu0 %v557_v6  ;;  %1434 = vmatpush.msra.mxu1 %v653_v7  ;;  %v6956_v4 = vld [vmem:[%s6783_s18 + $0x70] sm:$0xff]  ;;  %v706_v6 = vld [vmem:[#allocation7 + $0x788] sm:$0xff] }
  0x8b   : > { %1240 = vmatpush.msra.mxu2 %v742_v8  ;;  %1305 = vmatpush.msra.mxu3 %v838_v9  ;;  %v802_v7 = vld [vmem:[#allocation7 + $0xa88] sm:$0xff]  ;;  %v521_v8 = vld [vmem:[#allocation7 + $0x1c0] sm:$0xff] }
  0x8c   : > { %1370 = vmatpush.msra.mxu0 %v551_v20  ;;  %1435 = vmatpush.msra.mxu1 %v647_v21  ;;  %v617_v9 = vld [vmem:[#allocation7 + $0x4c0] sm:$0xff]  ;;  %v700_v20 = vld [vmem:[#allocation7 + $0x758] sm:$0xff] }
  0x8d   : > { %883 = vmatmul.f32.gmra.mxu0 %v6894_v10  ;;  %907 = vmatmul.f32.gmra.mxu2 %v6897_v11  ;;  %v796_v21 = vld [vmem:[#allocation7 + $0xa58] sm:$0xff] }
  0x8e   : > { %948 = vmatmul.f32.gmra.mxu1 %v6900_v12  ;;  %972 = vmatmul.f32.gmra.mxu3 %v6903_v13 }
  0x8f   : > { %1241 = vmatpush.msra.mxu2 %v736_v14  ;;  %1306 = vmatpush.msra.mxu3 %v832_v15  ;;  %v6966_v14 = vld [vmem:[%s6783_s18 + $0x90] sm:$0xff]  ;;  %v6969_v15 = vld [vmem:[%s6783_s18 + $0x98] sm:$0xff] }
  0x90   : > { %1371 = vmatpush.msra.mxu0 %v545_v28  ;;  %1436 = vmatpush.msra.mxu1 %v641_v29  ;;  %v611_v28 = vld [vmem:[#allocation7 + $0x490] sm:$0xff]  ;;  %v6979_v29 = vld [vmem:[%s6783_s18 + $0xb8] sm:$0xff] }
  0x91   : > { %1242 = vmatpush.msra.mxu2 %v730_v26  ;;  %1307 = vmatpush.msra.mxu3 %v826_v27  ;;  %v515_v26 = vld [vmem:[#allocation7 + $0x190] sm:$0xff] }
  0x92   : > { %1372 = vmatpush.msra.mxu0 %v539_v42  ;;  %1437 = vmatpush.msra.mxu1 %v635_v43  ;;  %v6976_v27 = vld [vmem:[%s6783_s18 + $0xb0] sm:$0xff]  ;;  %v509_v42 = vld [vmem:[#allocation7 + $0x160] sm:$0xff] }
  0x93   : > { %1243 = vmatpush.msra.mxu2 %v724_v40  ;;  %1308 = vmatpush.msra.mxu3 %v820_v41  ;;  %v694_v40 = vld [vmem:[#allocation7 + $0x728] sm:$0xff]  ;;  %v6986_v43 = vld [vmem:[%s6783_s18 + $0xd0] sm:$0xff] }
  0x94   : > { %1373 = vmatpush.msra.mxu0 %v533_v52  ;;  %1438 = vmatpush.msra.mxu1 %v629_v53  ;;  %v790_v41 = vld [vmem:[#allocation7 + $0xa28] sm:$0xff]  ;;  %v688_v52 = vld [vmem:[#allocation7 + $0x6f8] sm:$0xff] }
  0x95   : > { %886 = vmatmul.f32.gmra.mxu0 %v6910_v22  ;;  %910 = vmatmul.f32.gmra.mxu2 %v6913_v23  ;;  %v784_v53 = vld [vmem:[#allocation7 + $0x9f8] sm:$0xff] }
  0x96   : > { %951 = vmatmul.f32.gmra.mxu1 %v6916_v24  ;;  %975 = vmatmul.f32.gmra.mxu3 %v6919_v25 }
  0x97   : > { %1244 = vmatpush.msra.mxu2 %v718_v46  ;;  %1309 = vmatpush.msra.mxu3 %v814_v47  ;;  %v605_v46 = vld [vmem:[#allocation7 + $0x460] sm:$0xff]  ;;  %v6989_v47 = vld [vmem:[%s6783_s18 + $0xd8] sm:$0xff] }
  0x98   : > { %1374 = vmatpush.msra.mxu0 %v527_v62  ;;  %1439 = vmatpush.msra.mxu1 %v623_v63  ;;  %v599_v62 = vld [vmem:[#allocation7 + $0x430] sm:$0xff]  ;;  %v6999_v63 = vld [vmem:[%s6783_s18 + $0xf8] sm:$0xff] }
  0x99   : > { %1245 = vmatpush.msra.mxu2 %v712_v60  ;;  %1310 = vmatpush.msra.mxu3 %v808_v61  ;;  %v503_v60 = vld [vmem:[#allocation7 + $0x130] sm:$0xff] }
  0x9a   : > { %1375 = vmatpush.msra.mxu0 %v521_v8  ;;  %1440 = vmatpush.msra.mxu1 %v617_v9  ;;  %v6996_v61 = vld [vmem:[%s6783_s18 + $0xf0] sm:$0xff]  ;;  %v497_v8 = vld [vmem:[#allocation7 + $0x100] sm:$0xff] }
  0x9b   : > { %1246 = vmatpush.msra.mxu2 %v706_v6  ;;  %1311 = vmatpush.msra.mxu3 %v802_v7  ;;  %v682_v6 = vld [vmem:[#allocation7 + $0x6c8] sm:$0xff] }
  0x9c   : > { %1376 = vmatpush.msra.mxu0 %v515_v26  ;;  %1441 = vmatpush.msra.mxu1 %v611_v28  ;;  %v778_v7 = vld [vmem:[#allocation7 + $0x9c8] sm:$0xff]  ;;  %v7013_v28 = vld [vmem:[%s6783_s18 + $0x118] sm:$0xff] }
  0x9d   : > { %995 = vmatmul.f32.vlgmr.msrb.gmra.mxu2 %v6926_v30  ;;  %1125 = vmatmul.f32.vlgmr.msrb.gmra.mxu0 %v6798_v32 }
  0x9e   : > { %1060 = vmatmul.f32.vlgmr.msrb.gmra.mxu3 %v6929_v31  ;;  %1190 = vmatmul.f32.vlgmr.msrb.gmra.mxu1 %v6804_v34 }
  0x9f   : > { %1247 = vmatpush.msra.mxu2 %v700_v20  ;;  %1312 = vmatpush.msra.mxu3 %v796_v21  ;;  %v7008_v20 = vld [vmem:[%s6783_s18 + $0x110] sm:$0xff]  ;;  %v593_v21 = vld [vmem:[#allocation7 + $0x400] sm:$0xff] }
  0xa0   : > { %1377 = vmatpush.msra.mxu0 %v509_v42  ;;  %1442 = vmatpush.msra.mxu1 %v605_v46  ;;  %v491_v42 = vld [vmem:[#allocation7 + $0xd0] sm:$0xff] }
  0xa1   : > { %1248 = vmatpush.msra.mxu2 %v694_v40  ;;  %1313 = vmatpush.msra.mxu3 %v790_v41  ;;  %v676_v40 = vld [vmem:[#allocation7 + $0x698] sm:$0xff] }
  0xa2   : > { %1378 = vmatpush.msra.mxu0 %v503_v60  ;;  %1443 = vmatpush.msra.mxu1 %v599_v62  ;;  %v772_v41 = vld [vmem:[#allocation7 + $0x998] sm:$0xff]  ;;  %v7024_v62 = vld [vmem:[%s6783_s18 + $0x130] sm:$0xff] }
  0xa3   : > { %1249 = vmatpush.msra.mxu2 %v688_v52  ;;  %1314 = vmatpush.msra.mxu3 %v784_v53  ;;  %10721 = vst [vmem:[#allocation16_spill] sm:$0xff] %v7024_v62 }
  0xa4   : > { %1379 = vmatpush.msra.mxu0 %v497_v8  ;;  %1444 = vmatpush.msra.mxu1 %v593_v21  ;;  %v766_v8 = vld [vmem:[#allocation7 + $0x968] sm:$0xff]  ;;  %v485_v21 = vld [vmem:[#allocation7 + $0xa0] sm:$0xff] }
  0xa5   : > { %998 = vmatmul.f32.gmra.mxu2 %v6936_v44  ;;  %1128 = vmatmul.f32.gmra.mxu0 %v6814_v48 }
  0xa6   : > { %1063 = vmatmul.f32.gmra.mxu3 %v6939_v45  ;;  %1193 = vmatmul.f32.gmra.mxu1 %v6820_v50 }
  0xa7   : > { %1250 = vmatpush.msra.mxu2 %v682_v6  ;;  %1315 = vmatpush.msra.mxu3 %v778_v7  ;;  %v7029_v7 = vld [vmem:[%s6783_s18 + $0x138] sm:$0xff] }
  0xa8   : > { %1380 = vmatpush.msra.mxu0 %v491_v42  ;;  %10722 = vst [vmem:[#allocation17_spill] sm:$0xff] %v7029_v7 }
  0xa9   : > { %1251 = vmatpush.msra.mxu2 %v676_v40  ;;  %1316 = vmatpush.msra.mxu3 %v772_v41 }
  0xaa   : > { %1381 = vmatpush.msra.mxu0 %v485_v21 }
  0xab   : > { %1317 = vmatpush.msra.mxu3 %v766_v8  ;;  %v479_v8 = vld [vmem:[#allocation7 + $0x70] sm:$0xff] }
  0xac   : > { %1382 = vmatpush.msra.mxu0 %v479_v8 }
  0xad   : > { %1001 = vmatmul.f32.gmra.mxu2 %v6946_v54  ;;  %1131 = vmatmul.f32.gmra.mxu0 %v6830_v0 }
  0xae   : > { %1066 = vmatmul.f32.gmra.mxu3 %v6949_v55  ;;  %1196 = vmatmul.f32.gmra.mxu1 %v6836_v2 }
  0xb5   : > { %1004 = vmatmul.f32.gmra.mxu2 %v6956_v4  ;;  %1134 = vmatmul.f32.gmra.mxu0 %v6846_v16 }
  0xb6   : > { %1069 = vmatmul.f32.gmra.mxu3 %v6959_v5  ;;  %1199 = vmatmul.f32.gmra.mxu1 %v6852_v18 }
  0xbd   : > { %1007 = vmatmul.f32.gmra.mxu2 %v6966_v14  ;;  %1137 = vmatmul.f32.gmra.mxu0 %v6862_v36 }
  0xbe   : > { %1072 = vmatmul.f32.gmra.mxu3 %v6969_v15  ;;  %1202 = vmatmul.f32.gmra.mxu1 %v6868_v38 }
  0xc5   : > { %1010 = vmatmul.f32.gmra.mxu2 %v6976_v27  ;;  %1140 = vmatmul.f32.gmra.mxu0 %v6878_v56 }
  0xc6   : > { %1075 = vmatmul.f32.gmra.mxu3 %v6979_v29  ;;  %1205 = vmatmul.f32.gmra.mxu1 %v6884_v58 }
  0xcd   : > { %1013 = vmatmul.f32.gmra.mxu2 %v6986_v43  ;;  %1143 = vmatmul.f32.gmra.mxu0 %v6894_v10 }
  0xce   : > { %1078 = vmatmul.f32.gmra.mxu3 %v6989_v47  ;;  %1208 = vmatmul.f32.gmra.mxu1 %v6900_v12 }
  0xd5   : > { %1016 = vmatmul.f32.gmra.mxu2 %v6996_v61  ;;  %1146 = vmatmul.f32.gmra.mxu0 %v6910_v22 }
  0xd6   : > { %1081 = vmatmul.f32.gmra.mxu3 %v6999_v63  ;;  %1211 = vmatmul.f32.gmra.mxu1 %v6916_v24 }
  0xda   : > { %v7005_v9 = vpop.f32.mrf.mxu0 }
  0xdb   : > { %v7010_v26 = vpop.f32.mrf.mxu1 }
  0xdd   : > { %1019 = vmatmul.f32.gmra.mxu2 %v7008_v20  ;;  %1149 = vmatmul.f32.gmra.mxu0 %v6801_v33  ;;  %v587_v33 = vld [vmem:[#allocation7 + $0x3d0] sm:$0xff] }
  0xde   : > { %1084 = vmatmul.f32.gmra.mxu3 %v7013_v28  ;;  %1214 = vmatmul.f32.gmra.mxu1 %v6807_v35  ;;  %v670_v35 = vld [vmem:[#allocation7 + $0x668] sm:$0xff] }
  0xdf   : > { %1445 = vmatpush.msra.mxu1 %v587_v33  ;;  %1252 = vmatpush.msra.mxu2 %v670_v35  ;;  %v760_v35 = vld [vmem:[#allocation7 + $0x938] sm:$0xff] }
  0xe0   : > { %v890_v46 = vpop.f32.mrf.mxu2  ;;  %1318 = vmatpush.msra.mxu3 %v760_v35  ;;  %v473_v35 = vld [vmem:[#allocation7 + $0x40] sm:$0xff] }
  0xe1   : > { %v955_v52 = vpop.f32.mrf.mxu3  ;;  %1383 = vmatpush.msra.mxu0 %v473_v35 }
  0xe2   : > { %v7019_v53 = vadd.f32 %v955_v52, %v890_v46  ;;  %v7021_v60 = vpop.f32.mrf.mxu0  ;;  %v7040_v52 = vld [vmem:[%s6783_s18 + $0x150] sm:$0xff] }
  0xe3   : > { %v7026_v6 = vpop.f32.mrf.mxu1  ;;  %10724 = vst [vmem:[#allocation19_spill] sm:$0xff] %v7040_v52 }
  0xe5   : > { %1022 = vmatmul.f32.gmra.mxu2 %v7024_v62  ;;  %1152 = vmatmul.f32.gmra.mxu0 %v6817_v49  ;;  %v581_v49 = vld [vmem:[#allocation7 + $0x3a0] sm:$0xff]  ;;  %v563_v62 = vld [vmem:[#allocation7 + $0x310] sm:$0xff] }
  0xe6   : > { %1087 = vmatmul.f32.gmra.mxu3 %v7029_v7  ;;  %1217 = vmatmul.f32.gmra.mxu1 %v6823_v51  ;;  %v7045_v7 = vld [vmem:[%s6783_s18 + $0x158] sm:$0xff] }
  0xe7   : > { %10725 = vst [vmem:[#allocation20_spill] sm:$0xff] %v7045_v7  ;;  %1446 = vmatpush.msra.mxu1 %v581_v49  ;;  %v664_v51 = vld [vmem:[#allocation7 + $0x638] sm:$0xff] }
  0xe8   : > { %v893_v40 = vpop.f32.mrf.mxu2  ;;  %1253 = vmatpush.msra.mxu2 %v664_v51  ;;  %v754_v51 = vld [vmem:[#allocation7 + $0x908] sm:$0xff] }
  0xe9   : > { %v958_v41 = vpop.f32.mrf.mxu3  ;;  %1319 = vmatpush.msra.mxu3 %v754_v51  ;;  %v845_v51 = vld [vmem:[#allocation7 + $0xbe0] sm:$0xff] }
  0xea   : > { %v7035_v42 = vadd.f32 %v958_v41, %v893_v40  ;;  %v7037_v46 = vpop.f32.mrf.mxu0 }
  0xeb   : > { %v7042_v33 = vpop.f32.mrf.mxu1  ;;  %1564 = vmatpush.msrb.mxu3 %v845_v51 }
  0xec   : > { %10723 = vst [vmem:[#allocation18_spill] sm:$0xff] %v7035_v42 }
  0xed   : > { %1025 = vmatmul.f32.gmra.mxu2 %v7040_v52  ;;  %1155 = vmatmul.f32.gmra.mxu0 %v6833_v1  ;;  %v7056_v52 = vld [vmem:[%s6783_s18 + $0x170] sm:$0xff] }
  0xee   : > { %1090 = vmatmul.f32.gmra.mxu3 %v7045_v7  ;;  %1220 = vmatmul.f32.gmra.mxu1 %v6839_v3  ;;  %10727 = vst [vmem:[#allocation22_spill] sm:$0xff] %v7056_v52  ;;  %v575_v1 = vld [vmem:[#allocation7 + $0x370] sm:$0xff]  ;;  %v7061_v7 = vld [vmem:[%s6783_s18 + $0x178] sm:$0xff]  ;;  %v658_v3 = vld [vmem:[#allocation7 + $0x608] sm:$0xff] }
  0xef   : > { %10728 = vst [vmem:[#allocation23_spill] sm:$0xff] %v7061_v7  ;;  %1447 = vmatpush.msra.mxu1 %v575_v1  ;;  %1254 = vmatpush.msra.mxu2 %v658_v3  ;;  %v749_v3 = vld [vmem:[#allocation7 + $0x8e0] sm:$0xff] }
  0xf0   : > { %v896_v21 = vpop.f32.mrf.mxu2 }
  0xf1   : > { %v961_v40 = vpop.f32.mrf.mxu3  ;;  %1499 = vmatpush.msrb.mxu2 %v749_v3 }
  0xf2   : > { %v7051_v41 = vadd.f32 %v961_v40, %v896_v21  ;;  %v7053_v49 = vpop.f32.mrf.mxu0 }
  0xf3   : > { %v7058_v42 = vpop.f32.mrf.mxu1 }
  0xf4   : > { %10726 = vst [vmem:[#allocation21_spill] sm:$0xff] %v7051_v41 }
  0xf5   : > { %1028 = vmatmul.f32.gmra.mxu2 %v7056_v52  ;;  %1158 = vmatmul.f32.gmra.mxu0 %v6849_v17  ;;  %v7072_v52 = vld [vmem:[%s6783_s18 + $0x190] sm:$0xff]  ;;  %v569_v17 = vld [vmem:[#allocation7 + $0x340] sm:$0xff] }
  0xf6   : > { %1093 = vmatmul.f32.gmra.mxu3 %v7061_v7  ;;  %1223 = vmatmul.f32.gmra.mxu1 %v6855_v19  ;;  %10730 = vst [vmem:[#allocation25_spill] sm:$0xff] %v7072_v52  ;;  %v7077_v7 = vld [vmem:[%s6783_s18 + $0x198] sm:$0xff]  ;;  %v467_v19 = vld [vmem:[#allocation7 + $0x10] sm:$0xff] }
  0xf7   : > { %1448 = vmatpush.msra.mxu1 %v569_v17  ;;  %1384 = vmatpush.msra.mxu0 %v467_v19  ;;  %v558_v19 = vld [vmem:[#allocation7 + $0x2e8] sm:$0xff] }
  0xf8   : > { %v899_v8 = vpop.f32.mrf.mxu2 }
  0xf9   : > { %v964_v21 = vpop.f32.mrf.mxu3  ;;  %1449 = vmatpush.msra.mxu1 %v563_v62  ;;  %v839_v62 = vld [vmem:[#allocation7 + $0xbb0] sm:$0xff]  ;;  %1629 = vmatpush.msrb.mxu0 %v558_v19 }
  0xfa   : > { %v7067_v40 = vadd.f32 %v964_v21, %v899_v8  ;;  %v7069_v1 = vpop.f32.mrf.mxu0  ;;  %1565 = vmatpush.msrb.mxu3 %v839_v62  ;;  %v552_v62 = vld [vmem:[#allocation7 + $0x2b8] sm:$0xff] }
  0xfb   : > { %v7074_v41 = vpop.f32.mrf.mxu1  ;;  %1630 = vmatpush.msrb.mxu0 %v552_v62 }
  0xfc   : > { %10729 = vst [vmem:[#allocation24_spill] sm:$0xff] %v7067_v40 }
  0xfd   : > { %1031 = vmatmul.f32.gmra.mxu2 %v7072_v52  ;;  %1161 = vmatmul.f32.gmra.mxu0 %v6865_v37  ;;  %v7088_v52 = vld [vmem:[%s6783_s18 + $0x1b0] sm:$0xff]  ;;  %v7093_v37 = vld [vmem:[%s6783_s18 + $0x1b8] sm:$0xff] }
  0xfe   : > { %1096 = vmatmul.f32.gmra.mxu3 %v7077_v7  ;;  %1226 = vmatmul.f32.gmra.mxu1 %v6871_v39  ;;  %10732 = vst [vmem:[#allocation27_spill] sm:$0xff] %v7088_v52  ;;  %v743_v39 = vld [vmem:[#allocation7 + $0x8b0] sm:$0xff] }
  0xff   : > { %10733 = vst [vmem:[#allocation28_spill] sm:$0xff] %v7093_v37  ;;  %1500 = vmatpush.msrb.mxu2 %v743_v39  ;;  %v833_v39 = vld [vmem:[#allocation7 + $0xb80] sm:$0xff] }
 0x100   : > { %v902_v35 = vpop.f32.mrf.mxu2  ;;  %1566 = vmatpush.msrb.mxu3 %v833_v39  ;;  %v546_v39 = vld [vmem:[#allocation7 + $0x288] sm:$0xff] }
 0x101   : > { %v967_v8 = vpop.f32.mrf.mxu3  ;;  %1631 = vmatpush.msrb.mxu0 %v546_v39 }
 0x102   : > { %v7083_v21 = vadd.f32 %v967_v8, %v902_v35  ;;  %v7085_v17 = vpop.f32.mrf.mxu0 }
 0x103   : > { %v7090_v40 = vpop.f32.mrf.mxu1 }
 0x104   : > { %10731 = vst [vmem:[#allocation26_spill] sm:$0xff] %v7083_v21 }
 0x105   : > { %1034 = vmatmul.f32.gmra.mxu2 %v7088_v52  ;;  %1164 = vmatmul.f32.gmra.mxu0 %v6881_v57  ;;  %v7104_v52 = vld [vmem:[%s6783_s18 + $0x1d0] sm:$0xff]  ;;  %v7109_v57 = vld [vmem:[%s6783_s18 + $0x1d8] sm:$0xff] }
 0x106   : > { %1099 = vmatmul.f32.gmra.mxu3 %v7093_v37  ;;  %1229 = vmatmul.f32.gmra.mxu1 %v6887_v59  ;;  %10735 = vst [vmem:[#allocation30_spill] sm:$0xff] %v7104_v52  ;;  %v654_v37 = vld [vmem:[#allocation7 + $0x5e8] sm:$0xff]  ;;  %v737_v59 = vld [vmem:[#allocation7 + $0x880] sm:$0xff] }
 0x107   : > { %10736 = vst [vmem:[#allocation31_spill] sm:$0xff] %v7109_v57  ;;  %1694 = vmatpush.msrb.mxu1 %v654_v37  ;;  %1501 = vmatpush.msrb.mxu2 %v737_v59  ;;  %v827_v59 = vld [vmem:[#allocation7 + $0xb50] sm:$0xff] }
 0x108   : > { %v905_v3 = vpop.f32.mrf.mxu2  ;;  %1567 = vmatpush.msrb.mxu3 %v827_v59  ;;  %v932_v59 = vadd.f32 %v7010_v26, %v7005_v9  ;;  %v815_v9 = vld [vmem:[#allocation7 + $0xaf0] sm:$0xff]  ;;  %v534_v26 = vld [vmem:[#allocation7 + $0x228] sm:$0xff] }
 0x109   : > { %v970_v51 = vpop.f32.mrf.mxu3 }
 0x10a   : > { %v7099_v35 = vadd.f32 %v970_v51, %v905_v3  ;;  %v7101_v8 = vpop.f32.mrf.mxu0 }
 0x10b   : > { %v7106_v21 = vpop.f32.mrf.mxu1 }
 0x10c   : > { %10734 = vst [vmem:[#allocation29_spill] sm:$0xff] %v7099_v35 }
 0x10d   : > { %1037 = vmatmul.f32.gmra.mxu2 %v7104_v52  ;;  %1167 = vmatmul.f32.gmra.mxu0 %v6897_v11  ;;  %v7120_v52 = vld [vmem:[%s6783_s18 + $0x1f0] sm:$0xff]  ;;  %v7125_v11 = vld [vmem:[%s6783_s18 + $0x1f8] sm:$0xff] }
 0x10e   : > { %1102 = vmatmul.f32.gmra.mxu3 %v7109_v57  ;;  %1232 = vmatmul.f32.gmra.mxu1 %v6903_v13  ;;  %10738 = vst [vmem:[#allocation33_spill] sm:$0xff] %v7120_v52  ;;  %v648_v57 = vld [vmem:[#allocation7 + $0x5b8] sm:$0xff]  ;;  %v731_v13 = vld [vmem:[#allocation7 + $0x850] sm:$0xff] }
 0x10f   : > { %1695 = vmatpush.msrb.mxu1 %v648_v57  ;;  %1502 = vmatpush.msrb.mxu2 %v731_v13  ;;  %v540_v13 = vld [vmem:[#allocation7 + $0x258] sm:$0xff] }
 0x110   : > { %v908_v19 = vpop.f32.mrf.mxu2  ;;  %1632 = vmatpush.msrb.mxu0 %v540_v13 }
 0x111   : > { %v973_v3 = vpop.f32.mrf.mxu3 }
 0x112   : > { %v7115_v51 = vadd.f32 %v973_v3, %v908_v19  ;;  %v7117_v37 = vpop.f32.mrf.mxu0  ;;  %1633 = vmatpush.msrb.mxu0 %v534_v26  ;;  %v941_v26 = vadd.f32 %v7058_v42, %v7053_v49  ;;  %v797_v42 = vld [vmem:[#allocation7 + $0xa60] sm:$0xff]  ;;  %v516_v49 = vld [vmem:[#allocation7 + $0x198] sm:$0xff] }
 0x113   : > { %v7122_v35 = vpop.f32.mrf.mxu1 }
 0x114   : > { %10737 = vst [vmem:[#allocation32_spill] sm:$0xff] %v7115_v51 }
 0x115   : > { %1040 = vmatmul.f32.gmra.mxu2 %v7120_v52  ;;  %1170 = vmatmul.f32.gmra.mxu0 %v6913_v23  ;;  %v642_v52 = vld [vmem:[#allocation7 + $0x588] sm:$0xff]  ;;  %v725_v23 = vld [vmem:[#allocation7 + $0x820] sm:$0xff] }
 0x116   : > { %1105 = vmatmul.f32.gmra.mxu3 %v7125_v11  ;;  %1235 = vmatmul.f32.gmra.mxu1 %v6919_v25  ;;  %v821_v25 = vld [vmem:[#allocation7 + $0xb20] sm:$0xff] }
 0x117   : > { %1696 = vmatpush.msrb.mxu1 %v642_v52  ;;  %1503 = vmatpush.msrb.mxu2 %v725_v23  ;;  %v935_v23 = vadd.f32 %v7026_v6, %v7021_v60  ;;  %v809_v60 = vld [vmem:[#allocation7 + $0xac0] sm:$0xff]  ;;  %v528_v6 = vld [vmem:[#allocation7 + $0x1f8] sm:$0xff] }
 0x118   : > { %v911_v62 = vpop.f32.mrf.mxu2  ;;  %1568 = vmatpush.msrb.mxu3 %v821_v25  ;;  %1634 = vmatpush.msrb.mxu0 %v528_v6 }
 0x119   : > { %v976_v19 = vpop.f32.mrf.mxu3 }
 0x11a   : > { %v7131_v3 = vadd.f32 %v976_v19, %v911_v62  ;;  %v7133_v51 = vpop.f32.mrf.mxu0  ;;  %1569 = vmatpush.msrb.mxu3 %v815_v9 }
 0x11b   : > { %v7135_v57 = vpop.f32.mrf.mxu1 }
 0x11c   : > { %1570 = vmatpush.msrb.mxu3 %v809_v60 }
 0x11d   : > { %1255 = vmatmul.f32.vlgmr.msra.gmra.mxu2 %v6926_v30  ;;  %1385 = vmatmul.f32.vlgmr.msra.gmra.mxu0 %v6798_v32 }
 0x11e   : > { %1320 = vmatmul.f32.vlgmr.msra.gmra.mxu3 %v6929_v31  ;;  %1450 = vmatmul.f32.vlgmr.msra.gmra.mxu1 %v6804_v34  ;;  %v636_v31 = vld [vmem:[#allocation7 + $0x558] sm:$0xff]  ;;  %v719_v34 = vld [vmem:[#allocation7 + $0x7f0] sm:$0xff] }
 0x11f   : > { %1697 = vmatpush.msrb.mxu1 %v636_v31  ;;  %1504 = vmatpush.msrb.mxu2 %v719_v34 }
 0x120   : > { %v996_v39 = vpop.f32.mrf.mxu2 }
 0x121   : > { %v997_v62 = vadd.f32 %v996_v39, %v932_v59  ;;  %v1061_v52 = vpop.f32.mrf.mxu3 }
 0x122   : > { %v7143_v19 = vpop.f32.mrf.mxu0 }
 0x123   : > { %v7145_v30 = vadd.f32 %v1061_v52, %v997_v62  ;;  %v7147_v32 = vpop.f32.mrf.mxu1  ;;  %v938_v62 = vadd.f32 %v7042_v33, %v7037_v46  ;;  %v803_v46 = vld [vmem:[#allocation7 + $0xa90] sm:$0xff]  ;;  %v522_v33 = vld [vmem:[#allocation7 + $0x1c8] sm:$0xff] }
 0x124   : > { %1571 = vmatpush.msrb.mxu3 %v803_v46  ;;  %1635 = vmatpush.msrb.mxu0 %v522_v33  ;;  %v950_v46 = vadd.f32 %v7106_v21, %v7101_v8  ;;  %v779_v21 = vld [vmem:[#allocation7 + $0x9d0] sm:$0xff]  ;;  %v498_v8 = vld [vmem:[#allocation7 + $0x108] sm:$0xff] }
 0x125   : > { %10739 = vst [vmem:[#allocation34_spill] sm:$0xff] %v7145_v30  ;;  %1258 = vmatmul.f32.gmra.mxu2 %v6936_v44  ;;  %1388 = vmatmul.f32.gmra.mxu0 %v6814_v48 }
 0x126   : > { %1323 = vmatmul.f32.gmra.mxu3 %v6939_v45  ;;  %1453 = vmatmul.f32.gmra.mxu1 %v6820_v50  ;;  %v630_v45 = vld [vmem:[#allocation7 + $0x528] sm:$0xff]  ;;  %v713_v50 = vld [vmem:[#allocation7 + $0x7c0] sm:$0xff] }
 0x127   : > { %1698 = vmatpush.msrb.mxu1 %v630_v45  ;;  %1505 = vmatpush.msrb.mxu2 %v713_v50  ;;  %v944_v45 = vadd.f32 %v7074_v41, %v7069_v1  ;;  %v791_v41 = vld [vmem:[#allocation7 + $0xa30] sm:$0xff]  ;;  %v510_v1 = vld [vmem:[#allocation7 + $0x168] sm:$0xff] }
 0x128   : > { %v999_v25 = vpop.f32.mrf.mxu2  ;;  %1572 = vmatpush.msrb.mxu3 %v797_v42  ;;  %1636 = vmatpush.msrb.mxu0 %v516_v49  ;;  %v7235_v49 = vld [vmem:[%s6783_s18 + $0x100] sm:$0xff] }
 0x129   : > { %v1000_v13 = vadd.f32 %v999_v25, %v935_v23  ;;  %v1064_v59 = vpop.f32.mrf.mxu3 }
 0x12a   : > { %v7155_v39 = vpop.f32.mrf.mxu0  ;;  %1573 = vmatpush.msrb.mxu3 %v791_v41  ;;  %1637 = vmatpush.msrb.mxu0 %v510_v1  ;;  %v588_v41 = vld [vmem:[#allocation7 + $0x3d8] sm:$0xff]  ;;  %v10748_v1 = vld [vmem:[#allocation16_spill] sm:$0xff] }
 0x12b   : > { %v7157_v44 = vadd.f32 %v1064_v59, %v1000_v13  ;;  %v7159_v48 = vpop.f32.mrf.mxu1 }
 0x12d   : > { %10740 = vst [vmem:[#allocation35_spill] sm:$0xff] %v7157_v44  ;;  %1261 = vmatmul.f32.gmra.mxu2 %v6946_v54  ;;  %1391 = vmatmul.f32.gmra.mxu0 %v6830_v0 }
 0x12e   : > { %1326 = vmatmul.f32.gmra.mxu3 %v6949_v55  ;;  %1456 = vmatmul.f32.gmra.mxu1 %v6836_v2  ;;  %v624_v55 = vld [vmem:[#allocation7 + $0x4f8] sm:$0xff]  ;;  %v707_v2 = vld [vmem:[#allocation7 + $0x790] sm:$0xff] }
 0x12f   : > { %1699 = vmatpush.msrb.mxu1 %v624_v55  ;;  %1506 = vmatpush.msrb.mxu2 %v707_v2 }
 0x130   : > { %v1002_v52 = vpop.f32.mrf.mxu2 }
 0x131   : > { %v1003_v31 = vadd.f32 %v1002_v52, %v938_v62  ;;  %v1067_v34 = vpop.f32.mrf.mxu3  ;;  %v947_v52 = vadd.f32 %v7090_v40, %v7085_v17  ;;  %v785_v40 = vld [vmem:[#allocation7 + $0xa00] sm:$0xff]  ;;  %v504_v17 = vld [vmem:[#allocation7 + $0x138] sm:$0xff] }
 0x132   : > { %v7167_v9 = vpop.f32.mrf.mxu0  ;;  %1574 = vmatpush.msrb.mxu3 %v785_v40  ;;  %1638 = vmatpush.msrb.mxu0 %v504_v17  ;;  %v10750_v40 = vld [vmem:[#allocation18_spill] sm:$0xff] }
 0x133   : > { %v7169_v54 = vadd.f32 %v1067_v34, %v1003_v31  ;;  %v7171_v0 = vpop.f32.mrf.mxu1 }
 0x134   : > { %1575 = vmatpush.msrb.mxu3 %v779_v21  ;;  %1639 = vmatpush.msrb.mxu0 %v498_v8  ;;  %v7269_v21 = vld [vmem:[%s6783_s18 + $0x140] sm:$0xff] }
 0x135   : > { %10741 = vst [vmem:[#allocation36_spill] sm:$0xff] %v7169_v54  ;;  %1264 = vmatmul.f32.gmra.mxu2 %v6956_v4  ;;  %1394 = vmatmul.f32.gmra.mxu0 %v6846_v16  ;;  %v10753_v8 = vld [vmem:[#allocation20_spill] sm:$0xff] }
 0x136   : > { %1329 = vmatmul.f32.gmra.mxu3 %v6959_v5  ;;  %1459 = vmatmul.f32.gmra.mxu1 %v6852_v18  ;;  %v618_v5 = vld [vmem:[#allocation7 + $0x4c8] sm:$0xff]  ;;  %v701_v18 = vld [vmem:[#allocation7 + $0x760] sm:$0xff] }
 0x137   : > { %1700 = vmatpush.msrb.mxu1 %v618_v5  ;;  %1507 = vmatpush.msrb.mxu2 %v701_v18 }
 0x138   : > { %v1005_v23 = vpop.f32.mrf.mxu2 }
 0x139   : > { %v1006_v25 = vadd.f32 %v1005_v23, %v941_v26  ;;  %v1070_v13 = vpop.f32.mrf.mxu3 }
 0x13a   : > { %v7179_v59 = vpop.f32.mrf.mxu0 }
 0x13b   : > { %v7181_v4 = vadd.f32 %v1070_v13, %v1006_v25  ;;  %v7183_v16 = vpop.f32.mrf.mxu1  ;;  %v953_v13 = vadd.f32 %v7122_v35, %v7117_v37  ;;  %v7240_v35 = vld [vmem:[%s6783_s18 + $0x108] sm:$0xff]  ;;  %v677_v37 = vld [vmem:[#allocation7 + $0x6a0] sm:$0xff] }
 0x13d   : > { %10742 = vst [vmem:[#allocation37_spill] sm:$0xff] %v7181_v4  ;;  %1267 = vmatmul.f32.gmra.mxu2 %v6966_v14  ;;  %1397 = vmatmul.f32.gmra.mxu0 %v6862_v36 }
 0x13e   : > { %1332 = vmatmul.f32.gmra.mxu3 %v6969_v15  ;;  %1462 = vmatmul.f32.gmra.mxu1 %v6868_v38  ;;  %v612_v15 = vld [vmem:[#allocation7 + $0x498] sm:$0xff]  ;;  %v695_v38 = vld [vmem:[#allocation7 + $0x730] sm:$0xff] }
 0x13f   : > { %1701 = vmatpush.msrb.mxu1 %v612_v15  ;;  %1508 = vmatpush.msrb.mxu2 %v695_v38 }
 0x140   : > { %v1008_v50 = vpop.f32.mrf.mxu2 }
 0x141   : > { %v1009_v60 = vadd.f32 %v1008_v50, %v944_v45  ;;  %v1073_v6 = vpop.f32.mrf.mxu3  ;;  %v773_v45 = vld [vmem:[#allocation7 + $0x9a0] sm:$0xff]  ;;  %v492_v50 = vld [vmem:[#allocation7 + $0xd8] sm:$0xff] }
 0x142   : > { %v7191_v62 = vpop.f32.mrf.mxu0  ;;  %1576 = vmatpush.msrb.mxu3 %v773_v45  ;;  %1640 = vmatpush.msrb.mxu0 %v492_v50 }
 0x143   : > { %v7193_v14 = vadd.f32 %v1073_v6, %v1009_v60  ;;  %v7195_v36 = vpop.f32.mrf.mxu1 }
 0x145   : > { %10743 = vst [vmem:[#allocation38_spill] sm:$0xff] %v7193_v14  ;;  %1270 = vmatmul.f32.gmra.mxu2 %v6976_v27  ;;  %1400 = vmatmul.f32.gmra.mxu0 %v6878_v56  ;;  %v7370_v14 = vld [vmem:[%s6783_s18 + $0x10] sm:$0xff] }
 0x146   : > { %1335 = vmatmul.f32.gmra.mxu3 %v6979_v29  ;;  %1465 = vmatmul.f32.gmra.mxu1 %v6884_v58  ;;  %v606_v29 = vld [vmem:[#allocation7 + $0x468] sm:$0xff]  ;;  %v689_v58 = vld [vmem:[#allocation7 + $0x700] sm:$0xff] }
 0x147   : > { %1702 = vmatpush.msrb.mxu1 %v606_v29  ;;  %1509 = vmatpush.msrb.mxu2 %v689_v58  ;;  %v486_v29 = vld [vmem:[#allocation7 + $0xa8] sm:$0xff] }
 0x148   : > { %v1011_v31 = vpop.f32.mrf.mxu2  ;;  %1641 = vmatpush.msrb.mxu0 %v486_v29  ;;  %v659_v29 = vld [vmem:[#allocation7 + $0x610] sm:$0xff] }
 0x149   : > { %v1012_v34 = vadd.f32 %v1011_v31, %v947_v52  ;;  %v1076_v55 = vpop.f32.mrf.mxu3  ;;  %v7252_v52 = vld [vmem:[%s6783_s18 + $0x120] sm:$0xff]  ;;  %v10749_v31 = vld [vmem:[#allocation17_spill] sm:$0xff] }
 0x14a   : > { %v7203_v2 = vpop.f32.mrf.mxu0 }
 0x14b   : > { %v7205_v27 = vadd.f32 %v1076_v55, %v1012_v34  ;;  %v7207_v56 = vpop.f32.mrf.mxu1  ;;  %v7257_v34 = vld [vmem:[%s6783_s18 + $0x128] sm:$0xff]  ;;  %v767_v55 = vld [vmem:[#allocation7 + $0x970] sm:$0xff] }
 0x14c   : > { %1577 = vmatpush.msrb.mxu3 %v767_v55  ;;  %v7291_v55 = vld [vmem:[%s6783_s18 + $0x168] sm:$0xff] }
 0x14d   : > { %10744 = vst [vmem:[#allocation39_spill] sm:$0xff] %v7205_v27  ;;  %1273 = vmatmul.f32.gmra.mxu2 %v6986_v43  ;;  %1403 = vmatmul.f32.gmra.mxu0 %v6894_v10  ;;  %v7354_v27 = vld [vmem:[%s6783_s18 + $0x1e0] sm:$0xff] }
 0x14e   : > { %1338 = vmatmul.f32.gmra.mxu3 %v6989_v47  ;;  %1468 = vmatmul.f32.gmra.mxu1 %v6900_v12  ;;  %v600_v47 = vld [vmem:[#allocation7 + $0x438] sm:$0xff]  ;;  %v683_v12 = vld [vmem:[#allocation7 + $0x6d0] sm:$0xff] }
 0x14f   : > { %1703 = vmatpush.msrb.mxu1 %v600_v47  ;;  %1510 = vmatpush.msrb.mxu2 %v683_v12  ;;  %v582_v47 = vld [vmem:[#allocation7 + $0x3a8] sm:$0xff]  ;;  %v10752_v12 = vld [vmem:[#allocation19_spill] sm:$0xff] }
 0x150   : > { %v1014_v33 = vpop.f32.mrf.mxu2 }
 0x151   : > { %v1015_v26 = vadd.f32 %v1014_v33, %v950_v46  ;;  %v1079_v23 = vpop.f32.mrf.mxu3  ;;  %1511 = vmatpush.msrb.mxu2 %v677_v37  ;;  %v10754_v37 = vld [vmem:[#allocation21_spill] sm:$0xff] }
 0x152   : > { %v7215_v25 = vpop.f32.mrf.mxu0 }
 0x153   : > { %v7217_v43 = vadd.f32 %v1079_v23, %v1015_v26  ;;  %v7219_v10 = vpop.f32.mrf.mxu1 }
 0x155   : > { %10745 = vst [vmem:[#allocation40_spill] sm:$0xff] %v7217_v43  ;;  %1276 = vmatmul.f32.gmra.mxu2 %v6996_v61  ;;  %1406 = vmatmul.f32.gmra.mxu0 %v6910_v22  ;;  %v10771_v43 = vld [vmem:[#allocation33_spill] sm:$0xff] }
 0x156   : > { %1341 = vmatmul.f32.gmra.mxu3 %v6999_v63  ;;  %1471 = vmatmul.f32.gmra.mxu1 %v6916_v24  ;;  %v594_v24 = vld [vmem:[#allocation7 + $0x408] sm:$0xff] }
 0x157   : > { %1704 = vmatpush.msrb.mxu1 %v594_v24 }
 0x158   : > { %v1017_v5 = vpop.f32.mrf.mxu2 }
 0x159   : > { %v1018_v18 = vadd.f32 %v1017_v5, %v953_v13  ;;  %v1082_v61 = vpop.f32.mrf.mxu3  ;;  %1705 = vmatpush.msrb.mxu1 %v588_v41  ;;  %v7274_v13 = vld [vmem:[%s6783_s18 + $0x148] sm:$0xff]  ;;  %v665_v5 = vld [vmem:[#allocation7 + $0x640] sm:$0xff]  ;;  %v576_v41 = vld [vmem:[#allocation7 + $0x378] sm:$0xff] }
 0x15a   : > { %v7227_v42 = vpop.f32.mrf.mxu0 }
 0x15b   : > { %v7229_v22 = vadd.f32 %v1082_v61, %v1018_v18  ;;  %v7231_v63 = vpop.f32.mrf.mxu1  ;;  %1706 = vmatpush.msrb.mxu1 %v582_v47  ;;  %v761_v18 = vld [vmem:[#allocation7 + $0x940] sm:$0xff]  ;;  %v480_v61 = vld [vmem:[#allocation7 + $0x78] sm:$0xff] }
 0x15c   : > { %1578 = vmatpush.msrb.mxu3 %v761_v18  ;;  %1642 = vmatpush.msrb.mxu0 %v480_v61 }
 0x15d   : > { %10746 = vst [vmem:[#allocation41_spill] sm:$0xff] %v7229_v22  ;;  %1279 = vmatmul.f32.gmra.mxu2 %v7008_v20  ;;  %1409 = vmatmul.f32.gmra.mxu0 %v7235_v49  ;;  %v649_v22 = vld [vmem:[#allocation7 + $0x5c0] sm:$0xff] }
 0x15e   : > { %1344 = vmatmul.f32.gmra.mxu3 %v7013_v28  ;;  %1474 = vmatmul.f32.gmra.mxu1 %v7240_v35 }
 0x15f   : > { %1707 = vmatpush.msrb.mxu1 %v576_v41  ;;  %v7308_v41 = vld [vmem:[%s6783_s18 + $0x188] sm:$0xff] }
 0x160   : > { %v1020_v60 = vpop.f32.mrf.mxu2 }
 0x161   : > { %v1021_v20 = vadd.f32 %v1020_v60, %v7019_v53  ;;  %v1085_v6 = vpop.f32.mrf.mxu3  ;;  %v671_v53 = vld [vmem:[#allocation7 + $0x670] sm:$0xff] }
 0x162   : > { %v7244_v15 = vpop.f32.mrf.mxu0  ;;  %1512 = vmatpush.msrb.mxu2 %v671_v53  ;;  %v10757_v53 = vld [vmem:[#allocation23_spill] sm:$0xff] }
 0x163   : > { %v7246_v38 = vadd.f32 %v1085_v6, %v1021_v20  ;;  %v7248_v28 = vpop.f32.mrf.mxu1 }
 0x164   : > { %1513 = vmatpush.msrb.mxu2 %v665_v5  ;;  %v570_v5 = vld [vmem:[#allocation7 + $0x348] sm:$0xff] }
 0x165   : > { %10747 = vst [vmem:[#allocation42_spill] sm:$0xff] %v7246_v38  ;;  %1282 = vmatmul.f32.gmra.mxu2 %v10748_v1  ;;  %1412 = vmatmul.f32.gmra.mxu0 %v7252_v52  ;;  %v10756_v1 = vld [vmem:[#allocation22_spill] sm:$0xff] }
 0x166   : > { %1347 = vmatmul.f32.gmra.mxu3 %v10749_v31  ;;  %1477 = vmatmul.f32.gmra.mxu1 %v7257_v34  ;;  %v7286_v31 = vld [vmem:[%s6783_s18 + $0x160] sm:$0xff] }
 0x167   : > { %1514 = vmatpush.msrb.mxu2 %v659_v29  ;;  %1708 = vmatpush.msrb.mxu1 %v570_v5  ;;  %v7320_v5 = vld [vmem:[%s6783_s18 + $0x1a0] sm:$0xff] }
 0x168   : > { %v1023_v58 = vpop.f32.mrf.mxu2 }
 0x169   : > { %v1024_v17 = vadd.f32 %v1023_v58, %v10750_v40  ;;  %v1088_v46 = vpop.f32.mrf.mxu3  ;;  %v755_v58 = vld [vmem:[#allocation7 + $0x910] sm:$0xff]  ;;  %v474_v40 = vld [vmem:[#allocation7 + $0x48] sm:$0xff] }
 0x16a   : > { %v7261_v33 = vpop.f32.mrf.mxu0  ;;  %1579 = vmatpush.msrb.mxu3 %v755_v58  ;;  %1643 = vmatpush.msrb.mxu0 %v474_v40  ;;  %v10761_v58 = vld [vmem:[#allocation26_spill] sm:$0xff] }
 0x16b   : > { %v7263_v26 = vadd.f32 %v1088_v46, %v1024_v17  ;;  %v7265_v23 = vpop.f32.mrf.mxu1  ;;  %v10758_v46 = vld [vmem:[#allocation24_spill] sm:$0xff] }
 0x16d   : > { %10751 = vst [vmem:[#allocation16_spill] sm:$0xff] %v7263_v26  ;;  %1285 = vmatmul.f32.gmra.mxu2 %v10752_v12  ;;  %1415 = vmatmul.f32.gmra.mxu0 %v7269_v21  ;;  %v7337_v26 = vld [vmem:[%s6783_s18 + $0x1c0] sm:$0xff] }
 0x16e   : > { %1350 = vmatmul.f32.gmra.mxu3 %v10753_v8  ;;  %1480 = vmatmul.f32.gmra.mxu1 %v7274_v13 }
 0x170   : > { %v1026_v24 = vpop.f32.mrf.mxu2 }
 0x171   : > { %v1027_v45 = vadd.f32 %v1026_v24, %v10754_v37  ;;  %v1091_v50 = vpop.f32.mrf.mxu3  ;;  %v468_v24 = vld [vmem:[#allocation7 + $0x18] sm:$0xff] }
 0x172   : > { %v7278_v60 = vpop.f32.mrf.mxu0  ;;  %v564_v37 = vld [vmem:[#allocation7 + $0x318] sm:$0xff]  ;;  %1644 = vmatpush.msrb.mxu0 %v468_v24  ;;  %v10764_v24 = vld [vmem:[#allocation28_spill] sm:$0xff] }
 0x173   : > { %v7280_v20 = vadd.f32 %v1091_v50, %v1027_v45  ;;  %v7282_v6 = vpop.f32.mrf.mxu1  ;;  %v10760_v45 = vld [vmem:[#allocation25_spill] sm:$0xff]  ;;  %v7303_v50 = vld [vmem:[%s6783_s18 + $0x180] sm:$0xff]  ;;  %1709 = vmatpush.msrb.mxu1 %v564_v37 }
 0x174   : > { %v7325_v37 = vld [vmem:[%s6783_s18 + $0x1a8] sm:$0xff] }
 0x175   : > { %10755 = vst [vmem:[#allocation17_spill] sm:$0xff] %v7280_v20  ;;  %1288 = vmatmul.f32.gmra.mxu2 %v10756_v1  ;;  %1418 = vmatmul.f32.gmra.mxu0 %v7286_v31  ;;  %v750_v1 = vld [vmem:[#allocation7 + $0x8e8] sm:$0xff]  ;;  %v10767_v20 = vld [vmem:[#allocation30_spill] sm:$0xff] }
 0x176   : > { %1353 = vmatmul.f32.gmra.mxu3 %v10757_v53  ;;  %1483 = vmatmul.f32.gmra.mxu1 %v7291_v55  ;;  %v846_v53 = vld [vmem:[#allocation7 + $0xbe8] sm:$0xff] }
 0x177   : > { %1759 = vmatpush.msra.mxu2 %v750_v1  ;;  %1824 = vmatpush.msra.mxu3 %v846_v53  ;;  %v840_v1 = vld [vmem:[#allocation7 + $0xbb8] sm:$0xff]  ;;  %v559_v53 = vld [vmem:[#allocation7 + $0x2f0] sm:$0xff] }
 0x178   : > { %v1029_v17 = vpop.f32.mrf.mxu2  ;;  %1889 = vmatpush.msra.mxu0 %v559_v53  ;;  %v738_v53 = vld [vmem:[#allocation7 + $0x888] sm:$0xff] }
 0x179   : > { %v1030_v47 = vadd.f32 %v1029_v17, %v10758_v46  ;;  %v1094_v12 = vpop.f32.mrf.mxu3  ;;  %1825 = vmatpush.msra.mxu3 %v840_v1  ;;  %v7342_v1 = vld [vmem:[%s6783_s18 + $0x1c8] sm:$0xff] }
 0x17a   : > { %v7295_v8 = vpop.f32.mrf.mxu0 }
 0x17b   : > { %v7297_v18 = vadd.f32 %v1094_v12, %v1030_v47  ;;  %v7299_v61 = vpop.f32.mrf.mxu1  ;;  %v10763_v12 = vld [vmem:[#allocation27_spill] sm:$0xff] }
 0x17d   : > { %10759 = vst [vmem:[#allocation18_spill] sm:$0xff] %v7297_v18  ;;  %1291 = vmatmul.f32.gmra.mxu2 %v10760_v45  ;;  %1421 = vmatmul.f32.gmra.mxu0 %v7303_v50  ;;  %v744_v45 = vld [vmem:[#allocation7 + $0x8b8] sm:$0xff]  ;;  %v655_v18 = vld [vmem:[#allocation7 + $0x5f0] sm:$0xff] }
 0x17e   : > { %1356 = vmatmul.f32.gmra.mxu3 %v7077_v7  ;;  %1486 = vmatmul.f32.gmra.mxu1 %v7308_v41 }
 0x17f   : > { %1760 = vmatpush.msra.mxu2 %v744_v45  ;;  %1954 = vmatpush.msra.mxu1 %v655_v18  ;;  %v10768_v45 = vld [vmem:[#allocation31_spill] sm:$0xff] }
 0x180   : > { %v1032_v29 = vpop.f32.mrf.mxu2 }
 0x181   : > { %v1033_v40 = vadd.f32 %v1032_v29, %v10761_v58  ;;  %v1097_v17 = vpop.f32.mrf.mxu3  ;;  %v10765_v58 = vld [vmem:[#allocation29_spill] sm:$0xff]  ;;  %1761 = vmatpush.msra.mxu2 %v738_v53  ;;  %1955 = vmatpush.msra.mxu1 %v649_v22 }
 0x182   : > { %v7312_v46 = vpop.f32.mrf.mxu0  ;;  %v7359_v53 = vld [vmem:[%s6783_s18 + $0x1e8] sm:$0xff] }
 0x183   : > { %v7314_v47 = vadd.f32 %v1097_v17, %v1033_v40  ;;  %v7316_v7 = vpop.f32.mrf.mxu1 }
 0x185   : > { %10762 = vst [vmem:[#allocation19_spill] sm:$0xff] %v7314_v47  ;;  %1294 = vmatmul.f32.gmra.mxu2 %v10763_v12  ;;  %1424 = vmatmul.f32.gmra.mxu0 %v7320_v5 }
 0x186   : > { %1359 = vmatmul.f32.gmra.mxu3 %v10764_v24  ;;  %1489 = vmatmul.f32.gmra.mxu1 %v7325_v37 }
 0x188   : > { %v1035_v29 = vpop.f32.mrf.mxu2 }
 0x189   : > { %v1036_v40 = vadd.f32 %v1035_v29, %v10765_v58  ;;  %v1100_v17 = vpop.f32.mrf.mxu3  ;;  %v834_v29 = vld [vmem:[#allocation7 + $0xb88] sm:$0xff]  ;;  %v553_v58 = vld [vmem:[#allocation7 + $0x2c0] sm:$0xff] }
 0x18a   : > { %v7329_v12 = vpop.f32.mrf.mxu0  ;;  %1826 = vmatpush.msra.mxu3 %v834_v29  ;;  %1890 = vmatpush.msra.mxu0 %v553_v58  ;;  %v732_v29 = vld [vmem:[#allocation7 + $0x858] sm:$0xff] }
 0x18b   : > { %v7331_v47 = vadd.f32 %v1100_v17, %v1036_v40  ;;  %v7333_v24 = vpop.f32.mrf.mxu1  ;;  %v828_v58 = vld [vmem:[#allocation7 + $0xb58] sm:$0xff]  ;;  %1762 = vmatpush.msra.mxu2 %v732_v29  ;;  %v7374_v29 = vld [vmem:[%s6783_s18] sm:$0xff] }
 0x18c   : > { %1827 = vmatpush.msra.mxu3 %v828_v58  ;;  %v7378_v58 = vld [vmem:[%s6783_s18 + $0x18] sm:$0xff] }
 0x18d   : > { %10766 = vst [vmem:[#allocation20_spill] sm:$0xff] %v7331_v47  ;;  %1297 = vmatmul.f32.gmra.mxu2 %v10767_v20  ;;  %1427 = vmatmul.f32.gmra.mxu0 %v7337_v26  ;;  %v10769_v20 = vld [vmem:[#allocation32_spill] sm:$0xff] }
 0x18e   : > { %1362 = vmatmul.f32.gmra.mxu3 %v10768_v45  ;;  %1492 = vmatmul.f32.gmra.mxu1 %v7342_v1 }
 0x190   : > { %v1038_v18 = vpop.f32.mrf.mxu2 }
 0x191   : > { %v1039_v40 = vadd.f32 %v1038_v18, %v10769_v20  ;;  %v1103_v17 = vpop.f32.mrf.mxu3  ;;  %v547_v18 = vld [vmem:[#allocation7 + $0x290] sm:$0xff] }
 0x192   : > { %v7346_v47 = vpop.f32.mrf.mxu0  ;;  %1891 = vmatpush.msra.mxu0 %v547_v18  ;;  %v726_v18 = vld [vmem:[#allocation7 + $0x828] sm:$0xff] }
 0x193   : > { %v7348_v38 = vadd.f32 %v1103_v17, %v1039_v40  ;;  %v7350_v45 = vpop.f32.mrf.mxu1  ;;  %1763 = vmatpush.msra.mxu2 %v726_v18  ;;  %v7406_v18 = vld [vmem:[%s6783_s18 + $0x28] sm:$0xff] }
 0x194   : > { %10779 = vst [vmem:[#allocation29_spill] sm:$0xff] %v7406_v18 }
 0x195   : > { %10770 = vst [vmem:[#allocation21_spill] sm:$0xff] %v7348_v38  ;;  %1300 = vmatmul.f32.gmra.mxu2 %v10771_v43  ;;  %1430 = vmatmul.f32.gmra.mxu0 %v7354_v27  ;;  %v643_v38 = vld [vmem:[#allocation7 + $0x590] sm:$0xff] }
 0x196   : > { %1365 = vmatmul.f32.gmra.mxu3 %v7125_v11  ;;  %1495 = vmatmul.f32.gmra.mxu1 %v7359_v53 }
 0x197   : > { %1956 = vmatpush.msra.mxu1 %v643_v38  ;;  %v541_v38 = vld [vmem:[#allocation7 + $0x260] sm:$0xff] }
 0x198   : > { %v1041_v43 = vpop.f32.mrf.mxu2  ;;  %1892 = vmatpush.msra.mxu0 %v541_v38 }
 0x199   : > { %v1042_v22 = vadd.f32 %v1041_v43, %v7131_v3  ;;  %v1106_v20 = vpop.f32.mrf.mxu3  ;;  %v7382_v3 = vld [vmem:[%s6783_s18 + $0x8] sm:$0xff] }
 0x19a   : > { %v7363_v40 = vpop.f32.mrf.mxu0  ;;  %v822_v43 = vld [vmem:[#allocation7 + $0xb28] sm:$0xff] }
 0x19b   : > { %10772 = vst [vmem:[#allocation22_spill] sm:$0xff] %v7363_v40  ;;  %v7365_v11 = vadd.f32 %v1106_v20, %v1042_v22  ;;  %v7367_v17 = vpop.f32.mrf.mxu1  ;;  %v1192_v22 = vadd.f32 %v7135_v57, %v7133_v51  ;;  %1828 = vmatpush.msra.mxu3 %v822_v43  ;;  %v7394_v40 = vld [vmem:[%s6783_s18 + $0x30] sm:$0xff]  ;;  %v7398_v51 = vld [vmem:[%s6783_s18 + $0x20] sm:$0xff]  ;;  %v7402_v57 = vld [vmem:[%s6783_s18 + $0x38] sm:$0xff]  ;;  %v1195_v43 = vadd.f32 %v7147_v32, %v7143_v19 }
 0x19c   : > { %10774 = vst [vmem:[#allocation24_spill] sm:$0xff] %v7367_v17  ;;  %v637_v17 = vld [vmem:[#allocation7 + $0x560] sm:$0xff]  ;;  %v7426_v32 = vld [vmem:[%s6783_s18 + $0x58] sm:$0xff] }
 0x19d   : > { %10773 = vst [vmem:[#allocation23_spill] sm:$0xff] %v7365_v11  ;;  %1515 = vmatmul.f32.vlgmr.msrb.gmra.mxu2 %v7370_v14  ;;  %1645 = vmatmul.f32.vlgmr.msrb.gmra.mxu0 %v7374_v29  ;;  %v7422_v19 = vld [vmem:[%s6783_s18 + $0x40] sm:$0xff] }
 0x19e   : > { %1580 = vmatmul.f32.vlgmr.msrb.gmra.mxu3 %v7378_v58  ;;  %1710 = vmatmul.f32.vlgmr.msrb.gmra.mxu1 %v7382_v3  ;;  %10778 = vst [vmem:[#allocation28_spill] sm:$0xff] %v7402_v57 }
 0x19f   : > { %1957 = vmatpush.msra.mxu1 %v637_v17  ;;  %v535_v17 = vld [vmem:[#allocation7 + $0x230] sm:$0xff]  ;;  %10783 = vst [vmem:[#allocation33_spill] sm:$0xff] %v7426_v32 }
 0x1a0   : > { %v1256_v20 = vpop.f32.mrf.mxu2  ;;  %1893 = vmatpush.msra.mxu0 %v535_v17  ;;  %v810_v17 = vld [vmem:[#allocation7 + $0xac8] sm:$0xff] }
 0x1a1   : > { %v1257_v11 = vadd.f32 %v1256_v20, %v1192_v22  ;;  %v1321_v4 = vpop.f32.mrf.mxu3 }
 0x1a2   : > { %v7387_v54 = vpop.f32.mrf.mxu0 }
 0x1a3   : > { %10775 = vst [vmem:[#allocation25_spill] sm:$0xff] %v7387_v54  ;;  %v7389_v44 = vadd.f32 %v1321_v4, %v1257_v11  ;;  %v7391_v30 = vpop.f32.mrf.mxu1  ;;  %v720_v4 = vld [vmem:[#allocation7 + $0x7f8] sm:$0xff] }
 0x1a4   : > { %10777 = vst [vmem:[#allocation27_spill] sm:$0xff] %v7391_v30  ;;  %v816_v11 = vld [vmem:[#allocation7 + $0xaf8] sm:$0xff]  ;;  %1764 = vmatpush.msra.mxu2 %v720_v4  ;;  %v7430_v4 = vld [vmem:[%s6783_s18 + $0x48] sm:$0xff] }
 0x1a5   : > { %10776 = vst [vmem:[#allocation26_spill] sm:$0xff] %v7389_v44  ;;  %1518 = vmatmul.f32.gmra.mxu2 %v7394_v40  ;;  %1648 = vmatmul.f32.gmra.mxu0 %v7398_v51 }
 0x1a6   : > { %1583 = vmatmul.f32.gmra.mxu3 %v7402_v57  ;;  %1713 = vmatmul.f32.gmra.mxu1 %v7406_v18  ;;  %v631_v18 = vld [vmem:[#allocation7 + $0x530] sm:$0xff]  ;;  %10784 = vst [vmem:[#allocation43_spill] sm:$0xff] %v7430_v4 }
 0x1a7   : > { %1829 = vmatpush.msra.mxu3 %v816_v11  ;;  %1958 = vmatpush.msra.mxu1 %v631_v18  ;;  %v7418_v57 = vld [vmem:[%s6783_s18 + $0x50] sm:$0xff]  ;;  %v714_v11 = vld [vmem:[#allocation7 + $0x7c8] sm:$0xff]  ;;  %v529_v18 = vld [vmem:[#allocation7 + $0x200] sm:$0xff] }
 0x1a8   : > { %v1259_v38 = vpop.f32.mrf.mxu2  ;;  %1765 = vmatpush.msra.mxu2 %v714_v11  ;;  %1894 = vmatpush.msra.mxu0 %v529_v18  ;;  %v7454_v11 = vld [vmem:[%s6783_s18 + $0x68] sm:$0xff]  ;;  %v804_v18 = vld [vmem:[#allocation7 + $0xa98] sm:$0xff] }
 0x1a9   : > { %v1260_v22 = vadd.f32 %v1259_v38, %v1195_v43  ;;  %v1324_v20 = vpop.f32.mrf.mxu3  ;;  %v1198_v43 = vadd.f32 %v7159_v48, %v7155_v39  ;;  %1830 = vmatpush.msra.mxu3 %v810_v17  ;;  %v7446_v39 = vld [vmem:[%s6783_s18 + $0x60] sm:$0xff]  ;;  %v7450_v48 = vld [vmem:[%s6783_s18 + $0x78] sm:$0xff]  ;;  %10789 = vst [vmem:[#allocation48_spill] sm:$0xff] %v7454_v11 }
 0x1aa   : > { %v7411_v44 = vpop.f32.mrf.mxu0  ;;  %10788 = vst [vmem:[#allocation47_spill] sm:$0xff] %v7450_v48  ;;  %v708_v17 = vld [vmem:[#allocation7 + $0x798] sm:$0xff] }
 0x1ab   : > { %10780 = vst [vmem:[#allocation30_spill] sm:$0xff] %v7411_v44  ;;  %v7413_v30 = vadd.f32 %v1324_v20, %v1260_v22  ;;  %v7415_v54 = vpop.f32.mrf.mxu1  ;;  %1766 = vmatpush.msra.mxu2 %v708_v17  ;;  %1831 = vmatpush.msra.mxu3 %v804_v18  ;;  %v7478_v17 = vld [vmem:[%s6783_s18 + $0x88] sm:$0xff] }
 0x1ac   : > { %10782 = vst [vmem:[#allocation32_spill] sm:$0xff] %v7415_v54  ;;  %v702_v18 = vld [vmem:[#allocation7 + $0x768] sm:$0xff] }
 0x1ad   : > { %10781 = vst [vmem:[#allocation31_spill] sm:$0xff] %v7413_v30  ;;  %1521 = vmatmul.f32.gmra.mxu2 %v7418_v57  ;;  %1651 = vmatmul.f32.gmra.mxu0 %v7422_v19 }
 0x1ae   : > { %1586 = vmatmul.f32.gmra.mxu3 %v7426_v32  ;;  %1716 = vmatmul.f32.gmra.mxu1 %v7430_v4  ;;  %v625_v4 = vld [vmem:[#allocation7 + $0x500] sm:$0xff]  ;;  %v7442_v32 = vld [vmem:[%s6783_s18 + $0x70] sm:$0xff]  ;;  %10794 = vst [vmem:[#allocation53_spill] sm:$0xff] %v7478_v17 }
 0x1af   : > { %1959 = vmatpush.msra.mxu1 %v625_v4  ;;  %v523_v4 = vld [vmem:[#allocation7 + $0x1d0] sm:$0xff]  ;;  %1767 = vmatpush.msra.mxu2 %v702_v18  ;;  %v7502_v18 = vld [vmem:[%s6783_s18 + $0xa8] sm:$0xff] }
 0x1b0   : > { %v1262_v38 = vpop.f32.mrf.mxu2  ;;  %1895 = vmatpush.msra.mxu0 %v523_v4  ;;  %v798_v4 = vld [vmem:[#allocation7 + $0xa68] sm:$0xff]  ;;  %10799 = vst [vmem:[#allocation58_spill] sm:$0xff] %v7502_v18 }
 0x1b1   : > { %v1263_v22 = vadd.f32 %v1262_v38, %v1198_v43  ;;  %v1327_v20 = vpop.f32.mrf.mxu3  ;;  %v1201_v43 = vadd.f32 %v7171_v0, %v7167_v9  ;;  %v7470_v9 = vld [vmem:[%s6783_s18 + $0x80] sm:$0xff]  ;;  %v7474_v0 = vld [vmem:[%s6783_s18 + $0x98] sm:$0xff]  ;;  %1832 = vmatpush.msra.mxu3 %v798_v4 }
 0x1b2   : > { %v7435_v30 = vpop.f32.mrf.mxu0  ;;  %10793 = vst [vmem:[#allocation52_spill] sm:$0xff] %v7474_v0  ;;  %v696_v4 = vld [vmem:[#allocation7 + $0x738] sm:$0xff] }
 0x1b3   : > { %10785 = vst [vmem:[#allocation44_spill] sm:$0xff] %v7435_v30  ;;  %v7437_v54 = vadd.f32 %v1327_v20, %v1263_v22  ;;  %v7439_v44 = vpop.f32.mrf.mxu1  ;;  %1768 = vmatpush.msra.mxu2 %v696_v4  ;;  %v7526_v4 = vld [vmem:[%s6783_s18 + $0xc8] sm:$0xff] }
 0x1b4   : > { %10787 = vst [vmem:[#allocation46_spill] sm:$0xff] %v7439_v44 }
 0x1b5   : > { %10786 = vst [vmem:[#allocation45_spill] sm:$0xff] %v7437_v54  ;;  %1524 = vmatmul.f32.gmra.mxu2 %v7442_v32  ;;  %1654 = vmatmul.f32.gmra.mxu0 %v7446_v39 }
 0x1b6   : > { %1589 = vmatmul.f32.gmra.mxu3 %v7450_v48  ;;  %1719 = vmatmul.f32.gmra.mxu1 %v7454_v11  ;;  %v619_v11 = vld [vmem:[#allocation7 + $0x4d0] sm:$0xff]  ;;  %10804 = vst [vmem:[#allocation63_spill] sm:$0xff] %v7526_v4 }
 0x1b7   : > { %1960 = vmatpush.msra.mxu1 %v619_v11  ;;  %v7466_v48 = vld [vmem:[%s6783_s18 + $0x90] sm:$0xff]  ;;  %v517_v11 = vld [vmem:[#allocation7 + $0x1a0] sm:$0xff] }
 0x1b8   : > { %v1265_v38 = vpop.f32.mrf.mxu2  ;;  %1896 = vmatpush.msra.mxu0 %v517_v11  ;;  %v792_v11 = vld [vmem:[#allocation7 + $0xa38] sm:$0xff] }
 0x1b9   : > { %v1266_v22 = vadd.f32 %v1265_v38, %v1201_v43  ;;  %v1330_v20 = vpop.f32.mrf.mxu3  ;;  %v1204_v43 = vadd.f32 %v7183_v16, %v7179_v59  ;;  %v7494_v59 = vld [vmem:[%s6783_s18 + $0xa0] sm:$0xff]  ;;  %v7498_v16 = vld [vmem:[%s6783_s18 + $0xb8] sm:$0xff]  ;;  %1833 = vmatpush.msra.mxu3 %v792_v11  ;;  %v690_v11 = vld [vmem:[#allocation7 + $0x708] sm:$0xff] }
 0x1ba   : > { %v7459_v54 = vpop.f32.mrf.mxu0  ;;  %10798 = vst [vmem:[#allocation57_spill] sm:$0xff] %v7498_v16  ;;  %1769 = vmatpush.msra.mxu2 %v690_v11  ;;  %v7550_v11 = vld [vmem:[%s6783_s18 + $0xe8] sm:$0xff] }
 0x1bb   : > { %10790 = vst [vmem:[#allocation49_spill] sm:$0xff] %v7459_v54  ;;  %v7461_v44 = vadd.f32 %v1330_v20, %v1266_v22  ;;  %v7463_v30 = vpop.f32.mrf.mxu1 }
 0x1bc   : > { %10792 = vst [vmem:[#allocation51_spill] sm:$0xff] %v7463_v30 }
 0x1bd   : > { %10791 = vst [vmem:[#allocation50_spill] sm:$0xff] %v7461_v44  ;;  %1527 = vmatmul.f32.gmra.mxu2 %v7466_v48  ;;  %1657 = vmatmul.f32.gmra.mxu0 %v7470_v9 }
 0x1be   : > { %1592 = vmatmul.f32.gmra.mxu3 %v7474_v0  ;;  %1722 = vmatmul.f32.gmra.mxu1 %v7478_v17  ;;  %v613_v17 = vld [vmem:[#allocation7 + $0x4a0] sm:$0xff]  ;;  %v7490_v0 = vld [vmem:[%s6783_s18 + $0xb0] sm:$0xff]  ;;  %10809 = vst [vmem:[#allocation68_spill] sm:$0xff] %v7550_v11 }
 0x1bf   : > { %1961 = vmatpush.msra.mxu1 %v613_v17  ;;  %v511_v17 = vld [vmem:[#allocation7 + $0x170] sm:$0xff] }
 0x1c0   : > { %v1268_v38 = vpop.f32.mrf.mxu2  ;;  %1897 = vmatpush.msra.mxu0 %v511_v17  ;;  %v786_v17 = vld [vmem:[#allocation7 + $0xa08] sm:$0xff] }
 0x1c1   : > { %v1269_v22 = vadd.f32 %v1268_v38, %v1204_v43  ;;  %v1333_v20 = vpop.f32.mrf.mxu3  ;;  %v1207_v43 = vadd.f32 %v7195_v36, %v7191_v62  ;;  %v7518_v62 = vld [vmem:[%s6783_s18 + $0xc0] sm:$0xff]  ;;  %v7522_v36 = vld [vmem:[%s6783_s18 + $0xd8] sm:$0xff]  ;;  %1834 = vmatpush.msra.mxu3 %v786_v17 }
 0x1c2   : > { %v7483_v44 = vpop.f32.mrf.mxu0  ;;  %10803 = vst [vmem:[#allocation62_spill] sm:$0xff] %v7522_v36  ;;  %v684_v17 = vld [vmem:[#allocation7 + $0x6d8] sm:$0xff] }
 0x1c3   : > { %10795 = vst [vmem:[#allocation54_spill] sm:$0xff] %v7483_v44  ;;  %v7485_v30 = vadd.f32 %v1333_v20, %v1269_v22  ;;  %v7487_v54 = vpop.f32.mrf.mxu1  ;;  %1770 = vmatpush.msra.mxu2 %v684_v17  ;;  %v774_v17 = vld [vmem:[#allocation7 + $0x9a8] sm:$0xff] }
 0x1c4   : > { %10797 = vst [vmem:[#allocation56_spill] sm:$0xff] %v7487_v54 }
 0x1c5   : > { %10796 = vst [vmem:[#allocation55_spill] sm:$0xff] %v7485_v30  ;;  %1530 = vmatmul.f32.gmra.mxu2 %v7490_v0  ;;  %1660 = vmatmul.f32.gmra.mxu0 %v7494_v59 }
 0x1c6   : > { %1595 = vmatmul.f32.gmra.mxu3 %v7498_v16  ;;  %1725 = vmatmul.f32.gmra.mxu1 %v7502_v18  ;;  %v607_v18 = vld [vmem:[#allocation7 + $0x470] sm:$0xff] }
 0x1c7   : > { %1962 = vmatpush.msra.mxu1 %v607_v18  ;;  %v7514_v16 = vld [vmem:[%s6783_s18 + $0xd0] sm:$0xff]  ;;  %v505_v18 = vld [vmem:[#allocation7 + $0x140] sm:$0xff] }
 0x1c8   : > { %v1271_v38 = vpop.f32.mrf.mxu2  ;;  %1898 = vmatpush.msra.mxu0 %v505_v18  ;;  %v780_v18 = vld [vmem:[#allocation7 + $0x9d8] sm:$0xff] }
 0x1c9   : > { %v1272_v22 = vadd.f32 %v1271_v38, %v1207_v43  ;;  %v1336_v20 = vpop.f32.mrf.mxu3  ;;  %v1210_v43 = vadd.f32 %v7207_v56, %v7203_v2  ;;  %v7542_v2 = vld [vmem:[%s6783_s18 + $0xe0] sm:$0xff]  ;;  %v7546_v56 = vld [vmem:[%s6783_s18 + $0xf8] sm:$0xff]  ;;  %1835 = vmatpush.msra.mxu3 %v780_v18 }
 0x1ca   : > { %v7507_v30 = vpop.f32.mrf.mxu0  ;;  %10808 = vst [vmem:[#allocation67_spill] sm:$0xff] %v7546_v56  ;;  %v493_v18 = vld [vmem:[#allocation7 + $0xe0] sm:$0xff] }
 0x1cb   : > { %10800 = vst [vmem:[#allocation59_spill] sm:$0xff] %v7507_v30  ;;  %v7509_v54 = vadd.f32 %v1336_v20, %v1272_v22  ;;  %v7511_v44 = vpop.f32.mrf.mxu1  ;;  %1836 = vmatpush.msra.mxu3 %v774_v17  ;;  %v487_v17 = vld [vmem:[#allocation7 + $0xb0] sm:$0xff] }
 0x1cc   : > { %10802 = vst [vmem:[#allocation61_spill] sm:$0xff] %v7511_v44 }
 0x1cd   : > { %10801 = vst [vmem:[#allocation60_spill] sm:$0xff] %v7509_v54  ;;  %1533 = vmatmul.f32.gmra.mxu2 %v7514_v16  ;;  %1663 = vmatmul.f32.gmra.mxu0 %v7518_v62 }
 0x1ce   : > { %1598 = vmatmul.f32.gmra.mxu3 %v7522_v36  ;;  %1728 = vmatmul.f32.gmra.mxu1 %v7526_v4  ;;  %v601_v4 = vld [vmem:[#allocation7 + $0x440] sm:$0xff]  ;;  %v7538_v36 = vld [vmem:[%s6783_s18 + $0xf0] sm:$0xff] }
 0x1cf   : > { %1963 = vmatpush.msra.mxu1 %v601_v4  ;;  %v499_v4 = vld [vmem:[#allocation7 + $0x110] sm:$0xff] }
 0x1d0   : > { %v1274_v38 = vpop.f32.mrf.mxu2  ;;  %1899 = vmatpush.msra.mxu0 %v499_v4 }
 0x1d1   : > { %v1275_v22 = vadd.f32 %v1274_v38, %v1210_v43  ;;  %v1339_v20 = vpop.f32.mrf.mxu3  ;;  %v1213_v43 = vadd.f32 %v7219_v10, %v7215_v25  ;;  %v7567_v25 = vld [vmem:[%s6783_s18 + $0x118] sm:$0xff]  ;;  %v678_v10 = vld [vmem:[#allocation7 + $0x6a8] sm:$0xff] }
 0x1d2   : > { %v7531_v54 = vpop.f32.mrf.mxu0  ;;  %1771 = vmatpush.msra.mxu2 %v678_v10  ;;  %1900 = vmatpush.msra.mxu0 %v493_v18  ;;  %v768_v10 = vld [vmem:[#allocation7 + $0x978] sm:$0xff]  ;;  %v1219_v18 = vadd.f32 %v7248_v28, %v7244_v15  ;;  %v666_v28 = vld [vmem:[#allocation7 + $0x648] sm:$0xff] }
 0x1d3   : > { %10805 = vst [vmem:[#allocation64_spill] sm:$0xff] %v7531_v54  ;;  %v7533_v44 = vadd.f32 %v1339_v20, %v1275_v22  ;;  %v7535_v30 = vpop.f32.mrf.mxu1  ;;  %1837 = vmatpush.msra.mxu3 %v768_v10  ;;  %v7603_v15 = vld [vmem:[%s6783_s18 + $0x158] sm:$0xff]  ;;  %v481_v10 = vld [vmem:[#allocation7 + $0x80] sm:$0xff] }
 0x1d4   : > { %10807 = vst [vmem:[#allocation66_spill] sm:$0xff] %v7535_v30  ;;  %1901 = vmatpush.msra.mxu0 %v487_v17  ;;  %v1222_v17 = vadd.f32 %v7265_v23, %v7261_v33  ;;  %v7621_v33 = vld [vmem:[%s6783_s18 + $0x178] sm:$0xff] }
 0x1d5   : > { %10806 = vst [vmem:[#allocation65_spill] sm:$0xff] %v7533_v44  ;;  %1536 = vmatmul.f32.gmra.mxu2 %v7538_v36  ;;  %1666 = vmatmul.f32.gmra.mxu0 %v7542_v2  ;;  %v660_v23 = vld [vmem:[#allocation7 + $0x618] sm:$0xff] }
 0x1d6   : > { %1601 = vmatmul.f32.gmra.mxu3 %v7546_v56  ;;  %1731 = vmatmul.f32.gmra.mxu1 %v7550_v11  ;;  %v595_v11 = vld [vmem:[#allocation7 + $0x410] sm:$0xff] }
 0x1d7   : > { %1964 = vmatpush.msra.mxu1 %v595_v11  ;;  %v7562_v56 = vld [vmem:[%s6783_s18 + $0x110] sm:$0xff]  ;;  %v1216_v11 = vadd.f32 %v7231_v63, %v7227_v42  ;;  %v7585_v42 = vld [vmem:[%s6783_s18 + $0x138] sm:$0xff]  ;;  %1902 = vmatpush.msra.mxu0 %v481_v10  ;;  %v1225_v10 = vadd.f32 %v7282_v6, %v7278_v60 }
 0x1d8   : > { %v1277_v38 = vpop.f32.mrf.mxu2  ;;  %v672_v63 = vld [vmem:[#allocation7 + $0x678] sm:$0xff]  ;;  %v751_v6 = vld [vmem:[#allocation7 + $0x8f0] sm:$0xff] }
 0x1d9   : > { %v1278_v22 = vadd.f32 %v1277_v38, %v1213_v43  ;;  %v1342_v20 = vpop.f32.mrf.mxu3  ;;  %1772 = vmatpush.msra.mxu2 %v672_v63  ;;  %v762_v63 = vld [vmem:[#allocation7 + $0x948] sm:$0xff]  ;;  %v7639_v60 = vld [vmem:[%s6783_s18 + $0x198] sm:$0xff] }
 0x1da   : > { %v7555_v44 = vpop.f32.mrf.mxu0  ;;  %1838 = vmatpush.msra.mxu3 %v762_v63  ;;  %v475_v63 = vld [vmem:[#allocation7 + $0x50] sm:$0xff] }
 0x1db   : > { %v7557_v30 = vadd.f32 %v1342_v20, %v1278_v22  ;;  %v7559_v54 = vpop.f32.mrf.mxu1  ;;  %1773 = vmatpush.msra.mxu2 %v666_v28  ;;  %v756_v28 = vld [vmem:[#allocation7 + $0x918] sm:$0xff]  ;;  %1903 = vmatpush.msra.mxu0 %v475_v63 }
 0x1dc   : > { %1839 = vmatpush.msra.mxu3 %v756_v28  ;;  %v1228_v28 = vadd.f32 %v7299_v61, %v7295_v8  ;;  %v7657_v8 = vld [vmem:[%s6783_s18 + $0x1b8] sm:$0xff]  ;;  %v745_v61 = vld [vmem:[#allocation7 + $0x8c0] sm:$0xff] }
 0x1dd   : > { %10810 = vst [vmem:[#allocation69_spill] sm:$0xff] %v7557_v30  ;;  %1539 = vmatmul.f32.gmra.mxu2 %v7562_v56  ;;  %1669 = vmatmul.f32.gmra.mxu0 %v7235_v49  ;;  %v7580_v30 = vld [vmem:[%s6783_s18 + $0x130] sm:$0xff] }
 0x1de   : > { %1604 = vmatmul.f32.gmra.mxu3 %v7567_v25  ;;  %1734 = vmatmul.f32.gmra.mxu1 %v7240_v35  ;;  %v589_v35 = vld [vmem:[#allocation7 + $0x3e0] sm:$0xff] }
 0x1df   : > { %1965 = vmatpush.msra.mxu1 %v589_v35  ;;  %1774 = vmatpush.msra.mxu2 %v660_v23  ;;  %v847_v23 = vld [vmem:[#allocation7 + $0xbf0] sm:$0xff] }
 0x1e0   : > { %v1280_v4 = vpop.f32.mrf.mxu2  ;;  %2084 = vmatpush.msrb.mxu3 %v847_v23 }
 0x1e1   : > { %v1281_v43 = vadd.f32 %v1280_v4, %v1216_v11  ;;  %v1345_v49 = vpop.f32.mrf.mxu3  ;;  %2019 = vmatpush.msrb.mxu2 %v751_v6 }
 0x1e2   : > { %v7573_v38 = vpop.f32.mrf.mxu0 }
 0x1e3   : > { %v7575_v22 = vadd.f32 %v1345_v49, %v1281_v43  ;;  %v7577_v20 = vpop.f32.mrf.mxu1  ;;  %2020 = vmatpush.msrb.mxu2 %v745_v61  ;;  %v835_v61 = vld [vmem:[#allocation7 + $0xb90] sm:$0xff] }
 0x1e5   : > { %10811 = vst [vmem:[#allocation70_spill] sm:$0xff] %v7575_v22  ;;  %1542 = vmatmul.f32.gmra.mxu2 %v7580_v30  ;;  %1672 = vmatmul.f32.gmra.mxu0 %v7252_v52  ;;  %v7598_v22 = vld [vmem:[%s6783_s18 + $0x150] sm:$0xff] }
 0x1e6   : > { %1607 = vmatmul.f32.gmra.mxu3 %v7585_v42  ;;  %1737 = vmatmul.f32.gmra.mxu1 %v7257_v34  ;;  %v583_v34 = vld [vmem:[#allocation7 + $0x3b0] sm:$0xff] }
 0x1e7   : > { %1966 = vmatpush.msra.mxu1 %v583_v34 }
 0x1e8   : > { %v1283_v11 = vpop.f32.mrf.mxu2 }
 0x1e9   : > { %v1284_v4 = vadd.f32 %v1283_v11, %v1219_v18  ;;  %v1348_v52 = vpop.f32.mrf.mxu3 }
 0x1ea   : > { %v7591_v43 = vpop.f32.mrf.mxu0 }
 0x1eb   : > { %v7593_v49 = vadd.f32 %v1348_v52, %v1284_v4  ;;  %v7595_v35 = vpop.f32.mrf.mxu1 }
 0x1ed   : > { %10812 = vst [vmem:[#allocation71_spill] sm:$0xff] %v7593_v49  ;;  %1545 = vmatmul.f32.gmra.mxu2 %v7598_v22  ;;  %1675 = vmatmul.f32.gmra.mxu0 %v7269_v21  ;;  %v7616_v49 = vld [vmem:[%s6783_s18 + $0x170] sm:$0xff] }
 0x1ee   : > { %1610 = vmatmul.f32.gmra.mxu3 %v7603_v15  ;;  %1740 = vmatmul.f32.gmra.mxu1 %v7274_v13  ;;  %v577_v13 = vld [vmem:[#allocation7 + $0x380] sm:$0xff] }
 0x1ef   : > { %1967 = vmatpush.msra.mxu1 %v577_v13 }
 0x1f0   : > { %v1286_v18 = vpop.f32.mrf.mxu2 }
 0x1f1   : > { %v1287_v11 = vadd.f32 %v1286_v18, %v1222_v17  ;;  %v1351_v21 = vpop.f32.mrf.mxu3 }
 0x1f2   : > { %v7609_v4 = vpop.f32.mrf.mxu0 }
 0x1f3   : > { %10813 = vst [vmem:[#allocation72_spill] sm:$0xff] %v7609_v4  ;;  %v7611_v52 = vadd.f32 %v1351_v21, %v1287_v11  ;;  %v7613_v34 = vpop.f32.mrf.mxu1  ;;  %v571_v21 = vld [vmem:[#allocation7 + $0x350] sm:$0xff] }
 0x1f4   : > { %10815 = vst [vmem:[#allocation74_spill] sm:$0xff] %v7613_v34  ;;  %1968 = vmatpush.msra.mxu1 %v571_v21  ;;  %v565_v34 = vld [vmem:[#allocation7 + $0x320] sm:$0xff]  ;;  %v7634_v4 = vld [vmem:[%s6783_s18 + $0x190] sm:$0xff]  ;;  %v1231_v21 = vadd.f32 %v7316_v7, %v7312_v46  ;;  %v7675_v46 = vld [vmem:[%s6783_s18 + $0x1d8] sm:$0xff] }
 0x1f5   : > { %10814 = vst [vmem:[#allocation73_spill] sm:$0xff] %v7611_v52  ;;  %1548 = vmatmul.f32.gmra.mxu2 %v7616_v49  ;;  %1678 = vmatmul.f32.gmra.mxu0 %v7286_v31  ;;  %v469_v52 = vld [vmem:[#allocation7 + $0x20] sm:$0xff]  ;;  %v739_v7 = vld [vmem:[#allocation7 + $0x890] sm:$0xff] }
 0x1f6   : > { %1613 = vmatmul.f32.gmra.mxu3 %v7621_v33  ;;  %1743 = vmatmul.f32.gmra.mxu1 %v7291_v55 }
 0x1f7   : > { %1904 = vmatpush.msra.mxu0 %v469_v52  ;;  %1969 = vmatpush.msra.mxu1 %v565_v34  ;;  %v841_v52 = vld [vmem:[#allocation7 + $0xbc0] sm:$0xff]  ;;  %v560_v34 = vld [vmem:[#allocation7 + $0x2f8] sm:$0xff] }
 0x1f8   : > { %v1289_v17 = vpop.f32.mrf.mxu2  ;;  %2085 = vmatpush.msrb.mxu3 %v841_v52  ;;  %v554_v52 = vld [vmem:[#allocation7 + $0x2c8] sm:$0xff]  ;;  %2021 = vmatpush.msrb.mxu2 %v739_v7  ;;  %v829_v7 = vld [vmem:[#allocation7 + $0xb60] sm:$0xff] }
 0x1f9   : > { %v1290_v18 = vadd.f32 %v1289_v17, %v1225_v10  ;;  %v1354_v31 = vpop.f32.mrf.mxu3  ;;  %2149 = vmatpush.msrb.mxu0 %v560_v34  ;;  %v1234_v34 = vadd.f32 %v7333_v24, %v7329_v12  ;;  %v7693_v12 = vld [vmem:[%s6783_s18 + $0x1f8] sm:$0xff]  ;;  %v733_v24 = vld [vmem:[#allocation7 + $0x860] sm:$0xff] }
 0x1fa   : > { %v7627_v11 = vpop.f32.mrf.mxu0  ;;  %2086 = vmatpush.msrb.mxu3 %v835_v61  ;;  %v548_v61 = vld [vmem:[#allocation7 + $0x298] sm:$0xff]  ;;  %2022 = vmatpush.msrb.mxu2 %v733_v24 }
 0x1fb   : > { %v7629_v13 = vadd.f32 %v1354_v31, %v1290_v18  ;;  %v7631_v55 = vpop.f32.mrf.mxu1  ;;  %2150 = vmatpush.msrb.mxu0 %v554_v52  ;;  %v1237_v52 = vadd.f32 %v7350_v45, %v7346_v47  ;;  %v727_v47 = vld [vmem:[#allocation7 + $0x830] sm:$0xff] }
 0x1fc   : > { %2087 = vmatpush.msrb.mxu3 %v829_v7  ;;  %v823_v45 = vld [vmem:[#allocation7 + $0xb30] sm:$0xff]  ;;  %v10822_v7 = vld [vmem:[#allocation24_spill] sm:$0xff]  ;;  %2023 = vmatpush.msrb.mxu2 %v727_v47 }
 0x1fd   : > { %10816 = vst [vmem:[#allocation75_spill] sm:$0xff] %v7629_v13  ;;  %1551 = vmatmul.f32.gmra.mxu2 %v7634_v4  ;;  %1681 = vmatmul.f32.gmra.mxu0 %v7303_v50  ;;  %v10821_v24 = vld [vmem:[#allocation22_spill] sm:$0xff]  ;;  %v721_v47 = vld [vmem:[#allocation7 + $0x800] sm:$0xff] }
 0x1fe   : > { %1616 = vmatmul.f32.gmra.mxu3 %v7639_v60  ;;  %1746 = vmatmul.f32.gmra.mxu1 %v7308_v41  ;;  %v7652_v41 = vld [vmem:[%s6783_s18 + $0x1b0] sm:$0xff] }
 0x1ff   : > { %2151 = vmatpush.msrb.mxu0 %v548_v61  ;;  %v1452_v61 = vadd.f32 %v10822_v7, %v10821_v24  ;;  %2088 = vmatpush.msrb.mxu3 %v823_v45  ;;  %v817_v45 = vld [vmem:[#allocation7 + $0xb00] sm:$0xff]  ;;  %v10826_v24 = vld [vmem:[#allocation25_spill] sm:$0xff] }
 0x200   : > { %v1292_v63 = vpop.f32.mrf.mxu2  ;;  %v10827_v7 = vld [vmem:[#allocation27_spill] sm:$0xff]  ;;  %2024 = vmatpush.msrb.mxu2 %v721_v47 }
 0x201   : > { %v1293_v10 = vadd.f32 %v1292_v63, %v1228_v28  ;;  %v1357_v50 = vpop.f32.mrf.mxu3  ;;  %2089 = vmatpush.msrb.mxu3 %v817_v45  ;;  %v10830_v47 = vld [vmem:[#allocation43_spill] sm:$0xff]  ;;  %v715_v45 = vld [vmem:[#allocation7 + $0x7d0] sm:$0xff] }
 0x202   : > { %v7645_v17 = vpop.f32.mrf.mxu0  ;;  %2025 = vmatpush.msrb.mxu2 %v715_v45  ;;  %v10835_v45 = vld [vmem:[#allocation48_spill] sm:$0xff] }
 0x203   : > { %v7647_v18 = vadd.f32 %v1357_v50, %v1293_v10  ;;  %v7649_v31 = vpop.f32.mrf.mxu1  ;;  %v7670_v50 = vld [vmem:[%s6783_s18 + $0x1d0] sm:$0xff] }
 0x205   : > { %10817 = vst [vmem:[#allocation76_spill] sm:$0xff] %v7647_v18  ;;  %1554 = vmatmul.f32.gmra.mxu2 %v7652_v41  ;;  %1684 = vmatmul.f32.gmra.mxu0 %v7320_v5 }
 0x206   : > { %1619 = vmatmul.f32.gmra.mxu3 %v7657_v8  ;;  %1749 = vmatmul.f32.gmra.mxu1 %v7325_v37  ;;  %v656_v37 = vld [vmem:[#allocation7 + $0x5f8] sm:$0xff] }
 0x207   : > { %2214 = vmatpush.msrb.mxu1 %v656_v37 }
 0x208   : > { %v1295_v6 = vpop.f32.mrf.mxu2 }
 0x209   : > { %v1296_v23 = vadd.f32 %v1295_v6, %v1231_v21  ;;  %v1360_v5 = vpop.f32.mrf.mxu3 }
 0x20a   : > { %v7663_v28 = vpop.f32.mrf.mxu0 }
 0x20b   : > { %v7665_v63 = vadd.f32 %v1360_v5, %v1296_v23  ;;  %v7667_v10 = vpop.f32.mrf.mxu1 }
 0x20d   : > { %10818 = vst [vmem:[#allocation77_spill] sm:$0xff] %v7665_v63  ;;  %1557 = vmatmul.f32.gmra.mxu2 %v7670_v50  ;;  %1687 = vmatmul.f32.gmra.mxu0 %v7337_v26  ;;  %v7688_v63 = vld [vmem:[%s6783_s18 + $0x1f0] sm:$0xff] }
 0x20e   : > { %1622 = vmatmul.f32.gmra.mxu3 %v7675_v46  ;;  %1752 = vmatmul.f32.gmra.mxu1 %v7342_v1  ;;  %v650_v1 = vld [vmem:[#allocation7 + $0x5c8] sm:$0xff] }
 0x20f   : > { %2215 = vmatpush.msrb.mxu1 %v650_v1 }
 0x210   : > { %v1298_v21 = vpop.f32.mrf.mxu2 }
 0x211   : > { %v1299_v6 = vadd.f32 %v1298_v21, %v1234_v34  ;;  %v1363_v26 = vpop.f32.mrf.mxu3 }
 0x212   : > { %v7681_v23 = vpop.f32.mrf.mxu0 }
 0x213   : > { %v7683_v5 = vadd.f32 %v1363_v26, %v1299_v6  ;;  %v7685_v37 = vpop.f32.mrf.mxu1 }
 0x215   : > { %10819 = vst [vmem:[#allocation78_spill] sm:$0xff] %v7683_v5  ;;  %1560 = vmatmul.f32.gmra.mxu2 %v7688_v63  ;;  %1690 = vmatmul.f32.gmra.mxu0 %v7354_v27  ;;  %v644_v5 = vld [vmem:[#allocation7 + $0x598] sm:$0xff] }
 0x216   : > { %1625 = vmatmul.f32.gmra.mxu3 %v7693_v12  ;;  %1755 = vmatmul.f32.gmra.mxu1 %v7359_v53  ;;  %v542_v53 = vld [vmem:[#allocation7 + $0x268] sm:$0xff] }
 0x217   : > { %2216 = vmatpush.msrb.mxu1 %v644_v5  ;;  %2152 = vmatpush.msrb.mxu0 %v542_v53  ;;  %v536_v53 = vld [vmem:[#allocation7 + $0x238] sm:$0xff] }
 0x218   : > { %v1301_v34 = vpop.f32.mrf.mxu2 }
 0x219   : > { %v1302_v21 = vadd.f32 %v1301_v34, %v1237_v52  ;;  %v1366_v6 = vpop.f32.mrf.mxu3  ;;  %2153 = vmatpush.msrb.mxu0 %v536_v53  ;;  %v811_v53 = vld [vmem:[#allocation7 + $0xad0] sm:$0xff] }
 0x21a   : > { %v7699_v26 = vpop.f32.mrf.mxu0  ;;  %2090 = vmatpush.msrb.mxu3 %v811_v53  ;;  %v709_v53 = vld [vmem:[#allocation7 + $0x7a0] sm:$0xff] }
 0x21b   : > { %v7701_v27 = vadd.f32 %v1366_v6, %v1302_v21  ;;  %v7703_v1 = vpop.f32.mrf.mxu1  ;;  %v10825_v6 = vld [vmem:[#allocation29_spill] sm:$0xff]  ;;  %2026 = vmatpush.msrb.mxu2 %v709_v53 }
 0x21c   : > { %v10840_v53 = vld [vmem:[#allocation53_spill] sm:$0xff] }
 0x21d   : > { %10820 = vst [vmem:[#allocation79_spill] sm:$0xff] %v7701_v27  ;;  %1775 = vmatmul.f32.vlgmr.msra.gmra.mxu2 %v7370_v14  ;;  %1905 = vmatmul.f32.vlgmr.msra.gmra.mxu0 %v7374_v29 }
 0x21e   : > { %1840 = vmatmul.f32.vlgmr.msra.gmra.mxu3 %v7378_v58  ;;  %1970 = vmatmul.f32.vlgmr.msra.gmra.mxu1 %v7382_v3  ;;  %v638_v58 = vld [vmem:[#allocation7 + $0x568] sm:$0xff] }
 0x21f   : > { %2217 = vmatpush.msrb.mxu1 %v638_v58  ;;  %v10824_v3 = vld [vmem:[#allocation28_spill] sm:$0xff] }
 0x220   : > { %v1516_v52 = vpop.f32.mrf.mxu2 }
 0x221   : > { %v1517_v34 = vadd.f32 %v1516_v52, %v1452_v61  ;;  %v1581_v5 = vpop.f32.mrf.mxu3  ;;  %v1455_v61 = vadd.f32 %v10827_v7, %v10826_v24  ;;  %v530_v24 = vld [vmem:[#allocation7 + $0x208] sm:$0xff]  ;;  %v10831_v7 = vld [vmem:[#allocation30_spill] sm:$0xff] }
 0x222   : > { %v7711_v21 = vpop.f32.mrf.mxu0  ;;  %2154 = vmatpush.msrb.mxu0 %v530_v24  ;;  %v805_v24 = vld [vmem:[#allocation7 + $0xaa0] sm:$0xff] }
 0x223   : > { %v7713_v14 = vadd.f32 %v1581_v5, %v1517_v34  ;;  %v7715_v29 = vpop.f32.mrf.mxu1  ;;  %2091 = vmatpush.msrb.mxu3 %v805_v24  ;;  %v703_v24 = vld [vmem:[#allocation7 + $0x770] sm:$0xff] }
 0x224   : > { %2027 = vmatpush.msrb.mxu2 %v703_v24  ;;  %v10845_v24 = vld [vmem:[#allocation58_spill] sm:$0xff] }
 0x225   : > { %10823 = vst [vmem:[#allocation22_spill] sm:$0xff] %v7713_v14  ;;  %1778 = vmatmul.f32.gmra.mxu2 %v7394_v40  ;;  %1908 = vmatmul.f32.gmra.mxu0 %v7398_v51  ;;  %v7969_v14 = vld [vmem:[%s6783_s18 + $0x38] sm:$0xff] }
 0x226   : > { %1843 = vmatmul.f32.gmra.mxu3 %v10824_v3  ;;  %1973 = vmatmul.f32.gmra.mxu1 %v10825_v6  ;;  %v632_v3 = vld [vmem:[#allocation7 + $0x538] sm:$0xff]  ;;  %v10829_v6 = vld [vmem:[#allocation33_spill] sm:$0xff] }
 0x227   : > { %2218 = vmatpush.msrb.mxu1 %v632_v3 }
 0x228   : > { %v1519_v52 = vpop.f32.mrf.mxu2 }
 0x229   : > { %v1520_v34 = vadd.f32 %v1519_v52, %v1455_v61  ;;  %v1584_v5 = vpop.f32.mrf.mxu3  ;;  %v10832_v61 = vld [vmem:[#allocation32_spill] sm:$0xff] }
 0x22a   : > { %v7723_v58 = vpop.f32.mrf.mxu0  ;;  %v1458_v52 = vadd.f32 %v10832_v61, %v10831_v7  ;;  %v524_v7 = vld [vmem:[#allocation7 + $0x1d8] sm:$0xff]  ;;  %v10836_v61 = vld [vmem:[#allocation44_spill] sm:$0xff] }
 0x22b   : > { %v7725_v40 = vadd.f32 %v1584_v5, %v1520_v34  ;;  %v7727_v51 = vpop.f32.mrf.mxu1  ;;  %2155 = vmatpush.msrb.mxu0 %v524_v7  ;;  %v799_v7 = vld [vmem:[#allocation7 + $0xa70] sm:$0xff] }
 0x22c   : > { %2092 = vmatpush.msrb.mxu3 %v799_v7  ;;  %v697_v7 = vld [vmem:[#allocation7 + $0x740] sm:$0xff] }
 0x22d   : > { %10828 = vst [vmem:[#allocation24_spill] sm:$0xff] %v7725_v40  ;;  %1781 = vmatmul.f32.gmra.mxu2 %v7418_v57  ;;  %1911 = vmatmul.f32.gmra.mxu0 %v7422_v19  ;;  %v566_v40 = vld [vmem:[#allocation7 + $0x328] sm:$0xff] }
 0x22e   : > { %1846 = vmatmul.f32.gmra.mxu3 %v10829_v6  ;;  %1976 = vmatmul.f32.gmra.mxu1 %v10830_v47  ;;  %v626_v6 = vld [vmem:[#allocation7 + $0x508] sm:$0xff]  ;;  %v10834_v47 = vld [vmem:[#allocation47_spill] sm:$0xff] }
 0x22f   : > { %2219 = vmatpush.msrb.mxu1 %v626_v6  ;;  %2028 = vmatpush.msrb.mxu2 %v697_v7  ;;  %v10850_v7 = vld [vmem:[#allocation63_spill] sm:$0xff] }
 0x230   : > { %v1522_v34 = vpop.f32.mrf.mxu2 }
 0x231   : > { %v1523_v5 = vadd.f32 %v1522_v34, %v1458_v52  ;;  %v1587_v3 = vpop.f32.mrf.mxu3  ;;  %v10837_v52 = vld [vmem:[#allocation46_spill] sm:$0xff] }
 0x232   : > { %v7735_v27 = vpop.f32.mrf.mxu0  ;;  %v1461_v34 = vadd.f32 %v10837_v52, %v10836_v61  ;;  %v518_v61 = vld [vmem:[#allocation7 + $0x1a8] sm:$0xff] }
 0x233   : > { %v7737_v57 = vadd.f32 %v1587_v3, %v1523_v5  ;;  %v7739_v19 = vpop.f32.mrf.mxu1  ;;  %v10841_v52 = vld [vmem:[#allocation49_spill] sm:$0xff]  ;;  %2156 = vmatpush.msrb.mxu0 %v518_v61  ;;  %v793_v61 = vld [vmem:[#allocation7 + $0xa40] sm:$0xff] }
 0x234   : > { %2093 = vmatpush.msrb.mxu3 %v793_v61  ;;  %v691_v61 = vld [vmem:[#allocation7 + $0x710] sm:$0xff] }
 0x235   : > { %10833 = vst [vmem:[#allocation28_spill] sm:$0xff] %v7737_v57  ;;  %1784 = vmatmul.f32.gmra.mxu2 %v7442_v32  ;;  %1914 = vmatmul.f32.gmra.mxu0 %v7446_v39  ;;  %v470_v57 = vld [vmem:[#allocation7 + $0x28] sm:$0xff] }
 0x236   : > { %1849 = vmatmul.f32.gmra.mxu3 %v10834_v47  ;;  %1979 = vmatmul.f32.gmra.mxu1 %v10835_v45  ;;  %v620_v47 = vld [vmem:[#allocation7 + $0x4d8] sm:$0xff]  ;;  %v10839_v45 = vld [vmem:[#allocation52_spill] sm:$0xff] }
 0x237   : > { %2220 = vmatpush.msrb.mxu1 %v620_v47  ;;  %2029 = vmatpush.msrb.mxu2 %v691_v61  ;;  %v10855_v61 = vld [vmem:[#allocation68_spill] sm:$0xff] }
 0x238   : > { %v1525_v5 = vpop.f32.mrf.mxu2 }
 0x239   : > { %v1526_v3 = vadd.f32 %v1525_v5, %v1461_v34  ;;  %v1590_v6 = vpop.f32.mrf.mxu3  ;;  %v10842_v34 = vld [vmem:[#allocation51_spill] sm:$0xff] }
 0x23a   : > { %v7747_v18 = vpop.f32.mrf.mxu0  ;;  %v1464_v5 = vadd.f32 %v10842_v34, %v10841_v52  ;;  %v512_v52 = vld [vmem:[#allocation7 + $0x178] sm:$0xff] }
 0x23b   : > { %v7749_v32 = vadd.f32 %v1590_v6, %v1526_v3  ;;  %v7751_v39 = vpop.f32.mrf.mxu1  ;;  %v10846_v34 = vld [vmem:[#allocation54_spill] sm:$0xff]  ;;  %2157 = vmatpush.msrb.mxu0 %v512_v52 }
 0x23c   : > { %v787_v52 = vld [vmem:[#allocation7 + $0xa10] sm:$0xff] }
 0x23d   : > { %10838 = vst [vmem:[#allocation29_spill] sm:$0xff] %v7749_v32  ;;  %1787 = vmatmul.f32.gmra.mxu2 %v7466_v48  ;;  %1917 = vmatmul.f32.gmra.mxu0 %v7470_v9 }
 0x23e   : > { %1852 = vmatmul.f32.gmra.mxu3 %v10839_v45  ;;  %1982 = vmatmul.f32.gmra.mxu1 %v10840_v53  ;;  %v614_v45 = vld [vmem:[#allocation7 + $0x4a8] sm:$0xff] }
 0x23f   : > { %2221 = vmatpush.msrb.mxu1 %v614_v45  ;;  %v10844_v53 = vld [vmem:[#allocation57_spill] sm:$0xff]  ;;  %2094 = vmatpush.msrb.mxu3 %v787_v52  ;;  %v685_v52 = vld [vmem:[#allocation7 + $0x6e0] sm:$0xff] }
 0x240   : > { %v1528_v3 = vpop.f32.mrf.mxu2  ;;  %2030 = vmatpush.msrb.mxu2 %v685_v52  ;;  %v7808_v52 = vld [vmem:[%s6783_s18 + $0x108] sm:$0xff] }
 0x241   : > { %v1529_v6 = vadd.f32 %v1528_v3, %v1464_v5  ;;  %v1593_v47 = vpop.f32.mrf.mxu3  ;;  %v10847_v5 = vld [vmem:[#allocation56_spill] sm:$0xff] }
 0x242   : > { %v7759_v13 = vpop.f32.mrf.mxu0  ;;  %v1467_v3 = vadd.f32 %v10847_v5, %v10846_v34  ;;  %v506_v34 = vld [vmem:[#allocation7 + $0x148] sm:$0xff]  ;;  %v10851_v5 = vld [vmem:[#allocation59_spill] sm:$0xff] }
 0x243   : > { %v7761_v48 = vadd.f32 %v1593_v47, %v1529_v6  ;;  %v7763_v9 = vpop.f32.mrf.mxu1  ;;  %2158 = vmatpush.msrb.mxu0 %v506_v34  ;;  %v781_v34 = vld [vmem:[#allocation7 + $0x9e0] sm:$0xff] }
 0x244   : > { %2095 = vmatpush.msrb.mxu3 %v781_v34  ;;  %v679_v34 = vld [vmem:[#allocation7 + $0x6b0] sm:$0xff] }
 0x245   : > { %10843 = vst [vmem:[#allocation25_spill] sm:$0xff] %v7761_v48  ;;  %1790 = vmatmul.f32.gmra.mxu2 %v7490_v0  ;;  %1920 = vmatmul.f32.gmra.mxu0 %v7494_v59 }
 0x246   : > { %1855 = vmatmul.f32.gmra.mxu3 %v10844_v53  ;;  %1985 = vmatmul.f32.gmra.mxu1 %v10845_v24  ;;  %v608_v53 = vld [vmem:[#allocation7 + $0x478] sm:$0xff] }
 0x247   : > { %2222 = vmatpush.msrb.mxu1 %v608_v53  ;;  %v10849_v24 = vld [vmem:[#allocation62_spill] sm:$0xff]  ;;  %2031 = vmatpush.msrb.mxu2 %v679_v34  ;;  %v769_v34 = vld [vmem:[#allocation7 + $0x980] sm:$0xff] }
 0x248   : > { %v1531_v6 = vpop.f32.mrf.mxu2 }
 0x249   : > { %v1532_v47 = vadd.f32 %v1531_v6, %v1467_v3  ;;  %v1596_v45 = vpop.f32.mrf.mxu3  ;;  %v10852_v3 = vld [vmem:[#allocation61_spill] sm:$0xff] }
 0x24a   : > { %v7771_v48 = vpop.f32.mrf.mxu0  ;;  %v1470_v6 = vadd.f32 %v10852_v3, %v10851_v5  ;;  %v500_v5 = vld [vmem:[#allocation7 + $0x118] sm:$0xff]  ;;  %v10856_v3 = vld [vmem:[#allocation64_spill] sm:$0xff] }
 0x24b   : > { %v7773_v0 = vadd.f32 %v1596_v45, %v1532_v47  ;;  %v7775_v59 = vpop.f32.mrf.mxu1  ;;  %2159 = vmatpush.msrb.mxu0 %v500_v5  ;;  %v775_v5 = vld [vmem:[#allocation7 + $0x9b0] sm:$0xff] }
 0x24c   : > { %2096 = vmatpush.msrb.mxu3 %v775_v5  ;;  %v488_v5 = vld [vmem:[#allocation7 + $0xb8] sm:$0xff] }
 0x24d   : > { %10848 = vst [vmem:[#allocation27_spill] sm:$0xff] %v7773_v0  ;;  %1793 = vmatmul.f32.gmra.mxu2 %v7514_v16  ;;  %1923 = vmatmul.f32.gmra.mxu0 %v7518_v62 }
 0x24e   : > { %1858 = vmatmul.f32.gmra.mxu3 %v10849_v24  ;;  %1988 = vmatmul.f32.gmra.mxu1 %v10850_v7  ;;  %v602_v24 = vld [vmem:[#allocation7 + $0x448] sm:$0xff]  ;;  %v10854_v7 = vld [vmem:[#allocation67_spill] sm:$0xff] }
 0x24f   : > { %2223 = vmatpush.msrb.mxu1 %v602_v24  ;;  %2097 = vmatpush.msrb.mxu3 %v769_v34  ;;  %v482_v34 = vld [vmem:[#allocation7 + $0x88] sm:$0xff] }
 0x250   : > { %v1534_v47 = vpop.f32.mrf.mxu2 }
 0x251   : > { %v1535_v45 = vadd.f32 %v1534_v47, %v1470_v6  ;;  %v1599_v53 = vpop.f32.mrf.mxu3  ;;  %v10857_v6 = vld [vmem:[#allocation66_spill] sm:$0xff] }
 0x252   : > { %v7783_v0 = vpop.f32.mrf.mxu0  ;;  %v1473_v47 = vadd.f32 %v10857_v6, %v10856_v3  ;;  %v494_v3 = vld [vmem:[#allocation7 + $0xe8] sm:$0xff]  ;;  %v1476_v6 = vadd.f32 %v7559_v54, %v7555_v44  ;;  %v673_v54 = vld [vmem:[#allocation7 + $0x680] sm:$0xff] }
 0x253   : > { %v7785_v16 = vadd.f32 %v1599_v53, %v1535_v45  ;;  %v7787_v62 = vpop.f32.mrf.mxu1  ;;  %2160 = vmatpush.msrb.mxu0 %v494_v3  ;;  %v7826_v44 = vld [vmem:[%s6783_s18 + $0x128] sm:$0xff]  ;;  %v1479_v3 = vadd.f32 %v7577_v20, %v7573_v38  ;;  %2032 = vmatpush.msrb.mxu2 %v673_v54  ;;  %v667_v20 = vld [vmem:[#allocation7 + $0x650] sm:$0xff] }
 0x254   : > { %v7844_v38 = vld [vmem:[%s6783_s18 + $0x148] sm:$0xff]  ;;  %v763_v54 = vld [vmem:[#allocation7 + $0x950] sm:$0xff] }
 0x255   : > { %10853 = vst [vmem:[#allocation33_spill] sm:$0xff] %v7785_v16  ;;  %1796 = vmatmul.f32.gmra.mxu2 %v7538_v36  ;;  %1926 = vmatmul.f32.gmra.mxu0 %v7542_v2  ;;  %v7803_v16 = vld [vmem:[%s6783_s18 + $0x100] sm:$0xff] }
 0x256   : > { %1861 = vmatmul.f32.gmra.mxu3 %v10854_v7  ;;  %1991 = vmatmul.f32.gmra.mxu1 %v10855_v61  ;;  %v596_v61 = vld [vmem:[#allocation7 + $0x418] sm:$0xff] }
 0x257   : > { %2224 = vmatpush.msrb.mxu1 %v596_v61  ;;  %v590_v61 = vld [vmem:[#allocation7 + $0x3e8] sm:$0xff]  ;;  %2161 = vmatpush.msrb.mxu0 %v488_v5  ;;  %v1482_v5 = vadd.f32 %v7595_v35, %v7591_v43  ;;  %v661_v35 = vld [vmem:[#allocation7 + $0x620] sm:$0xff] }
 0x258   : > { %v1537_v45 = vpop.f32.mrf.mxu2  ;;  %2033 = vmatpush.msrb.mxu2 %v667_v20  ;;  %2098 = vmatpush.msrb.mxu3 %v763_v54  ;;  %v7862_v43 = vld [vmem:[%s6783_s18 + $0x168] sm:$0xff]  ;;  %v757_v20 = vld [vmem:[#allocation7 + $0x920] sm:$0xff]  ;;  %v476_v54 = vld [vmem:[#allocation7 + $0x58] sm:$0xff] }
 0x259   : > { %v1538_v53 = vadd.f32 %v1537_v45, %v1473_v47  ;;  %v1602_v36 = vpop.f32.mrf.mxu3  ;;  %2225 = vmatpush.msrb.mxu1 %v590_v61  ;;  %v584_v61 = vld [vmem:[#allocation7 + $0x3b8] sm:$0xff]  ;;  %2162 = vmatpush.msrb.mxu0 %v482_v34  ;;  %v10862_v34 = vld [vmem:[#allocation72_spill] sm:$0xff] }
 0x25a   : > { %v7795_v24 = vpop.f32.mrf.mxu0  ;;  %2034 = vmatpush.msrb.mxu2 %v661_v35  ;;  %2099 = vmatpush.msrb.mxu3 %v757_v20  ;;  %v7880_v35 = vld [vmem:[%s6783_s18 + $0x188] sm:$0xff]  ;;  %v752_v20 = vld [vmem:[#allocation7 + $0x8f8] sm:$0xff] }
 0x25b   : > { %v7797_v2 = vadd.f32 %v1602_v36, %v1538_v53  ;;  %v7799_v7 = vpop.f32.mrf.mxu1  ;;  %2226 = vmatpush.msrb.mxu1 %v584_v61  ;;  %v578_v61 = vld [vmem:[#allocation7 + $0x388] sm:$0xff]  ;;  %2163 = vmatpush.msrb.mxu0 %v476_v54  ;;  %v848_v54 = vld [vmem:[#allocation7 + $0xbf8] sm:$0xff] }
 0x25c   : > { %2279 = vmatpush.msra.mxu2 %v752_v20  ;;  %2344 = vmatpush.msra.mxu3 %v848_v54  ;;  %v1491_v20 = vadd.f32 %v7649_v31, %v7645_v17  ;;  %v7916_v17 = vld [vmem:[%s6783_s18 + $0x1c8] sm:$0xff]  ;;  %v740_v31 = vld [vmem:[#allocation7 + $0x898] sm:$0xff] }
 0x25d   : > { %10858 = vst [vmem:[#allocation43_spill] sm:$0xff] %v7797_v2  ;;  %1799 = vmatmul.f32.gmra.mxu2 %v7562_v56  ;;  %1929 = vmatmul.f32.gmra.mxu0 %v7803_v16  ;;  %v7821_v2 = vld [vmem:[%s6783_s18 + $0x120] sm:$0xff] }
 0x25e   : > { %1864 = vmatmul.f32.gmra.mxu3 %v7567_v25  ;;  %1994 = vmatmul.f32.gmra.mxu1 %v7808_v52 }
 0x25f   : > { %2227 = vmatpush.msrb.mxu1 %v578_v61  ;;  %2164 = vmatpush.msrb.mxu0 %v470_v57  ;;  %v395_v57 = vld [vmem:[#allocation5 + $0x90] sm:$0xff] }
 0x260   : > { %v1540_v56 = vpop.f32.mrf.mxu2 }
 0x261   : > { %v1541_v47 = vadd.f32 %v1540_v56, %v1476_v6  ;;  %v1605_v45 = vpop.f32.mrf.mxu3  ;;  %2470 = vmatpush.msra.mxu0 %v395_v57 }
 0x262   : > { %v7813_v53 = vpop.f32.mrf.mxu0 }
 0x263   : > { %v7815_v25 = vadd.f32 %v1605_v45, %v1541_v47  ;;  %v7817_v36 = vpop.f32.mrf.mxu1 }
 0x265   : > { %10859 = vst [vmem:[#allocation30_spill] sm:$0xff] %v7815_v25  ;;  %1802 = vmatmul.f32.gmra.mxu2 %v7580_v30  ;;  %1932 = vmatmul.f32.gmra.mxu0 %v7821_v2  ;;  %v7839_v25 = vld [vmem:[%s6783_s18 + $0x140] sm:$0xff] }
 0x266   : > { %1867 = vmatmul.f32.gmra.mxu3 %v7585_v42  ;;  %1997 = vmatmul.f32.gmra.mxu1 %v7826_v44 }
 0x268   : > { %v1543_v30 = vpop.f32.mrf.mxu2 }
 0x269   : > { %v1544_v6 = vadd.f32 %v1543_v30, %v1479_v3  ;;  %v1608_v56 = vpop.f32.mrf.mxu3 }
 0x26a   : > { %v7831_v47 = vpop.f32.mrf.mxu0 }
 0x26b   : > { %v7833_v42 = vadd.f32 %v1608_v56, %v1544_v6  ;;  %v7835_v45 = vpop.f32.mrf.mxu1 }
 0x26d   : > { %10860 = vst [vmem:[#allocation32_spill] sm:$0xff] %v7833_v42  ;;  %1805 = vmatmul.f32.gmra.mxu2 %v7598_v22  ;;  %1935 = vmatmul.f32.gmra.mxu0 %v7839_v25  ;;  %v7857_v42 = vld [vmem:[%s6783_s18 + $0x160] sm:$0xff] }
 0x26e   : > { %1870 = vmatmul.f32.gmra.mxu3 %v7603_v15  ;;  %2000 = vmatmul.f32.gmra.mxu1 %v7844_v38 }
 0x270   : > { %v1546_v22 = vpop.f32.mrf.mxu2 }
 0x271   : > { %v1547_v3 = vadd.f32 %v1546_v22, %v1482_v5  ;;  %v1611_v30 = vpop.f32.mrf.mxu3  ;;  %v10863_v5 = vld [vmem:[#allocation74_spill] sm:$0xff] }
 0x272   : > { %v7849_v6 = vpop.f32.mrf.mxu0  ;;  %v1485_v22 = vadd.f32 %v10863_v5, %v10862_v34  ;;  %v7875_v34 = vld [vmem:[%s6783_s18 + $0x180] sm:$0xff]  ;;  %v1488_v5 = vadd.f32 %v7631_v55, %v7627_v11  ;;  %v7898_v11 = vld [vmem:[%s6783_s18 + $0x1a8] sm:$0xff] }
 0x273   : > { %v7851_v15 = vadd.f32 %v1611_v30, %v1547_v3  ;;  %v7853_v56 = vpop.f32.mrf.mxu1  ;;  %v746_v55 = vld [vmem:[#allocation7 + $0x8c8] sm:$0xff] }
 0x274   : > { %2280 = vmatpush.msra.mxu2 %v746_v55  ;;  %v836_v55 = vld [vmem:[#allocation7 + $0xb98] sm:$0xff] }
 0x275   : > { %10861 = vst [vmem:[#allocation47_spill] sm:$0xff] %v7851_v15  ;;  %1808 = vmatmul.f32.gmra.mxu2 %v7616_v49  ;;  %1938 = vmatmul.f32.gmra.mxu0 %v7857_v42 }
 0x276   : > { %1873 = vmatmul.f32.gmra.mxu3 %v7621_v33  ;;  %2003 = vmatmul.f32.gmra.mxu1 %v7862_v43  ;;  %v572_v33 = vld [vmem:[#allocation7 + $0x358] sm:$0xff] }
 0x277   : > { %2228 = vmatpush.msrb.mxu1 %v572_v33  ;;  %v7893_v33 = vld [vmem:[%s6783_s18 + $0x1a0] sm:$0xff]  ;;  %2281 = vmatpush.msra.mxu2 %v740_v31  ;;  %v1497_v31 = vadd.f32 %v7685_v37, %v7681_v23  ;;  %v6346_v23 = vld [vmem:[%s6783_s18 + $0x8] sm:$0xff]  ;;  %v728_v37 = vld [vmem:[#allocation7 + $0x838] sm:$0xff] }
 0x278   : > { %v1549_v49 = vpop.f32.mrf.mxu2 }
 0x279   : > { %v1550_v3 = vadd.f32 %v1549_v49, %v1485_v22  ;;  %v1614_v30 = vpop.f32.mrf.mxu3  ;;  %2229 = vmatpush.msrb.mxu1 %v566_v40  ;;  %v842_v40 = vld [vmem:[#allocation7 + $0xbc8] sm:$0xff] }
 0x27a   : > { %v7867_v61 = vpop.f32.mrf.mxu0  ;;  %2345 = vmatpush.msra.mxu3 %v842_v40  ;;  %v1494_v40 = vadd.f32 %v7667_v10, %v7663_v28  ;;  %v7934_v28 = vld [vmem:[%s6783_s18 + $0x1e8] sm:$0xff] }
 0x27b   : > { %v7869_v15 = vadd.f32 %v1614_v30, %v1550_v3  ;;  %v7871_v32 = vpop.f32.mrf.mxu1  ;;  %v734_v10 = vld [vmem:[#allocation7 + $0x868] sm:$0xff] }
 0x27c   : > { %2346 = vmatpush.msra.mxu3 %v836_v55  ;;  %2282 = vmatpush.msra.mxu2 %v734_v10  ;;  %v824_v10 = vld [vmem:[#allocation7 + $0xb38] sm:$0xff] }
 0x27d   : > { %10864 = vst [vmem:[#allocation48_spill] sm:$0xff] %v7869_v15  ;;  %1811 = vmatmul.f32.gmra.mxu2 %v7634_v4  ;;  %1941 = vmatmul.f32.gmra.mxu0 %v7875_v34  ;;  %v7964_v15 = vld [vmem:[%s6783_s18 + $0x30] sm:$0xff] }
 0x27e   : > { %1876 = vmatmul.f32.gmra.mxu3 %v7639_v60  ;;  %2006 = vmatmul.f32.gmra.mxu1 %v7880_v35 }
 0x27f   : > { %2283 = vmatpush.msra.mxu2 %v728_v37  ;;  %v818_v37 = vld [vmem:[#allocation7 + $0xb08] sm:$0xff] }
 0x280   : > { %v1552_v4 = vpop.f32.mrf.mxu2 }
 0x281   : > { %v1553_v22 = vadd.f32 %v1552_v4, %v1488_v5  ;;  %v1617_v49 = vpop.f32.mrf.mxu3 }
 0x282   : > { %v7885_v3 = vpop.f32.mrf.mxu0 }
 0x283   : > { %v7887_v60 = vadd.f32 %v1617_v49, %v1553_v22  ;;  %v7889_v30 = vpop.f32.mrf.mxu1  ;;  %v396_v49 = vld [vmem:[#allocation5 + $0x98] sm:$0xff] }
 0x284   : > { %2535 = vmatpush.msra.mxu1 %v396_v49  ;;  %v830_v49 = vld [vmem:[#allocation7 + $0xb68] sm:$0xff] }
 0x285   : > { %10865 = vst [vmem:[#allocation44_spill] sm:$0xff] %v7887_v60  ;;  %1814 = vmatmul.f32.gmra.mxu2 %v7652_v41  ;;  %1944 = vmatmul.f32.gmra.mxu0 %v7893_v33  ;;  %v7911_v60 = vld [vmem:[%s6783_s18 + $0x1c0] sm:$0xff] }
 0x286   : > { %1879 = vmatmul.f32.gmra.mxu3 %v7657_v8  ;;  %2009 = vmatmul.f32.gmra.mxu1 %v7898_v11 }
 0x287   : > { %2347 = vmatpush.msra.mxu3 %v830_v49  ;;  %v1712_v49 = vadd.f32 %v7703_v1, %v7699_v26  ;;  %v6350_v26 = vld [vmem:[%s6783_s18 + $0x28] sm:$0xff] }
 0x288   : > { %v1555_v41 = vpop.f32.mrf.mxu2  ;;  %v722_v1 = vld [vmem:[#allocation7 + $0x808] sm:$0xff] }
 0x289   : > { %v1556_v54 = vadd.f32 %v1555_v41, %v1491_v20  ;;  %v1620_v5 = vpop.f32.mrf.mxu3  ;;  %2348 = vmatpush.msra.mxu3 %v824_v10  ;;  %v389_v10 = vld [vmem:[#allocation5 + $0x60] sm:$0xff]  ;;  %2284 = vmatpush.msra.mxu2 %v722_v1  ;;  %v6354_v1 = vld [vmem:[%s6783_s18 + $0x48] sm:$0xff] }
 0x28a   : > { %v7903_v4 = vpop.f32.mrf.mxu0  ;;  %2471 = vmatpush.msra.mxu0 %v389_v10  ;;  %v812_v10 = vld [vmem:[#allocation7 + $0xad8] sm:$0xff] }
 0x28b   : > { %v7905_v8 = vadd.f32 %v1620_v5, %v1556_v54  ;;  %v7907_v22 = vpop.f32.mrf.mxu1  ;;  %v7929_v5 = vld [vmem:[%s6783_s18 + $0x1e0] sm:$0xff]  ;;  %2349 = vmatpush.msra.mxu3 %v818_v37  ;;  %v716_v37 = vld [vmem:[#allocation7 + $0x7d8] sm:$0xff] }
 0x28c   : > { %2285 = vmatpush.msra.mxu2 %v716_v37  ;;  %v806_v37 = vld [vmem:[#allocation7 + $0xaa8] sm:$0xff] }
 0x28d   : > { %10866 = vst [vmem:[#allocation46_spill] sm:$0xff] %v7905_v8  ;;  %1817 = vmatmul.f32.gmra.mxu2 %v7670_v50  ;;  %1947 = vmatmul.f32.gmra.mxu0 %v7911_v60  ;;  %v7951_v8 = vld [vmem:[%s6783_s18 + $0x18] sm:$0xff] }
 0x28e   : > { %1882 = vmatmul.f32.gmra.mxu3 %v7675_v46  ;;  %2012 = vmatmul.f32.gmra.mxu1 %v7916_v17 }
 0x28f   : > { %2350 = vmatpush.msra.mxu3 %v812_v10  ;;  %v1721_v10 = vadd.f32 %v7739_v19, %v7735_v27  ;;  %v6362_v27 = vld [vmem:[%s6783_s18 + $0x88] sm:$0xff]  ;;  %v704_v19 = vld [vmem:[#allocation7 + $0x778] sm:$0xff] }
 0x290   : > { %v1558_v50 = vpop.f32.mrf.mxu2 }
 0x291   : > { %v1559_v57 = vadd.f32 %v1558_v50, %v1494_v40  ;;  %v1623_v20 = vpop.f32.mrf.mxu3  ;;  %2351 = vmatpush.msra.mxu3 %v806_v37  ;;  %v1724_v37 = vadd.f32 %v7751_v39, %v7747_v18  ;;  %v6366_v18 = vld [vmem:[%s6783_s18 + $0xa8] sm:$0xff] }
 0x292   : > { %v7921_v41 = vpop.f32.mrf.mxu0  ;;  %v698_v39 = vld [vmem:[#allocation7 + $0x748] sm:$0xff] }
 0x293   : > { %v7923_v54 = vadd.f32 %v1623_v20, %v1559_v57  ;;  %v7925_v46 = vpop.f32.mrf.mxu1  ;;  %v7946_v20 = vld [vmem:[%s6783_s18 + $0x10] sm:$0xff] }
 0x295   : > { %10867 = vst [vmem:[#allocation52_spill] sm:$0xff] %v7923_v54  ;;  %1820 = vmatmul.f32.gmra.mxu2 %v7688_v63  ;;  %1950 = vmatmul.f32.gmra.mxu0 %v7929_v5  ;;  %v6344_v54 = vld [vmem:[%s6783_s18] sm:$0xff] }
 0x296   : > { %1885 = vmatmul.f32.gmra.mxu3 %v7693_v12  ;;  %2015 = vmatmul.f32.gmra.mxu1 %v7934_v28 }
 0x298   : > { %v1561_v63 = vpop.f32.mrf.mxu2 }
 0x299   : > { %v1562_v55 = vadd.f32 %v1561_v63, %v1497_v31  ;;  %v1626_v40 = vpop.f32.mrf.mxu3 }
 0x29a   : > { %v7939_v50 = vpop.f32.mrf.mxu0 }
 0x29b   : > { %v7941_v12 = vadd.f32 %v1626_v40, %v1562_v55  ;;  %v7943_v57 = vpop.f32.mrf.mxu1 }
 0x29d   : > { %10868 = vst [vmem:[#allocation53_spill] sm:$0xff] %v7941_v12  ;;  %2035 = vmatmul.f32.vlgmr.msrb.gmra.mxu2 %v7946_v20  ;;  %2165 = vmatmul.f32.vlgmr.msrb.gmra.mxu0 %v6344_v54 }
 0x29e   : > { %2100 = vmatmul.f32.vlgmr.msrb.gmra.mxu3 %v7951_v8  ;;  %2230 = vmatmul.f32.vlgmr.msrb.gmra.mxu1 %v6346_v23  ;;  %v6348_v23 = vld [vmem:[%s6783_s18 + $0x20] sm:$0xff] }
 0x2a0   : > { %v1776_v31 = vpop.f32.mrf.mxu2 }
 0x2a1   : > { %v1777_v63 = vadd.f32 %v1776_v31, %v1712_v49  ;;  %v1841_v54 = vpop.f32.mrf.mxu3  ;;  %v1715_v49 = vadd.f32 %v7715_v29, %v7711_v21  ;;  %v6352_v21 = vld [vmem:[%s6783_s18 + $0x40] sm:$0xff]  ;;  %v7987_v29 = vld [vmem:[%s6783_s18 + $0x58] sm:$0xff] }
 0x2a2   : > { %v7957_v55 = vpop.f32.mrf.mxu0 }
 0x2a3   : > { %10869 = vst [vmem:[#allocation49_spill] sm:$0xff] %v7957_v55  ;;  %v7959_v40 = vadd.f32 %v1841_v54, %v1777_v63  ;;  %v7961_v12 = vpop.f32.mrf.mxu1  ;;  %v7982_v55 = vld [vmem:[%s6783_s18 + $0x50] sm:$0xff] }
 0x2a4   : > { %10871 = vst [vmem:[#allocation57_spill] sm:$0xff] %v7961_v12  ;;  %v390_v12 = vld [vmem:[#allocation5 + $0x68] sm:$0xff] }
 0x2a5   : > { %10870 = vst [vmem:[#allocation51_spill] sm:$0xff] %v7959_v40  ;;  %2038 = vmatmul.f32.gmra.mxu2 %v7964_v15  ;;  %2168 = vmatmul.f32.gmra.mxu0 %v6348_v23 }
 0x2a6   : > { %2103 = vmatmul.f32.gmra.mxu3 %v7969_v14  ;;  %2233 = vmatmul.f32.gmra.mxu1 %v6350_v26 }
 0x2a7   : > { %2536 = vmatpush.msra.mxu1 %v390_v12  ;;  %v1718_v12 = vadd.f32 %v7727_v51, %v7723_v58  ;;  %v6358_v58 = vld [vmem:[%s6783_s18 + $0x68] sm:$0xff] }
 0x2a8   : > { %v1779_v31 = vpop.f32.mrf.mxu2  ;;  %v710_v51 = vld [vmem:[#allocation7 + $0x7a8] sm:$0xff] }
 0x2a9   : > { %v1780_v63 = vadd.f32 %v1779_v31, %v1715_v49  ;;  %v1844_v54 = vpop.f32.mrf.mxu3  ;;  %2286 = vmatpush.msra.mxu2 %v710_v51  ;;  %v800_v51 = vld [vmem:[#allocation7 + $0xa78] sm:$0xff] }
 0x2aa   : > { %v7975_v23 = vpop.f32.mrf.mxu0  ;;  %2352 = vmatpush.msra.mxu3 %v800_v51  ;;  %v383_v51 = vld [vmem:[#allocation5 + $0x30] sm:$0xff] }
 0x2ab   : > { %10872 = vst [vmem:[#allocation58_spill] sm:$0xff] %v7975_v23  ;;  %v7977_v40 = vadd.f32 %v1844_v54, %v1780_v63  ;;  %v7979_v26 = vpop.f32.mrf.mxu1  ;;  %v8005_v23 = vld [vmem:[%s6783_s18 + $0x78] sm:$0xff]  ;;  %2287 = vmatpush.msra.mxu2 %v704_v19  ;;  %v794_v19 = vld [vmem:[#allocation7 + $0xa48] sm:$0xff]  ;;  %2472 = vmatpush.msra.mxu0 %v383_v51 }
 0x2ac   : > { %10874 = vst [vmem:[#allocation56_spill] sm:$0xff] %v7979_v26  ;;  %v8000_v26 = vld [vmem:[%s6783_s18 + $0x70] sm:$0xff]  ;;  %2353 = vmatpush.msra.mxu3 %v794_v19  ;;  %v692_v19 = vld [vmem:[#allocation7 + $0x718] sm:$0xff] }
 0x2ad   : > { %10873 = vst [vmem:[#allocation54_spill] sm:$0xff] %v7977_v40  ;;  %2041 = vmatmul.f32.gmra.mxu2 %v7982_v55  ;;  %2171 = vmatmul.f32.gmra.mxu0 %v6352_v21  ;;  %v788_v51 = vld [vmem:[#allocation7 + $0xa18] sm:$0xff] }
 0x2ae   : > { %2106 = vmatmul.f32.gmra.mxu3 %v7987_v29  ;;  %2236 = vmatmul.f32.gmra.mxu1 %v6354_v1  ;;  %v6356_v1 = vld [vmem:[%s6783_s18 + $0x60] sm:$0xff] }
 0x2af   : > { %2288 = vmatpush.msra.mxu2 %v698_v39  ;;  %v6370_v39 = vld [vmem:[%s6783_s18 + $0xc8] sm:$0xff]  ;;  %2354 = vmatpush.msra.mxu3 %v788_v51  ;;  %v1733_v51 = vadd.f32 %v7787_v62, %v7783_v0  ;;  %v680_v0 = vld [vmem:[#allocation7 + $0x6b8] sm:$0xff] }
 0x2b0   : > { %v1782_v49 = vpop.f32.mrf.mxu2  ;;  %v776_v62 = vld [vmem:[#allocation7 + $0x9b8] sm:$0xff] }
 0x2b1   : > { %v1783_v31 = vadd.f32 %v1782_v49, %v1718_v12  ;;  %v1847_v63 = vpop.f32.mrf.mxu3  ;;  %2289 = vmatpush.msra.mxu2 %v692_v19  ;;  %v782_v19 = vld [vmem:[#allocation7 + $0x9e8] sm:$0xff] }
 0x2b2   : > { %v7993_v54 = vpop.f32.mrf.mxu0  ;;  %2355 = vmatpush.msra.mxu3 %v782_v19 }
 0x2b3   : > { %10875 = vst [vmem:[#allocation62_spill] sm:$0xff] %v7993_v54  ;;  %v7995_v21 = vadd.f32 %v1847_v63, %v1783_v31  ;;  %v7997_v40 = vpop.f32.mrf.mxu1  ;;  %v8023_v54 = vld [vmem:[%s6783_s18 + $0x98] sm:$0xff] }
 0x2b4   : > { %10877 = vst [vmem:[#allocation59_spill] sm:$0xff] %v7997_v40  ;;  %v8018_v40 = vld [vmem:[%s6783_s18 + $0x90] sm:$0xff]  ;;  %2356 = vmatpush.msra.mxu3 %v776_v62  ;;  %v1739_v62 = vadd.f32 %v7817_v36, %v7813_v53  ;;  %v8131_v53 = vld [vmem:[%s6783_s18 + $0x158] sm:$0xff] }
 0x2b5   : > { %10876 = vst [vmem:[#allocation63_spill] sm:$0xff] %v7995_v21  ;;  %2044 = vmatmul.f32.gmra.mxu2 %v8000_v26  ;;  %2174 = vmatmul.f32.gmra.mxu0 %v6356_v1  ;;  %v668_v36 = vld [vmem:[#allocation7 + $0x658] sm:$0xff] }
 0x2b6   : > { %2109 = vmatmul.f32.gmra.mxu3 %v8005_v23  ;;  %2239 = vmatmul.f32.gmra.mxu1 %v6358_v58  ;;  %v6360_v58 = vld [vmem:[%s6783_s18 + $0x80] sm:$0xff] }
 0x2b8   : > { %v1785_v12 = vpop.f32.mrf.mxu2 }
 0x2b9   : > { %v1786_v49 = vadd.f32 %v1785_v12, %v1721_v10  ;;  %v1850_v31 = vpop.f32.mrf.mxu3 }
 0x2ba   : > { %v8011_v63 = vpop.f32.mrf.mxu0 }
 0x2bb   : > { %10878 = vst [vmem:[#allocation61_spill] sm:$0xff] %v8011_v63  ;;  %v8013_v1 = vadd.f32 %v1850_v31, %v1786_v49  ;;  %v8015_v21 = vpop.f32.mrf.mxu1  ;;  %v8041_v63 = vld [vmem:[%s6783_s18 + $0xb8] sm:$0xff] }
 0x2bc   : > { %10880 = vst [vmem:[#allocation68_spill] sm:$0xff] %v8015_v21  ;;  %v8036_v21 = vld [vmem:[%s6783_s18 + $0xb0] sm:$0xff] }
 0x2bd   : > { %10879 = vst [vmem:[#allocation67_spill] sm:$0xff] %v8013_v1  ;;  %2047 = vmatmul.f32.gmra.mxu2 %v8018_v40  ;;  %2177 = vmatmul.f32.gmra.mxu0 %v6360_v58 }
 0x2be   : > { %2112 = vmatmul.f32.gmra.mxu3 %v8023_v54  ;;  %2242 = vmatmul.f32.gmra.mxu1 %v6362_v27  ;;  %v6364_v27 = vld [vmem:[%s6783_s18 + $0xa0] sm:$0xff] }
 0x2c0   : > { %v1788_v10 = vpop.f32.mrf.mxu2 }
 0x2c1   : > { %v1789_v12 = vadd.f32 %v1788_v10, %v1724_v37  ;;  %v1853_v49 = vpop.f32.mrf.mxu3  ;;  %v1727_v37 = vadd.f32 %v7763_v9, %v7759_v13  ;;  %v6368_v13 = vld [vmem:[%s6783_s18 + $0xc0] sm:$0xff]  ;;  %v8059_v9 = vld [vmem:[%s6783_s18 + $0xd8] sm:$0xff] }
 0x2c2   : > { %v8029_v31 = vpop.f32.mrf.mxu0 }
 0x2c3   : > { %10881 = vst [vmem:[#allocation64_spill] sm:$0xff] %v8029_v31  ;;  %v8031_v58 = vadd.f32 %v1853_v49, %v1789_v12  ;;  %v8033_v1 = vpop.f32.mrf.mxu1  ;;  %v8054_v31 = vld [vmem:[%s6783_s18 + $0xd0] sm:$0xff] }
 0x2c4   : > { %10883 = vst [vmem:[#allocation72_spill] sm:$0xff] %v8033_v1  ;;  %v384_v1 = vld [vmem:[#allocation5 + $0x38] sm:$0xff] }
 0x2c5   : > { %10882 = vst [vmem:[#allocation66_spill] sm:$0xff] %v8031_v58  ;;  %2050 = vmatmul.f32.gmra.mxu2 %v8036_v21  ;;  %2180 = vmatmul.f32.gmra.mxu0 %v6364_v27 }
 0x2c6   : > { %2115 = vmatmul.f32.gmra.mxu3 %v8041_v63  ;;  %2245 = vmatmul.f32.gmra.mxu1 %v6366_v18 }
 0x2c7   : > { %2537 = vmatpush.msra.mxu1 %v384_v1  ;;  %v1730_v1 = vadd.f32 %v7775_v59, %v7771_v48  ;;  %v6374_v48 = vld [vmem:[%s6783_s18 + $0xe8] sm:$0xff] }
 0x2c8   : > { %v1791_v10 = vpop.f32.mrf.mxu2  ;;  %v686_v59 = vld [vmem:[#allocation7 + $0x6e8] sm:$0xff] }
 0x2c9   : > { %v1792_v12 = vadd.f32 %v1791_v10, %v1727_v37  ;;  %v1856_v49 = vpop.f32.mrf.mxu3  ;;  %2290 = vmatpush.msra.mxu2 %v686_v59  ;;  %v1736_v59 = vadd.f32 %v7799_v7, %v7795_v24  ;;  %v674_v24 = vld [vmem:[#allocation7 + $0x688] sm:$0xff] }
 0x2ca   : > { %v8047_v27 = vpop.f32.mrf.mxu0  ;;  %v770_v7 = vld [vmem:[#allocation7 + $0x988] sm:$0xff] }
 0x2cb   : > { %10884 = vst [vmem:[#allocation74_spill] sm:$0xff] %v8047_v27  ;;  %v8049_v58 = vadd.f32 %v1856_v49, %v1792_v12  ;;  %v8051_v18 = vpop.f32.mrf.mxu1  ;;  %v8077_v27 = vld [vmem:[%s6783_s18 + $0xf8] sm:$0xff]  ;;  %2291 = vmatpush.msra.mxu2 %v680_v0  ;;  %v377_v0 = vld [vmem:[#allocation5] sm:$0xff]  ;;  %2357 = vmatpush.msra.mxu3 %v770_v7  ;;  %v1742_v7 = vadd.f32 %v7835_v45, %v7831_v47  ;;  %v662_v47 = vld [vmem:[#allocation7 + $0x628] sm:$0xff] }
 0x2cc   : > { %10886 = vst [vmem:[#allocation81_spill] sm:$0xff] %v8051_v18  ;;  %v8072_v18 = vld [vmem:[%s6783_s18 + $0xf0] sm:$0xff]  ;;  %2473 = vmatpush.msra.mxu0 %v377_v0  ;;  %v758_v45 = vld [vmem:[#allocation7 + $0x928] sm:$0xff] }
 0x2cd   : > { %10885 = vst [vmem:[#allocation80_spill] sm:$0xff] %v8049_v58  ;;  %2053 = vmatmul.f32.gmra.mxu2 %v8054_v31  ;;  %2183 = vmatmul.f32.gmra.mxu0 %v6368_v13 }
 0x2ce   : > { %2118 = vmatmul.f32.gmra.mxu3 %v8059_v9  ;;  %2248 = vmatmul.f32.gmra.mxu1 %v6370_v39  ;;  %v6372_v39 = vld [vmem:[%s6783_s18 + $0xe0] sm:$0xff] }
 0x2cf   : > { %2292 = vmatpush.msra.mxu2 %v674_v24  ;;  %v764_v24 = vld [vmem:[#allocation7 + $0x958] sm:$0xff] }
 0x2d0   : > { %v1794_v37 = vpop.f32.mrf.mxu2  ;;  %2358 = vmatpush.msra.mxu3 %v764_v24 }
 0x2d1   : > { %v1795_v10 = vadd.f32 %v1794_v37, %v1730_v1  ;;  %v1859_v12 = vpop.f32.mrf.mxu3  ;;  %2293 = vmatpush.msra.mxu2 %v668_v36  ;;  %v1745_v36 = vadd.f32 %v7853_v56, %v7849_v6  ;;  %v397_v6 = vld [vmem:[#allocation5 + $0xa0] sm:$0xff]  ;;  %v398_v56 = vld [vmem:[#allocation5 + $0xa8] sm:$0xff] }
 0x2d2   : > { %v8065_v49 = vpop.f32.mrf.mxu0  ;;  %2359 = vmatpush.msra.mxu3 %v758_v45 }
 0x2d3   : > { %v8067_v13 = vadd.f32 %v1859_v12, %v1795_v10  ;;  %v8069_v58 = vpop.f32.mrf.mxu1  ;;  %2294 = vmatpush.msra.mxu2 %v662_v47  ;;  %v1748_v47 = vadd.f32 %v7871_v32, %v7867_v61  ;;  %v399_v32 = vld [vmem:[#allocation5 + $0xb0] sm:$0xff]  ;;  %v1751_v61 = vadd.f32 %v7889_v30, %v7885_v3  ;;  %v8204_v3 = vld [vmem:[%s6783_s18 + $0x1d8] sm:$0xff]  ;;  %v1754_v30 = vadd.f32 %v7907_v22, %v7903_v4 }
 0x2d4   : > { %10888 = vst [vmem:[#allocation83_spill] sm:$0xff] %v8069_v58  ;;  %v8090_v58 = vld [vmem:[%s6783_s18 + $0x110] sm:$0xff]  ;;  %2665 = vmatpush.msrb.mxu3 %v398_v56  ;;  %2730 = vmatpush.msrb.mxu0 %v399_v32  ;;  %v1757_v4 = vadd.f32 %v7925_v46, %v7921_v41  ;;  %v392_v46 = vld [vmem:[#allocation5 + $0x78] sm:$0xff] }
 0x2d5   : > { %10887 = vst [vmem:[#allocation82_spill] sm:$0xff] %v8067_v13  ;;  %2056 = vmatmul.f32.gmra.mxu2 %v8072_v18  ;;  %2186 = vmatmul.f32.gmra.mxu0 %v6372_v39  ;;  %v391_v41 = vld [vmem:[#allocation5 + $0x70] sm:$0xff] }
 0x2d6   : > { %2121 = vmatmul.f32.gmra.mxu3 %v8077_v27  ;;  %2251 = vmatmul.f32.gmra.mxu1 %v6374_v48  ;;  %v8095_v48 = vld [vmem:[%s6783_s18 + $0x118] sm:$0xff] }
 0x2d7   : > { %2600 = vmatpush.msrb.mxu2 %v397_v6  ;;  %2666 = vmatpush.msrb.mxu3 %v392_v46 }
 0x2d8   : > { %v1797_v1 = vpop.f32.mrf.mxu2 }
 0x2d9   : > { %v1798_v37 = vadd.f32 %v1797_v1, %v1733_v51  ;;  %v1862_v10 = vpop.f32.mrf.mxu3  ;;  %2601 = vmatpush.msrb.mxu2 %v391_v41  ;;  %v10901_v41 = vld [vmem:[#allocation57_spill] sm:$0xff] }
 0x2da   : > { %v8083_v12 = vpop.f32.mrf.mxu0 }
 0x2db   : > { %v8085_v39 = vadd.f32 %v1862_v10, %v1798_v37  ;;  %v8087_v13 = vpop.f32.mrf.mxu1 }
 0x2dd   : > { %10889 = vst [vmem:[#allocation84_spill] sm:$0xff] %v8085_v39  ;;  %2059 = vmatmul.f32.gmra.mxu2 %v8090_v58  ;;  %2189 = vmatmul.f32.gmra.mxu0 %v7803_v16  ;;  %v8108_v39 = vld [vmem:[%s6783_s18 + $0x130] sm:$0xff] }
 0x2de   : > { %2124 = vmatmul.f32.gmra.mxu3 %v8095_v48  ;;  %2254 = vmatmul.f32.gmra.mxu1 %v7808_v52  ;;  %v8113_v52 = vld [vmem:[%s6783_s18 + $0x138] sm:$0xff] }
 0x2e0   : > { %v1800_v19 = vpop.f32.mrf.mxu2 }
 0x2e1   : > { %v1801_v51 = vadd.f32 %v1800_v19, %v1736_v59  ;;  %v1865_v1 = vpop.f32.mrf.mxu3 }
 0x2e2   : > { %v8101_v37 = vpop.f32.mrf.mxu0 }
 0x2e3   : > { %v8103_v16 = vadd.f32 %v1865_v1, %v1801_v51  ;;  %v8105_v10 = vpop.f32.mrf.mxu1 }
 0x2e4   : > { %10891 = vst [vmem:[#allocation86_spill] sm:$0xff] %v8105_v10  ;;  %v8126_v10 = vld [vmem:[%s6783_s18 + $0x150] sm:$0xff] }
 0x2e5   : > { %10890 = vst [vmem:[#allocation85_spill] sm:$0xff] %v8103_v16  ;;  %2062 = vmatmul.f32.gmra.mxu2 %v8108_v39  ;;  %2192 = vmatmul.f32.gmra.mxu0 %v7821_v2 }
 0x2e6   : > { %2127 = vmatmul.f32.gmra.mxu3 %v8113_v52  ;;  %2257 = vmatmul.f32.gmra.mxu1 %v7826_v44  ;;  %v378_v44 = vld [vmem:[#allocation5 + $0x8] sm:$0xff] }
 0x2e7   : > { %2538 = vmatpush.msra.mxu1 %v378_v44  ;;  %v8144_v44 = vld [vmem:[%s6783_s18 + $0x170] sm:$0xff] }
 0x2e8   : > { %v1803_v59 = vpop.f32.mrf.mxu2 }
 0x2e9   : > { %v1804_v19 = vadd.f32 %v1803_v59, %v1739_v62  ;;  %v1868_v2 = vpop.f32.mrf.mxu3 }
 0x2ea   : > { %v8119_v51 = vpop.f32.mrf.mxu0 }
 0x2eb   : > { %v8121_v1 = vadd.f32 %v1868_v2, %v1804_v19  ;;  %v8123_v16 = vpop.f32.mrf.mxu1 }
 0x2ed   : > { %10892 = vst [vmem:[#allocation87_spill] sm:$0xff] %v8121_v1  ;;  %2065 = vmatmul.f32.gmra.mxu2 %v8126_v10  ;;  %2195 = vmatmul.f32.gmra.mxu0 %v7839_v25  ;;  %v8321_v1 = vld [vmem:[%s8231_s12 + $0x28] sm:$0xff] }
 0x2ee   : > { %2130 = vmatmul.f32.gmra.mxu3 %v8131_v53  ;;  %2260 = vmatmul.f32.gmra.mxu1 %v7844_v38  ;;  %v8149_v38 = vld [vmem:[%s6783_s18 + $0x178] sm:$0xff] }
 0x2f0   : > { %v1806_v0 = vpop.f32.mrf.mxu2 }
 0x2f1   : > { %v1807_v62 = vadd.f32 %v1806_v0, %v1742_v7  ;;  %v1871_v59 = vpop.f32.mrf.mxu3 }
 0x2f2   : > { %v8137_v19 = vpop.f32.mrf.mxu0 }
 0x2f3   : > { %v8139_v25 = vadd.f32 %v1871_v59, %v1807_v62  ;;  %v8141_v2 = vpop.f32.mrf.mxu1 }
 0x2f5   : > { %10893 = vst [vmem:[#allocation88_spill] sm:$0xff] %v8139_v25  ;;  %2068 = vmatmul.f32.gmra.mxu2 %v8144_v44  ;;  %2198 = vmatmul.f32.gmra.mxu0 %v7857_v42  ;;  %v8162_v25 = vld [vmem:[%s6783_s18 + $0x190] sm:$0xff] }
 0x2f6   : > { %2133 = vmatmul.f32.gmra.mxu3 %v8149_v38  ;;  %2263 = vmatmul.f32.gmra.mxu1 %v7862_v43  ;;  %v8167_v43 = vld [vmem:[%s6783_s18 + $0x198] sm:$0xff] }
 0x2f8   : > { %v1809_v24 = vpop.f32.mrf.mxu2 }
 0x2f9   : > { %v1810_v7 = vadd.f32 %v1809_v24, %v1745_v36  ;;  %v1874_v0 = vpop.f32.mrf.mxu3 }
 0x2fa   : > { %v8155_v62 = vpop.f32.mrf.mxu0 }
 0x2fb   : > { %v8157_v42 = vadd.f32 %v1874_v0, %v1810_v7  ;;  %v8159_v59 = vpop.f32.mrf.mxu1 }
 0x2fd   : > { %10894 = vst [vmem:[#allocation89_spill] sm:$0xff] %v8157_v42  ;;  %2071 = vmatmul.f32.gmra.mxu2 %v8162_v25  ;;  %2201 = vmatmul.f32.gmra.mxu0 %v7875_v34  ;;  %v8180_v42 = vld [vmem:[%s6783_s18 + $0x1b0] sm:$0xff] }
 0x2fe   : > { %2136 = vmatmul.f32.gmra.mxu3 %v8167_v43  ;;  %2266 = vmatmul.f32.gmra.mxu1 %v7880_v35  ;;  %v8185_v35 = vld [vmem:[%s6783_s18 + $0x1b8] sm:$0xff] }
 0x300   : > { %v1812_v45 = vpop.f32.mrf.mxu2 }
 0x301   : > { %v1813_v36 = vadd.f32 %v1812_v45, %v1748_v47  ;;  %v1877_v24 = vpop.f32.mrf.mxu3 }
 0x302   : > { %v8173_v7 = vpop.f32.mrf.mxu0 }
 0x303   : > { %v8175_v34 = vadd.f32 %v1877_v24, %v1813_v36  ;;  %v8177_v0 = vpop.f32.mrf.mxu1  ;;  %v400_v24 = vld [vmem:[#allocation5 + $0xb8] sm:$0xff] }
 0x304   : > { %2795 = vmatpush.msrb.mxu1 %v400_v24 }
 0x305   : > { %10895 = vst [vmem:[#allocation90_spill] sm:$0xff] %v8175_v34  ;;  %2074 = vmatmul.f32.gmra.mxu2 %v8180_v42  ;;  %2204 = vmatmul.f32.gmra.mxu0 %v7893_v33 }
 0x306   : > { %2139 = vmatmul.f32.gmra.mxu3 %v8185_v35  ;;  %2269 = vmatmul.f32.gmra.mxu1 %v7898_v11  ;;  %v8199_v11 = vld [vmem:[%s6783_s18 + $0x1d0] sm:$0xff] }
 0x308   : > { %v1815_v6 = vpop.f32.mrf.mxu2 }
 0x309   : > { %v1816_v56 = vadd.f32 %v1815_v6, %v1751_v61  ;;  %v1880_v47 = vpop.f32.mrf.mxu3 }
 0x30a   : > { %v8192_v45 = vpop.f32.mrf.mxu0 }
 0x30b   : > { %v8194_v33 = vadd.f32 %v1880_v47, %v1816_v56  ;;  %v8196_v36 = vpop.f32.mrf.mxu1 }
 0x30d   : > { %10896 = vst [vmem:[#allocation91_spill] sm:$0xff] %v8194_v33  ;;  %2077 = vmatmul.f32.gmra.mxu2 %v8199_v11  ;;  %2207 = vmatmul.f32.gmra.mxu0 %v7911_v60  ;;  %v8217_v60 = vld [vmem:[%s6783_s18 + $0x1f0] sm:$0xff] }
 0x30e   : > { %2142 = vmatmul.f32.gmra.mxu3 %v8204_v3  ;;  %2272 = vmatmul.f32.gmra.mxu1 %v7916_v17  ;;  %v8222_v17 = vld [vmem:[%s6783_s18 + $0x1f8] sm:$0xff]  ;;  %s6558_s18 = sshra.s32 %s5891_s17, 4  ;;  %s6559_s18 = int_to_ptr.hbm [resolvable:$true] %s6558_s18 }
 0x30f   : > { %s6560_s27 = scalar_lea.hbm %s6559_s18, 768  ;;  %p6565_p2 = scmp.lt.s32.totalorder %s6559_s18, %s10418_s6 }
 0x310   : > { %v1818_v32 = vpop.f32.mrf.mxu2  ;;  %p6561_p4 = scmp.ne.s32.totalorder %s6559_s18, %s6560_s27  ;;  %p6566_p9 = scmp.lt.s32.totalorder %s6564_s10, %s6560_s27 }
 0x311   : > { %v1819_v61 = vadd.f32 %v1818_v32, %v1754_v30  ;;  %v1883_v6 = vpop.f32.mrf.mxu3 }
 0x312   : > { %v8210_v56 = vpop.f32.mrf.mxu0  ;;  %p6562_p8 = pnand %p6561_p4, %p6749_p3  ;;  %p6567_p10 = por %p6566_p9, %p6565_p2 }
 0x313   : > { %v8212_v47 = vadd.f32 %v1883_v6, %v1819_v61  ;;  %v8214_v24 = vpop.f32.mrf.mxu1 }
 0x314   : > { %p6563_p11 = pneg %p6562_p8 }
 0x315   : > { %10897 = vst [vmem:[#allocation92_spill] sm:$0xff] %v8212_v47  ;;  %2080 = vmatmul.f32.gmra.mxu2 %v8217_v60  ;;  %2210 = vmatmul.f32.gmra.mxu0 %v7929_v5  ;;  %v8236_v5 = vld [vmem:[%s8231_s12] sm:$0xff] }
 0x316   : > { %2145 = vmatmul.f32.gmra.mxu3 %v8222_v17  ;;  %2275 = vmatmul.f32.gmra.mxu1 %v7934_v28  ;;  %p6568_p12 = pnand %p6567_p10, %p6563_p11 }
 0x318   : > { %v1821_v22 = vpop.f32.mrf.mxu2 }
 0x319   : > { %v1822_v30 = vadd.f32 %v1821_v22, %v1757_v4  ;;  %v1886_v32 = vpop.f32.mrf.mxu3  ;;  %v1972_v4 = vadd.f32 %v7943_v57, %v7939_v50  ;;  %v393_v50 = vld [vmem:[#allocation5 + $0x80] sm:$0xff]  ;;  %v10900_v57 = vld [vmem:[#allocation49_spill] sm:$0xff] }
 0x31a   : > { %v8233_v61 = vpop.f32.mrf.mxu0  ;;  %v1975_v46 = vadd.f32 %v10901_v41, %v10900_v57  ;;  %2731 = vmatpush.msrb.mxu0 %v393_v50  ;;  %v10903_v50 = vld [vmem:[#allocation58_spill] sm:$0xff]  ;;  %v10904_v57 = vld [vmem:[#allocation56_spill] sm:$0xff] }
 0x31b   : > { %v8238_v6 = vadd.f32 %v1886_v32, %v1822_v30  ;;  %v8240_v28 = vpop.f32.mrf.mxu1  ;;  %v1978_v41 = vadd.f32 %v10904_v57, %v10903_v50  ;;  %v10907_v50 = vld [vmem:[#allocation59_spill] sm:$0xff] }
 0x31d   : > { %10898 = vst [vmem:[#allocation93_spill] sm:$0xff] %v8238_v6  ;;  %2295 = vmatmul.f32.vlgmr.msra.gmra.mxu2 %v7946_v20  ;;  %6033 = vmatmul.msk.f32.vlgmr.msra.gmra.mxu0 %vm2409_vm0, %v8236_v5  ;;  %v8253_v6 = vld [vmem:[%s8231_s12 + $0x8] sm:$0xff] }
 0x31e   : > { %2360 = vmatmul.f32.vlgmr.msra.gmra.mxu3 %v7951_v8  ;;  %6049 = vmatmul.msk.f32.vlgmr.msra.gmra.mxu1 %vm2409_vm0, %v8236_v5 }
 0x320   : > { %v2036_v22 = vpop.f32.mrf.mxu2 }
 0x321   : > { %v2037_v30 = vadd.f32 %v2036_v22, %v1972_v4  ;;  %v2101_v32 = vpop.f32.mrf.mxu3 }
 0x322   : > { %v8250_v20 = vpop.f32.mrf.mxu0 }
 0x323   : > { %v8255_v47 = vadd.f32 %v2101_v32, %v2037_v30  ;;  %v8257_v8 = vpop.f32.mrf.mxu1 }
 0x325   : > { %10899 = vst [vmem:[#allocation94_spill] sm:$0xff] %v8255_v47  ;;  %2298 = vmatmul.f32.gmra.mxu2 %v7964_v15  ;;  %6034 = vmatmul.msk.f32.gmra.mxu0 %vm2409_vm0, %v8253_v6  ;;  %v8270_v15 = vld [vmem:[%s8231_s12 + $0x10] sm:$0xff] }
 0x326   : > { %2363 = vmatmul.f32.gmra.mxu3 %v7969_v14  ;;  %6050 = vmatmul.msk.f32.gmra.mxu1 %vm2409_vm0, %v8253_v6  ;;  %v394_v14 = vld [vmem:[#allocation5 + $0x88] sm:$0xff] }
 0x327   : > { %2796 = vmatpush.msrb.mxu1 %v394_v14  ;;  %v8287_v14 = vld [vmem:[%s8231_s12 + $0x18] sm:$0xff] }
 0x328   : > { %v2039_v4 = vpop.f32.mrf.mxu2 }
 0x329   : > { %v2040_v22 = vadd.f32 %v2039_v4, %v1975_v46  ;;  %v2104_v30 = vpop.f32.mrf.mxu3 }
 0x32a   : > { %v8267_v32 = vpop.f32.mrf.mxu0 }
 0x32b   : > { %v8272_v47 = vadd.f32 %v2104_v30, %v2040_v22  ;;  %v8274_v33 = vpop.f32.mrf.mxu1 }
 0x32d   : > { %10902 = vst [vmem:[#allocation49_spill] sm:$0xff] %v8272_v47  ;;  %2301 = vmatmul.f32.gmra.mxu2 %v7982_v55  ;;  %6035 = vmatmul.msk.f32.gmra.mxu0 %vm2409_vm0, %v8270_v15 }
 0x32e   : > { %2366 = vmatmul.f32.gmra.mxu3 %v7987_v29  ;;  %6051 = vmatmul.msk.f32.gmra.mxu1 %vm2409_vm0, %v8270_v15  ;;  %v10906_v29 = vld [vmem:[#allocation62_spill] sm:$0xff] }
 0x32f   : > { %v1981_v57 = vadd.f32 %v10907_v50, %v10906_v29  ;;  %v386_v29 = vld [vmem:[#allocation5 + $0x48] sm:$0xff] }
 0x330   : > { %v2042_v46 = vpop.f32.mrf.mxu2  ;;  %v10910_v50 = vld [vmem:[#allocation61_spill] sm:$0xff]  ;;  %2667 = vmatpush.msrb.mxu3 %v386_v29  ;;  %v10914_v29 = vld [vmem:[#allocation64_spill] sm:$0xff] }
 0x331   : > { %v2043_v4 = vadd.f32 %v2042_v46, %v1978_v41  ;;  %v2107_v22 = vpop.f32.mrf.mxu3 }
 0x332   : > { %v8284_v30 = vpop.f32.mrf.mxu0 }
 0x333   : > { %v8289_v55 = vadd.f32 %v2107_v22, %v2043_v4  ;;  %v8291_v47 = vpop.f32.mrf.mxu1  ;;  %v8304_v22 = vld [vmem:[%s8231_s12 + $0x20] sm:$0xff] }
 0x335   : > { %10905 = vst [vmem:[#allocation57_spill] sm:$0xff] %v8289_v55  ;;  %2304 = vmatmul.f32.gmra.mxu2 %v8000_v26  ;;  %6036 = vmatmul.msk.f32.gmra.mxu0 %vm2409_vm0, %v8287_v14 }
 0x336   : > { %2369 = vmatmul.f32.gmra.mxu3 %v8005_v23  ;;  %6052 = vmatmul.msk.f32.gmra.mxu1 %vm2409_vm0, %v8287_v14  ;;  %v385_v23 = vld [vmem:[#allocation5 + $0x40] sm:$0xff] }
 0x337   : > { %2602 = vmatpush.msrb.mxu2 %v385_v23  ;;  %v387_v23 = vld [vmem:[#allocation5 + $0x50] sm:$0xff] }
 0x338   : > { %v2045_v41 = vpop.f32.mrf.mxu2  ;;  %2732 = vmatpush.msrb.mxu0 %v387_v23  ;;  %v10917_v23 = vld [vmem:[#allocation74_spill] sm:$0xff] }
 0x339   : > { %v2046_v46 = vadd.f32 %v2045_v41, %v1981_v57  ;;  %v2110_v34 = vpop.f32.mrf.mxu3  ;;  %v10911_v57 = vld [vmem:[#allocation68_spill] sm:$0xff] }
 0x33a   : > { %v8301_v4 = vpop.f32.mrf.mxu0  ;;  %v1984_v41 = vadd.f32 %v10911_v57, %v10910_v50  ;;  %v10915_v50 = vld [vmem:[#allocation72_spill] sm:$0xff] }
 0x33b   : > { %v8306_v26 = vadd.f32 %v2110_v34, %v2046_v46  ;;  %v8308_v55 = vpop.f32.mrf.mxu1  ;;  %v1987_v57 = vadd.f32 %v10915_v50, %v10914_v29  ;;  %v10918_v29 = vld [vmem:[#allocation81_spill] sm:$0xff] }
 0x33c   : > { %10909 = vst [vmem:[#allocation56_spill] sm:$0xff] %v8308_v55  ;;  %v1990_v50 = vadd.f32 %v10918_v29, %v10917_v23 }
 0x33d   : > { %10908 = vst [vmem:[#allocation58_spill] sm:$0xff] %v8306_v26  ;;  %2307 = vmatmul.f32.gmra.mxu2 %v8018_v40  ;;  %6037 = vmatmul.msk.f32.gmra.mxu0 %vm2409_vm0, %v8304_v22 }
 0x33e   : > { %2372 = vmatmul.f32.gmra.mxu3 %v8023_v54  ;;  %6053 = vmatmul.msk.f32.gmra.mxu1 %vm2409_vm0, %v8304_v22 }
 0x340   : > { %v2048_v34 = vpop.f32.mrf.mxu2 }
 0x341   : > { %v2049_v46 = vadd.f32 %v2048_v34, %v1984_v41  ;;  %v2113_v26 = vpop.f32.mrf.mxu3 }
 0x342   : > { %v8318_v40 = vpop.f32.mrf.mxu0 }
 0x343   : > { %v8323_v55 = vadd.f32 %v2113_v26, %v2049_v46  ;;  %v8325_v54 = vpop.f32.mrf.mxu1 }
 0x344   : > { %10913 = vst [vmem:[#allocation59_spill] sm:$0xff] %v8325_v54 }
 0x345   : > { %10912 = vst [vmem:[#allocation62_spill] sm:$0xff] %v8323_v55  ;;  %2310 = vmatmul.f32.gmra.mxu2 %v8036_v21  ;;  %6038 = vmatmul.msk.f32.gmra.mxu0 %vm2409_vm0, %v8321_v1  ;;  %v8338_v21 = vld [vmem:[%s8231_s12 + $0x30] sm:$0xff] }
 0x346   : > { %2375 = vmatmul.f32.gmra.mxu3 %v8041_v63  ;;  %6054 = vmatmul.msk.f32.gmra.mxu1 %vm2409_vm0, %v8321_v1  ;;  %v388_v63 = vld [vmem:[#allocation5 + $0x58] sm:$0xff] }
 0x347   : > { %2797 = vmatpush.msrb.mxu1 %v388_v63  ;;  %v8355_v63 = vld [vmem:[%s8231_s12 + $0x38] sm:$0xff] }
 0x348   : > { %v2051_v41 = vpop.f32.mrf.mxu2 }
 0x349   : > { %v2052_v26 = vadd.f32 %v2051_v41, %v1987_v57  ;;  %v2116_v34 = vpop.f32.mrf.mxu3 }
 0x34a   : > { %v8335_v46 = vpop.f32.mrf.mxu0 }
 0x34b   : > { %v8340_v55 = vadd.f32 %v2116_v34, %v2052_v26  ;;  %v8342_v54 = vpop.f32.mrf.mxu1 }
 0x34d   : > { %10916 = vst [vmem:[#allocation61_spill] sm:$0xff] %v8340_v55  ;;  %2313 = vmatmul.f32.gmra.mxu2 %v8054_v31  ;;  %6039 = vmatmul.msk.f32.gmra.mxu0 %vm2409_vm0, %v8338_v21 }
 0x34e   : > { %2378 = vmatmul.f32.gmra.mxu3 %v8059_v9  ;;  %6055 = vmatmul.msk.f32.gmra.mxu1 %vm2409_vm0, %v8338_v21  ;;  %v10920_v9 = vld [vmem:[#allocation83_spill] sm:$0xff] }
 0x34f   : > { %v1993_v23 = vadd.f32 %v10920_v9, %v8065_v49  ;;  %v380_v49 = vld [vmem:[#allocation5 + $0x18] sm:$0xff]  ;;  %v1996_v9 = vadd.f32 %v8087_v13, %v8083_v12  ;;  %v381_v13 = vld [vmem:[#allocation5 + $0x20] sm:$0xff] }
 0x350   : > { %v2054_v57 = vpop.f32.mrf.mxu2  ;;  %2668 = vmatpush.msrb.mxu3 %v380_v49  ;;  %v10923_v12 = vld [vmem:[#allocation86_spill] sm:$0xff]  ;;  %2733 = vmatpush.msrb.mxu0 %v381_v13 }
 0x351   : > { %v2055_v41 = vadd.f32 %v2054_v57, %v1990_v50  ;;  %v2119_v26 = vpop.f32.mrf.mxu3 }
 0x352   : > { %v8352_v34 = vpop.f32.mrf.mxu0 }
 0x353   : > { %v8357_v31 = vadd.f32 %v2119_v26, %v2055_v41  ;;  %v8359_v55 = vpop.f32.mrf.mxu1  ;;  %v8372_v26 = vld [vmem:[%s8231_s12 + $0x40] sm:$0xff] }
 0x355   : > { %10919 = vst [vmem:[#allocation68_spill] sm:$0xff] %v8357_v31  ;;  %2316 = vmatmul.f32.gmra.mxu2 %v8072_v18  ;;  %6040 = vmatmul.msk.f32.gmra.mxu0 %vm2409_vm0, %v8355_v63 }
 0x356   : > { %2381 = vmatmul.f32.gmra.mxu3 %v8077_v27  ;;  %6056 = vmatmul.msk.f32.gmra.mxu1 %vm2409_vm0, %v8355_v63  ;;  %v379_v27 = vld [vmem:[#allocation5 + $0x10] sm:$0xff] }
 0x357   : > { %2603 = vmatpush.msrb.mxu2 %v379_v27  ;;  %v1999_v27 = vadd.f32 %v10923_v12, %v8101_v37  ;;  %v2002_v37 = vadd.f32 %v8123_v16, %v8119_v51  ;;  %v2005_v16 = vadd.f32 %v8141_v2, %v8137_v19  ;;  %v2938_v19 = vld [vmem:[#allocation8 + $0x2d0] sm:$0xff] }
 0x358   : > { %v2057_v29 = vpop.f32.mrf.mxu2  ;;  %v3034_v2 = vld [vmem:[#allocation8 + $0x5d0] sm:$0xff] }
 0x359   : > { %v2058_v50 = vadd.f32 %v2057_v29, %v1993_v23  ;;  %v2122_v57 = vpop.f32.mrf.mxu3  ;;  %3438 = vmatpush.msra.mxu2 %v2938_v19  ;;  %3503 = vmatpush.msra.mxu3 %v3034_v2  ;;  %v3130_v19 = vld [vmem:[#allocation8 + $0x8d0] sm:$0xff]  ;;  %v2011_v2 = vadd.f32 %v8177_v0, %v8173_v7 }
 0x35a   : > { %v8369_v41 = vpop.f32.mrf.mxu0  ;;  %3568 = vmatpush.msra.mxu0 %v3130_v19  ;;  %v2926_v7 = vld [vmem:[#allocation8 + $0x270] sm:$0xff] }
 0x35b   : > { %v8374_v18 = vadd.f32 %v2122_v57, %v2058_v50  ;;  %v8376_v31 = vpop.f32.mrf.mxu1  ;;  %v8389_v57 = vld [vmem:[%s8231_s12 + $0x48] sm:$0xff]  ;;  %v3022_v0 = vld [vmem:[#allocation8 + $0x570] sm:$0xff] }
 0x35d   : > { %10921 = vst [vmem:[#allocation64_spill] sm:$0xff] %v8374_v18  ;;  %2319 = vmatmul.f32.gmra.mxu2 %v8090_v58  ;;  %6041 = vmatmul.msk.f32.gmra.mxu0 %vm2409_vm0, %v8372_v26 }
 0x35e   : > { %2384 = vmatmul.f32.gmra.mxu3 %v8095_v48  ;;  %6057 = vmatmul.msk.f32.gmra.mxu1 %vm2409_vm0, %v8372_v26 }
 0x360   : > { %v2060_v23 = vpop.f32.mrf.mxu2 }
 0x361   : > { %v2061_v29 = vadd.f32 %v2060_v23, %v1996_v9  ;;  %v2125_v50 = vpop.f32.mrf.mxu3 }
 0x362   : > { %v8386_v58 = vpop.f32.mrf.mxu0 }
 0x363   : > { %v8391_v18 = vadd.f32 %v2125_v50, %v2061_v29  ;;  %v8393_v48 = vpop.f32.mrf.mxu1 }
 0x365   : > { %10922 = vst [vmem:[#allocation72_spill] sm:$0xff] %v8391_v18  ;;  %2322 = vmatmul.f32.gmra.mxu2 %v8108_v39  ;;  %6042 = vmatmul.msk.f32.gmra.mxu0 %vm2409_vm0, %v8389_v57  ;;  %v8406_v39 = vld [vmem:[%s8231_s12 + $0x50] sm:$0xff] }
 0x366   : > { %2387 = vmatmul.f32.gmra.mxu3 %v8113_v52  ;;  %6058 = vmatmul.msk.f32.gmra.mxu1 %vm2409_vm0, %v8389_v57  ;;  %v382_v52 = vld [vmem:[#allocation5 + $0x28] sm:$0xff] }
 0x367   : > { %2798 = vmatpush.msrb.mxu1 %v382_v52 }
 0x368   : > { %v2063_v49 = vpop.f32.mrf.mxu2 }
 0x369   : > { %v2064_v9 = vadd.f32 %v2063_v49, %v1999_v27  ;;  %v2128_v23 = vpop.f32.mrf.mxu3 }
 0x36a   : > { %v8403_v29 = vpop.f32.mrf.mxu0 }
 0x36b   : > { %v8408_v50 = vadd.f32 %v2128_v23, %v2064_v9  ;;  %v8410_v18 = vpop.f32.mrf.mxu1  ;;  %v8423_v9 = vld [vmem:[%s8231_s12 + $0x58] sm:$0xff] }
 0x36d   : > { %10924 = vst [vmem:[#allocation74_spill] sm:$0xff] %v8408_v50  ;;  %2325 = vmatmul.f32.gmra.mxu2 %v8126_v10  ;;  %6043 = vmatmul.msk.f32.gmra.mxu0 %vm2409_vm0, %v8406_v39 }
 0x36e   : > { %2390 = vmatmul.f32.gmra.mxu3 %v8131_v53  ;;  %6059 = vmatmul.msk.f32.gmra.mxu1 %vm2409_vm0, %v8406_v39 }
 0x370   : > { %v2066_v13 = vpop.f32.mrf.mxu2 }
 0x371   : > { %v2067_v12 = vadd.f32 %v2066_v13, %v2002_v37  ;;  %v2131_v27 = vpop.f32.mrf.mxu3  ;;  %v8440_v13 = vld [vmem:[%s8231_s12 + $0x60] sm:$0xff] }
 0x372   : > { %v8420_v49 = vpop.f32.mrf.mxu0 }
 0x373   : > { %v8425_v10 = vadd.f32 %v2131_v27, %v2067_v12  ;;  %v8427_v23 = vpop.f32.mrf.mxu1 }
 0x375   : > { %10925 = vst [vmem:[#allocation81_spill] sm:$0xff] %v8425_v10  ;;  %2328 = vmatmul.f32.gmra.mxu2 %v8144_v44  ;;  %6044 = vmatmul.msk.f32.gmra.mxu0 %vm2409_vm0, %v8423_v9 }
 0x376   : > { %2393 = vmatmul.f32.gmra.mxu3 %v8149_v38  ;;  %6060 = vmatmul.msk.f32.gmra.mxu1 %vm2409_vm0, %v8423_v9  ;;  %v2008_v38 = vadd.f32 %v8159_v59, %v8155_v62  ;;  %v2932_v62 = vld [vmem:[#allocation8 + $0x2a0] sm:$0xff] }
 0x377   : > { %v3028_v59 = vld [vmem:[#allocation8 + $0x5a0] sm:$0xff]  ;;  %3439 = vmatpush.msra.mxu2 %v2932_v62 }
 0x378   : > { %v2069_v51 = vpop.f32.mrf.mxu2  ;;  %3504 = vmatpush.msra.mxu3 %v3028_v59  ;;  %v3124_v62 = vld [vmem:[#allocation8 + $0x8a0] sm:$0xff]  ;;  %v2014_v59 = vadd.f32 %v8196_v36, %v8192_v45 }
 0x379   : > { %v2070_v53 = vadd.f32 %v2069_v51, %v2005_v16  ;;  %v2134_v52 = vpop.f32.mrf.mxu3  ;;  %3440 = vmatpush.msra.mxu2 %v2926_v7  ;;  %3569 = vmatpush.msra.mxu0 %v3124_v62  ;;  %v2920_v45 = vld [vmem:[#allocation8 + $0x240] sm:$0xff]  ;;  %v3118_v7 = vld [vmem:[#allocation8 + $0x870] sm:$0xff] }
 0x37a   : > { %v8437_v37 = vpop.f32.mrf.mxu0  ;;  %3505 = vmatpush.msra.mxu3 %v3022_v0  ;;  %v3016_v36 = vld [vmem:[#allocation8 + $0x540] sm:$0xff]  ;;  %v2017_v0 = vadd.f32 %v8214_v24, %v8210_v56  ;;  %v2914_v56 = vld [vmem:[#allocation8 + $0x210] sm:$0xff] }
 0x37b   : > { %v8442_v44 = vadd.f32 %v2134_v52, %v2070_v53  ;;  %v8444_v12 = vpop.f32.mrf.mxu1  ;;  %3441 = vmatpush.msra.mxu2 %v2920_v45  ;;  %3570 = vmatpush.msra.mxu0 %v3118_v7  ;;  %v3010_v24 = vld [vmem:[#allocation8 + $0x510] sm:$0xff]  ;;  %v2232_v45 = vadd.f32 %v8240_v28, %v8233_v61  ;;  %v2908_v61 = vld [vmem:[#allocation8 + $0x1e0] sm:$0xff] }
 0x37c   : > { %3506 = vmatpush.msra.mxu3 %v3016_v36  ;;  %v3106_v28 = vld [vmem:[#allocation8 + $0x810] sm:$0xff] }
 0x37d   : > { %10926 = vst [vmem:[#allocation83_spill] sm:$0xff] %v8442_v44  ;;  %2331 = vmatmul.f32.gmra.mxu2 %v8162_v25  ;;  %6045 = vmatmul.msk.f32.gmra.mxu0 %vm2409_vm0, %v8440_v13  ;;  %v8457_v25 = vld [vmem:[%s8231_s12 + $0x68] sm:$0xff]  ;;  %v3226_v44 = vld [vmem:[#allocation8 + $0xbd0] sm:$0xff] }
 0x37e   : > { %2396 = vmatmul.f32.gmra.mxu3 %v8167_v43  ;;  %6061 = vmatmul.msk.f32.gmra.mxu1 %vm2409_vm0, %v8440_v13 }
 0x37f   : > { %3633 = vmatpush.msra.mxu1 %v3226_v44  ;;  %3442 = vmatpush.msra.mxu2 %v2914_v56  ;;  %v2235_v56 = vadd.f32 %v8257_v8, %v8250_v20  ;;  %v2998_v20 = vld [vmem:[#allocation8 + $0x4b0] sm:$0xff]  ;;  %v3100_v8 = vld [vmem:[#allocation8 + $0x7e0] sm:$0xff] }
 0x380   : > { %v2072_v27 = vpop.f32.mrf.mxu2  ;;  %3507 = vmatpush.msra.mxu3 %v3010_v24 }
 0x381   : > { %v2073_v16 = vadd.f32 %v2072_v27, %v2008_v38  ;;  %v2137_v51 = vpop.f32.mrf.mxu3  ;;  %3443 = vmatpush.msra.mxu2 %v2908_v61  ;;  %v2238_v61 = vadd.f32 %v8274_v33, %v8267_v32  ;;  %v2896_v33 = vld [vmem:[#allocation8 + $0x180] sm:$0xff] }
 0x382   : > { %v8454_v53 = vpop.f32.mrf.mxu0  ;;  %v2992_v32 = vld [vmem:[#allocation8 + $0x480] sm:$0xff] }
 0x383   : > { %v8459_v52 = vadd.f32 %v2137_v51, %v2073_v16  ;;  %v8461_v43 = vpop.f32.mrf.mxu1  ;;  %v8474_v51 = vld [vmem:[%s8231_s12 + $0x70] sm:$0xff] }
 0x385   : > { %10927 = vst [vmem:[#allocation86_spill] sm:$0xff] %v8459_v52  ;;  %2334 = vmatmul.f32.gmra.mxu2 %v8180_v42  ;;  %6046 = vmatmul.msk.f32.gmra.mxu0 %vm2409_vm0, %v8457_v25 }
 0x386   : > { %2399 = vmatmul.f32.gmra.mxu3 %v8185_v35  ;;  %6062 = vmatmul.msk.f32.gmra.mxu1 %vm2409_vm0, %v8457_v25 }
 0x388   : > { %v2075_v38 = vpop.f32.mrf.mxu2 }
 0x389   : > { %v2076_v27 = vadd.f32 %v2075_v38, %v2011_v2  ;;  %v2140_v42 = vpop.f32.mrf.mxu3  ;;  %v8491_v38 = vld [vmem:[%s8231_s12 + $0x78] sm:$0xff] }
 0x38a   : > { %v8471_v16 = vpop.f32.mrf.mxu0 }
 0x38b   : > { %v8476_v35 = vadd.f32 %v2140_v42, %v2076_v27  ;;  %v8478_v52 = vpop.f32.mrf.mxu1  ;;  %v3220_v42 = vld [vmem:[#allocation8 + $0xba0] sm:$0xff] }
 0x38c   : > { %3634 = vmatpush.msra.mxu1 %v3220_v42  ;;  %v3112_v42 = vld [vmem:[#allocation8 + $0x840] sm:$0xff] }
 0x38d   : > { %10928 = vst [vmem:[#allocation95_spill] sm:$0xff] %v8476_v35  ;;  %2337 = vmatmul.f32.gmra.mxu2 %v8199_v11  ;;  %6047 = vmatmul.msk.f32.gmra.mxu0 %vm2409_vm0, %v8474_v51 }
 0x38e   : > { %2402 = vmatmul.f32.gmra.mxu3 %v8204_v3  ;;  %6063 = vmatmul.msk.f32.gmra.mxu1 %vm2409_vm0, %v8474_v51 }
 0x38f   : > { %3571 = vmatpush.msra.mxu0 %v3112_v42 }
 0x390   : > { %v2078_v44 = vpop.f32.mrf.mxu2 }
 0x391   : > { %v2079_v19 = vadd.f32 %v2078_v44, %v2014_v59  ;;  %v2143_v11 = vpop.f32.mrf.mxu3  ;;  %3572 = vmatpush.msra.mxu0 %v3106_v28 }
 0x392   : > { %v8488_v2 = vpop.f32.mrf.mxu0 }
 0x393   : > { %v8493_v3 = vadd.f32 %v2143_v11, %v2079_v19  ;;  %v8495_v27 = vpop.f32.mrf.mxu1  ;;  %v3214_v11 = vld [vmem:[#allocation8 + $0xb70] sm:$0xff]  ;;  %3573 = vmatpush.msra.mxu0 %v3100_v8 }
 0x394   : > { %3635 = vmatpush.msra.mxu1 %v3214_v11  ;;  %v3208_v11 = vld [vmem:[#allocation8 + $0xb40] sm:$0xff] }
 0x395   : > { %10929 = vst [vmem:[#allocation96_spill] sm:$0xff] %v8493_v3  ;;  %2340 = vmatmul.f32.gmra.mxu2 %v8217_v60  ;;  %6048 = vmatmul.msk.f32.gmra.mxu0 %vm2409_vm0, %v8491_v38  ;;  %v3178_v3 = vld [vmem:[#allocation8 + $0xa50] sm:$0xff] }
 0x396   : > { %2405 = vmatmul.f32.gmra.mxu3 %v8222_v17  ;;  %6064 = vmatmul.msk.f32.gmra.mxu1 %vm2409_vm0, %v8491_v38 }
 0x397   : > { %3636 = vmatpush.msra.mxu1 %v3208_v11  ;;  %v3202_v11 = vld [vmem:[#allocation8 + $0xb10] sm:$0xff] }
 0x398   : > { %v2081_v62 = vpop.f32.mrf.mxu2 }
 0x399   : > { %v2082_v59 = vadd.f32 %v2081_v62, %v2017_v0  ;;  %v2146_v60 = vpop.f32.mrf.mxu3  ;;  %3637 = vmatpush.msra.mxu1 %v3202_v11  ;;  %v3196_v11 = vld [vmem:[#allocation8 + $0xae0] sm:$0xff] }
 0x39a   : > { %v8505_v44 = vpop.f32.mrf.mxu0 }
 0x39b   : > { %v8507_v19 = vadd.f32 %v2146_v60, %v2082_v59  ;;  %v8509_v17 = vpop.f32.mrf.mxu1  ;;  %3638 = vmatpush.msra.mxu1 %v3196_v11  ;;  %v3190_v11 = vld [vmem:[#allocation8 + $0xab0] sm:$0xff] }
 0x39d   : > { %10930 = vst [vmem:[#allocation97_spill] sm:$0xff] %v8507_v19  ;;  %6065 = vmatmul.msk.f32.vlgmr.msrb.gmra.mxu2 %vm2409_vm0, %v8236_v5  ;;  %6097 = vmatmul.msk.f32.vlgmr.msrb.gmra.mxu0 %vm2409_vm0, %v8236_v5  ;;  %v3184_v19 = vld [vmem:[#allocation8 + $0xa80] sm:$0xff] }
 0x39e   : > { %6081 = vmatmul.msk.f32.vlgmr.msrb.gmra.mxu3 %vm2409_vm0, %v8236_v5  ;;  %6113 = vmatmul.msk.f32.vlgmr.msrb.gmra.mxu1 %vm2409_vm0, %v8236_v5  ;;  %v3004_v5 = vld [vmem:[#allocation8 + $0x4e0] sm:$0xff] }
 0x39f   : > { %3508 = vmatpush.msra.mxu3 %v3004_v5  ;;  %3639 = vmatpush.msra.mxu1 %v3190_v11 }
 0x3a0   : > { %v2296_v36 = vpop.f32.mrf.mxu2 }
 0x3a1   : > { %v2297_v7 = vadd.f32 %v2296_v36, %v2232_v45  ;;  %v2361_v0 = vpop.f32.mrf.mxu3  ;;  %3509 = vmatpush.msra.mxu3 %v2998_v20  ;;  %3640 = vmatpush.msra.mxu1 %v3184_v19 }
 0x3a2   : > { %v8521_v62 = vpop.f32.mrf.mxu0 }
 0x3a3   : > { %v8523_v59 = vadd.f32 %v2361_v0, %v2297_v7  ;;  %v8525_v60 = vpop.f32.mrf.mxu1  ;;  %3510 = vmatpush.msra.mxu3 %v2992_v32  ;;  %3641 = vmatpush.msra.mxu1 %v3178_v3 }
 0x3a5   : > { %6066 = vmatmul.msk.f32.gmra.mxu2 %vm2409_vm0, %v8253_v6  ;;  %6098 = vmatmul.msk.f32.gmra.mxu0 %vm2409_vm0, %v8253_v6 }
 0x3a6   : > { %6082 = vmatmul.msk.f32.gmra.mxu3 %vm2409_vm0, %v8253_v6  ;;  %6114 = vmatmul.msk.f32.gmra.mxu1 %vm2409_vm0, %v8253_v6  ;;  %v2902_v6 = vld [vmem:[#allocation8 + $0x1b0] sm:$0xff] }
 0x3a7   : > { %3444 = vmatpush.msra.mxu2 %v2902_v6  ;;  %v2241_v6 = vadd.f32 %v8291_v47, %v8284_v30  ;;  %v2890_v47 = vld [vmem:[#allocation8 + $0x150] sm:$0xff] }
 0x3a8   : > { %v2299_v24 = vpop.f32.mrf.mxu2  ;;  %v2986_v30 = vld [vmem:[#allocation8 + $0x450] sm:$0xff] }
 0x3a9   : > { %v2300_v42 = vadd.f32 %v2299_v24, %v2235_v56  ;;  %v2364_v45 = vpop.f32.mrf.mxu3  ;;  %3445 = vmatpush.msra.mxu2 %v2896_v33  ;;  %v10931_v33 = vld [vmem:[#allocation56_spill] sm:$0xff]  ;;  %3511 = vmatpush.msra.mxu3 %v2986_v30  ;;  %v10932_v30 = vld [vmem:[#allocation59_spill] sm:$0xff] }
 0x3aa   : > { %v8537_v36 = vpop.f32.mrf.mxu0  ;;  %v2244_v32 = vadd.f32 %v10931_v33, %v8301_v4  ;;  %v2884_v4 = vld [vmem:[#allocation8 + $0x120] sm:$0xff] }
 0x3ab   : > { %v8539_v7 = vadd.f32 %v2364_v45, %v2300_v42  ;;  %v8541_v0 = vpop.f32.mrf.mxu1  ;;  %3446 = vmatpush.msra.mxu2 %v2890_v47  ;;  %v3082_v47 = vld [vmem:[#allocation8 + $0x750] sm:$0xff] }
 0x3ad   : > { %6067 = vmatmul.msk.f32.gmra.mxu2 %vm2409_vm0, %v8270_v15  ;;  %6099 = vmatmul.msk.f32.gmra.mxu0 %vm2409_vm0, %v8270_v15 }
 0x3ae   : > { %6083 = vmatmul.msk.f32.gmra.mxu3 %vm2409_vm0, %v8270_v15  ;;  %6115 = vmatmul.msk.f32.gmra.mxu1 %vm2409_vm0, %v8270_v15  ;;  %v3094_v15 = vld [vmem:[#allocation8 + $0x7b0] sm:$0xff] }
 0x3af   : > { %3574 = vmatpush.msra.mxu0 %v3094_v15  ;;  %3447 = vmatpush.msra.mxu2 %v2884_v4  ;;  %v3076_v4 = vld [vmem:[#allocation8 + $0x720] sm:$0xff] }
 0x3b0   : > { %v2302_v5 = vpop.f32.mrf.mxu2 }
 0x3b1   : > { %v2303_v28 = vadd.f32 %v2302_v5, %v2238_v61  ;;  %v2367_v56 = vpop.f32.mrf.mxu3 }
 0x3b2   : > { %v8553_v24 = vpop.f32.mrf.mxu0 }
 0x3b3   : > { %v8555_v42 = vadd.f32 %v2367_v56, %v2303_v28  ;;  %v8557_v45 = vpop.f32.mrf.mxu1 }
 0x3b5   : > { %6068 = vmatmul.msk.f32.gmra.mxu2 %vm2409_vm0, %v8287_v14  ;;  %6100 = vmatmul.msk.f32.gmra.mxu0 %vm2409_vm0, %v8287_v14 }
 0x3b6   : > { %6084 = vmatmul.msk.f32.gmra.mxu3 %vm2409_vm0, %v8287_v14  ;;  %6116 = vmatmul.msk.f32.gmra.mxu1 %vm2409_vm0, %v8287_v14  ;;  %v3088_v14 = vld [vmem:[#allocation8 + $0x780] sm:$0xff] }
 0x3b7   : > { %3575 = vmatpush.msra.mxu0 %v3088_v14  ;;  %v2247_v14 = vadd.f32 %v10932_v30, %v8318_v40  ;;  %v2974_v40 = vld [vmem:[#allocation8 + $0x3f0] sm:$0xff] }
 0x3b8   : > { %v2305_v20 = vpop.f32.mrf.mxu2 }
 0x3b9   : > { %v2306_v8 = vadd.f32 %v2305_v20, %v2241_v6  ;;  %v2370_v61 = vpop.f32.mrf.mxu3  ;;  %3576 = vmatpush.msra.mxu0 %v3082_v47 }
 0x3ba   : > { %v8569_v5 = vpop.f32.mrf.mxu0 }
 0x3bb   : > { %v8571_v28 = vadd.f32 %v2370_v61, %v2306_v8  ;;  %v8573_v56 = vpop.f32.mrf.mxu1  ;;  %3577 = vmatpush.msra.mxu0 %v3076_v4 }
 0x3bd   : > { %6069 = vmatmul.msk.f32.gmra.mxu2 %vm2409_vm0, %v8304_v22  ;;  %6101 = vmatmul.msk.f32.gmra.mxu0 %vm2409_vm0, %v8304_v22 }
 0x3be   : > { %6085 = vmatmul.msk.f32.gmra.mxu3 %vm2409_vm0, %v8304_v22  ;;  %6117 = vmatmul.msk.f32.gmra.mxu1 %vm2409_vm0, %v8304_v22  ;;  %v2980_v22 = vld [vmem:[#allocation8 + $0x420] sm:$0xff] }
 0x3bf   : > { %3512 = vmatpush.msra.mxu3 %v2980_v22  ;;  %v2250_v22 = vadd.f32 %v8342_v54, %v8335_v46  ;;  %v2872_v54 = vld [vmem:[#allocation8 + $0xc0] sm:$0xff] }
 0x3c0   : > { %v2308_v15 = vpop.f32.mrf.mxu2  ;;  %v2968_v46 = vld [vmem:[#allocation8 + $0x3c0] sm:$0xff] }
 0x3c1   : > { %v2309_v6 = vadd.f32 %v2308_v15, %v2244_v32  ;;  %v2373_v20 = vpop.f32.mrf.mxu3  ;;  %3513 = vmatpush.msra.mxu3 %v2974_v40 }
 0x3c2   : > { %v8585_v8 = vpop.f32.mrf.mxu0 }
 0x3c3   : > { %v8587_v61 = vadd.f32 %v2373_v20, %v2309_v6  ;;  %v8589_v11 = vpop.f32.mrf.mxu1  ;;  %3514 = vmatpush.msra.mxu3 %v2968_v46 }
 0x3c5   : > { %6070 = vmatmul.msk.f32.gmra.mxu2 %vm2409_vm0, %v8321_v1  ;;  %6102 = vmatmul.msk.f32.gmra.mxu0 %vm2409_vm0, %v8321_v1 }
 0x3c6   : > { %6086 = vmatmul.msk.f32.gmra.mxu3 %vm2409_vm0, %v8321_v1  ;;  %6118 = vmatmul.msk.f32.gmra.mxu1 %vm2409_vm0, %v8321_v1  ;;  %v2878_v1 = vld [vmem:[#allocation8 + $0xf0] sm:$0xff] }
 0x3c7   : > { %3448 = vmatpush.msra.mxu2 %v2878_v1  ;;  %v2253_v1 = vadd.f32 %v8359_v55, %v8352_v34  ;;  %v2866_v55 = vld [vmem:[#allocation8 + $0x90] sm:$0xff] }
 0x3c8   : > { %v2311_v19 = vpop.f32.mrf.mxu2  ;;  %v2962_v34 = vld [vmem:[#allocation8 + $0x390] sm:$0xff] }
 0x3c9   : > { %v2312_v33 = vadd.f32 %v2311_v19, %v2247_v14  ;;  %v2376_v32 = vpop.f32.mrf.mxu3  ;;  %3449 = vmatpush.msra.mxu2 %v2872_v54  ;;  %v2256_v54 = vadd.f32 %v8376_v31, %v8369_v41  ;;  %3515 = vmatpush.msra.mxu3 %v2962_v34  ;;  %v2860_v31 = vld [vmem:[#allocation8 + $0x60] sm:$0xff] }
 0x3ca   : > { %v8601_v15 = vpop.f32.mrf.mxu0  ;;  %v2956_v41 = vld [vmem:[#allocation8 + $0x360] sm:$0xff] }
 0x3cb   : > { %v8603_v6 = vadd.f32 %v2376_v32, %v2312_v33  ;;  %v8605_v20 = vpop.f32.mrf.mxu1  ;;  %v3172_v32 = vld [vmem:[#allocation8 + $0xa20] sm:$0xff]  ;;  %3450 = vmatpush.msra.mxu2 %v2866_v55  ;;  %v2259_v55 = vadd.f32 %v8393_v48, %v8386_v58  ;;  %3516 = vmatpush.msra.mxu3 %v2956_v41  ;;  %v2854_v58 = vld [vmem:[#allocation8 + $0x30] sm:$0xff] }
 0x3cc   : > { %3642 = vmatpush.msra.mxu1 %v3172_v32  ;;  %v3166_v32 = vld [vmem:[#allocation8 + $0x9f0] sm:$0xff]  ;;  %v3052_v48 = vld [vmem:[#allocation8 + $0x660] sm:$0xff] }
 0x3cd   : > { %6071 = vmatmul.msk.f32.gmra.mxu2 %vm2409_vm0, %v8338_v21  ;;  %6103 = vmatmul.msk.f32.gmra.mxu0 %vm2409_vm0, %v8338_v21 }
 0x3ce   : > { %6087 = vmatmul.msk.f32.gmra.mxu3 %vm2409_vm0, %v8338_v21  ;;  %6119 = vmatmul.msk.f32.gmra.mxu1 %vm2409_vm0, %v8338_v21  ;;  %v3070_v21 = vld [vmem:[#allocation8 + $0x6f0] sm:$0xff] }
 0x3cf   : > { %3578 = vmatpush.msra.mxu0 %v3070_v21  ;;  %3643 = vmatpush.msra.mxu1 %v3166_v32  ;;  %v3160_v32 = vld [vmem:[#allocation8 + $0x9c0] sm:$0xff] }
 0x3d0   : > { %v2314_v3 = vpop.f32.mrf.mxu2  ;;  %3451 = vmatpush.msra.mxu2 %v2860_v31  ;;  %v2262_v31 = vadd.f32 %v8410_v18, %v8403_v29  ;;  %v2848_v18 = vld [vmem:[#allocation8] sm:$0xff] }
 0x3d1   : > { %v2315_v47 = vadd.f32 %v2314_v3, %v2250_v22  ;;  %v2379_v30 = vpop.f32.mrf.mxu3  ;;  %3644 = vmatpush.msra.mxu1 %v3160_v32  ;;  %v3154_v32 = vld [vmem:[#allocation8 + $0x990] sm:$0xff]  ;;  %v2944_v29 = vld [vmem:[#allocation8 + $0x300] sm:$0xff] }
 0x3d2   : > { %v8617_v14 = vpop.f32.mrf.mxu0  ;;  %3452 = vmatpush.msra.mxu2 %v2854_v58  ;;  %v2265_v58 = vadd.f32 %v8427_v23, %v8420_v49  ;;  %v3322_v49 = vld [vmem:[#allocation8 + $0xed0] sm:$0xff] }
 0x3d3   : > { %v8619_v19 = vadd.f32 %v2379_v30, %v2315_v47  ;;  %v8621_v33 = vpop.f32.mrf.mxu1  ;;  %3645 = vmatpush.msra.mxu1 %v3154_v32  ;;  %v3148_v32 = vld [vmem:[#allocation8 + $0x960] sm:$0xff]  ;;  %v3418_v23 = vld [vmem:[#allocation8 + $0x11d0] sm:$0xff] }
 0x3d4   : > { %3453 = vmatpush.msra.mxu2 %v2848_v18  ;;  %v2268_v18 = vadd.f32 %v8444_v12, %v8437_v37  ;;  %v3316_v37 = vld [vmem:[#allocation8 + $0xea0] sm:$0xff]  ;;  %v2939_v12 = vld [vmem:[#allocation8 + $0x2d8] sm:$0xff] }
 0x3d5   : > { %6072 = vmatmul.msk.f32.gmra.mxu2 %vm2409_vm0, %v8355_v63  ;;  %6104 = vmatmul.msk.f32.gmra.mxu0 %vm2409_vm0, %v8355_v63 }
 0x3d6   : > { %6088 = vmatmul.msk.f32.gmra.mxu3 %vm2409_vm0, %v8355_v63  ;;  %6120 = vmatmul.msk.f32.gmra.mxu1 %vm2409_vm0, %v8355_v63  ;;  %v3064_v63 = vld [vmem:[#allocation8 + $0x6c0] sm:$0xff] }
 0x3d7   : > { %3579 = vmatpush.msra.mxu0 %v3064_v63  ;;  %3646 = vmatpush.msra.mxu1 %v3148_v32  ;;  %v3142_v32 = vld [vmem:[#allocation8 + $0x930] sm:$0xff] }
 0x3d8   : > { %v2317_v40 = vpop.f32.mrf.mxu2  ;;  %3698 = vmatpush.msrb.mxu2 %v3322_v49  ;;  %v2271_v49 = vadd.f32 %v8461_v43, %v8454_v53  ;;  %v3310_v53 = vld [vmem:[#allocation8 + $0xe70] sm:$0xff]  ;;  %v2933_v43 = vld [vmem:[#allocation8 + $0x2a8] sm:$0xff] }
 0x3d9   : > { %v2318_v4 = vadd.f32 %v2317_v40, %v2253_v1  ;;  %v2382_v22 = vpop.f32.mrf.mxu3  ;;  %3647 = vmatpush.msra.mxu1 %v3142_v32 }
 0x3da   : > { %v8633_v3 = vpop.f32.mrf.mxu0  ;;  %3699 = vmatpush.msrb.mxu2 %v3316_v37  ;;  %v2274_v37 = vadd.f32 %v8478_v52, %v8471_v16  ;;  %v3304_v52 = vld [vmem:[#allocation8 + $0xe40] sm:$0xff] }
 0x3db   : > { %v8635_v47 = vadd.f32 %v2382_v22, %v2318_v4  ;;  %v8637_v30 = vpop.f32.mrf.mxu1  ;;  %v3400_v16 = vld [vmem:[#allocation8 + $0x1140] sm:$0xff] }
 0x3dc   : > { %3700 = vmatpush.msrb.mxu2 %v3310_v53  ;;  %v2277_v53 = vadd.f32 %v8495_v27, %v8488_v2  ;;  %v3298_v27 = vld [vmem:[#allocation8 + $0xe10] sm:$0xff] }
 0x3dd   : > { %10933 = vst [vmem:[#allocation56_spill] sm:$0xff] %v8635_v47  ;;  %6073 = vmatmul.msk.f32.gmra.mxu2 %vm2409_vm0, %v8372_v26  ;;  %6105 = vmatmul.msk.f32.gmra.mxu0 %vm2409_vm0, %v8372_v26 }
 0x3de   : > { %6089 = vmatmul.msk.f32.gmra.mxu3 %vm2409_vm0, %v8372_v26  ;;  %6121 = vmatmul.msk.f32.gmra.mxu1 %vm2409_vm0, %v8372_v26  ;;  %v3058_v26 = vld [vmem:[#allocation8 + $0x690] sm:$0xff] }
 0x3df   : > { %3580 = vmatpush.msra.mxu0 %v3058_v26  ;;  %3701 = vmatpush.msrb.mxu2 %v3304_v52  ;;  %v3394_v52 = vld [vmem:[#allocation8 + $0x1110] sm:$0xff] }
 0x3e0   : > { %v2320_v46 = vpop.f32.mrf.mxu2 }
 0x3e1   : > { %v2321_v21 = vadd.f32 %v2320_v46, %v2256_v54  ;;  %v2385_v1 = vpop.f32.mrf.mxu3  ;;  %3581 = vmatpush.msra.mxu0 %v3052_v48  ;;  %3702 = vmatpush.msrb.mxu2 %v3298_v27  ;;  %v10952_v27 = vld [vmem:[#allocation31_spill] sm:$0xff] }
 0x3e2   : > { %v8649_v40 = vpop.f32.mrf.mxu0 }
 0x3e3   : > { %v8651_v4 = vadd.f32 %v2385_v1, %v2321_v21  ;;  %v8653_v22 = vpop.f32.mrf.mxu1 }
 0x3e5   : > { %10934 = vst [vmem:[#allocation59_spill] sm:$0xff] %v8651_v4  ;;  %6074 = vmatmul.msk.f32.gmra.mxu2 %vm2409_vm0, %v8389_v57  ;;  %6106 = vmatmul.msk.f32.gmra.mxu0 %vm2409_vm0, %v8389_v57 }
 0x3e6   : > { %6090 = vmatmul.msk.f32.gmra.mxu3 %vm2409_vm0, %v8389_v57  ;;  %6122 = vmatmul.msk.f32.gmra.mxu1 %vm2409_vm0, %v8389_v57  ;;  %v2950_v57 = vld [vmem:[#allocation8 + $0x330] sm:$0xff] }
 0x3e7   : > { %3517 = vmatpush.msra.mxu3 %v2950_v57 }
 0x3e8   : > { %v2323_v34 = vpop.f32.mrf.mxu2 }
 0x3e9   : > { %v2324_v63 = vadd.f32 %v2323_v34, %v2259_v55  ;;  %v2388_v54 = vpop.f32.mrf.mxu3  ;;  %3518 = vmatpush.msra.mxu3 %v2944_v29 }
 0x3ea   : > { %v8665_v46 = vpop.f32.mrf.mxu0 }
 0x3eb   : > { %v8667_v21 = vadd.f32 %v2388_v54, %v2324_v63  ;;  %v8669_v1 = vpop.f32.mrf.mxu1  ;;  %3763 = vmatpush.msrb.mxu3 %v3418_v23 }
 0x3ed   : > { %10935 = vst [vmem:[#allocation98_spill] sm:$0xff] %v8667_v21  ;;  %6075 = vmatmul.msk.f32.gmra.mxu2 %vm2409_vm0, %v8406_v39  ;;  %6107 = vmatmul.msk.f32.gmra.mxu0 %vm2409_vm0, %v8406_v39 }
 0x3ee   : > { %6091 = vmatmul.msk.f32.gmra.mxu3 %vm2409_vm0, %v8406_v39  ;;  %6123 = vmatmul.msk.f32.gmra.mxu1 %vm2409_vm0, %v8406_v39  ;;  %v3046_v39 = vld [vmem:[#allocation8 + $0x630] sm:$0xff] }
 0x3ef   : > { %3582 = vmatpush.msra.mxu0 %v3046_v39 }
 0x3f0   : > { %v2326_v41 = vpop.f32.mrf.mxu2 }
 0x3f1   : > { %v2327_v26 = vadd.f32 %v2326_v41, %v2262_v31  ;;  %v2391_v55 = vpop.f32.mrf.mxu3 }
 0x3f2   : > { %v8681_v34 = vpop.f32.mrf.mxu0 }
 0x3f3   : > { %v8683_v63 = vadd.f32 %v2391_v55, %v2327_v26  ;;  %v8685_v54 = vpop.f32.mrf.mxu1 }
 0x3f5   : > { %10936 = vst [vmem:[#allocation99_spill] sm:$0xff] %v8683_v63  ;;  %6076 = vmatmul.msk.f32.gmra.mxu2 %vm2409_vm0, %v8423_v9  ;;  %6108 = vmatmul.msk.f32.gmra.mxu0 %vm2409_vm0, %v8423_v9 }
 0x3f6   : > { %6092 = vmatmul.msk.f32.gmra.mxu3 %vm2409_vm0, %v8423_v9  ;;  %6124 = vmatmul.msk.f32.gmra.mxu1 %vm2409_vm0, %v8423_v9  ;;  %v3040_v9 = vld [vmem:[#allocation8 + $0x600] sm:$0xff] }
 0x3f7   : > { %3583 = vmatpush.msra.mxu0 %v3040_v9 }
 0x3f8   : > { %v2329_v57 = vpop.f32.mrf.mxu2 }
 0x3f9   : > { %v2330_v48 = vadd.f32 %v2329_v57, %v2265_v58  ;;  %v2394_v31 = vpop.f32.mrf.mxu3  ;;  %3828 = vmatpush.msrb.mxu0 %v2939_v12 }
 0x3fa   : > { %v8697_v41 = vpop.f32.mrf.mxu0 }
 0x3fb   : > { %v8699_v26 = vadd.f32 %v2394_v31, %v2330_v48  ;;  %v8701_v55 = vpop.f32.mrf.mxu1  ;;  %v3136_v48 = vld [vmem:[#allocation8 + $0x900] sm:$0xff]  ;;  %3829 = vmatpush.msrb.mxu0 %v2933_v43 }
 0x3fc   : > { %3648 = vmatpush.msra.mxu1 %v3136_v48 }
 0x3fd   : > { %10937 = vst [vmem:[#allocation100_spill] sm:$0xff] %v8699_v26  ;;  %6077 = vmatmul.msk.f32.gmra.mxu2 %vm2409_vm0, %v8440_v13  ;;  %6109 = vmatmul.msk.f32.gmra.mxu0 %vm2409_vm0, %v8440_v13 }
 0x3fe   : > { %6093 = vmatmul.msk.f32.gmra.mxu3 %vm2409_vm0, %v8440_v13  ;;  %6125 = vmatmul.msk.f32.gmra.mxu1 %vm2409_vm0, %v8440_v13  ;;  %v3412_v13 = vld [vmem:[#allocation8 + $0x11a0] sm:$0xff] }
 0x3ff   : > { %3764 = vmatpush.msrb.mxu3 %v3412_v13 }
 0x400   : > { %v2332_v29 = vpop.f32.mrf.mxu2 }
 0x401   : > { %v2333_v39 = vadd.f32 %v2332_v29, %v2268_v18  ;;  %v2397_v58 = vpop.f32.mrf.mxu3 }
 0x402   : > { %v8713_v57 = vpop.f32.mrf.mxu0 }
 0x403   : > { %v8715_v31 = vadd.f32 %v2397_v58, %v2333_v39  ;;  %v8717_v32 = vpop.f32.mrf.mxu1  ;;  %v3035_v39 = vld [vmem:[#allocation8 + $0x5d8] sm:$0xff] }
 0x404   : > { %3893 = vmatpush.msrb.mxu1 %v3035_v39 }
 0x405   : > { %10938 = vst [vmem:[#allocation101_spill] sm:$0xff] %v8715_v31  ;;  %6078 = vmatmul.msk.f32.gmra.mxu2 %vm2409_vm0, %v8457_v25  ;;  %6110 = vmatmul.msk.f32.gmra.mxu0 %vm2409_vm0, %v8457_v25 }
 0x406   : > { %6094 = vmatmul.msk.f32.gmra.mxu3 %vm2409_vm0, %v8457_v25  ;;  %6126 = vmatmul.msk.f32.gmra.mxu1 %vm2409_vm0, %v8457_v25  ;;  %v3406_v25 = vld [vmem:[#allocation8 + $0x1170] sm:$0xff] }
 0x407   : > { %3765 = vmatpush.msrb.mxu3 %v3406_v25 }
 0x408   : > { %v2335_v9 = vpop.f32.mrf.mxu2 }
 0x409   : > { %v2336_v23 = vadd.f32 %v2335_v9, %v2271_v49  ;;  %v2400_v18 = vpop.f32.mrf.mxu3  ;;  %3766 = vmatpush.msrb.mxu3 %v3400_v16  ;;  %v2921_v16 = vld [vmem:[#allocation8 + $0x248] sm:$0xff] }
 0x40a   : > { %v8729_v29 = vpop.f32.mrf.mxu0 }
 0x40b   : > { %v8731_v58 = vadd.f32 %v2400_v18, %v2336_v23  ;;  %v8733_v48 = vpop.f32.mrf.mxu1  ;;  %v3029_v23 = vld [vmem:[#allocation8 + $0x5a8] sm:$0xff]  ;;  %3767 = vmatpush.msrb.mxu3 %v3394_v52  ;;  %v8794_v52 = vadd.f32 %v8525_v60, %v10952_v27 }
 0x40c   : > { %3894 = vmatpush.msrb.mxu1 %v3029_v23 }
 0x40d   : > { %10939 = vst [vmem:[#allocation102_spill] sm:$0xff] %v8731_v58  ;;  %6079 = vmatmul.msk.f32.gmra.mxu2 %vm2409_vm0, %v8474_v51  ;;  %6111 = vmatmul.msk.f32.gmra.mxu0 %vm2409_vm0, %v8474_v51  ;;  %v10944_v58 = vld [vmem:[#allocation26_spill] sm:$0xff] }
 0x40e   : > { %6095 = vmatmul.msk.f32.gmra.mxu3 %vm2409_vm0, %v8474_v51  ;;  %6127 = vmatmul.msk.f32.gmra.mxu1 %vm2409_vm0, %v8474_v51  ;;  %v2927_v51 = vld [vmem:[#allocation8 + $0x278] sm:$0xff]  ;;  %v8773_v2 = vadd.f32 %v8509_v17, %v10944_v58  ;;  %v3017_v58 = vld [vmem:[#allocation8 + $0x548] sm:$0xff]  ;;  %10953 = vst [vmem:[#allocation31_spill] sm:$0xff] %v8794_v52 }
 0x40f   : > { %3830 = vmatpush.msrb.mxu0 %v2927_v51  ;;  %v10946_v51 = vld [vmem:[#allocation22_spill] sm:$0xff] }
 0x410   : > { %v2338_v13 = vpop.f32.mrf.mxu2  ;;  %10945 = vst [vmem:[#allocation26_spill] sm:$0xff] %v8773_v2 }
 0x411   : > { %v2339_v12 = vadd.f32 %v2338_v13, %v2274_v37  ;;  %v2403_v49 = vpop.f32.mrf.mxu3  ;;  %3831 = vmatpush.msrb.mxu0 %v2921_v16  ;;  %v3292_v16 = vld [vmem:[#allocation8 + $0xde0] sm:$0xff] }
 0x412   : > { %v8745_v9 = vpop.f32.mrf.mxu0  ;;  %3703 = vmatpush.msrb.mxu2 %v3292_v16  ;;  %v10960_v16 = vld [vmem:[#allocation45_spill] sm:$0xff] }
 0x413   : > { %v8747_v18 = vadd.f32 %v2403_v49, %v2339_v12  ;;  %v8749_v39 = vpop.f32.mrf.mxu1  ;;  %v3023_v12 = vld [vmem:[#allocation8 + $0x578] sm:$0xff] }
 0x414   : > { %v10941_v49 = vld [vmem:[#allocation34_spill] sm:$0xff]  ;;  %3895 = vmatpush.msrb.mxu1 %v3023_v12  ;;  %v10950_v12 = vld [vmem:[#allocation35_spill] sm:$0xff] }
 0x415   : > { %10940 = vst [vmem:[#allocation103_spill] sm:$0xff] %v8747_v18  ;;  %6080 = vmatmul.msk.f32.gmra.mxu2 %vm2409_vm0, %v8491_v38  ;;  %6112 = vmatmul.msk.f32.gmra.mxu0 %vm2409_vm0, %v8491_v38  ;;  %v8765_v23 = vadd.f32 %v8505_v44, %v10941_v49  ;;  %v8787_v49 = vadd.f32 %v8521_v62, %v10950_v12  ;;  %v10956_v12 = vld [vmem:[#allocation54_spill] sm:$0xff] }
 0x416   : > { %6096 = vmatmul.msk.f32.gmra.mxu3 %vm2409_vm0, %v8491_v38  ;;  %6128 = vmatmul.msk.f32.gmra.mxu1 %vm2409_vm0, %v8491_v38 }
 0x417   : > { %10942 = vst [vmem:[#allocation34_spill] sm:$0xff] %v8765_v23  ;;  %3896 = vmatpush.msrb.mxu1 %v3017_v58 }
 0x418   : > { %v2341_v25 = vpop.f32.mrf.mxu2  ;;  %10951 = vst [vmem:[#allocation35_spill] sm:$0xff] %v8787_v49 }
 0x419   : > { %v2342_v43 = vadd.f32 %v2341_v25, %v2277_v53  ;;  %v2406_v37 = vpop.f32.mrf.mxu3 }
 0x41a   : > { %v8761_v13 = vpop.f32.mrf.mxu0 }
 0x41b   : > { %v8767_v38 = vadd.f32 %v2406_v37, %v2342_v43  ;;  %v8769_v18 = vpop.f32.mrf.mxu1  ;;  %v10948_v43 = vld [vmem:[#allocation51_spill] sm:$0xff] }
 0x41d   : > { %10943 = vst [vmem:[#allocation104_spill] sm:$0xff] %v8767_v38  ;;  %3454 = vmatmul.f32.vlgmr.msra.gmra.mxu2 %v8765_v23 }
 0x41e   : > { %3519 = vmatmul.f32.vlgmr.msra.gmra.mxu3 %v8773_v2 }
 0x420   : > { %v2605_v44 = vpop.f32.mrf.mxu2 }
 0x421   : > { %v8778_v53 = vadd.f32 %v2605_v44, %v10946_v51  ;;  %v2670_v25 = vpop.f32.mrf.mxu3  ;;  %v3388_v44 = vld [vmem:[#allocation8 + $0x10e0] sm:$0xff]  ;;  %v2915_v51 = vld [vmem:[#allocation8 + $0x218] sm:$0xff] }
 0x422   : > { %v8781_v37 = vadd.f32 %v2670_v25, %v10948_v43  ;;  %v8783_v17 = vpop.f32.mrf.mxu0  ;;  %3768 = vmatpush.msrb.mxu3 %v3388_v44  ;;  %3832 = vmatpush.msrb.mxu0 %v2915_v51  ;;  %v10954_v25 = vld [vmem:[#allocation24_spill] sm:$0xff]  ;;  %v8816_v44 = vadd.f32 %v8541_v0, %v10960_v16  ;;  %v3286_v51 = vld [vmem:[#allocation8 + $0xdb0] sm:$0xff] }
 0x423   : > { %10947 = vst [vmem:[#allocation22_spill] sm:$0xff] %v8778_v53  ;;  %v8789_v38 = vpop.f32.mrf.mxu1  ;;  %3584 = vmatmul.f32.vlgmr.msra.gmra.mxu0 %v8778_v53  ;;  %v10958_v53 = vld [vmem:[#allocation36_spill] sm:$0xff]  ;;  %3704 = vmatpush.msrb.mxu2 %v3286_v51  ;;  %v10968_v51 = vld [vmem:[#allocation50_spill] sm:$0xff] }
 0x424   : > { %10949 = vst [vmem:[#allocation51_spill] sm:$0xff] %v8781_v37  ;;  %3649 = vmatmul.f32.vlgmr.msra.gmra.mxu1 %v8781_v37  ;;  %v3011_v37 = vld [vmem:[#allocation8 + $0x518] sm:$0xff]  ;;  %v8809_v35 = vadd.f32 %v8537_v36, %v10958_v53  ;;  %v10962_v53 = vld [vmem:[#allocation28_spill] sm:$0xff] }
 0x425   : > { %3457 = vmatmul.f32.gmra.mxu2 %v8787_v49  ;;  %3897 = vmatpush.msrb.mxu1 %v3011_v37  ;;  %10961 = vst [vmem:[#allocation45_spill] sm:$0xff] %v8816_v44 }
 0x426   : > { %3522 = vmatmul.f32.gmra.mxu3 %v8794_v52  ;;  %10959 = vst [vmem:[#allocation36_spill] sm:$0xff] %v8809_v35 }
 0x428   : > { %v2608_v62 = vpop.f32.mrf.mxu2 }
 0x429   : > { %v8800_v43 = vadd.f32 %v2608_v62, %v10954_v25  ;;  %v2673_v58 = vpop.f32.mrf.mxu3  ;;  %v3382_v62 = vld [vmem:[#allocation8 + $0x10b0] sm:$0xff]  ;;  %v2909_v25 = vld [vmem:[#allocation8 + $0x1e8] sm:$0xff] }
 0x42a   : > { %v8803_v60 = vadd.f32 %v2673_v58, %v10956_v12  ;;  %v8805_v27 = vpop.f32.mrf.mxu0  ;;  %3769 = vmatpush.msrb.mxu3 %v3382_v62  ;;  %3833 = vmatpush.msrb.mxu0 %v2909_v25  ;;  %v10964_v12 = vld [vmem:[#allocation63_spill] sm:$0xff]  ;;  %v8838_v62 = vadd.f32 %v8557_v45, %v10968_v51 }
 0x42b   : > { %10955 = vst [vmem:[#allocation24_spill] sm:$0xff] %v8800_v43  ;;  %v8811_v31 = vpop.f32.mrf.mxu1  ;;  %3587 = vmatmul.f32.gmra.mxu0 %v8800_v43  ;;  %v10966_v43 = vld [vmem:[#allocation37_spill] sm:$0xff]  ;;  %v3280_v25 = vld [vmem:[#allocation8 + $0xd80] sm:$0xff] }
 0x42c   : > { %10957 = vst [vmem:[#allocation54_spill] sm:$0xff] %v8803_v60  ;;  %3652 = vmatmul.f32.gmra.mxu1 %v8803_v60  ;;  %v3005_v60 = vld [vmem:[#allocation8 + $0x4e8] sm:$0xff]  ;;  %v8831_v26 = vadd.f32 %v8553_v24, %v10966_v43  ;;  %3705 = vmatpush.msrb.mxu2 %v3280_v25  ;;  %v10976_v25 = vld [vmem:[#allocation55_spill] sm:$0xff] }
 0x42d   : > { %3460 = vmatmul.f32.gmra.mxu2 %v8809_v35  ;;  %3898 = vmatpush.msrb.mxu1 %v3005_v60  ;;  %10969 = vst [vmem:[#allocation50_spill] sm:$0xff] %v8838_v62  ;;  %v10970_v43 = vld [vmem:[#allocation29_spill] sm:$0xff] }
 0x42e   : > { %3525 = vmatmul.f32.gmra.mxu3 %v8816_v44  ;;  %10967 = vst [vmem:[#allocation37_spill] sm:$0xff] %v8831_v26 }
 0x430   : > { %v2611_v36 = vpop.f32.mrf.mxu2 }
 0x431   : > { %v8822_v58 = vadd.f32 %v2611_v36, %v10962_v53  ;;  %v2676_v37 = vpop.f32.mrf.mxu3  ;;  %v3376_v36 = vld [vmem:[#allocation8 + $0x1080] sm:$0xff]  ;;  %v2903_v53 = vld [vmem:[#allocation8 + $0x1b8] sm:$0xff] }
 0x432   : > { %v8825_v0 = vadd.f32 %v2676_v37, %v10964_v12  ;;  %v8827_v16 = vpop.f32.mrf.mxu0  ;;  %3770 = vmatpush.msrb.mxu3 %v3376_v36  ;;  %3834 = vmatpush.msrb.mxu0 %v2903_v53  ;;  %v10972_v12 = vld [vmem:[#allocation67_spill] sm:$0xff]  ;;  %v8860_v36 = vadd.f32 %v8573_v56, %v10976_v25  ;;  %v3274_v53 = vld [vmem:[#allocation8 + $0xd50] sm:$0xff] }
 0x433   : > { %10963 = vst [vmem:[#allocation28_spill] sm:$0xff] %v8822_v58  ;;  %v8833_v63 = vpop.f32.mrf.mxu1  ;;  %3590 = vmatmul.f32.gmra.mxu0 %v8822_v58  ;;  %v10974_v58 = vld [vmem:[#allocation38_spill] sm:$0xff]  ;;  %3706 = vmatpush.msrb.mxu2 %v3274_v53  ;;  %v10984_v53 = vld [vmem:[#allocation60_spill] sm:$0xff] }
 0x434   : > { %10965 = vst [vmem:[#allocation63_spill] sm:$0xff] %v8825_v0  ;;  %3655 = vmatmul.f32.gmra.mxu1 %v8825_v0  ;;  %v2999_v0 = vld [vmem:[#allocation8 + $0x4b8] sm:$0xff]  ;;  %v8853_v10 = vadd.f32 %v8569_v5, %v10974_v58  ;;  %v10978_v58 = vld [vmem:[#allocation25_spill] sm:$0xff] }
 0x435   : > { %3463 = vmatmul.f32.gmra.mxu2 %v8831_v26  ;;  %3899 = vmatpush.msrb.mxu1 %v2999_v0  ;;  %10977 = vst [vmem:[#allocation55_spill] sm:$0xff] %v8860_v36 }
 0x436   : > { %3528 = vmatmul.f32.gmra.mxu3 %v8838_v62  ;;  %10975 = vst [vmem:[#allocation38_spill] sm:$0xff] %v8853_v10 }
 0x438   : > { %v2614_v24 = vpop.f32.mrf.mxu2 }
 0x439   : > { %v8844_v37 = vadd.f32 %v2614_v24, %v10970_v43  ;;  %v2679_v60 = vpop.f32.mrf.mxu3  ;;  %v3370_v24 = vld [vmem:[#allocation8 + $0x1050] sm:$0xff]  ;;  %v2897_v43 = vld [vmem:[#allocation8 + $0x188] sm:$0xff] }
 0x43a   : > { %v8847_v45 = vadd.f32 %v2679_v60, %v10972_v12  ;;  %v8849_v51 = vpop.f32.mrf.mxu0  ;;  %3771 = vmatpush.msrb.mxu3 %v3370_v24  ;;  %3835 = vmatpush.msrb.mxu0 %v2897_v43  ;;  %v10980_v12 = vld [vmem:[#allocation66_spill] sm:$0xff]  ;;  %v8882_v24 = vadd.f32 %v8589_v11, %v10984_v53  ;;  %v3268_v43 = vld [vmem:[#allocation8 + $0xd20] sm:$0xff] }
 0x43b   : > { %10971 = vst [vmem:[#allocation29_spill] sm:$0xff] %v8844_v37  ;;  %v8855_v21 = vpop.f32.mrf.mxu1  ;;  %3593 = vmatmul.f32.gmra.mxu0 %v8844_v37  ;;  %v10982_v37 = vld [vmem:[#allocation39_spill] sm:$0xff]  ;;  %3707 = vmatpush.msrb.mxu2 %v3268_v43  ;;  %v10992_v43 = vld [vmem:[#allocation65_spill] sm:$0xff] }
 0x43c   : > { %10973 = vst [vmem:[#allocation67_spill] sm:$0xff] %v8847_v45  ;;  %3658 = vmatmul.f32.gmra.mxu1 %v8847_v45  ;;  %v2993_v45 = vld [vmem:[#allocation8 + $0x488] sm:$0xff]  ;;  %v8875_v50 = vadd.f32 %v8585_v8, %v10982_v37  ;;  %v10986_v37 = vld [vmem:[#allocation27_spill] sm:$0xff] }
 0x43d   : > { %3466 = vmatmul.f32.gmra.mxu2 %v8853_v10  ;;  %3900 = vmatpush.msrb.mxu1 %v2993_v45  ;;  %10985 = vst [vmem:[#allocation60_spill] sm:$0xff] %v8882_v24 }
 0x43e   : > { %3531 = vmatmul.f32.gmra.mxu3 %v8860_v36  ;;  %10983 = vst [vmem:[#allocation39_spill] sm:$0xff] %v8875_v50 }
 0x440   : > { %v2617_v5 = vpop.f32.mrf.mxu2 }
 0x441   : > { %v8866_v60 = vadd.f32 %v2617_v5, %v10978_v58  ;;  %v2682_v0 = vpop.f32.mrf.mxu3  ;;  %v3364_v5 = vld [vmem:[#allocation8 + $0x1020] sm:$0xff]  ;;  %v2891_v58 = vld [vmem:[#allocation8 + $0x158] sm:$0xff] }
 0x442   : > { %v8869_v56 = vadd.f32 %v2682_v0, %v10980_v12  ;;  %v8871_v25 = vpop.f32.mrf.mxu0  ;;  %3772 = vmatpush.msrb.mxu3 %v3364_v5  ;;  %3836 = vmatpush.msrb.mxu0 %v2891_v58  ;;  %v10988_v12 = vld [vmem:[#allocation80_spill] sm:$0xff]  ;;  %v8904_v5 = vadd.f32 %v8605_v20, %v10992_v43  ;;  %v3262_v58 = vld [vmem:[#allocation8 + $0xcf0] sm:$0xff] }
 0x443   : > { %10979 = vst [vmem:[#allocation25_spill] sm:$0xff] %v8866_v60  ;;  %v8877_v4 = vpop.f32.mrf.mxu1  ;;  %3596 = vmatmul.f32.gmra.mxu0 %v8866_v60  ;;  %v10990_v60 = vld [vmem:[#allocation40_spill] sm:$0xff]  ;;  %3708 = vmatpush.msrb.mxu2 %v3262_v58  ;;  %v11000_v58 = vld [vmem:[#allocation69_spill] sm:$0xff] }
 0x444   : > { %10981 = vst [vmem:[#allocation66_spill] sm:$0xff] %v8869_v56  ;;  %3661 = vmatmul.f32.gmra.mxu1 %v8869_v56  ;;  %v2987_v56 = vld [vmem:[#allocation8 + $0x458] sm:$0xff]  ;;  %v8897_v47 = vadd.f32 %v8601_v15, %v10990_v60  ;;  %v10994_v60 = vld [vmem:[#allocation33_spill] sm:$0xff] }
 0x445   : > { %3469 = vmatmul.f32.gmra.mxu2 %v8875_v50  ;;  %3901 = vmatpush.msrb.mxu1 %v2987_v56  ;;  %10993 = vst [vmem:[#allocation65_spill] sm:$0xff] %v8904_v5 }
 0x446   : > { %3534 = vmatmul.f32.gmra.mxu3 %v8882_v24  ;;  %10991 = vst [vmem:[#allocation40_spill] sm:$0xff] %v8897_v47 }
 0x448   : > { %v2620_v8 = vpop.f32.mrf.mxu2 }
 0x449   : > { %v8888_v0 = vadd.f32 %v2620_v8, %v10986_v37  ;;  %v2685_v45 = vpop.f32.mrf.mxu3  ;;  %v3358_v8 = vld [vmem:[#allocation8 + $0xff0] sm:$0xff]  ;;  %v2885_v37 = vld [vmem:[#allocation8 + $0x128] sm:$0xff] }
 0x44a   : > { %v8891_v11 = vadd.f32 %v2685_v45, %v10988_v12  ;;  %v8893_v53 = vpop.f32.mrf.mxu0  ;;  %3773 = vmatpush.msrb.mxu3 %v3358_v8  ;;  %3837 = vmatpush.msrb.mxu0 %v2885_v37  ;;  %v10996_v12 = vld [vmem:[#allocation82_spill] sm:$0xff]  ;;  %v8926_v8 = vadd.f32 %v8621_v33, %v11000_v58  ;;  %v3256_v37 = vld [vmem:[#allocation8 + $0xcc0] sm:$0xff] }
 0x44b   : > { %10987 = vst [vmem:[#allocation27_spill] sm:$0xff] %v8888_v0  ;;  %v8899_v24 = vpop.f32.mrf.mxu1  ;;  %3599 = vmatmul.f32.gmra.mxu0 %v8888_v0  ;;  %v10998_v0 = vld [vmem:[#allocation41_spill] sm:$0xff]  ;;  %3709 = vmatpush.msrb.mxu2 %v3256_v37  ;;  %v11008_v37 = vld [vmem:[#allocation70_spill] sm:$0xff] }
 0x44c   : > { %10989 = vst [vmem:[#allocation80_spill] sm:$0xff] %v8891_v11  ;;  %3664 = vmatmul.f32.gmra.mxu1 %v8891_v11  ;;  %v2981_v11 = vld [vmem:[#allocation8 + $0x428] sm:$0xff] }
 0x44d   : > { %3472 = vmatmul.f32.gmra.mxu2 %v8897_v47  ;;  %3902 = vmatpush.msrb.mxu1 %v2981_v11  ;;  %11001 = vst [vmem:[#allocation69_spill] sm:$0xff] %v8926_v8 }
 0x44e   : > { %3537 = vmatmul.f32.gmra.mxu3 %v8904_v5  ;;  %v8919_v5 = vadd.f32 %v8617_v14, %v10998_v0  ;;  %v11002_v0 = vld [vmem:[#allocation43_spill] sm:$0xff] }
 0x450   : > { %v2623_v15 = vpop.f32.mrf.mxu2  ;;  %10999 = vst [vmem:[#allocation41_spill] sm:$0xff] %v8919_v5 }
 0x451   : > { %v8910_v45 = vadd.f32 %v2623_v15, %v10994_v60  ;;  %v2688_v56 = vpop.f32.mrf.mxu3  ;;  %v3352_v15 = vld [vmem:[#allocation8 + $0xfc0] sm:$0xff]  ;;  %v2879_v60 = vld [vmem:[#allocation8 + $0xf8] sm:$0xff] }
 0x452   : > { %v8913_v20 = vadd.f32 %v2688_v56, %v10996_v12  ;;  %v8915_v43 = vpop.f32.mrf.mxu0  ;;  %3774 = vmatpush.msrb.mxu3 %v3352_v15  ;;  %3838 = vmatpush.msrb.mxu0 %v2879_v60  ;;  %v11004_v12 = vld [vmem:[#allocation84_spill] sm:$0xff]  ;;  %v8948_v15 = vadd.f32 %v8637_v30, %v11008_v37  ;;  %v3250_v60 = vld [vmem:[#allocation8 + $0xc90] sm:$0xff] }
 0x453   : > { %10995 = vst [vmem:[#allocation33_spill] sm:$0xff] %v8910_v45  ;;  %v8921_v47 = vpop.f32.mrf.mxu1  ;;  %3602 = vmatmul.f32.gmra.mxu0 %v8910_v45  ;;  %v11006_v45 = vld [vmem:[#allocation42_spill] sm:$0xff]  ;;  %3710 = vmatpush.msrb.mxu2 %v3250_v60  ;;  %v11016_v60 = vld [vmem:[#allocation71_spill] sm:$0xff] }
 0x454   : > { %10997 = vst [vmem:[#allocation82_spill] sm:$0xff] %v8913_v20  ;;  %3667 = vmatmul.f32.gmra.mxu1 %v8913_v20  ;;  %v2975_v20 = vld [vmem:[#allocation8 + $0x3f8] sm:$0xff] }
 0x455   : > { %3475 = vmatmul.f32.gmra.mxu2 %v8919_v5  ;;  %3903 = vmatpush.msrb.mxu1 %v2975_v20  ;;  %11009 = vst [vmem:[#allocation70_spill] sm:$0xff] %v8948_v15 }
 0x456   : > { %3540 = vmatmul.f32.gmra.mxu3 %v8926_v8  ;;  %v8941_v8 = vadd.f32 %v8633_v3, %v11006_v45  ;;  %v11010_v45 = vld [vmem:[#allocation30_spill] sm:$0xff] }
 0x458   : > { %v2626_v14 = vpop.f32.mrf.mxu2  ;;  %11007 = vst [vmem:[#allocation42_spill] sm:$0xff] %v8941_v8 }
 0x459   : > { %v8932_v56 = vadd.f32 %v2626_v14, %v11002_v0  ;;  %v2691_v11 = vpop.f32.mrf.mxu3  ;;  %v3346_v14 = vld [vmem:[#allocation8 + $0xf90] sm:$0xff]  ;;  %v2873_v0 = vld [vmem:[#allocation8 + $0xc8] sm:$0xff] }
 0x45a   : > { %v8935_v33 = vadd.f32 %v2691_v11, %v11004_v12  ;;  %v8937_v58 = vpop.f32.mrf.mxu0  ;;  %3775 = vmatpush.msrb.mxu3 %v3346_v14  ;;  %3839 = vmatpush.msrb.mxu0 %v2873_v0  ;;  %v11012_v12 = vld [vmem:[#allocation85_spill] sm:$0xff]  ;;  %v8970_v14 = vadd.f32 %v8653_v22, %v11016_v60  ;;  %v3244_v0 = vld [vmem:[#allocation8 + $0xc60] sm:$0xff] }
 0x45b   : > { %11003 = vst [vmem:[#allocation43_spill] sm:$0xff] %v8932_v56  ;;  %v8943_v5 = vpop.f32.mrf.mxu1  ;;  %3605 = vmatmul.f32.gmra.mxu0 %v8932_v56  ;;  %v11014_v56 = vld [vmem:[#allocation16_spill] sm:$0xff]  ;;  %3711 = vmatpush.msrb.mxu2 %v3244_v0  ;;  %v11024_v0 = vld [vmem:[#allocation73_spill] sm:$0xff] }
 0x45c   : > { %11005 = vst [vmem:[#allocation84_spill] sm:$0xff] %v8935_v33  ;;  %3670 = vmatmul.f32.gmra.mxu1 %v8935_v33  ;;  %v2969_v33 = vld [vmem:[#allocation8 + $0x3c8] sm:$0xff] }
 0x45d   : > { %3478 = vmatmul.f32.gmra.mxu2 %v8941_v8  ;;  %3904 = vmatpush.msrb.mxu1 %v2969_v33  ;;  %11017 = vst [vmem:[#allocation71_spill] sm:$0xff] %v8970_v14 }
 0x45e   : > { %3543 = vmatmul.f32.gmra.mxu3 %v8948_v15  ;;  %v8963_v15 = vadd.f32 %v8649_v40, %v11014_v56  ;;  %v11018_v56 = vld [vmem:[#allocation32_spill] sm:$0xff] }
 0x460   : > { %v2629_v3 = vpop.f32.mrf.mxu2  ;;  %11015 = vst [vmem:[#allocation16_spill] sm:$0xff] %v8963_v15 }
 0x461   : > { %v8954_v11 = vadd.f32 %v2629_v3, %v11010_v45  ;;  %v2694_v20 = vpop.f32.mrf.mxu3  ;;  %v3340_v3 = vld [vmem:[#allocation8 + $0xf60] sm:$0xff]  ;;  %v2867_v45 = vld [vmem:[#allocation8 + $0x98] sm:$0xff] }
 0x462   : > { %v8957_v30 = vadd.f32 %v2694_v20, %v11012_v12  ;;  %v8959_v37 = vpop.f32.mrf.mxu0  ;;  %3776 = vmatpush.msrb.mxu3 %v3340_v3  ;;  %3840 = vmatpush.msrb.mxu0 %v2867_v45  ;;  %v11020_v12 = vld [vmem:[#allocation87_spill] sm:$0xff]  ;;  %v8992_v3 = vadd.f32 %v8669_v1, %v11024_v0  ;;  %v3238_v45 = vld [vmem:[#allocation8 + $0xc30] sm:$0xff] }
 0x463   : > { %11011 = vst [vmem:[#allocation30_spill] sm:$0xff] %v8954_v11  ;;  %v8965_v8 = vpop.f32.mrf.mxu1  ;;  %3608 = vmatmul.f32.gmra.mxu0 %v8954_v11  ;;  %v11022_v11 = vld [vmem:[#allocation17_spill] sm:$0xff]  ;;  %3712 = vmatpush.msrb.mxu2 %v3238_v45  ;;  %v11032_v45 = vld [vmem:[#allocation75_spill] sm:$0xff] }
 0x464   : > { %11013 = vst [vmem:[#allocation85_spill] sm:$0xff] %v8957_v30  ;;  %3673 = vmatmul.f32.gmra.mxu1 %v8957_v30  ;;  %v2963_v30 = vld [vmem:[#allocation8 + $0x398] sm:$0xff] }
 0x465   : > { %3481 = vmatmul.f32.gmra.mxu2 %v8963_v15  ;;  %3905 = vmatpush.msrb.mxu1 %v2963_v30  ;;  %11025 = vst [vmem:[#allocation73_spill] sm:$0xff] %v8992_v3 }
 0x466   : > { %3546 = vmatmul.f32.gmra.mxu3 %v8970_v14  ;;  %v8985_v14 = vadd.f32 %v8665_v46, %v11022_v11  ;;  %v11026_v11 = vld [vmem:[#allocation47_spill] sm:$0xff] }
 0x468   : > { %v2632_v40 = vpop.f32.mrf.mxu2  ;;  %11023 = vst [vmem:[#allocation17_spill] sm:$0xff] %v8985_v14 }
 0x469   : > { %v8976_v20 = vadd.f32 %v2632_v40, %v11018_v56  ;;  %v2697_v33 = vpop.f32.mrf.mxu3  ;;  %v3334_v40 = vld [vmem:[#allocation8 + $0xf30] sm:$0xff]  ;;  %v2861_v56 = vld [vmem:[#allocation8 + $0x68] sm:$0xff] }
 0x46a   : > { %v8979_v22 = vadd.f32 %v2697_v33, %v11020_v12  ;;  %v8981_v60 = vpop.f32.mrf.mxu0  ;;  %3777 = vmatpush.msrb.mxu3 %v3334_v40  ;;  %3841 = vmatpush.msrb.mxu0 %v2861_v56  ;;  %v11028_v12 = vld [vmem:[#allocation88_spill] sm:$0xff]  ;;  %v9014_v40 = vadd.f32 %v8685_v54, %v11032_v45 }
 0x46b   : > { %11019 = vst [vmem:[#allocation32_spill] sm:$0xff] %v8976_v20  ;;  %v8987_v15 = vpop.f32.mrf.mxu1  ;;  %3611 = vmatmul.f32.gmra.mxu0 %v8976_v20  ;;  %v11030_v20 = vld [vmem:[#allocation18_spill] sm:$0xff]  ;;  %v3232_v56 = vld [vmem:[#allocation8 + $0xc00] sm:$0xff] }
 0x46c   : > { %11021 = vst [vmem:[#allocation87_spill] sm:$0xff] %v8979_v22  ;;  %3676 = vmatmul.f32.gmra.mxu1 %v8979_v22  ;;  %v2957_v22 = vld [vmem:[#allocation8 + $0x368] sm:$0xff]  ;;  %3713 = vmatpush.msrb.mxu2 %v3232_v56 }
 0x46d   : > { %3484 = vmatmul.f32.gmra.mxu2 %v8985_v14  ;;  %3906 = vmatpush.msrb.mxu1 %v2957_v22  ;;  %11033 = vst [vmem:[#allocation75_spill] sm:$0xff] %v9014_v40  ;;  %v11040_v56 = vld [vmem:[#allocation76_spill] sm:$0xff] }
 0x46e   : > { %3549 = vmatmul.f32.gmra.mxu3 %v8992_v3  ;;  %v9007_v3 = vadd.f32 %v8681_v34, %v11030_v20  ;;  %v11034_v20 = vld [vmem:[#allocation48_spill] sm:$0xff] }
 0x470   : > { %v2635_v46 = vpop.f32.mrf.mxu2  ;;  %11031 = vst [vmem:[#allocation18_spill] sm:$0xff] %v9007_v3 }
 0x471   : > { %v8998_v33 = vadd.f32 %v2635_v46, %v11026_v11  ;;  %v2700_v30 = vpop.f32.mrf.mxu3  ;;  %v3328_v46 = vld [vmem:[#allocation8 + $0xf00] sm:$0xff]  ;;  %v2855_v11 = vld [vmem:[#allocation8 + $0x38] sm:$0xff] }
 0x472   : > { %v9001_v1 = vadd.f32 %v2700_v30, %v11028_v12  ;;  %v9003_v0 = vpop.f32.mrf.mxu0  ;;  %3778 = vmatpush.msrb.mxu3 %v3328_v46  ;;  %3842 = vmatpush.msrb.mxu0 %v2855_v11  ;;  %v11036_v12 = vld [vmem:[#allocation89_spill] sm:$0xff]  ;;  %v9036_v46 = vadd.f32 %v8701_v55, %v11040_v56  ;;  %v3131_v11 = vld [vmem:[#allocation8 + $0x8d8] sm:$0xff] }
 0x473   : > { %11027 = vst [vmem:[#allocation47_spill] sm:$0xff] %v8998_v33  ;;  %v9009_v14 = vpop.f32.mrf.mxu1  ;;  %3614 = vmatmul.f32.gmra.mxu0 %v8998_v33  ;;  %v11038_v33 = vld [vmem:[#allocation19_spill] sm:$0xff]  ;;  %3958 = vmatpush.msra.mxu2 %v3131_v11  ;;  %v2945_v56 = vld [vmem:[#allocation8 + $0x308] sm:$0xff] }
 0x474   : > { %11029 = vst [vmem:[#allocation88_spill] sm:$0xff] %v9001_v1  ;;  %3679 = vmatmul.f32.gmra.mxu1 %v9001_v1  ;;  %v2951_v1 = vld [vmem:[#allocation8 + $0x338] sm:$0xff] }
 0x475   : > { %3487 = vmatmul.f32.gmra.mxu2 %v9007_v3  ;;  %3907 = vmatpush.msrb.mxu1 %v2951_v1  ;;  %11041 = vst [vmem:[#allocation76_spill] sm:$0xff] %v9036_v46 }
 0x476   : > { %3552 = vmatmul.f32.gmra.mxu3 %v9014_v40  ;;  %v9029_v40 = vadd.f32 %v8697_v41, %v11038_v33  ;;  %v11042_v33 = vld [vmem:[#allocation44_spill] sm:$0xff] }
 0x477   : > { %3908 = vmatpush.msrb.mxu1 %v2945_v56 }
 0x478   : > { %v2638_v34 = vpop.f32.mrf.mxu2  ;;  %11039 = vst [vmem:[#allocation19_spill] sm:$0xff] %v9029_v40 }
 0x479   : > { %v9020_v30 = vadd.f32 %v2638_v34, %v11034_v20  ;;  %v2703_v22 = vpop.f32.mrf.mxu3  ;;  %v2849_v34 = vld [vmem:[#allocation8 + $0x8] sm:$0xff]  ;;  %v3227_v20 = vld [vmem:[#allocation8 + $0xbd8] sm:$0xff] }
 0x47a   : > { %v9023_v54 = vadd.f32 %v2703_v22, %v11036_v12  ;;  %v9025_v45 = vpop.f32.mrf.mxu0  ;;  %3843 = vmatpush.msrb.mxu0 %v2849_v34  ;;  %4023 = vmatpush.msra.mxu3 %v3227_v20  ;;  %v11044_v12 = vld [vmem:[#allocation90_spill] sm:$0xff] }
 0x47b   : > { %11035 = vst [vmem:[#allocation48_spill] sm:$0xff] %v9020_v30  ;;  %v9031_v3 = vpop.f32.mrf.mxu1  ;;  %3617 = vmatmul.f32.gmra.mxu0 %v9020_v30 }
 0x47c   : > { %11037 = vst [vmem:[#allocation89_spill] sm:$0xff] %v9023_v54  ;;  %3682 = vmatmul.f32.gmra.mxu1 %v9023_v54  ;;  %v11046_v54 = vld [vmem:[#allocation20_spill] sm:$0xff] }
 0x47d   : > { %3490 = vmatmul.f32.gmra.mxu2 %v9029_v40  ;;  %v9049_v30 = vadd.f32 %v8713_v57, %v11046_v54  ;;  %v3221_v57 = vld [vmem:[#allocation8 + $0xba8] sm:$0xff]  ;;  %v3323_v54 = vld [vmem:[#allocation8 + $0xed8] sm:$0xff] }
 0x47e   : > { %3555 = vmatmul.f32.gmra.mxu3 %v9036_v46  ;;  %v11048_v46 = vld [vmem:[#allocation77_spill] sm:$0xff]  ;;  %4088 = vmatpush.msra.mxu0 %v3323_v54  ;;  %v3419_v54 = vld [vmem:[#allocation8 + $0x11d8] sm:$0xff] }
 0x47f   : > { %11047 = vst [vmem:[#allocation20_spill] sm:$0xff] %v9049_v30  ;;  %v9054_v11 = vadd.f32 %v8717_v32, %v11048_v46  ;;  %4024 = vmatpush.msra.mxu3 %v3221_v57  ;;  %v11052_v46 = vld [vmem:[#allocation91_spill] sm:$0xff]  ;;  %4153 = vmatpush.msra.mxu1 %v3419_v54 }
 0x480   : > { %v2641_v41 = vpop.f32.mrf.mxu2 }
 0x481   : > { %v9042_v22 = vadd.f32 %v2641_v41, %v11042_v33  ;;  %v2706_v1 = vpop.f32.mrf.mxu3  ;;  %11049 = vst [vmem:[#allocation77_spill] sm:$0xff] %v9054_v11  ;;  %v3125_v41 = vld [vmem:[#allocation8 + $0x8a8] sm:$0xff] }
 0x482   : > { %v9045_v55 = vadd.f32 %v2706_v1, %v11044_v12  ;;  %v9056_v34 = vpop.f32.mrf.mxu0  ;;  %3959 = vmatpush.msra.mxu2 %v3125_v41  ;;  %v11050_v1 = vld [vmem:[#allocation46_spill] sm:$0xff] }
 0x483   : > { %11043 = vst [vmem:[#allocation44_spill] sm:$0xff] %v9042_v22  ;;  %3620 = vmatmul.f32.gmra.mxu0 %v9042_v22  ;;  %v9059_v20 = vpop.f32.mrf.mxu1 }
 0x484   : > { %11045 = vst [vmem:[#allocation90_spill] sm:$0xff] %v9045_v55  ;;  %3685 = vmatmul.f32.gmra.mxu1 %v9045_v55  ;;  %v11054_v55 = vld [vmem:[#allocation21_spill] sm:$0xff] }
 0x485   : > { %3493 = vmatmul.f32.gmra.mxu2 %v9049_v30  ;;  %v9071_v22 = vadd.f32 %v8729_v29, %v11054_v55  ;;  %v3215_v29 = vld [vmem:[#allocation8 + $0xb78] sm:$0xff] }
 0x486   : > { %3558 = vmatmul.f32.gmra.mxu3 %v9054_v11  ;;  %v11056_v11 = vld [vmem:[#allocation78_spill] sm:$0xff] }
 0x487   : > { %11055 = vst [vmem:[#allocation21_spill] sm:$0xff] %v9071_v22  ;;  %v9076_v30 = vadd.f32 %v8733_v48, %v11056_v11  ;;  %4025 = vmatpush.msra.mxu3 %v3215_v29  ;;  %v3113_v29 = vld [vmem:[#allocation8 + $0x848] sm:$0xff] }
 0x488   : > { %v2644_v33 = vpop.f32.mrf.mxu2 }
 0x489   : > { %v9064_v12 = vadd.f32 %v2644_v33, %v11050_v1  ;;  %v2709_v32 = vpop.f32.mrf.mxu3  ;;  %11057 = vst [vmem:[#allocation78_spill] sm:$0xff] %v9076_v30  ;;  %v3119_v33 = vld [vmem:[#allocation8 + $0x878] sm:$0xff]  ;;  %v3317_v1 = vld [vmem:[#allocation8 + $0xea8] sm:$0xff] }
 0x48a   : > { %v9067_v56 = vadd.f32 %v2709_v32, %v11052_v46  ;;  %v9080_v41 = vpop.f32.mrf.mxu0  ;;  %3960 = vmatpush.msra.mxu2 %v3119_v33  ;;  %v11058_v32 = vld [vmem:[#allocation52_spill] sm:$0xff]  ;;  %4089 = vmatpush.msra.mxu0 %v3317_v1 }
 0x48b   : > { %11051 = vst [vmem:[#allocation46_spill] sm:$0xff] %v9064_v12  ;;  %3623 = vmatmul.f32.gmra.mxu0 %v9064_v12  ;;  %v9083_v57 = vpop.f32.mrf.mxu1  ;;  %v11060_v46 = vld [vmem:[#allocation92_spill] sm:$0xff]  ;;  %v11062_v12 = vld [vmem:[#allocation23_spill] sm:$0xff] }
 0x48c   : > { %11053 = vst [vmem:[#allocation91_spill] sm:$0xff] %v9067_v56  ;;  %3688 = vmatmul.f32.gmra.mxu1 %v9067_v56  ;;  %v3413_v33 = vld [vmem:[#allocation8 + $0x11a8] sm:$0xff]  ;;  %3961 = vmatpush.msra.mxu2 %v3113_v29 }
 0x48d   : > { %3496 = vmatmul.f32.gmra.mxu2 %v9071_v22  ;;  %v11064_v22 = vld [vmem:[#allocation79_spill] sm:$0xff]  ;;  %4154 = vmatpush.msra.mxu1 %v3413_v33  ;;  %v9120_v33 = vadd.f32 %v8769_v18, %v8523_v59 }
 0x48e   : > { %3561 = vmatmul.f32.gmra.mxu3 %v9076_v30  ;;  %v9093_v30 = vadd.f32 %v8745_v9, %v11062_v12  ;;  %v9098_v54 = vadd.f32 %v8749_v39, %v11064_v22  ;;  %v3311_v9 = vld [vmem:[#allocation8 + $0xe78] sm:$0xff] }
 0x48f   : > { %4090 = vmatpush.msra.mxu0 %v3311_v9  ;;  %11072 = vst [vmem:[#allocation105_spill] sm:$0xff] %v9120_v33  ;;  %v3203_v9 = vld [vmem:[#allocation8 + $0xb18] sm:$0xff] }
 0x490   : > { %v2647_v55 = vpop.f32.mrf.mxu2  ;;  %11063 = vst [vmem:[#allocation23_spill] sm:$0xff] %v9093_v30 }
 0x491   : > { %v9086_v48 = vadd.f32 %v2647_v55, %v11058_v32  ;;  %v2712_v11 = vpop.f32.mrf.mxu3  ;;  %11065 = vst [vmem:[#allocation79_spill] sm:$0xff] %v9098_v54  ;;  %v3209_v55 = vld [vmem:[#allocation8 + $0xb48] sm:$0xff] }
 0x492   : > { %v9089_v56 = vadd.f32 %v2712_v11, %v11060_v46  ;;  %v9103_v1 = vpop.f32.mrf.mxu0  ;;  %v11066_v11 = vld [vmem:[#allocation53_spill] sm:$0xff]  ;;  %4026 = vmatpush.msra.mxu3 %v3209_v55  ;;  %v3407_v55 = vld [vmem:[#allocation8 + $0x1178] sm:$0xff] }
 0x493   : > { %11059 = vst [vmem:[#allocation52_spill] sm:$0xff] %v9086_v48  ;;  %3626 = vmatmul.f32.gmra.mxu0 %v9086_v48  ;;  %v9105_v12 = vpop.f32.mrf.mxu1  ;;  %v11068_v46 = vld [vmem:[#allocation93_spill] sm:$0xff]  ;;  %v3424_v48 = vld [vmem:[#allocation10] sm:$0x3f]  ;;  %4155 = vmatpush.msra.mxu1 %v3407_v55 }
 0x494   : > { %11061 = vst [vmem:[#allocation92_spill] sm:$0xff] %v9089_v56  ;;  %3691 = vmatmul.f32.gmra.mxu1 %v9089_v56  ;;  %v9124_v29 = vperm.slane %v3424_v48, 0  ;;  %4027 = vmatpush.msra.mxu3 %v3203_v9  ;;  %v3401_v9 = vld [vmem:[#allocation8 + $0x1148] sm:$0xff] }
 0x495   : > { %3499 = vmatmul.f32.gmra.mxu2 %v9093_v30  ;;  %4156 = vmatpush.msra.mxu1 %v3401_v9 }
 0x496   : > { %3564 = vmatmul.f32.gmra.mxu3 %v9098_v54  ;;  %v11070_v54 = vld [vmem:[#allocation94_spill] sm:$0xff] }
 0x497   : > { %v9115_v30 = vadd.f32 %v8761_v13, %v11070_v54  ;;  %v3305_v54 = vld [vmem:[#allocation8 + $0xe48] sm:$0xff] }
 0x498   : > { %v2650_v32 = vpop.f32.mrf.mxu2  ;;  %4091 = vmatpush.msra.mxu0 %v3305_v54 }
 0x499   : > { %v9108_v39 = vadd.f32 %v2650_v32, %v11066_v11  ;;  %v2715_v22 = vpop.f32.mrf.mxu3  ;;  %11071 = vst [vmem:[#allocation94_spill] sm:$0xff] %v9115_v30  ;;  %v3107_v32 = vld [vmem:[#allocation8 + $0x818] sm:$0xff] }
 0x49a   : > { %v9111_v56 = vadd.f32 %v2715_v22, %v11068_v46  ;;  %3962 = vmatpush.msra.mxu2 %v3107_v32  ;;  %v11073_v46 = vld [vmem:[#allocation49_spill] sm:$0xff] }
 0x49b   : > { %11067 = vst [vmem:[#allocation53_spill] sm:$0xff] %v9108_v39  ;;  %3629 = vmatmul.f32.gmra.mxu0 %v9108_v39  ;;  %v9130_v48 = vadd.f32 %v8783_v17, %v11073_v46  ;;  %v9135_v39 = vadd.f32 %v8789_v38, %v8539_v7  ;;  %v3197_v17 = vld [vmem:[#allocation8 + $0xae8] sm:$0xff] }
 0x49c   : > { %11069 = vst [vmem:[#allocation93_spill] sm:$0xff] %v9111_v56  ;;  %3694 = vmatmul.f32.gmra.mxu1 %v9111_v56  ;;  %4028 = vmatpush.msra.mxu3 %v3197_v17  ;;  %v3395_v17 = vld [vmem:[#allocation8 + $0x1118] sm:$0xff] }
 0x49d   : > { %3714 = vmatmul.f32.vlgmr.msrb.gmra.mxu2 %v9115_v30  ;;  %11074 = vst [vmem:[#allocation49_spill] sm:$0xff] %v9130_v48  ;;  %4157 = vmatpush.msra.mxu1 %v3395_v17 }
 0x49e   : > { %3779 = vmatmul.f32.vlgmr.msrb.gmra.mxu3 %v9120_v33  ;;  %11075 = vst [vmem:[#allocation106_spill] sm:$0xff] %v9135_v39 }
 0x4a0   : > { %v3455_v11 = vpop.f32.mrf.mxu2  ;;  %v3585_v13 = vpop.f32.mrf.mxu0 }
 0x4a1   : > { %v3456_v22 = vadd.f32 %v3455_v11, %v9124_v29  ;;  %v3520_v59 = vpop.f32.mrf.mxu3  ;;  %v3650_v18 = vpop.f32.mrf.mxu1  ;;  %v3101_v11 = vld [vmem:[#allocation8 + $0x7e8] sm:$0xff] }
 0x4a2   : > { %3963 = vmatpush.msra.mxu2 %v3101_v11 }
 0x4a3   : > { %v3521_v56 = vadd.f32 %v3520_v59, %v3456_v22  ;;  %3844 = vmatmul.f32.vlgmr.msrb.gmra.mxu0 %v8765_v23  ;;  %v3299_v59 = vld [vmem:[#allocation8 + $0xe18] sm:$0xff] }
 0x4a4   : > { %3909 = vmatmul.f32.vlgmr.msrb.gmra.mxu1 %v8773_v2  ;;  %4092 = vmatpush.msra.mxu0 %v3299_v59  ;;  %v11147_v2 = vld [vmem:[#allocation22_spill] sm:$0xff] }
 0x4a5   : > { %v3586_v55 = vadd.f32 %v3585_v13, %v3521_v56  ;;  %3717 = vmatmul.f32.gmra.mxu2 %v9130_v48  ;;  %v11076_v56 = vld [vmem:[#allocation57_spill] sm:$0xff] }
 0x4a6   : > { %3782 = vmatmul.f32.gmra.mxu3 %v9135_v39  ;;  %v9145_v13 = vadd.f32 %v8805_v27, %v11076_v56  ;;  %v3191_v27 = vld [vmem:[#allocation8 + $0xab8] sm:$0xff] }
 0x4a7   : > { %v9140_v32 = vadd.f32 %v3650_v18, %v3586_v55  ;;  %v9150_v55 = vadd.f32 %v8811_v31, %v8555_v42  ;;  %4029 = vmatpush.msra.mxu3 %v3191_v27  ;;  %v3389_v27 = vld [vmem:[#allocation8 + $0x10e8] sm:$0xff] }
 0x4a8   : > { %v3458_v54 = vpop.f32.mrf.mxu2  ;;  %v3588_v22 = vpop.f32.mrf.mxu0  ;;  %11077 = vst [vmem:[#allocation57_spill] sm:$0xff] %v9145_v13  ;;  %4158 = vmatpush.msra.mxu1 %v3389_v27 }
 0x4a9   : > { %v3459_v7 = vadd.f32 %v3458_v54, %v9124_v29  ;;  %v3523_v38 = vpop.f32.mrf.mxu3  ;;  %v3653_v46 = vpop.f32.mrf.mxu1  ;;  %11078 = vst [vmem:[#allocation107_spill] sm:$0xff] %v9150_v55  ;;  %v3095_v54 = vld [vmem:[#allocation8 + $0x7b8] sm:$0xff] }
 0x4aa   : > { %3964 = vmatpush.msra.mxu2 %v3095_v54 }
 0x4ab   : > { %v3524_v18 = vadd.f32 %v3523_v38, %v3459_v7  ;;  %3847 = vmatmul.f32.gmra.mxu0 %v8787_v49  ;;  %v3293_v38 = vld [vmem:[#allocation8 + $0xde8] sm:$0xff] }
 0x4ac   : > { %3912 = vmatmul.f32.gmra.mxu1 %v8794_v52  ;;  %4093 = vmatpush.msra.mxu0 %v3293_v38  ;;  %v3132_v52 = vld [vmem:[#allocation8 + $0x8e0] sm:$0xff] }
 0x4ad   : > { %v3589_v9 = vadd.f32 %v3588_v22, %v3524_v18  ;;  %3720 = vmatmul.f32.gmra.mxu2 %v9145_v13  ;;  %v11079_v22 = vld [vmem:[#allocation58_spill] sm:$0xff]  ;;  %v11142_v49 = vld [vmem:[#allocation104_spill] sm:$0xff] }
 0x4ae   : > { %3785 = vmatmul.f32.gmra.mxu3 %v9150_v55  ;;  %v9160_v18 = vadd.f32 %v8827_v16, %v11079_v22  ;;  %v3185_v16 = vld [vmem:[#allocation8 + $0xa88] sm:$0xff] }
 0x4af   : > { %v9155_v11 = vadd.f32 %v3653_v46, %v3589_v9  ;;  %v9165_v9 = vadd.f32 %v8833_v63, %v8571_v28  ;;  %4030 = vmatpush.msra.mxu3 %v3185_v16  ;;  %v3383_v16 = vld [vmem:[#allocation8 + $0x10b8] sm:$0xff] }
 0x4b0   : > { %v3461_v59 = vpop.f32.mrf.mxu2  ;;  %v3591_v7 = vpop.f32.mrf.mxu0  ;;  %11080 = vst [vmem:[#allocation58_spill] sm:$0xff] %v9160_v18  ;;  %4159 = vmatpush.msra.mxu1 %v3383_v16 }
 0x4b1   : > { %v3462_v42 = vadd.f32 %v3461_v59, %v9124_v29  ;;  %v3526_v31 = vpop.f32.mrf.mxu3  ;;  %v3656_v56 = vpop.f32.mrf.mxu1  ;;  %11081 = vst [vmem:[#allocation108_spill] sm:$0xff] %v9165_v9  ;;  %v3089_v59 = vld [vmem:[#allocation8 + $0x788] sm:$0xff] }
 0x4b2   : > { %3965 = vmatpush.msra.mxu2 %v3089_v59 }
 0x4b3   : > { %v3527_v46 = vadd.f32 %v3526_v31, %v3462_v42  ;;  %3850 = vmatmul.f32.gmra.mxu0 %v8809_v35  ;;  %v3287_v31 = vld [vmem:[#allocation8 + $0xdb8] sm:$0xff] }
 0x4b4   : > { %3915 = vmatmul.f32.gmra.mxu1 %v8816_v44  ;;  %4094 = vmatpush.msra.mxu0 %v3287_v31 }
 0x4b5   : > { %v3592_v17 = vadd.f32 %v3591_v7, %v3527_v46  ;;  %3723 = vmatmul.f32.gmra.mxu2 %v9160_v18  ;;  %v11082_v7 = vld [vmem:[#allocation62_spill] sm:$0xff] }
 0x4b6   : > { %3788 = vmatmul.f32.gmra.mxu3 %v9165_v9  ;;  %v9175_v46 = vadd.f32 %v8849_v51, %v11082_v7  ;;  %v3179_v51 = vld [vmem:[#allocation8 + $0xa58] sm:$0xff] }
 0x4b7   : > { %v9170_v54 = vadd.f32 %v3656_v56, %v3592_v17  ;;  %v9180_v17 = vadd.f32 %v8855_v21, %v8587_v61  ;;  %4031 = vmatpush.msra.mxu3 %v3179_v51  ;;  %v3377_v51 = vld [vmem:[#allocation8 + $0x1088] sm:$0xff] }
 0x4b8   : > { %v3464_v38 = vpop.f32.mrf.mxu2  ;;  %v3594_v42 = vpop.f32.mrf.mxu0  ;;  %11083 = vst [vmem:[#allocation62_spill] sm:$0xff] %v9175_v46  ;;  %4160 = vmatpush.msra.mxu1 %v3377_v51  ;;  %v11091_v51 = vld [vmem:[#allocation60_spill] sm:$0xff] }
 0x4b9   : > { %v3465_v28 = vadd.f32 %v3464_v38, %v9124_v29  ;;  %v3529_v63 = vpop.f32.mrf.mxu3  ;;  %v3659_v22 = vpop.f32.mrf.mxu1  ;;  %11084 = vst [vmem:[#allocation109_spill] sm:$0xff] %v9180_v17  ;;  %v3083_v38 = vld [vmem:[#allocation8 + $0x758] sm:$0xff] }
 0x4ba   : > { %3966 = vmatpush.msra.mxu2 %v3083_v38 }
 0x4bb   : > { %v3530_v56 = vadd.f32 %v3529_v63, %v3465_v28  ;;  %3853 = vmatmul.f32.gmra.mxu0 %v8831_v26  ;;  %v3281_v63 = vld [vmem:[#allocation8 + $0xd88] sm:$0xff] }
 0x4bc   : > { %3918 = vmatmul.f32.gmra.mxu1 %v8838_v62  ;;  %4095 = vmatpush.msra.mxu0 %v3281_v63 }
 0x4bd   : > { %v3595_v27 = vadd.f32 %v3594_v42, %v3530_v56  ;;  %3726 = vmatmul.f32.gmra.mxu2 %v9175_v46  ;;  %v11085_v42 = vld [vmem:[#allocation61_spill] sm:$0xff] }
 0x4be   : > { %3791 = vmatmul.f32.gmra.mxu3 %v9180_v17  ;;  %v9190_v56 = vadd.f32 %v8871_v25, %v11085_v42  ;;  %v3173_v25 = vld [vmem:[#allocation8 + $0xa28] sm:$0xff] }
 0x4bf   : > { %v9185_v59 = vadd.f32 %v3659_v22, %v3595_v27  ;;  %v9195_v27 = vadd.f32 %v8877_v4, %v8603_v6  ;;  %4032 = vmatpush.msra.mxu3 %v3173_v25 }
 0x4c0   : > { %v3467_v31 = vpop.f32.mrf.mxu2  ;;  %v3597_v28 = vpop.f32.mrf.mxu0  ;;  %11086 = vst [vmem:[#allocation61_spill] sm:$0xff] %v9190_v56 }
 0x4c1   : > { %v3468_v61 = vadd.f32 %v3467_v31, %v9124_v29  ;;  %v3532_v21 = vpop.f32.mrf.mxu3  ;;  %v3662_v7 = vpop.f32.mrf.mxu1  ;;  %11087 = vst [vmem:[#allocation110_spill] sm:$0xff] %v9195_v27  ;;  %v3077_v31 = vld [vmem:[#allocation8 + $0x728] sm:$0xff] }
 0x4c2   : > { %3967 = vmatpush.msra.mxu2 %v3077_v31 }
 0x4c3   : > { %v3533_v22 = vadd.f32 %v3532_v21, %v3468_v61  ;;  %3856 = vmatmul.f32.gmra.mxu0 %v8853_v10  ;;  %v3275_v21 = vld [vmem:[#allocation8 + $0xd58] sm:$0xff] }
 0x4c4   : > { %3921 = vmatmul.f32.gmra.mxu1 %v8860_v36  ;;  %4096 = vmatpush.msra.mxu0 %v3275_v21  ;;  %v3071_v21 = vld [vmem:[#allocation8 + $0x6f8] sm:$0xff] }
 0x4c5   : > { %v3598_v16 = vadd.f32 %v3597_v28, %v3533_v22  ;;  %3729 = vmatmul.f32.gmra.mxu2 %v9190_v56  ;;  %v11088_v28 = vld [vmem:[#allocation68_spill] sm:$0xff] }
 0x4c6   : > { %3794 = vmatmul.f32.gmra.mxu3 %v9195_v27  ;;  %v9205_v22 = vadd.f32 %v8893_v53, %v11088_v28  ;;  %v3167_v53 = vld [vmem:[#allocation8 + $0x9f8] sm:$0xff]  ;;  %3968 = vmatpush.msra.mxu2 %v3071_v21 }
 0x4c7   : > { %v9200_v38 = vadd.f32 %v3662_v7, %v3598_v16  ;;  %v9210_v16 = vadd.f32 %v8899_v24, %v8619_v19  ;;  %4033 = vmatpush.msra.mxu3 %v3167_v53 }
 0x4c8   : > { %v3470_v63 = vpop.f32.mrf.mxu2  ;;  %v3600_v61 = vpop.f32.mrf.mxu0  ;;  %11089 = vst [vmem:[#allocation68_spill] sm:$0xff] %v9205_v22 }
 0x4c9   : > { %v3471_v6 = vadd.f32 %v3470_v63, %v9124_v29  ;;  %v3535_v4 = vpop.f32.mrf.mxu3  ;;  %v3665_v42 = vpop.f32.mrf.mxu1  ;;  %11090 = vst [vmem:[#allocation111_spill] sm:$0xff] %v9210_v16  ;;  %v3371_v63 = vld [vmem:[#allocation8 + $0x1058] sm:$0xff] }
 0x4ca   : > { %4161 = vmatpush.msra.mxu1 %v3371_v63  ;;  %v11097_v63 = vld [vmem:[#allocation65_spill] sm:$0xff] }
 0x4cb   : > { %v3536_v7 = vadd.f32 %v3535_v4, %v3471_v6  ;;  %3859 = vmatmul.f32.gmra.mxu0 %v8875_v50  ;;  %v3269_v4 = vld [vmem:[#allocation8 + $0xd28] sm:$0xff] }
 0x4cc   : > { %3924 = vmatmul.f32.gmra.mxu1 %v11091_v51  ;;  %4097 = vmatpush.msra.mxu0 %v3269_v4  ;;  %v11095_v51 = vld [vmem:[#allocation56_spill] sm:$0xff] }
 0x4cd   : > { %v3601_v31 = vadd.f32 %v3600_v61, %v3536_v7  ;;  %3732 = vmatmul.f32.gmra.mxu2 %v9205_v22  ;;  %v11092_v61 = vld [vmem:[#allocation64_spill] sm:$0xff]  ;;  %v9225_v36 = vadd.f32 %v8921_v47, %v11095_v51 }
 0x4ce   : > { %3797 = vmatmul.f32.gmra.mxu3 %v9210_v16  ;;  %v9220_v7 = vadd.f32 %v8915_v43, %v11092_v61  ;;  %v3065_v4 = vld [vmem:[#allocation8 + $0x6c8] sm:$0xff] }
 0x4cf   : > { %v9215_v25 = vadd.f32 %v3665_v42, %v3601_v31  ;;  %v11094_v31 = vld [vmem:[#allocation40_spill] sm:$0xff]  ;;  %11096 = vst [vmem:[#allocation56_spill] sm:$0xff] %v9225_v36  ;;  %3969 = vmatpush.msra.mxu2 %v3065_v4 }
 0x4d0   : > { %v3473_v28 = vpop.f32.mrf.mxu2  ;;  %v3603_v6 = vpop.f32.mrf.mxu0  ;;  %11093 = vst [vmem:[#allocation64_spill] sm:$0xff] %v9220_v7  ;;  %v3161_v43 = vld [vmem:[#allocation8 + $0x9c8] sm:$0xff] }
 0x4d1   : > { %v3474_v19 = vadd.f32 %v3473_v28, %v9124_v29  ;;  %v3538_v24 = vpop.f32.mrf.mxu3  ;;  %v3668_v50 = vpop.f32.mrf.mxu1  ;;  %v3365_v28 = vld [vmem:[#allocation8 + $0x1028] sm:$0xff]  ;;  %4034 = vmatpush.msra.mxu3 %v3161_v43 }
 0x4d2   : > { %4162 = vmatpush.msra.mxu1 %v3365_v28  ;;  %v11103_v28 = vld [vmem:[#allocation69_spill] sm:$0xff] }
 0x4d3   : > { %v3539_v42 = vadd.f32 %v3538_v24, %v3474_v19  ;;  %3862 = vmatmul.f32.gmra.mxu0 %v11094_v31  ;;  %v3263_v24 = vld [vmem:[#allocation8 + $0xcf8] sm:$0xff] }
 0x4d4   : > { %3927 = vmatmul.f32.gmra.mxu1 %v11097_v63  ;;  %4098 = vmatpush.msra.mxu0 %v3263_v24  ;;  %v11101_v63 = vld [vmem:[#allocation59_spill] sm:$0xff] }
 0x4d5   : > { %v3604_v21 = vadd.f32 %v3603_v6, %v3539_v42  ;;  %3735 = vmatmul.f32.gmra.mxu2 %v9220_v7  ;;  %v11098_v6 = vld [vmem:[#allocation72_spill] sm:$0xff]  ;;  %v9240_v10 = vadd.f32 %v8943_v5, %v11101_v63  ;;  %v3059_v24 = vld [vmem:[#allocation8 + $0x698] sm:$0xff] }
 0x4d6   : > { %3800 = vmatmul.f32.gmra.mxu3 %v9225_v36  ;;  %v9235_v42 = vadd.f32 %v8937_v58, %v11098_v6  ;;  %v3155_v58 = vld [vmem:[#allocation8 + $0x998] sm:$0xff]  ;;  %3970 = vmatpush.msra.mxu2 %v3059_v24 }
 0x4d7   : > { %v9230_v53 = vadd.f32 %v3668_v50, %v3604_v21  ;;  %v11100_v21 = vld [vmem:[#allocation41_spill] sm:$0xff]  ;;  %11102 = vst [vmem:[#allocation59_spill] sm:$0xff] %v9240_v10  ;;  %4035 = vmatpush.msra.mxu3 %v3155_v58 }
 0x4d8   : > { %v3476_v61 = vpop.f32.mrf.mxu2  ;;  %v3606_v19 = vpop.f32.mrf.mxu0  ;;  %11099 = vst [vmem:[#allocation72_spill] sm:$0xff] %v9235_v42 }
 0x4d9   : > { %v3477_v47 = vadd.f32 %v3476_v61, %v9124_v29  ;;  %v3541_v51 = vpop.f32.mrf.mxu3  ;;  %v3671_v31 = vpop.f32.mrf.mxu1  ;;  %v3359_v61 = vld [vmem:[#allocation8 + $0xff8] sm:$0xff] }
 0x4da   : > { %4163 = vmatpush.msra.mxu1 %v3359_v61  ;;  %v11109_v61 = vld [vmem:[#allocation70_spill] sm:$0xff] }
 0x4db   : > { %v3542_v50 = vadd.f32 %v3541_v51, %v3477_v47  ;;  %3865 = vmatmul.f32.gmra.mxu0 %v11100_v21  ;;  %v3257_v51 = vld [vmem:[#allocation8 + $0xcc8] sm:$0xff] }
 0x4dc   : > { %3930 = vmatmul.f32.gmra.mxu1 %v11103_v28  ;;  %4099 = vmatpush.msra.mxu0 %v3257_v51  ;;  %v11107_v28 = vld [vmem:[#allocation98_spill] sm:$0xff]  ;;  %v3053_v51 = vld [vmem:[#allocation8 + $0x668] sm:$0xff] }
 0x4dd   : > { %v3607_v4 = vadd.f32 %v3606_v19, %v3542_v50  ;;  %3738 = vmatmul.f32.gmra.mxu2 %v9235_v42  ;;  %v11104_v19 = vld [vmem:[#allocation74_spill] sm:$0xff]  ;;  %v9255_v62 = vadd.f32 %v8965_v8, %v11107_v28 }
 0x4de   : > { %3803 = vmatmul.f32.gmra.mxu3 %v9240_v10  ;;  %v9250_v50 = vadd.f32 %v8959_v37, %v11104_v19  ;;  %v3149_v37 = vld [vmem:[#allocation8 + $0x968] sm:$0xff]  ;;  %3971 = vmatpush.msra.mxu2 %v3053_v51 }
 0x4df   : > { %v9245_v43 = vadd.f32 %v3671_v31, %v3607_v4  ;;  %v11106_v4 = vld [vmem:[#allocation42_spill] sm:$0xff]  ;;  %11108 = vst [vmem:[#allocation98_spill] sm:$0xff] %v9255_v62  ;;  %4036 = vmatpush.msra.mxu3 %v3149_v37 }
 0x4e0   : > { %v3479_v6 = vpop.f32.mrf.mxu2  ;;  %v3609_v47 = vpop.f32.mrf.mxu0  ;;  %11105 = vst [vmem:[#allocation74_spill] sm:$0xff] %v9250_v50 }
 0x4e1   : > { %v3480_v5 = vadd.f32 %v3479_v6, %v9124_v29  ;;  %v3544_v63 = vpop.f32.mrf.mxu3  ;;  %v3674_v21 = vpop.f32.mrf.mxu1  ;;  %v3353_v6 = vld [vmem:[#allocation8 + $0xfc8] sm:$0xff] }
 0x4e2   : > { %4164 = vmatpush.msra.mxu1 %v3353_v6  ;;  %v11115_v6 = vld [vmem:[#allocation71_spill] sm:$0xff] }
 0x4e3   : > { %v3545_v31 = vadd.f32 %v3544_v63, %v3480_v5  ;;  %3868 = vmatmul.f32.gmra.mxu0 %v11106_v4  ;;  %v3251_v63 = vld [vmem:[#allocation8 + $0xc98] sm:$0xff] }
 0x4e4   : > { %3933 = vmatmul.f32.gmra.mxu1 %v11109_v61  ;;  %4100 = vmatpush.msra.mxu0 %v3251_v63  ;;  %v11113_v61 = vld [vmem:[#allocation99_spill] sm:$0xff] }
 0x4e5   : > { %v3610_v24 = vadd.f32 %v3609_v47, %v3545_v31  ;;  %3741 = vmatmul.f32.gmra.mxu2 %v9250_v50  ;;  %v11110_v47 = vld [vmem:[#allocation81_spill] sm:$0xff]  ;;  %v9270_v26 = vadd.f32 %v8987_v15, %v11113_v61  ;;  %v3047_v63 = vld [vmem:[#allocation8 + $0x638] sm:$0xff] }
 0x4e6   : > { %3806 = vmatmul.f32.gmra.mxu3 %v9255_v62  ;;  %v9265_v31 = vadd.f32 %v8981_v60, %v11110_v47  ;;  %v3143_v60 = vld [vmem:[#allocation8 + $0x938] sm:$0xff]  ;;  %3972 = vmatpush.msra.mxu2 %v3047_v63 }
 0x4e7   : > { %v9260_v58 = vadd.f32 %v3674_v21, %v3610_v24  ;;  %v11112_v24 = vld [vmem:[#allocation16_spill] sm:$0xff]  ;;  %11114 = vst [vmem:[#allocation99_spill] sm:$0xff] %v9270_v26  ;;  %4037 = vmatpush.msra.mxu3 %v3143_v60 }
 0x4e8   : > { %v3482_v19 = vpop.f32.mrf.mxu2  ;;  %v3612_v5 = vpop.f32.mrf.mxu0  ;;  %11111 = vst [vmem:[#allocation81_spill] sm:$0xff] %v9265_v31 }
 0x4e9   : > { %v3483_v8 = vadd.f32 %v3482_v19, %v9124_v29  ;;  %v3547_v28 = vpop.f32.mrf.mxu3  ;;  %v3677_v4 = vpop.f32.mrf.mxu1  ;;  %v3347_v19 = vld [vmem:[#allocation8 + $0xf98] sm:$0xff] }
 0x4ea   : > { %4165 = vmatpush.msra.mxu1 %v3347_v19  ;;  %v11121_v19 = vld [vmem:[#allocation73_spill] sm:$0xff] }
 0x4eb   : > { %v3548_v21 = vadd.f32 %v3547_v28, %v3483_v8  ;;  %3871 = vmatmul.f32.gmra.mxu0 %v11112_v24  ;;  %v3245_v28 = vld [vmem:[#allocation8 + $0xc68] sm:$0xff] }
 0x4ec   : > { %3936 = vmatmul.f32.gmra.mxu1 %v11115_v6  ;;  %4101 = vmatpush.msra.mxu0 %v3245_v28  ;;  %v11119_v6 = vld [vmem:[#allocation100_spill] sm:$0xff] }
 0x4ed   : > { %v3613_v51 = vadd.f32 %v3612_v5, %v3548_v21  ;;  %3744 = vmatmul.f32.gmra.mxu2 %v9265_v31  ;;  %v11116_v5 = vld [vmem:[#allocation83_spill] sm:$0xff]  ;;  %v9285_v44 = vadd.f32 %v9009_v14, %v11119_v6  ;;  %v3041_v28 = vld [vmem:[#allocation8 + $0x608] sm:$0xff] }
 0x4ee   : > { %3809 = vmatmul.f32.gmra.mxu3 %v9270_v26  ;;  %v9280_v21 = vadd.f32 %v9003_v0, %v11116_v5  ;;  %v3137_v0 = vld [vmem:[#allocation8 + $0x908] sm:$0xff]  ;;  %3973 = vmatpush.msra.mxu2 %v3041_v28 }
 0x4ef   : > { %v9275_v37 = vadd.f32 %v3677_v4, %v3613_v51  ;;  %v11118_v51 = vld [vmem:[#allocation17_spill] sm:$0xff]  ;;  %11120 = vst [vmem:[#allocation100_spill] sm:$0xff] %v9285_v44  ;;  %4038 = vmatpush.msra.mxu3 %v3137_v0 }
 0x4f0   : > { %v3485_v47 = vpop.f32.mrf.mxu2  ;;  %v3615_v8 = vpop.f32.mrf.mxu0  ;;  %11117 = vst [vmem:[#allocation83_spill] sm:$0xff] %v9280_v21 }
 0x4f1   : > { %v3486_v15 = vadd.f32 %v3485_v47, %v9124_v29  ;;  %v3550_v61 = vpop.f32.mrf.mxu3  ;;  %v3680_v24 = vpop.f32.mrf.mxu1  ;;  %v3341_v47 = vld [vmem:[#allocation8 + $0xf68] sm:$0xff] }
 0x4f2   : > { %4166 = vmatpush.msra.mxu1 %v3341_v47  ;;  %v11127_v47 = vld [vmem:[#allocation75_spill] sm:$0xff] }
 0x4f3   : > { %v3551_v4 = vadd.f32 %v3550_v61, %v3486_v15  ;;  %3874 = vmatmul.f32.gmra.mxu0 %v11118_v51  ;;  %v3239_v61 = vld [vmem:[#allocation8 + $0xc38] sm:$0xff] }
 0x4f4   : > { %3939 = vmatmul.f32.gmra.mxu1 %v11121_v19  ;;  %4102 = vmatpush.msra.mxu0 %v3239_v61  ;;  %v11125_v19 = vld [vmem:[#allocation101_spill] sm:$0xff]  ;;  %v2940_v61 = vld [vmem:[#allocation8 + $0x2e0] sm:$0xff] }
 0x4f5   : > { %v3616_v63 = vadd.f32 %v3615_v8, %v3551_v4  ;;  %3747 = vmatmul.f32.gmra.mxu2 %v9280_v21  ;;  %v11122_v8 = vld [vmem:[#allocation86_spill] sm:$0xff]  ;;  %v9300_v35 = vadd.f32 %v9031_v3, %v11125_v19 }
 0x4f6   : > { %3812 = vmatmul.f32.gmra.mxu3 %v9285_v44  ;;  %v9295_v4 = vadd.f32 %v9025_v45, %v11122_v8  ;;  %v3233_v45 = vld [vmem:[#allocation8 + $0xc08] sm:$0xff]  ;;  %4218 = vmatpush.msrb.mxu2 %v2940_v61 }
 0x4f7   : > { %v9290_v60 = vadd.f32 %v3680_v24, %v3616_v63  ;;  %v11124_v63 = vld [vmem:[#allocation18_spill] sm:$0xff]  ;;  %11126 = vst [vmem:[#allocation101_spill] sm:$0xff] %v9300_v35  ;;  %4103 = vmatpush.msra.mxu0 %v3233_v45  ;;  %v11132_v61 = vld [vmem:[#allocation76_spill] sm:$0xff] }
 0x4f8   : > { %v3488_v5 = vpop.f32.mrf.mxu2  ;;  %v3618_v15 = vpop.f32.mrf.mxu0  ;;  %11123 = vst [vmem:[#allocation86_spill] sm:$0xff] %v9295_v4  ;;  %v2934_v45 = vld [vmem:[#allocation8 + $0x2b0] sm:$0xff] }
 0x4f9   : > { %v3489_v14 = vadd.f32 %v3488_v5, %v9124_v29  ;;  %v3553_v6 = vpop.f32.mrf.mxu3  ;;  %v3683_v51 = vpop.f32.mrf.mxu1  ;;  %v3335_v5 = vld [vmem:[#allocation8 + $0xf38] sm:$0xff]  ;;  %4219 = vmatpush.msrb.mxu2 %v2934_v45  ;;  %4348 = vmatpush.msrb.mxu0 %v3132_v52  ;;  %v3228_v52 = vld [vmem:[#allocation8 + $0xbe0] sm:$0xff] }
 0x4fa   : > { %4167 = vmatpush.msra.mxu1 %v3335_v5 }
 0x4fb   : > { %v3554_v24 = vadd.f32 %v3553_v6, %v3489_v14  ;;  %3877 = vmatmul.f32.gmra.mxu0 %v11124_v63  ;;  %v3036_v6 = vld [vmem:[#allocation8 + $0x5e0] sm:$0xff] }
 0x4fc   : > { %3942 = vmatmul.f32.gmra.mxu1 %v11127_v47  ;;  %4283 = vmatpush.msrb.mxu3 %v3036_v6  ;;  %v3030_v6 = vld [vmem:[#allocation8 + $0x5b0] sm:$0xff] }
 0x4fd   : > { %v3619_v28 = vadd.f32 %v3618_v15, %v3554_v24  ;;  %3750 = vmatmul.f32.gmra.mxu2 %v9295_v4  ;;  %v3329_v15 = vld [vmem:[#allocation8 + $0xf08] sm:$0xff]  ;;  %v11128_v24 = vld [vmem:[#allocation95_spill] sm:$0xff] }
 0x4fe   : > { %3815 = vmatmul.f32.gmra.mxu3 %v9300_v35  ;;  %v9310_v47 = vadd.f32 %v9056_v34, %v11128_v24  ;;  %4168 = vmatpush.msra.mxu1 %v3329_v15 }
 0x4ff   : > { %v9305_v0 = vadd.f32 %v3683_v51, %v3619_v28  ;;  %v11130_v28 = vld [vmem:[#allocation102_spill] sm:$0xff]  ;;  %4284 = vmatpush.msrb.mxu3 %v3030_v6  ;;  %v2928_v6 = vld [vmem:[#allocation8 + $0x280] sm:$0xff] }
 0x500   : > { %v3491_v8 = vpop.f32.mrf.mxu2  ;;  %v3621_v14 = vpop.f32.mrf.mxu0  ;;  %11129 = vst [vmem:[#allocation95_spill] sm:$0xff] %v9310_v47  ;;  %v9315_v5 = vadd.f32 %v9059_v20, %v11130_v28  ;;  %v11133_v28 = vld [vmem:[#allocation96_spill] sm:$0xff]  ;;  %4413 = vmatpush.msrb.mxu1 %v3228_v52  ;;  %4220 = vmatpush.msrb.mxu2 %v2928_v6  ;;  %v11141_v52 = vld [vmem:[#allocation21_spill] sm:$0xff] }
 0x501   : > { %v3492_v3 = vadd.f32 %v3491_v8, %v9124_v29  ;;  %v3556_v19 = vpop.f32.mrf.mxu3  ;;  %v3686_v63 = vpop.f32.mrf.mxu1 }
 0x502   : > { %11131 = vst [vmem:[#allocation102_spill] sm:$0xff] %v9315_v5 }
 0x503   : > { %v3557_v51 = vadd.f32 %v3556_v19, %v3492_v3  ;;  %3880 = vmatmul.f32.gmra.mxu0 %v9029_v40  ;;  %v11136_v40 = vld [vmem:[#allocation103_spill] sm:$0xff] }
 0x504   : > { %3945 = vmatmul.f32.gmra.mxu1 %v11132_v61  ;;  %v11135_v61 = vld [vmem:[#allocation20_spill] sm:$0xff] }
 0x505   : > { %v3622_v8 = vadd.f32 %v3621_v14, %v3557_v51  ;;  %3753 = vmatmul.f32.gmra.mxu2 %v9310_v47  ;;  %v9325_v14 = vadd.f32 %v9080_v41, %v11133_v28  ;;  %v3126_v41 = vld [vmem:[#allocation8 + $0x8b0] sm:$0xff] }
 0x506   : > { %3818 = vmatmul.f32.gmra.mxu3 %v9315_v5  ;;  %4349 = vmatpush.msrb.mxu0 %v3126_v41  ;;  %v2922_v41 = vld [vmem:[#allocation8 + $0x250] sm:$0xff] }
 0x507   : > { %v9320_v34 = vadd.f32 %v3686_v63, %v3622_v8  ;;  %11134 = vst [vmem:[#allocation96_spill] sm:$0xff] %v9325_v14  ;;  %v9330_v63 = vadd.f32 %v9083_v57, %v11136_v40  ;;  %v11138_v8 = vld [vmem:[#allocation77_spill] sm:$0xff]  ;;  %4221 = vmatpush.msrb.mxu2 %v2922_v41  ;;  %v2916_v41 = vld [vmem:[#allocation8 + $0x220] sm:$0xff] }
 0x508   : > { %v3494_v3 = vpop.f32.mrf.mxu2  ;;  %v3624_v19 = vpop.f32.mrf.mxu0 }
 0x509   : > { %v3495_v20 = vadd.f32 %v3494_v3, %v9124_v29  ;;  %v3559_v15 = vpop.f32.mrf.mxu3  ;;  %v3689_v24 = vpop.f32.mrf.mxu1  ;;  %11137 = vst [vmem:[#allocation103_spill] sm:$0xff] %v9330_v63  ;;  %v3024_v3 = vld [vmem:[#allocation8 + $0x580] sm:$0xff]  ;;  %4222 = vmatpush.msrb.mxu2 %v2916_v41  ;;  %v3006_v41 = vld [vmem:[#allocation8 + $0x4f0] sm:$0xff] }
 0x50a   : > { %4285 = vmatpush.msrb.mxu3 %v3024_v3  ;;  %v3222_v3 = vld [vmem:[#allocation8 + $0xbb0] sm:$0xff] }
 0x50b   : > { %v3560_v51 = vadd.f32 %v3559_v15, %v3495_v20  ;;  %3883 = vmatmul.f32.gmra.mxu0 %v11135_v61  ;;  %4414 = vmatpush.msrb.mxu1 %v3222_v3 }
 0x50c   : > { %3948 = vmatmul.f32.gmra.mxu1 %v11138_v8 }
 0x50d   : > { %v3625_v45 = vadd.f32 %v3624_v19, %v3560_v51  ;;  %3756 = vmatmul.f32.gmra.mxu2 %v9325_v14  ;;  %v11139_v51 = vld [vmem:[#allocation97_spill] sm:$0xff] }
 0x50e   : > { %3821 = vmatmul.f32.gmra.mxu3 %v9330_v63  ;;  %v9340_v8 = vadd.f32 %v9103_v1, %v11139_v51  ;;  %v3120_v1 = vld [vmem:[#allocation8 + $0x880] sm:$0xff] }
 0x50f   : > { %v9335_v28 = vadd.f32 %v3689_v24, %v3625_v45  ;;  %v9345_v24 = vadd.f32 %v9105_v12, %v11142_v49  ;;  %v11144_v45 = vld [vmem:[#allocation78_spill] sm:$0xff]  ;;  %4350 = vmatpush.msrb.mxu0 %v3120_v1 }
 0x510   : > { %v3497_v20 = vpop.f32.mrf.mxu2  ;;  %v3627_v15 = vpop.f32.mrf.mxu0  ;;  %11140 = vst [vmem:[#allocation97_spill] sm:$0xff] %v9340_v8  ;;  %v3114_v1 = vld [vmem:[#allocation8 + $0x850] sm:$0xff] }
 0x511   : > { %v3498_v40 = vadd.f32 %v3497_v20, %v9124_v29  ;;  %v3562_v57 = vpop.f32.mrf.mxu3  ;;  %v3692_v19 = vpop.f32.mrf.mxu1  ;;  %11143 = vst [vmem:[#allocation104_spill] sm:$0xff] %v9345_v24  ;;  %v3018_v20 = vld [vmem:[#allocation8 + $0x550] sm:$0xff]  ;;  %4351 = vmatpush.msrb.mxu0 %v3114_v1 }
 0x512   : > { %4286 = vmatpush.msrb.mxu3 %v3018_v20  ;;  %v3012_v20 = vld [vmem:[#allocation8 + $0x520] sm:$0xff] }
 0x513   : > { %v3563_v61 = vadd.f32 %v3562_v57, %v3498_v40  ;;  %3886 = vmatmul.f32.gmra.mxu0 %v11141_v52  ;;  %v11146_v52 = vld [vmem:[#allocation79_spill] sm:$0xff] }
 0x514   : > { %3951 = vmatmul.f32.gmra.mxu1 %v11144_v45  ;;  %v11145_v45 = vld [vmem:[#allocation23_spill] sm:$0xff]  ;;  %4287 = vmatpush.msrb.mxu3 %v3012_v20 }
 0x515   : > { %v3628_v6 = vadd.f32 %v3627_v15, %v3563_v61  ;;  %3759 = vmatmul.f32.gmra.mxu2 %v9340_v8  ;;  %v3108_v20 = vld [vmem:[#allocation8 + $0x820] sm:$0xff] }
 0x516   : > { %3824 = vmatmul.f32.gmra.mxu3 %v9345_v24  ;;  %4352 = vmatpush.msrb.mxu0 %v3108_v20  ;;  %v3000_v20 = vld [vmem:[#allocation8 + $0x4c0] sm:$0xff] }
 0x517   : > { %v9350_v51 = vadd.f32 %v3692_v19, %v3628_v6  ;;  %v3216_v19 = vld [vmem:[#allocation8 + $0xb80] sm:$0xff]  ;;  %4288 = vmatpush.msrb.mxu3 %v3006_v41 }
 0x518   : > { %v3500_v40 = vpop.f32.mrf.mxu2  ;;  %v3630_v49 = vpop.f32.mrf.mxu0  ;;  %v11148_v6 = vld [vmem:[#allocation51_spill] sm:$0xff]  ;;  %4415 = vmatpush.msrb.mxu1 %v3216_v19  ;;  %v11150_v19 = vld [vmem:[#allocation54_spill] sm:$0xff] }
 0x519   : > { %v3501_v12 = vadd.f32 %v3500_v40, %v9124_v29  ;;  %v3565_v61 = vpop.f32.mrf.mxu3  ;;  %v3695_v15 = vpop.f32.mrf.mxu1  ;;  %v2904_v41 = vld [vmem:[#allocation8 + $0x1c0] sm:$0xff]  ;;  %4289 = vmatpush.msrb.mxu3 %v3000_v20  ;;  %v2898_v20 = vld [vmem:[#allocation8 + $0x190] sm:$0xff] }
 0x51b   : > { %v3566_v57 = vadd.f32 %v3565_v61, %v3501_v12  ;;  %3889 = vmatmul.f32.gmra.mxu0 %v11145_v45  ;;  %v3096_v45 = vld [vmem:[#allocation8 + $0x7c0] sm:$0xff] }
 0x51c   : > { %3954 = vmatmul.f32.gmra.mxu1 %v11146_v52  ;;  %v3102_v52 = vld [vmem:[#allocation8 + $0x7f0] sm:$0xff] }
 0x51d   : > { %v3631_v3 = vadd.f32 %v3630_v49, %v3566_v57  ;;  %3974 = vmatmul.f32.vlgmr.msra.gmra.mxu2 %v11147_v2  ;;  %4353 = vmatpush.msrb.mxu0 %v3102_v52  ;;  %v2994_v52 = vld [vmem:[#allocation8 + $0x490] sm:$0xff] }
 0x51e   : > { %4039 = vmatmul.f32.vlgmr.msra.gmra.mxu3 %v11148_v6 }
 0x51f   : > { %v9358_v23 = vadd.f32 %v3695_v15, %v3631_v3  ;;  %v11149_v15 = vld [vmem:[#allocation24_spill] sm:$0xff]  ;;  %v3210_v3 = vld [vmem:[#allocation8 + $0xb50] sm:$0xff]  ;;  %4290 = vmatpush.msrb.mxu3 %v2994_v52  ;;  %4354 = vmatpush.msrb.mxu0 %v3096_v45 }
 0x520   : > { %v3715_v29 = vpop.f32.mrf.mxu2  ;;  %v9360_v40 = vpop.f32.mrf.mxu0  ;;  %4416 = vmatpush.msrb.mxu1 %v3210_v3  ;;  %v11151_v3 = vld [vmem:[#allocation28_spill] sm:$0xff] }
 0x521   : > { %v3716_v49 = vadd.f32 %v3715_v29, %v9140_v32  ;;  %v3780_v12 = vpop.f32.mrf.mxu3  ;;  %v9363_v61 = vpop.f32.mrf.mxu1  ;;  %v2910_v32 = vld [vmem:[#allocation8 + $0x1f0] sm:$0xff]  ;;  %v2892_v52 = vld [vmem:[#allocation8 + $0x160] sm:$0xff] }
 0x522   : > { %4223 = vmatpush.msrb.mxu2 %v2910_v32  ;;  %v11152_v32 = vld [vmem:[#allocation63_spill] sm:$0xff] }
 0x523   : > { %v3781_v57 = vadd.f32 %v3780_v12, %v3716_v49  ;;  %4104 = vmatmul.f32.vlgmr.msra.gmra.mxu0 %v9115_v30  ;;  %v3204_v30 = vld [vmem:[#allocation8 + $0xb20] sm:$0xff] }
 0x524   : > { %4169 = vmatmul.f32.vlgmr.msra.gmra.mxu1 %v9120_v33  ;;  %4224 = vmatpush.msrb.mxu2 %v2904_v41  ;;  %v11154_v41 = vld [vmem:[#allocation67_spill] sm:$0xff] }
 0x525   : > { %5778 = vst [vmem:[%s9367_s26] sm:$0xff] %v3781_v57  ;;  %3977 = vmatmul.f32.gmra.mxu2 %v11149_v15  ;;  %4417 = vmatpush.msrb.mxu1 %v3204_v30  ;;  %v11153_v30 = vld [vmem:[#allocation29_spill] sm:$0xff]  ;;  %v2988_v45 = vld [vmem:[#allocation8 + $0x460] sm:$0xff] }
 0x526   : > { %4042 = vmatmul.f32.gmra.mxu3 %v11150_v19  ;;  %4225 = vmatpush.msrb.mxu2 %v2898_v20  ;;  %v11156_v20 = vld [vmem:[#allocation66_spill] sm:$0xff] }
 0x527   : > { %4291 = vmatpush.msrb.mxu3 %v2988_v45  ;;  %v2886_v45 = vld [vmem:[#allocation8 + $0x130] sm:$0xff] }
 0x528   : > { %v3718_v1 = vpop.f32.mrf.mxu2  ;;  %v9372_v29 = vpop.f32.mrf.mxu0  ;;  %4226 = vmatpush.msrb.mxu2 %v2892_v52  ;;  %v11158_v52 = vld [vmem:[#allocation80_spill] sm:$0xff] }
 0x529   : > { %v3719_v49 = vadd.f32 %v3718_v1, %v9155_v11  ;;  %v3783_v12 = vpop.f32.mrf.mxu3  ;;  %v9375_v57 = vpop.f32.mrf.mxu1 }
 0x52a   : > { %4227 = vmatpush.msrb.mxu2 %v2886_v45  ;;  %v11160_v45 = vld [vmem:[#allocation82_spill] sm:$0xff] }
 0x52b   : > { %v3784_v33 = vadd.f32 %v3783_v12, %v3719_v49  ;;  %4107 = vmatmul.f32.gmra.mxu0 %v9130_v48  ;;  %v3198_v48 = vld [vmem:[#allocation8 + $0xaf0] sm:$0xff] }
 0x52c   : > { %4172 = vmatmul.f32.gmra.mxu1 %v9135_v39 }
 0x52d   : > { %5784 = vst [vmem:[%s9367_s26 + $0x30] sm:$0xff] %v3784_v33  ;;  %3980 = vmatmul.f32.gmra.mxu2 %v11151_v3  ;;  %4418 = vmatpush.msrb.mxu1 %v3198_v48  ;;  %v11155_v48 = vld [vmem:[#allocation25_spill] sm:$0xff] }
 0x52e   : > { %4045 = vmatmul.f32.gmra.mxu3 %v11152_v32 }
 0x530   : > { %v3721_v11 = vpop.f32.mrf.mxu2  ;;  %v9382_v1 = vpop.f32.mrf.mxu0 }
 0x531   : > { %v3722_v49 = vadd.f32 %v3721_v11, %v9170_v54  ;;  %v3786_v12 = vpop.f32.mrf.mxu3  ;;  %v9385_v33 = vpop.f32.mrf.mxu1 }
 0x533   : > { %v3787_v39 = vadd.f32 %v3786_v12, %v3722_v49  ;;  %4110 = vmatmul.f32.gmra.mxu0 %v9145_v13  ;;  %v3192_v13 = vld [vmem:[#allocation8 + $0xac0] sm:$0xff] }
 0x534   : > { %4175 = vmatmul.f32.gmra.mxu1 %v9150_v55 }
 0x535   : > { %5790 = vst [vmem:[%s9367_s26 + $0x60] sm:$0xff] %v3787_v39  ;;  %3983 = vmatmul.f32.gmra.mxu2 %v11153_v30  ;;  %4419 = vmatpush.msrb.mxu1 %v3192_v13  ;;  %v11157_v13 = vld [vmem:[#allocation27_spill] sm:$0xff] }
 0x536   : > { %4048 = vmatmul.f32.gmra.mxu3 %v11154_v41  ;;  %v3090_v41 = vld [vmem:[#allocation8 + $0x790] sm:$0xff] }
 0x537   : > { %4355 = vmatpush.msrb.mxu0 %v3090_v41  ;;  %v2982_v41 = vld [vmem:[#allocation8 + $0x430] sm:$0xff] }
 0x538   : > { %v3724_v54 = vpop.f32.mrf.mxu2  ;;  %v9392_v11 = vpop.f32.mrf.mxu0  ;;  %4292 = vmatpush.msrb.mxu3 %v2982_v41  ;;  %v2880_v41 = vld [vmem:[#allocation8 + $0x100] sm:$0xff] }
 0x539   : > { %v3725_v49 = vadd.f32 %v3724_v54, %v9185_v59  ;;  %v3789_v12 = vpop.f32.mrf.mxu3  ;;  %v9395_v39 = vpop.f32.mrf.mxu1  ;;  %4228 = vmatpush.msrb.mxu2 %v2880_v41  ;;  %v11162_v41 = vld [vmem:[#allocation84_spill] sm:$0xff] }
 0x53b   : > { %v3790_v55 = vadd.f32 %v3789_v12, %v3725_v49  ;;  %4113 = vmatmul.f32.gmra.mxu0 %v9160_v18  ;;  %v3186_v18 = vld [vmem:[#allocation8 + $0xa90] sm:$0xff] }
 0x53c   : > { %4178 = vmatmul.f32.gmra.mxu1 %v9165_v9 }
 0x53d   : > { %5796 = vst [vmem:[%s9367_s26 + $0x90] sm:$0xff] %v3790_v55  ;;  %3986 = vmatmul.f32.gmra.mxu2 %v11155_v48  ;;  %4420 = vmatpush.msrb.mxu1 %v3186_v18  ;;  %v11159_v18 = vld [vmem:[#allocation33_spill] sm:$0xff] }
 0x53e   : > { %4051 = vmatmul.f32.gmra.mxu3 %v11156_v20  ;;  %v3084_v20 = vld [vmem:[#allocation8 + $0x760] sm:$0xff] }
 0x53f   : > { %4356 = vmatpush.msrb.mxu0 %v3084_v20  ;;  %v2976_v20 = vld [vmem:[#allocation8 + $0x400] sm:$0xff] }
 0x540   : > { %v3727_v59 = vpop.f32.mrf.mxu2  ;;  %v9402_v54 = vpop.f32.mrf.mxu0  ;;  %4293 = vmatpush.msrb.mxu3 %v2976_v20  ;;  %v2874_v20 = vld [vmem:[#allocation8 + $0xd0] sm:$0xff] }
 0x541   : > { %v3728_v49 = vadd.f32 %v3727_v59, %v9200_v38  ;;  %v3792_v12 = vpop.f32.mrf.mxu3  ;;  %v9405_v55 = vpop.f32.mrf.mxu1  ;;  %4229 = vmatpush.msrb.mxu2 %v2874_v20  ;;  %v11164_v20 = vld [vmem:[#allocation85_spill] sm:$0xff] }
 0x543   : > { %v3793_v9 = vadd.f32 %v3792_v12, %v3728_v49  ;;  %4116 = vmatmul.f32.gmra.mxu0 %v9175_v46  ;;  %v3180_v46 = vld [vmem:[#allocation8 + $0xa60] sm:$0xff] }
 0x544   : > { %4181 = vmatmul.f32.gmra.mxu1 %v9180_v17 }
 0x545   : > { %5802 = vst [vmem:[%s9367_s26 + $0xc0] sm:$0xff] %v3793_v9  ;;  %3989 = vmatmul.f32.gmra.mxu2 %v11157_v13  ;;  %4421 = vmatpush.msrb.mxu1 %v3180_v46  ;;  %v11161_v46 = vld [vmem:[#allocation43_spill] sm:$0xff] }
 0x546   : > { %4054 = vmatmul.f32.gmra.mxu3 %v11158_v52  ;;  %v3078_v52 = vld [vmem:[#allocation8 + $0x730] sm:$0xff] }
 0x547   : > { %4357 = vmatpush.msrb.mxu0 %v3078_v52  ;;  %v2970_v52 = vld [vmem:[#allocation8 + $0x3d0] sm:$0xff] }
 0x548   : > { %v3730_v38 = vpop.f32.mrf.mxu2  ;;  %v9412_v59 = vpop.f32.mrf.mxu0  ;;  %4294 = vmatpush.msrb.mxu3 %v2970_v52  ;;  %v2868_v52 = vld [vmem:[#allocation8 + $0xa0] sm:$0xff] }
 0x549   : > { %v3731_v49 = vadd.f32 %v3730_v38, %v9215_v25  ;;  %v3795_v12 = vpop.f32.mrf.mxu3  ;;  %v9415_v9 = vpop.f32.mrf.mxu1  ;;  %4230 = vmatpush.msrb.mxu2 %v2868_v52  ;;  %v11166_v52 = vld [vmem:[#allocation87_spill] sm:$0xff] }
 0x54b   : > { %v3796_v17 = vadd.f32 %v3795_v12, %v3731_v49  ;;  %4119 = vmatmul.f32.gmra.mxu0 %v9190_v56  ;;  %v3174_v56 = vld [vmem:[#allocation8 + $0xa30] sm:$0xff] }
 0x54c   : > { %4184 = vmatmul.f32.gmra.mxu1 %v9195_v27 }
 0x54d   : > { %5808 = vst [vmem:[%s9367_s26 + $0xf0] sm:$0xff] %v3796_v17  ;;  %3992 = vmatmul.f32.gmra.mxu2 %v11159_v18  ;;  %4422 = vmatpush.msrb.mxu1 %v3174_v56  ;;  %v11163_v56 = vld [vmem:[#allocation30_spill] sm:$0xff] }
 0x54e   : > { %4057 = vmatmul.f32.gmra.mxu3 %v11160_v45  ;;  %v3072_v45 = vld [vmem:[#allocation8 + $0x700] sm:$0xff] }
 0x54f   : > { %4358 = vmatpush.msrb.mxu0 %v3072_v45  ;;  %v2964_v45 = vld [vmem:[#allocation8 + $0x3a0] sm:$0xff] }
 0x550   : > { %v3733_v25 = vpop.f32.mrf.mxu2  ;;  %v9422_v38 = vpop.f32.mrf.mxu0  ;;  %4295 = vmatpush.msrb.mxu3 %v2964_v45  ;;  %v2862_v45 = vld [vmem:[#allocation8 + $0x70] sm:$0xff] }
 0x551   : > { %v3734_v49 = vadd.f32 %v3733_v25, %v9230_v53  ;;  %v3798_v12 = vpop.f32.mrf.mxu3  ;;  %v9425_v17 = vpop.f32.mrf.mxu1  ;;  %4231 = vmatpush.msrb.mxu2 %v2862_v45  ;;  %v11168_v45 = vld [vmem:[#allocation88_spill] sm:$0xff] }
 0x553   : > { %v3799_v27 = vadd.f32 %v3798_v12, %v3734_v49  ;;  %4122 = vmatmul.f32.gmra.mxu0 %v9205_v22  ;;  %v3168_v22 = vld [vmem:[#allocation8 + $0xa00] sm:$0xff] }
 0x554   : > { %4187 = vmatmul.f32.gmra.mxu1 %v9210_v16 }
 0x555   : > { %5814 = vst [vmem:[%s9367_s26 + $0x120] sm:$0xff] %v3799_v27  ;;  %3995 = vmatmul.f32.gmra.mxu2 %v11161_v46  ;;  %4423 = vmatpush.msrb.mxu1 %v3168_v22  ;;  %v11165_v22 = vld [vmem:[#allocation32_spill] sm:$0xff] }
 0x556   : > { %4060 = vmatmul.f32.gmra.mxu3 %v11162_v41  ;;  %v3066_v41 = vld [vmem:[#allocation8 + $0x6d0] sm:$0xff] }
 0x557   : > { %4359 = vmatpush.msrb.mxu0 %v3066_v41  ;;  %v2958_v41 = vld [vmem:[#allocation8 + $0x370] sm:$0xff] }
 0x558   : > { %v3736_v53 = vpop.f32.mrf.mxu2  ;;  %v9432_v25 = vpop.f32.mrf.mxu0  ;;  %4296 = vmatpush.msrb.mxu3 %v2958_v41  ;;  %v2856_v41 = vld [vmem:[#allocation8 + $0x40] sm:$0xff] }
 0x559   : > { %v3737_v49 = vadd.f32 %v3736_v53, %v9245_v43  ;;  %v3801_v12 = vpop.f32.mrf.mxu3  ;;  %v9435_v27 = vpop.f32.mrf.mxu1  ;;  %4232 = vmatpush.msrb.mxu2 %v2856_v41  ;;  %v11170_v41 = vld [vmem:[#allocation89_spill] sm:$0xff] }
 0x55b   : > { %v3802_v16 = vadd.f32 %v3801_v12, %v3737_v49  ;;  %4125 = vmatmul.f32.gmra.mxu0 %v9220_v7  ;;  %v3162_v7 = vld [vmem:[#allocation8 + $0x9d0] sm:$0xff] }
 0x55c   : > { %4190 = vmatmul.f32.gmra.mxu1 %v9225_v36 }
 0x55d   : > { %5820 = vst [vmem:[%s9367_s26 + $0x150] sm:$0xff] %v3802_v16  ;;  %3998 = vmatmul.f32.gmra.mxu2 %v11163_v56  ;;  %4424 = vmatpush.msrb.mxu1 %v3162_v7  ;;  %v11167_v7 = vld [vmem:[#allocation47_spill] sm:$0xff] }
 0x55e   : > { %4063 = vmatmul.f32.gmra.mxu3 %v11164_v20  ;;  %v3060_v20 = vld [vmem:[#allocation8 + $0x6a0] sm:$0xff] }
 0x55f   : > { %4360 = vmatpush.msrb.mxu0 %v3060_v20  ;;  %v2952_v20 = vld [vmem:[#allocation8 + $0x340] sm:$0xff] }
 0x560   : > { %v3739_v43 = vpop.f32.mrf.mxu2  ;;  %v9442_v53 = vpop.f32.mrf.mxu0  ;;  %4297 = vmatpush.msrb.mxu3 %v2952_v20  ;;  %v2850_v20 = vld [vmem:[#allocation8 + $0x10] sm:$0xff] }
 0x561   : > { %v3740_v49 = vadd.f32 %v3739_v43, %v9260_v58  ;;  %v3804_v12 = vpop.f32.mrf.mxu3  ;;  %v9445_v16 = vpop.f32.mrf.mxu1  ;;  %4233 = vmatpush.msrb.mxu2 %v2850_v20  ;;  %v11172_v20 = vld [vmem:[#allocation90_spill] sm:$0xff] }
 0x563   : > { %v3805_v36 = vadd.f32 %v3804_v12, %v3740_v49  ;;  %4128 = vmatmul.f32.gmra.mxu0 %v9235_v42  ;;  %v3156_v42 = vld [vmem:[#allocation8 + $0x9a0] sm:$0xff] }
 0x564   : > { %4193 = vmatmul.f32.gmra.mxu1 %v9240_v10 }
 0x565   : > { %5826 = vst [vmem:[%s9367_s26 + $0x180] sm:$0xff] %v3805_v36  ;;  %4001 = vmatmul.f32.gmra.mxu2 %v11165_v22  ;;  %4425 = vmatpush.msrb.mxu1 %v3156_v42  ;;  %v11169_v42 = vld [vmem:[#allocation48_spill] sm:$0xff] }
 0x566   : > { %4066 = vmatmul.f32.gmra.mxu3 %v11166_v52  ;;  %v3054_v52 = vld [vmem:[#allocation8 + $0x670] sm:$0xff] }
 0x567   : > { %4361 = vmatpush.msrb.mxu0 %v3054_v52  ;;  %v2946_v52 = vld [vmem:[#allocation8 + $0x310] sm:$0xff] }
 0x568   : > { %v3742_v58 = vpop.f32.mrf.mxu2  ;;  %v9452_v43 = vpop.f32.mrf.mxu0  ;;  %4298 = vmatpush.msrb.mxu3 %v2946_v52  ;;  %v3324_v52 = vld [vmem:[#allocation8 + $0xee0] sm:$0xff] }
 0x569   : > { %v3743_v49 = vadd.f32 %v3742_v58, %v9275_v37  ;;  %v3807_v12 = vpop.f32.mrf.mxu3  ;;  %v9455_v36 = vpop.f32.mrf.mxu1  ;;  %4478 = vmatpush.msra.mxu2 %v3324_v52  ;;  %v11174_v52 = vld [vmem:[#allocation91_spill] sm:$0xff] }
 0x56b   : > { %v3808_v10 = vadd.f32 %v3807_v12, %v3743_v49  ;;  %4131 = vmatmul.f32.gmra.mxu0 %v9250_v50  ;;  %v3150_v50 = vld [vmem:[#allocation8 + $0x970] sm:$0xff] }
 0x56c   : > { %4196 = vmatmul.f32.gmra.mxu1 %v9255_v62 }
 0x56d   : > { %5832 = vst [vmem:[%s9367_s26 + $0x1b0] sm:$0xff] %v3808_v10  ;;  %4004 = vmatmul.f32.gmra.mxu2 %v11167_v7  ;;  %4426 = vmatpush.msrb.mxu1 %v3150_v50  ;;  %v11171_v50 = vld [vmem:[#allocation44_spill] sm:$0xff] }
 0x56e   : > { %4069 = vmatmul.f32.gmra.mxu3 %v11168_v45  ;;  %v3048_v45 = vld [vmem:[#allocation8 + $0x640] sm:$0xff] }
 0x56f   : > { %4362 = vmatpush.msrb.mxu0 %v3048_v45  ;;  %v3042_v45 = vld [vmem:[#allocation8 + $0x610] sm:$0xff] }
 0x570   : > { %v3745_v37 = vpop.f32.mrf.mxu2  ;;  %v9462_v58 = vpop.f32.mrf.mxu0 }
 0x571   : > { %v3746_v49 = vadd.f32 %v3745_v37, %v9290_v60  ;;  %v3810_v12 = vpop.f32.mrf.mxu3  ;;  %v9465_v10 = vpop.f32.mrf.mxu1  ;;  %4363 = vmatpush.msrb.mxu0 %v3042_v45 }
 0x573   : > { %v3811_v62 = vadd.f32 %v3810_v12, %v3746_v49  ;;  %4134 = vmatmul.f32.gmra.mxu0 %v9265_v31  ;;  %v3144_v31 = vld [vmem:[#allocation8 + $0x940] sm:$0xff] }
 0x574   : > { %4199 = vmatmul.f32.gmra.mxu1 %v9270_v26 }
 0x575   : > { %5838 = vst [vmem:[%s9367_s26 + $0x1e0] sm:$0xff] %v3811_v62  ;;  %4007 = vmatmul.f32.gmra.mxu2 %v11169_v42  ;;  %4427 = vmatpush.msrb.mxu1 %v3144_v31  ;;  %v11173_v31 = vld [vmem:[#allocation46_spill] sm:$0xff] }
 0x576   : > { %4072 = vmatmul.f32.gmra.mxu3 %v11170_v41  ;;  %v3420_v41 = vld [vmem:[#allocation8 + $0x11e0] sm:$0xff] }
 0x577   : > { %4543 = vmatpush.msra.mxu3 %v3420_v41 }
 0x578   : > { %v3748_v60 = vpop.f32.mrf.mxu2  ;;  %v9472_v37 = vpop.f32.mrf.mxu0 }
 0x579   : > { %v3749_v49 = vadd.f32 %v3748_v60, %v9305_v0  ;;  %v3813_v12 = vpop.f32.mrf.mxu3  ;;  %v9475_v62 = vpop.f32.mrf.mxu1 }
 0x57b   : > { %v3814_v26 = vadd.f32 %v3813_v12, %v3749_v49  ;;  %4137 = vmatmul.f32.gmra.mxu0 %v9280_v21 }
 0x57c   : > { %4202 = vmatmul.f32.gmra.mxu1 %v9285_v44  ;;  %v3138_v44 = vld [vmem:[#allocation8 + $0x910] sm:$0xff] }
 0x57d   : > { %5844 = vst [vmem:[%s9367_s26 + $0x210] sm:$0xff] %v3814_v26  ;;  %4010 = vmatmul.f32.gmra.mxu2 %v11171_v50  ;;  %4428 = vmatpush.msrb.mxu1 %v3138_v44 }
 0x57e   : > { %4075 = vmatmul.f32.gmra.mxu3 %v11172_v20 }
 0x580   : > { %v3751_v0 = vpop.f32.mrf.mxu2  ;;  %v9482_v60 = vpop.f32.mrf.mxu0 }
 0x581   : > { %v3752_v49 = vadd.f32 %v3751_v0, %v9320_v34  ;;  %v3816_v12 = vpop.f32.mrf.mxu3  ;;  %v9485_v26 = vpop.f32.mrf.mxu1 }
 0x583   : > { %v3817_v21 = vadd.f32 %v3816_v12, %v3752_v49  ;;  %4140 = vmatmul.f32.gmra.mxu0 %v9295_v4  ;;  %v3318_v49 = vld [vmem:[#allocation8 + $0xeb0] sm:$0xff]  ;;  %v2941_v4 = vld [vmem:[#allocation8 + $0x2e8] sm:$0xff] }
 0x584   : > { %4205 = vmatmul.f32.gmra.mxu1 %v9300_v35  ;;  %v3414_v12 = vld [vmem:[#allocation8 + $0x11b0] sm:$0xff]  ;;  %4479 = vmatpush.msra.mxu2 %v3318_v49  ;;  %v11176_v35 = vld [vmem:[#allocation92_spill] sm:$0xff] }
 0x585   : > { %5850 = vst [vmem:[%s9367_s26 + $0x240] sm:$0xff] %v3817_v21  ;;  %4013 = vmatmul.f32.gmra.mxu2 %v11173_v31  ;;  %4544 = vmatpush.msra.mxu3 %v3414_v12  ;;  %v11175_v21 = vld [vmem:[#allocation52_spill] sm:$0xff] }
 0x586   : > { %4078 = vmatmul.f32.gmra.mxu3 %v11174_v52  ;;  %4608 = vmatpush.msra.mxu0 %v2941_v4  ;;  %v3408_v12 = vld [vmem:[#allocation8 + $0x1180] sm:$0xff]  ;;  %v2935_v4 = vld [vmem:[#allocation8 + $0x2b8] sm:$0xff] }
 0x587   : > { %4545 = vmatpush.msra.mxu3 %v3408_v12 }
 0x588   : > { %v3754_v45 = vpop.f32.mrf.mxu2  ;;  %v9492_v41 = vpop.f32.mrf.mxu0  ;;  %4609 = vmatpush.msra.mxu0 %v2935_v4  ;;  %v3031_v4 = vld [vmem:[#allocation8 + $0x5b8] sm:$0xff] }
 0x589   : > { %v3755_v34 = vadd.f32 %v3754_v45, %v9335_v28  ;;  %v3819_v0 = vpop.f32.mrf.mxu3  ;;  %v9495_v20 = vpop.f32.mrf.mxu1 }
 0x58b   : > { %v3820_v44 = vadd.f32 %v3819_v0, %v3755_v34  ;;  %4143 = vmatmul.f32.gmra.mxu0 %v9310_v47  ;;  %v3037_v34 = vld [vmem:[#allocation8 + $0x5e8] sm:$0xff]  ;;  %v3312_v0 = vld [vmem:[#allocation8 + $0xe80] sm:$0xff] }
 0x58c   : > { %4208 = vmatmul.f32.gmra.mxu1 %v9315_v5  ;;  %4480 = vmatpush.msra.mxu2 %v3312_v0  ;;  %v11177_v5 = vld [vmem:[#allocation53_spill] sm:$0xff] }
 0x58d   : > { %5856 = vst [vmem:[%s9367_s26 + $0x270] sm:$0xff] %v3820_v44  ;;  %4016 = vmatmul.f32.gmra.mxu2 %v11175_v21  ;;  %4673 = vmatpush.msra.mxu1 %v3037_v34 }
 0x58e   : > { %4081 = vmatmul.f32.gmra.mxu3 %v11176_v35 }
 0x58f   : > { %4674 = vmatpush.msra.mxu1 %v3031_v4 }
 0x590   : > { %v3757_v28 = vpop.f32.mrf.mxu2  ;;  %v9502_v45 = vpop.f32.mrf.mxu0 }
 0x591   : > { %v3758_v52 = vadd.f32 %v3757_v28, %v9350_v51  ;;  %v3822_v31 = vpop.f32.mrf.mxu3  ;;  %v9505_v49 = vpop.f32.mrf.mxu1  ;;  %v11178_v51 = vld [vmem:[#allocation93_spill] sm:$0xff]  ;;  %v9512_v28 = vld [vmem:[#allocation10] sm:$0x3f] }
 0x592   : > { %11179 = vst [vmem:[#allocation51_spill] sm:$0xff] %v9512_v28  ;;  %v9515_v47 = vperm.slane %v9512_v28, 1 }
 0x593   : > { %v3823_v44 = vadd.f32 %v3822_v31, %v3758_v52  ;;  %4146 = vmatmul.f32.gmra.mxu0 %v9325_v14  ;;  %v2929_v14 = vld [vmem:[#allocation8 + $0x288] sm:$0xff] }
 0x594   : > { %4211 = vmatmul.f32.gmra.mxu1 %v9330_v63  ;;  %v3402_v63 = vld [vmem:[#allocation8 + $0x1150] sm:$0xff]  ;;  %4610 = vmatpush.msra.mxu0 %v2929_v14  ;;  %v3849_v14 = vadd.f32 %v9372_v29, %v9515_v47 }
 0x595   : > { %5862 = vst [vmem:[%s9367_s26 + $0x2a0] sm:$0xff] %v3823_v44  ;;  %4019 = vmatmul.f32.gmra.mxu2 %v11177_v5  ;;  %v3306_v44 = vld [vmem:[#allocation8 + $0xe50] sm:$0xff]  ;;  %4546 = vmatpush.msra.mxu3 %v3402_v63  ;;  %v2923_v63 = vld [vmem:[#allocation8 + $0x258] sm:$0xff] }
 0x596   : > { %4084 = vmatmul.f32.gmra.mxu3 %v11178_v51  ;;  %4481 = vmatpush.msra.mxu2 %v3306_v44  ;;  %v3846_v51 = vadd.f32 %v9360_v40, %v9515_v47  ;;  %v3025_v40 = vld [vmem:[#allocation8 + $0x588] sm:$0xff] }
 0x597   : > { %4675 = vmatpush.msra.mxu1 %v3025_v40  ;;  %4611 = vmatpush.msra.mxu0 %v2923_v63  ;;  %v3852_v63 = vadd.f32 %v9382_v1, %v9515_v47 }
 0x598   : > { %v3760_v34 = vpop.f32.mrf.mxu2  ;;  %v9517_v0 = vpop.f32.mrf.mxu0  ;;  %v3911_v5 = vadd.f32 %v9363_v61, %v3846_v51  ;;  %v11183_v61 = vld [vmem:[#allocation35_spill] sm:$0xff] }
 0x599   : > { %v3761_v31 = vadd.f32 %v3760_v34, %v9358_v23  ;;  %v3825_v52 = vpop.f32.mrf.mxu3  ;;  %v9520_v12 = vpop.f32.mrf.mxu1  ;;  %v11181_v23 = vld [vmem:[#allocation34_spill] sm:$0xff]  ;;  %v11184_v51 = vld [vmem:[#allocation31_spill] sm:$0xff] }
 0x59a   : > { %11180 = vst [vmem:[#allocation24_spill] sm:$0xff] %v9520_v12  ;;  %v11182_v34 = vld [vmem:[#allocation26_spill] sm:$0xff] }
 0x59b   : > { %v3826_v28 = vadd.f32 %v3825_v52, %v3761_v31  ;;  %4149 = vmatmul.f32.gmra.mxu0 %v9340_v8  ;;  %v3300_v31 = vld [vmem:[#allocation8 + $0xe20] sm:$0xff] }
 0x59c   : > { %4214 = vmatmul.f32.gmra.mxu1 %v9345_v24  ;;  %v3396_v52 = vld [vmem:[#allocation8 + $0x1120] sm:$0xff]  ;;  %4482 = vmatpush.msra.mxu2 %v3300_v31 }
 0x59d   : > { %5868 = vst [vmem:[%s9367_s26 + $0x2d0] sm:$0xff] %v3826_v28  ;;  %4234 = vmatmul.f32.vlgmr.msrb.gmra.mxu2 %v11181_v23  ;;  %4547 = vmatpush.msra.mxu3 %v3396_v52  ;;  %v3390_v52 = vld [vmem:[#allocation8 + $0x10f0] sm:$0xff] }
 0x59e   : > { %4299 = vmatmul.f32.vlgmr.msrb.gmra.mxu3 %v11182_v34 }
 0x59f   : > { %4548 = vmatpush.msra.mxu3 %v3390_v52  ;;  %v3384_v52 = vld [vmem:[#allocation8 + $0x10c0] sm:$0xff] }
 0x5a0   : > { %v3975_v4 = vpop.f32.mrf.mxu2  ;;  %v4105_v44 = vpop.f32.mrf.mxu0 }
 0x5a1   : > { %v3976_v12 = vadd.f32 %v3975_v4, %v3911_v5  ;;  %v4040_v35 = vpop.f32.mrf.mxu3  ;;  %v4170_v21 = vpop.f32.mrf.mxu1  ;;  %v3914_v4 = vadd.f32 %v9375_v57, %v3849_v14  ;;  %v11186_v14 = vld [vmem:[#allocation45_spill] sm:$0xff]  ;;  %4549 = vmatpush.msra.mxu3 %v3384_v52 }
 0x5a2   : > { %v3378_v52 = vld [vmem:[#allocation8 + $0x1090] sm:$0xff] }
 0x5a3   : > { %v4041_v28 = vadd.f32 %v4040_v35, %v3976_v12  ;;  %4364 = vmatmul.f32.vlgmr.msrb.gmra.mxu0 %v11147_v2  ;;  %v3019_v12 = vld [vmem:[#allocation8 + $0x558] sm:$0xff]  ;;  %v3294_v2 = vld [vmem:[#allocation8 + $0xdf0] sm:$0xff]  ;;  %4550 = vmatpush.msra.mxu3 %v3378_v52  ;;  %v3372_v52 = vld [vmem:[#allocation8 + $0x1060] sm:$0xff] }
 0x5a4   : > { %4429 = vmatmul.f32.vlgmr.msrb.gmra.mxu1 %v11148_v6  ;;  %4483 = vmatpush.msra.mxu2 %v3294_v2 }
 0x5a5   : > { %v4106_v5 = vadd.f32 %v4105_v44, %v4041_v28  ;;  %4237 = vmatmul.f32.gmra.mxu2 %v11183_v61  ;;  %4676 = vmatpush.msra.mxu1 %v3019_v12  ;;  %v2917_v44 = vld [vmem:[#allocation8 + $0x228] sm:$0xff]  ;;  %v3288_v12 = vld [vmem:[#allocation8 + $0xdc0] sm:$0xff] }
 0x5a6   : > { %4302 = vmatmul.f32.gmra.mxu3 %v11184_v51  ;;  %4612 = vmatpush.msra.mxu0 %v2917_v44  ;;  %v3855_v44 = vadd.f32 %v9392_v11, %v9515_v47 }
 0x5a7   : > { %v4171_v40 = vadd.f32 %v4170_v21, %v4106_v5  ;;  %v11185_v21 = vld [vmem:[#allocation36_spill] sm:$0xff]  ;;  %v3917_v5 = vadd.f32 %v9385_v33, %v3852_v63  ;;  %4484 = vmatpush.msra.mxu2 %v3288_v12  ;;  %v11188_v63 = vld [vmem:[#allocation50_spill] sm:$0xff]  ;;  %4551 = vmatpush.msra.mxu3 %v3372_v52 }
 0x5a8   : > { %v3978_v31 = vpop.f32.mrf.mxu2  ;;  %v4108_v24 = vpop.f32.mrf.mxu0  ;;  %v3282_v12 = vld [vmem:[#allocation8 + $0xd90] sm:$0xff] }
 0x5a9   : > { %5779 = vst [vmem:[%s9367_s26 + $0x8] sm:$0xff] %v4171_v40  ;;  %v3979_v8 = vadd.f32 %v3978_v31, %v3914_v4  ;;  %v4043_v29 = vpop.f32.mrf.mxu3  ;;  %v4173_v35 = vpop.f32.mrf.mxu1  ;;  %4485 = vmatpush.msra.mxu2 %v3282_v12  ;;  %v3366_v52 = vld [vmem:[#allocation8 + $0x1030] sm:$0xff] }
 0x5aa   : > { %4552 = vmatpush.msra.mxu3 %v3366_v52  ;;  %v3360_v52 = vld [vmem:[#allocation8 + $0x1000] sm:$0xff] }
 0x5ab   : > { %v4044_v28 = vadd.f32 %v4043_v29, %v3979_v8  ;;  %4367 = vmatmul.f32.gmra.mxu0 %v11149_v15  ;;  %v3013_v29 = vld [vmem:[#allocation8 + $0x528] sm:$0xff] }
 0x5ac   : > { %4432 = vmatmul.f32.gmra.mxu1 %v11150_v19  ;;  %4553 = vmatpush.msra.mxu3 %v3360_v52  ;;  %v3354_v52 = vld [vmem:[#allocation8 + $0xfd0] sm:$0xff] }
 0x5ad   : > { %v4109_v57 = vadd.f32 %v4108_v24, %v4044_v28  ;;  %4240 = vmatmul.f32.gmra.mxu2 %v11185_v21  ;;  %4677 = vmatpush.msra.mxu1 %v3013_v29  ;;  %v2911_v24 = vld [vmem:[#allocation8 + $0x1f8] sm:$0xff] }
 0x5ae   : > { %4305 = vmatmul.f32.gmra.mxu3 %v11186_v14  ;;  %4613 = vmatpush.msra.mxu0 %v2911_v24  ;;  %v3858_v24 = vadd.f32 %v9402_v54, %v9515_v47 }
 0x5af   : > { %v4174_v4 = vadd.f32 %v4173_v35, %v4109_v57  ;;  %v11187_v35 = vld [vmem:[#allocation37_spill] sm:$0xff]  ;;  %v3920_v57 = vadd.f32 %v9395_v39, %v3855_v44  ;;  %v11189_v39 = vld [vmem:[#allocation67_spill] sm:$0xff]  ;;  %v11190_v44 = vld [vmem:[#allocation38_spill] sm:$0xff]  ;;  %4554 = vmatpush.msra.mxu3 %v3354_v52 }
 0x5b0   : > { %v3981_v2 = vpop.f32.mrf.mxu2  ;;  %v4111_v40 = vpop.f32.mrf.mxu0  ;;  %v3348_v52 = vld [vmem:[#allocation8 + $0xfa0] sm:$0xff] }
 0x5b1   : > { %5785 = vst [vmem:[%s9367_s26 + $0x38] sm:$0xff] %v4174_v4  ;;  %v3982_v31 = vadd.f32 %v3981_v2, %v3917_v5  ;;  %v4046_v1 = vpop.f32.mrf.mxu3  ;;  %v4176_v8 = vpop.f32.mrf.mxu1  ;;  %4555 = vmatpush.msra.mxu3 %v3348_v52  ;;  %v3342_v52 = vld [vmem:[#allocation8 + $0xf70] sm:$0xff] }
 0x5b3   : > { %v4047_v28 = vadd.f32 %v4046_v1, %v3982_v31  ;;  %4370 = vmatmul.f32.gmra.mxu0 %v11151_v3  ;;  %v3007_v1 = vld [vmem:[#allocation8 + $0x4f8] sm:$0xff]  ;;  %4556 = vmatpush.msra.mxu3 %v3342_v52  ;;  %v3336_v52 = vld [vmem:[#allocation8 + $0xf40] sm:$0xff] }
 0x5b4   : > { %4435 = vmatmul.f32.gmra.mxu1 %v11152_v32 }
 0x5b5   : > { %v4112_v33 = vadd.f32 %v4111_v40, %v4047_v28  ;;  %4243 = vmatmul.f32.gmra.mxu2 %v11187_v35  ;;  %4678 = vmatpush.msra.mxu1 %v3007_v1  ;;  %v2905_v40 = vld [vmem:[#allocation8 + $0x1c8] sm:$0xff] }
 0x5b6   : > { %4308 = vmatmul.f32.gmra.mxu3 %v11188_v63  ;;  %4614 = vmatpush.msra.mxu0 %v2905_v40  ;;  %v3861_v40 = vadd.f32 %v9412_v59, %v9515_v47 }
 0x5b7   : > { %v4177_v5 = vadd.f32 %v4176_v8, %v4112_v33  ;;  %v11191_v33 = vld [vmem:[#allocation55_spill] sm:$0xff]  ;;  %4557 = vmatpush.msra.mxu3 %v3336_v52  ;;  %v3330_v52 = vld [vmem:[#allocation8 + $0xf10] sm:$0xff] }
 0x5b8   : > { %v3984_v4 = vpop.f32.mrf.mxu2  ;;  %v4114_v2 = vpop.f32.mrf.mxu0 }
 0x5b9   : > { %5791 = vst [vmem:[%s9367_s26 + $0x68] sm:$0xff] %v4177_v5  ;;  %v3985_v29 = vadd.f32 %v3984_v4, %v3920_v57  ;;  %v4049_v11 = vpop.f32.mrf.mxu3  ;;  %v4179_v31 = vpop.f32.mrf.mxu1  ;;  %v3923_v57 = vadd.f32 %v9405_v55, %v3858_v24  ;;  %v11192_v55 = vld [vmem:[#allocation66_spill] sm:$0xff]  ;;  %v11193_v24 = vld [vmem:[#allocation39_spill] sm:$0xff]  ;;  %4558 = vmatpush.msra.mxu3 %v3330_v52  ;;  %v3133_v52 = vld [vmem:[#allocation8 + $0x8e8] sm:$0xff] }
 0x5bb   : > { %v4050_v28 = vadd.f32 %v4049_v11, %v3985_v29  ;;  %4373 = vmatmul.f32.gmra.mxu0 %v11153_v30  ;;  %v3001_v11 = vld [vmem:[#allocation8 + $0x4c8] sm:$0xff]  ;;  %v3276_v30 = vld [vmem:[#allocation8 + $0xd60] sm:$0xff] }
 0x5bc   : > { %4438 = vmatmul.f32.gmra.mxu1 %v11189_v39  ;;  %4486 = vmatpush.msra.mxu2 %v3276_v30 }
 0x5bd   : > { %v4115_v8 = vadd.f32 %v4114_v2, %v4050_v28  ;;  %4246 = vmatmul.f32.gmra.mxu2 %v11190_v44  ;;  %4679 = vmatpush.msra.mxu1 %v3001_v11  ;;  %v2899_v2 = vld [vmem:[#allocation8 + $0x198] sm:$0xff] }
 0x5be   : > { %4311 = vmatmul.f32.gmra.mxu3 %v11191_v33  ;;  %4615 = vmatpush.msra.mxu0 %v2899_v2  ;;  %v3864_v2 = vadd.f32 %v9422_v38, %v9515_v47 }
 0x5bf   : > { %v4180_v5 = vadd.f32 %v4179_v31, %v4115_v8  ;;  %v11194_v8 = vld [vmem:[#allocation60_spill] sm:$0xff] }
 0x5c0   : > { %v3987_v4 = vpop.f32.mrf.mxu2  ;;  %v4117_v1 = vpop.f32.mrf.mxu0 }
 0x5c1   : > { %5797 = vst [vmem:[%s9367_s26 + $0x98] sm:$0xff] %v4180_v5  ;;  %v3988_v12 = vadd.f32 %v3987_v4, %v3923_v57  ;;  %v4052_v54 = vpop.f32.mrf.mxu3  ;;  %v4182_v29 = vpop.f32.mrf.mxu1  ;;  %v3926_v57 = vadd.f32 %v9415_v9, %v3861_v40  ;;  %v11195_v9 = vld [vmem:[#allocation80_spill] sm:$0xff] }
 0x5c2   : > { %v11196_v40 = vld [vmem:[#allocation40_spill] sm:$0xff] }
 0x5c3   : > { %v4053_v28 = vadd.f32 %v4052_v54, %v3988_v12  ;;  %4376 = vmatmul.f32.gmra.mxu0 %v11155_v48  ;;  %v2995_v54 = vld [vmem:[#allocation8 + $0x498] sm:$0xff]  ;;  %v3270_v48 = vld [vmem:[#allocation8 + $0xd30] sm:$0xff] }
 0x5c4   : > { %4441 = vmatmul.f32.gmra.mxu1 %v11192_v55  ;;  %4487 = vmatpush.msra.mxu2 %v3270_v48 }
 0x5c5   : > { %v4118_v31 = vadd.f32 %v4117_v1, %v4053_v28  ;;  %4249 = vmatmul.f32.gmra.mxu2 %v11193_v24  ;;  %4680 = vmatpush.msra.mxu1 %v2995_v54  ;;  %v2893_v1 = vld [vmem:[#allocation8 + $0x168] sm:$0xff] }
 0x5c6   : > { %4314 = vmatmul.f32.gmra.mxu3 %v11194_v8  ;;  %4616 = vmatpush.msra.mxu0 %v2893_v1  ;;  %v3867_v1 = vadd.f32 %v9432_v25, %v9515_v47 }
 0x5c7   : > { %v4183_v5 = vadd.f32 %v4182_v29, %v4118_v31  ;;  %v11197_v31 = vld [vmem:[#allocation65_spill] sm:$0xff] }
 0x5c8   : > { %v3990_v30 = vpop.f32.mrf.mxu2  ;;  %v4120_v4 = vpop.f32.mrf.mxu0 }
 0x5c9   : > { %5803 = vst [vmem:[%s9367_s26 + $0xc8] sm:$0xff] %v4183_v5  ;;  %v3991_v11 = vadd.f32 %v3990_v30, %v3926_v57  ;;  %v4055_v59 = vpop.f32.mrf.mxu3  ;;  %v4185_v12 = vpop.f32.mrf.mxu1  ;;  %v3929_v57 = vadd.f32 %v9425_v17, %v3864_v2  ;;  %v11198_v17 = vld [vmem:[#allocation82_spill] sm:$0xff]  ;;  %v11199_v2 = vld [vmem:[#allocation41_spill] sm:$0xff] }
 0x5cb   : > { %v4056_v28 = vadd.f32 %v4055_v59, %v3991_v11  ;;  %4379 = vmatmul.f32.gmra.mxu0 %v11157_v13  ;;  %v2989_v59 = vld [vmem:[#allocation8 + $0x468] sm:$0xff]  ;;  %v3264_v13 = vld [vmem:[#allocation8 + $0xd00] sm:$0xff] }
 0x5cc   : > { %4444 = vmatmul.f32.gmra.mxu1 %v11195_v9  ;;  %4488 = vmatpush.msra.mxu2 %v3264_v13 }
 0x5cd   : > { %v4121_v29 = vadd.f32 %v4120_v4, %v4056_v28  ;;  %4252 = vmatmul.f32.gmra.mxu2 %v11196_v40  ;;  %4681 = vmatpush.msra.mxu1 %v2989_v59  ;;  %v2887_v4 = vld [vmem:[#allocation8 + $0x138] sm:$0xff] }
 0x5ce   : > { %4317 = vmatmul.f32.gmra.mxu3 %v11197_v31  ;;  %4617 = vmatpush.msra.mxu0 %v2887_v4  ;;  %v3870_v4 = vadd.f32 %v9442_v53, %v9515_v47 }
 0x5cf   : > { %v4186_v5 = vadd.f32 %v4185_v12, %v4121_v29  ;;  %v11200_v29 = vld [vmem:[#allocation69_spill] sm:$0xff] }
 0x5d0   : > { %v3993_v48 = vpop.f32.mrf.mxu2  ;;  %v4123_v30 = vpop.f32.mrf.mxu0 }
 0x5d1   : > { %5809 = vst [vmem:[%s9367_s26 + $0xf8] sm:$0xff] %v4186_v5  ;;  %v3994_v54 = vadd.f32 %v3993_v48, %v3929_v57  ;;  %v4058_v38 = vpop.f32.mrf.mxu3  ;;  %v4188_v11 = vpop.f32.mrf.mxu1  ;;  %v3932_v57 = vadd.f32 %v9435_v27, %v3867_v1  ;;  %v11201_v27 = vld [vmem:[#allocation84_spill] sm:$0xff]  ;;  %v11202_v1 = vld [vmem:[#allocation42_spill] sm:$0xff] }
 0x5d3   : > { %v4059_v28 = vadd.f32 %v4058_v38, %v3994_v54  ;;  %4382 = vmatmul.f32.gmra.mxu0 %v11159_v18  ;;  %v2983_v38 = vld [vmem:[#allocation8 + $0x438] sm:$0xff]  ;;  %v3258_v18 = vld [vmem:[#allocation8 + $0xcd0] sm:$0xff] }
 0x5d4   : > { %4447 = vmatmul.f32.gmra.mxu1 %v11198_v17  ;;  %4489 = vmatpush.msra.mxu2 %v3258_v18 }
 0x5d5   : > { %v4124_v12 = vadd.f32 %v4123_v30, %v4059_v28  ;;  %4255 = vmatmul.f32.gmra.mxu2 %v11199_v2  ;;  %4682 = vmatpush.msra.mxu1 %v2983_v38  ;;  %v2881_v30 = vld [vmem:[#allocation8 + $0x108] sm:$0xff] }
 0x5d6   : > { %4320 = vmatmul.f32.gmra.mxu3 %v11200_v29  ;;  %4618 = vmatpush.msra.mxu0 %v2881_v30  ;;  %v3873_v30 = vadd.f32 %v9452_v43, %v9515_v47 }
 0x5d7   : > { %v4189_v5 = vadd.f32 %v4188_v11, %v4124_v12  ;;  %v11203_v12 = vld [vmem:[#allocation70_spill] sm:$0xff] }
 0x5d8   : > { %v3996_v13 = vpop.f32.mrf.mxu2  ;;  %v4126_v48 = vpop.f32.mrf.mxu0 }
 0x5d9   : > { %5815 = vst [vmem:[%s9367_s26 + $0x128] sm:$0xff] %v4189_v5  ;;  %v3997_v59 = vadd.f32 %v3996_v13, %v3932_v57  ;;  %v4061_v25 = vpop.f32.mrf.mxu3  ;;  %v4191_v54 = vpop.f32.mrf.mxu1  ;;  %v3935_v57 = vadd.f32 %v9445_v16, %v3870_v4  ;;  %v11204_v16 = vld [vmem:[#allocation85_spill] sm:$0xff]  ;;  %v11205_v4 = vld [vmem:[#allocation16_spill] sm:$0xff] }
 0x5db   : > { %v4062_v28 = vadd.f32 %v4061_v25, %v3997_v59  ;;  %4385 = vmatmul.f32.gmra.mxu0 %v11161_v46  ;;  %v2977_v25 = vld [vmem:[#allocation8 + $0x408] sm:$0xff]  ;;  %v3252_v46 = vld [vmem:[#allocation8 + $0xca0] sm:$0xff] }
 0x5dc   : > { %4450 = vmatmul.f32.gmra.mxu1 %v11201_v27  ;;  %4490 = vmatpush.msra.mxu2 %v3252_v46 }
 0x5dd   : > { %v4127_v11 = vadd.f32 %v4126_v48, %v4062_v28  ;;  %4258 = vmatmul.f32.gmra.mxu2 %v11202_v1  ;;  %4683 = vmatpush.msra.mxu1 %v2977_v25  ;;  %v2875_v48 = vld [vmem:[#allocation8 + $0xd8] sm:$0xff] }
 0x5de   : > { %4323 = vmatmul.f32.gmra.mxu3 %v11203_v12  ;;  %4619 = vmatpush.msra.mxu0 %v2875_v48  ;;  %v3876_v48 = vadd.f32 %v9462_v58, %v9515_v47 }
 0x5df   : > { %v4192_v5 = vadd.f32 %v4191_v54, %v4127_v11  ;;  %v11206_v11 = vld [vmem:[#allocation71_spill] sm:$0xff] }
 0x5e0   : > { %v3999_v18 = vpop.f32.mrf.mxu2  ;;  %v4129_v13 = vpop.f32.mrf.mxu0 }
 0x5e1   : > { %5821 = vst [vmem:[%s9367_s26 + $0x158] sm:$0xff] %v4192_v5  ;;  %v4000_v38 = vadd.f32 %v3999_v18, %v3935_v57  ;;  %v4064_v53 = vpop.f32.mrf.mxu3  ;;  %v4194_v59 = vpop.f32.mrf.mxu1  ;;  %v3938_v57 = vadd.f32 %v9455_v36, %v3873_v30  ;;  %v11207_v36 = vld [vmem:[#allocation87_spill] sm:$0xff]  ;;  %v11208_v30 = vld [vmem:[#allocation17_spill] sm:$0xff] }
 0x5e3   : > { %v4065_v28 = vadd.f32 %v4064_v53, %v4000_v38  ;;  %4388 = vmatmul.f32.gmra.mxu0 %v11163_v56  ;;  %v2971_v53 = vld [vmem:[#allocation8 + $0x3d8] sm:$0xff]  ;;  %v3246_v56 = vld [vmem:[#allocation8 + $0xc70] sm:$0xff] }
 0x5e4   : > { %4453 = vmatmul.f32.gmra.mxu1 %v11204_v16  ;;  %4491 = vmatpush.msra.mxu2 %v3246_v56 }
 0x5e5   : > { %v4130_v54 = vadd.f32 %v4129_v13, %v4065_v28  ;;  %4261 = vmatmul.f32.gmra.mxu2 %v11205_v4  ;;  %4684 = vmatpush.msra.mxu1 %v2971_v53  ;;  %v2869_v13 = vld [vmem:[#allocation8 + $0xa8] sm:$0xff] }
 0x5e6   : > { %4326 = vmatmul.f32.gmra.mxu3 %v11206_v11  ;;  %4620 = vmatpush.msra.mxu0 %v2869_v13  ;;  %v3879_v13 = vadd.f32 %v9472_v37, %v9515_v47 }
 0x5e7   : > { %v4195_v5 = vadd.f32 %v4194_v59, %v4130_v54  ;;  %v11209_v54 = vld [vmem:[#allocation73_spill] sm:$0xff] }
 0x5e8   : > { %v4002_v46 = vpop.f32.mrf.mxu2  ;;  %v4132_v18 = vpop.f32.mrf.mxu0 }
 0x5e9   : > { %5827 = vst [vmem:[%s9367_s26 + $0x188] sm:$0xff] %v4195_v5  ;;  %v4003_v25 = vadd.f32 %v4002_v46, %v3938_v57  ;;  %v4067_v43 = vpop.f32.mrf.mxu3  ;;  %v4197_v38 = vpop.f32.mrf.mxu1  ;;  %v3941_v57 = vadd.f32 %v9465_v10, %v3876_v48  ;;  %v11210_v10 = vld [vmem:[#allocation88_spill] sm:$0xff]  ;;  %v11211_v48 = vld [vmem:[#allocation18_spill] sm:$0xff] }
 0x5eb   : > { %v4068_v28 = vadd.f32 %v4067_v43, %v4003_v25  ;;  %4391 = vmatmul.f32.gmra.mxu0 %v11165_v22  ;;  %v2965_v43 = vld [vmem:[#allocation8 + $0x3a8] sm:$0xff]  ;;  %v3240_v22 = vld [vmem:[#allocation8 + $0xc40] sm:$0xff] }
 0x5ec   : > { %4456 = vmatmul.f32.gmra.mxu1 %v11207_v36  ;;  %4492 = vmatpush.msra.mxu2 %v3240_v22 }
 0x5ed   : > { %v4133_v59 = vadd.f32 %v4132_v18, %v4068_v28  ;;  %4264 = vmatmul.f32.gmra.mxu2 %v11208_v30  ;;  %4685 = vmatpush.msra.mxu1 %v2965_v43  ;;  %v2863_v18 = vld [vmem:[#allocation8 + $0x78] sm:$0xff] }
 0x5ee   : > { %4329 = vmatmul.f32.gmra.mxu3 %v11209_v54  ;;  %4621 = vmatpush.msra.mxu0 %v2863_v18  ;;  %v3882_v18 = vadd.f32 %v9482_v60, %v9515_v47 }
 0x5ef   : > { %v4198_v5 = vadd.f32 %v4197_v38, %v4133_v59  ;;  %v11212_v59 = vld [vmem:[#allocation75_spill] sm:$0xff] }
 0x5f0   : > { %v4005_v56 = vpop.f32.mrf.mxu2  ;;  %v4135_v46 = vpop.f32.mrf.mxu0 }
 0x5f1   : > { %5833 = vst [vmem:[%s9367_s26 + $0x1b8] sm:$0xff] %v4198_v5  ;;  %v4006_v53 = vadd.f32 %v4005_v56, %v3941_v57  ;;  %v4070_v58 = vpop.f32.mrf.mxu3  ;;  %v4200_v25 = vpop.f32.mrf.mxu1  ;;  %v3944_v57 = vadd.f32 %v9475_v62, %v3879_v13  ;;  %v11213_v62 = vld [vmem:[#allocation89_spill] sm:$0xff]  ;;  %v11214_v13 = vld [vmem:[#allocation19_spill] sm:$0xff] }
 0x5f3   : > { %v4071_v28 = vadd.f32 %v4070_v58, %v4006_v53  ;;  %4394 = vmatmul.f32.gmra.mxu0 %v11167_v7  ;;  %v2959_v58 = vld [vmem:[#allocation8 + $0x378] sm:$0xff]  ;;  %v3234_v7 = vld [vmem:[#allocation8 + $0xc10] sm:$0xff] }
 0x5f4   : > { %4459 = vmatmul.f32.gmra.mxu1 %v11210_v10  ;;  %4493 = vmatpush.msra.mxu2 %v3234_v7 }
 0x5f5   : > { %v4136_v38 = vadd.f32 %v4135_v46, %v4071_v28  ;;  %4267 = vmatmul.f32.gmra.mxu2 %v11211_v48  ;;  %4686 = vmatpush.msra.mxu1 %v2959_v58  ;;  %v2857_v46 = vld [vmem:[#allocation8 + $0x48] sm:$0xff] }
 0x5f6   : > { %4332 = vmatmul.f32.gmra.mxu3 %v11212_v59  ;;  %4622 = vmatpush.msra.mxu0 %v2857_v46  ;;  %v2953_v58 = vld [vmem:[#allocation8 + $0x348] sm:$0xff]  ;;  %v3885_v46 = vadd.f32 %v9492_v41, %v9515_v47 }
 0x5f7   : > { %v4201_v5 = vadd.f32 %v4200_v25, %v4136_v38  ;;  %v11215_v38 = vld [vmem:[#allocation76_spill] sm:$0xff]  ;;  %4687 = vmatpush.msra.mxu1 %v2953_v58  ;;  %4738 = vmatpush.msrb.mxu2 %v3133_v52 }
 0x5f8   : > { %v4008_v22 = vpop.f32.mrf.mxu2  ;;  %v4138_v56 = vpop.f32.mrf.mxu0  ;;  %v3325_v58 = vld [vmem:[#allocation8 + $0xee8] sm:$0xff] }
 0x5f9   : > { %5839 = vst [vmem:[%s9367_s26 + $0x1e8] sm:$0xff] %v4201_v5  ;;  %v4009_v43 = vadd.f32 %v4008_v22, %v3944_v57  ;;  %v4073_v37 = vpop.f32.mrf.mxu3  ;;  %v4203_v53 = vpop.f32.mrf.mxu1  ;;  %v3947_v57 = vadd.f32 %v9485_v26, %v3882_v18  ;;  %v11216_v26 = vld [vmem:[#allocation90_spill] sm:$0xff]  ;;  %v11217_v18 = vld [vmem:[#allocation20_spill] sm:$0xff] }
 0x5fb   : > { %v4074_v28 = vadd.f32 %v4073_v37, %v4009_v43  ;;  %4397 = vmatmul.f32.gmra.mxu0 %v11169_v42  ;;  %v2851_v42 = vld [vmem:[#allocation8 + $0x18] sm:$0xff] }
 0x5fc   : > { %4462 = vmatmul.f32.gmra.mxu1 %v11213_v62  ;;  %v3229_v62 = vld [vmem:[#allocation8 + $0xbe8] sm:$0xff]  ;;  %4623 = vmatpush.msra.mxu0 %v2851_v42 }
 0x5fd   : > { %v4139_v25 = vadd.f32 %v4138_v56, %v4074_v28  ;;  %4270 = vmatmul.f32.gmra.mxu2 %v11214_v13  ;;  %v2947_v56 = vld [vmem:[#allocation8 + $0x318] sm:$0xff]  ;;  %4803 = vmatpush.msrb.mxu3 %v3229_v62 }
 0x5fe   : > { %4335 = vmatmul.f32.gmra.mxu3 %v11215_v38  ;;  %4688 = vmatpush.msra.mxu1 %v2947_v56 }
 0x5ff   : > { %v4204_v7 = vadd.f32 %v4203_v53, %v4139_v25  ;;  %v11218_v25 = vld [vmem:[#allocation77_spill] sm:$0xff]  ;;  %4868 = vmatpush.msrb.mxu0 %v3325_v58 }
 0x600   : > { %v4011_v5 = vpop.f32.mrf.mxu2  ;;  %v4141_v22 = vpop.f32.mrf.mxu0  ;;  %v3217_v58 = vld [vmem:[#allocation8 + $0xb88] sm:$0xff] }
 0x601   : > { %5845 = vst [vmem:[%s9367_s26 + $0x218] sm:$0xff] %v4204_v7  ;;  %v4012_v60 = vadd.f32 %v4011_v5, %v3947_v57  ;;  %v4076_v43 = vpop.f32.mrf.mxu3  ;;  %v4206_v37 = vpop.f32.mrf.mxu1  ;;  %v3950_v57 = vadd.f32 %v9495_v20, %v3885_v46  ;;  %v3127_v7 = vld [vmem:[#allocation8 + $0x8b8] sm:$0xff]  ;;  %v11221_v46 = vld [vmem:[#allocation21_spill] sm:$0xff] }
 0x602   : > { %v3223_v5 = vld [vmem:[#allocation8 + $0xbb8] sm:$0xff]  ;;  %4739 = vmatpush.msrb.mxu2 %v3127_v7  ;;  %v3421_v7 = vld [vmem:[#allocation8 + $0x11e8] sm:$0xff] }
 0x603   : > { %v4077_v28 = vadd.f32 %v4076_v43, %v4012_v60  ;;  %4400 = vmatmul.f32.gmra.mxu0 %v11171_v50  ;;  %4804 = vmatpush.msrb.mxu3 %v3223_v5  ;;  %v11220_v20 = vld [vmem:[#allocation91_spill] sm:$0xff]  ;;  %v3121_v5 = vld [vmem:[#allocation8 + $0x888] sm:$0xff] }
 0x604   : > { %4465 = vmatmul.f32.gmra.mxu1 %v11216_v26  ;;  %4740 = vmatpush.msrb.mxu2 %v3121_v5 }
 0x605   : > { %v4142_v53 = vadd.f32 %v4141_v22, %v4077_v28  ;;  %4273 = vmatmul.f32.gmra.mxu2 %v11217_v18  ;;  %v3888_v22 = vadd.f32 %v9502_v45, %v9515_v47  ;;  %v11219_v28 = vld [vmem:[#allocation46_spill] sm:$0xff]  ;;  %4933 = vmatpush.msrb.mxu1 %v3421_v7  ;;  %v11226_v7 = vld [vmem:[#allocation79_spill] sm:$0xff] }
 0x606   : > { %4338 = vmatmul.f32.gmra.mxu3 %v11218_v25  ;;  %v3319_v45 = vld [vmem:[#allocation8 + $0xeb8] sm:$0xff] }
 0x607   : > { %v4207_v42 = vadd.f32 %v4206_v37, %v4142_v53  ;;  %v11222_v53 = vld [vmem:[#allocation78_spill] sm:$0xff]  ;;  %4805 = vmatpush.msrb.mxu3 %v3217_v58  ;;  %4869 = vmatpush.msrb.mxu0 %v3319_v45 }
 0x608   : > { %v4014_v41 = vpop.f32.mrf.mxu2  ;;  %v4144_v60 = vpop.f32.mrf.mxu0  ;;  %v3115_v58 = vld [vmem:[#allocation8 + $0x858] sm:$0xff] }
 0x609   : > { %5851 = vst [vmem:[%s9367_s26 + $0x248] sm:$0xff] %v4207_v42  ;;  %v4015_v62 = vadd.f32 %v4014_v41, %v3950_v57  ;;  %v4079_v43 = vpop.f32.mrf.mxu3  ;;  %v4209_v52 = vpop.f32.mrf.mxu1  ;;  %v3953_v42 = vadd.f32 %v9505_v49, %v3888_v22  ;;  %v11223_v49 = vld [vmem:[#allocation52_spill] sm:$0xff]  ;;  %v3211_v45 = vld [vmem:[#allocation8 + $0xb58] sm:$0xff]  ;;  %4741 = vmatpush.msrb.mxu2 %v3115_v58 }
 0x60a   : > { %4806 = vmatpush.msrb.mxu3 %v3211_v45  ;;  %v3205_v58 = vld [vmem:[#allocation8 + $0xb28] sm:$0xff] }
 0x60b   : > { %v4080_v56 = vadd.f32 %v4079_v43, %v4015_v62  ;;  %4403 = vmatmul.f32.gmra.mxu0 %v11219_v28 }
 0x60c   : > { %4468 = vmatmul.f32.gmra.mxu1 %v11220_v20  ;;  %4807 = vmatpush.msrb.mxu3 %v3205_v58  ;;  %v3301_v58 = vld [vmem:[#allocation8 + $0xe28] sm:$0xff] }
 0x60d   : > { %v4145_v37 = vadd.f32 %v4144_v60, %v4080_v56  ;;  %4276 = vmatmul.f32.gmra.mxu2 %v11221_v46  ;;  %v3891_v60 = vadd.f32 %v9517_v0, %v9515_v47  ;;  %v3313_v47 = vld [vmem:[#allocation8 + $0xe88] sm:$0xff] }
 0x60e   : > { %4341 = vmatmul.f32.gmra.mxu3 %v11222_v53  ;;  %4870 = vmatpush.msrb.mxu0 %v3313_v47 }
 0x60f   : > { %v4210_v57 = vadd.f32 %v4209_v52, %v4145_v37  ;;  %v11224_v52 = vld [vmem:[#allocation92_spill] sm:$0xff]  ;;  %v11225_v37 = vld [vmem:[#allocation23_spill] sm:$0xff] }
 0x610   : > { %v4017_v41 = vpop.f32.mrf.mxu2  ;;  %v4147_v26 = vpop.f32.mrf.mxu0 }
 0x611   : > { %5857 = vst [vmem:[%s9367_s26 + $0x278] sm:$0xff] %v4210_v57  ;;  %v4018_v62 = vadd.f32 %v4017_v41, %v3953_v42  ;;  %v4082_v43 = vpop.f32.mrf.mxu3  ;;  %v4212_v20 = vpop.f32.mrf.mxu1  ;;  %v11227_v57 = vld [vmem:[#allocation24_spill] sm:$0xff]  ;;  %v3415_v41 = vld [vmem:[#allocation8 + $0x11b8] sm:$0xff] }
 0x612   : > { %v3956_v42 = vadd.f32 %v11227_v57, %v3891_v60  ;;  %4934 = vmatpush.msrb.mxu1 %v3415_v41  ;;  %v11229_v60 = vld [vmem:[#allocation93_spill] sm:$0xff]  ;;  %v11231_v57 = vld [vmem:[#allocation51_spill] sm:$0xff] }
 0x613   : > { %v4083_v56 = vadd.f32 %v4082_v43, %v4018_v62  ;;  %4406 = vmatmul.f32.gmra.mxu0 %v11223_v49  ;;  %v11232_v41 = vld [vmem:[#allocation105_spill] sm:$0xff] }
 0x614   : > { %4471 = vmatmul.f32.gmra.mxu1 %v11224_v52  ;;  %v9654_v52 = vperm.slane %v11231_v57, 2 }
 0x615   : > { %v4148_v22 = vadd.f32 %v4147_v26, %v4083_v56  ;;  %4279 = vmatmul.f32.gmra.mxu2 %v11225_v37  ;;  %v11228_v56 = vld [vmem:[#allocation53_spill] sm:$0xff] }
 0x616   : > { %4344 = vmatmul.f32.gmra.mxu3 %v11226_v7 }
 0x617   : > { %v4213_v5 = vadd.f32 %v4212_v20, %v4148_v22  ;;  %v11230_v22 = vld [vmem:[#allocation94_spill] sm:$0xff] }
 0x618   : > { %v4020_v28 = vpop.f32.mrf.mxu2  ;;  %v4150_v50 = vpop.f32.mrf.mxu0 }
 0x619   : > { %5863 = vst [vmem:[%s9367_s26 + $0x2a8] sm:$0xff] %v4213_v5  ;;  %v4021_v0 = vadd.f32 %v4020_v28, %v3956_v42  ;;  %v4085_v62 = vpop.f32.mrf.mxu3  ;;  %v4215_v43 = vpop.f32.mrf.mxu1  ;;  %v3409_v28 = vld [vmem:[#allocation8 + $0x1188] sm:$0xff] }
 0x61a   : > { %v3109_v42 = vld [vmem:[#allocation8 + $0x828] sm:$0xff]  ;;  %4935 = vmatpush.msrb.mxu1 %v3409_v28 }
 0x61b   : > { %v4086_v26 = vadd.f32 %v4085_v62, %v4021_v0  ;;  %4409 = vmatmul.f32.gmra.mxu0 %v11228_v56  ;;  %4742 = vmatpush.msrb.mxu2 %v3109_v42  ;;  %v3307_v0 = vld [vmem:[#allocation8 + $0xe58] sm:$0xff] }
 0x61c   : > { %4474 = vmatmul.f32.gmra.mxu1 %v11229_v60  ;;  %4871 = vmatpush.msrb.mxu0 %v3307_v0  ;;  %v11234_v60 = vld [vmem:[#allocation106_spill] sm:$0xff] }
 0x61d   : > { %v4151_v20 = vadd.f32 %v4150_v50, %v4086_v26  ;;  %4494 = vmatmul.f32.vlgmr.msra.gmra.mxu2 %v11230_v22  ;;  %v3403_v42 = vld [vmem:[#allocation8 + $0x1158] sm:$0xff] }
 0x61e   : > { %4559 = vmatmul.f32.vlgmr.msra.gmra.mxu3 %v11232_v41  ;;  %v3199_v56 = vld [vmem:[#allocation8 + $0xaf8] sm:$0xff]  ;;  %4936 = vmatpush.msrb.mxu1 %v3403_v42  ;;  %v3397_v42 = vld [vmem:[#allocation8 + $0x1128] sm:$0xff] }
 0x61f   : > { %v4216_v5 = vadd.f32 %v4215_v43, %v4151_v20  ;;  %v11233_v20 = vld [vmem:[#allocation49_spill] sm:$0xff]  ;;  %4808 = vmatpush.msrb.mxu3 %v3199_v56  ;;  %4872 = vmatpush.msrb.mxu0 %v3301_v58  ;;  %v3295_v56 = vld [vmem:[#allocation8 + $0xdf8] sm:$0xff] }
 0x620   : > { %v4235_v45 = vpop.f32.mrf.mxu2  ;;  %v4365_v47 = vpop.f32.mrf.mxu0  ;;  %4937 = vmatpush.msrb.mxu1 %v3397_v42  ;;  %v3391_v42 = vld [vmem:[#allocation8 + $0x10f8] sm:$0xff] }
 0x621   : > { %5869 = vst [vmem:[%s9367_s26 + $0x2d8] sm:$0xff] %v4216_v5  ;;  %v4236_v62 = vadd.f32 %v4235_v45, %v9654_v52  ;;  %v4300_v50 = vpop.f32.mrf.mxu3  ;;  %v4430_v26 = vpop.f32.mrf.mxu1  ;;  %v3103_v5 = vld [vmem:[#allocation8 + $0x7f8] sm:$0xff]  ;;  %4873 = vmatpush.msrb.mxu0 %v3295_v56 }
 0x622   : > { %4743 = vmatpush.msrb.mxu2 %v3103_v5  ;;  %v3097_v5 = vld [vmem:[#allocation8 + $0x7c8] sm:$0xff]  ;;  %4938 = vmatpush.msrb.mxu1 %v3391_v42 }
 0x623   : > { %v4301_v57 = vadd.f32 %v4300_v50, %v4236_v62  ;;  %4624 = vmatmul.f32.vlgmr.msra.gmra.mxu0 %v11181_v23  ;;  %v3193_v23 = vld [vmem:[#allocation8 + $0xac8] sm:$0xff] }
 0x624   : > { %4689 = vmatmul.f32.vlgmr.msra.gmra.mxu1 %v11182_v34  ;;  %4744 = vmatpush.msrb.mxu2 %v3097_v5  ;;  %v3091_v5 = vld [vmem:[#allocation8 + $0x798] sm:$0xff]  ;;  %v3385_v42 = vld [vmem:[#allocation8 + $0x10c8] sm:$0xff] }
 0x625   : > { %v4366_v43 = vadd.f32 %v4365_v47, %v4301_v57  ;;  %4497 = vmatmul.f32.gmra.mxu2 %v11233_v20  ;;  %v11235_v57 = vld [vmem:[#allocation57_spill] sm:$0xff]  ;;  %4809 = vmatpush.msrb.mxu3 %v3193_v23 }
 0x626   : > { %4562 = vmatmul.f32.gmra.mxu3 %v11234_v60  ;;  %4745 = vmatpush.msrb.mxu2 %v3091_v5  ;;  %v3289_v23 = vld [vmem:[#allocation8 + $0xdc8] sm:$0xff] }
 0x627   : > { %v9663_v28 = vadd.f32 %v4430_v26, %v4366_v43  ;;  %v11236_v43 = vld [vmem:[#allocation107_spill] sm:$0xff]  ;;  %4874 = vmatpush.msrb.mxu0 %v3289_v23  ;;  %v3085_v5 = vld [vmem:[#allocation8 + $0x768] sm:$0xff]  ;;  %4939 = vmatpush.msrb.mxu1 %v3385_v42 }
 0x628   : > { %v4238_v45 = vpop.f32.mrf.mxu2  ;;  %v4368_v49 = vpop.f32.mrf.mxu0  ;;  %4746 = vmatpush.msrb.mxu2 %v3085_v5  ;;  %v3379_v42 = vld [vmem:[#allocation8 + $0x1098] sm:$0xff] }
 0x629   : > { %v4239_v0 = vadd.f32 %v4238_v45, %v9654_v52  ;;  %v4303_v62 = vpop.f32.mrf.mxu3  ;;  %v4433_v50 = vpop.f32.mrf.mxu1  ;;  %v3079_v5 = vld [vmem:[#allocation8 + $0x738] sm:$0xff]  ;;  %4940 = vmatpush.msrb.mxu1 %v3379_v42  ;;  %v3373_v42 = vld [vmem:[#allocation8 + $0x1068] sm:$0xff] }
 0x62a   : > { %4747 = vmatpush.msrb.mxu2 %v3079_v5  ;;  %v3073_v5 = vld [vmem:[#allocation8 + $0x708] sm:$0xff] }
 0x62b   : > { %v4304_v47 = vadd.f32 %v4303_v62, %v4239_v0  ;;  %4627 = vmatmul.f32.gmra.mxu0 %v11183_v61  ;;  %v3187_v61 = vld [vmem:[#allocation8 + $0xa98] sm:$0xff]  ;;  %4941 = vmatpush.msrb.mxu1 %v3373_v42 }
 0x62c   : > { %4692 = vmatmul.f32.gmra.mxu1 %v11184_v51  ;;  %4810 = vmatpush.msrb.mxu3 %v3187_v61  ;;  %v3283_v61 = vld [vmem:[#allocation8 + $0xd98] sm:$0xff] }
 0x62d   : > { %v4369_v26 = vadd.f32 %v4368_v49, %v4304_v47  ;;  %4500 = vmatmul.f32.gmra.mxu2 %v11235_v57  ;;  %v11237_v47 = vld [vmem:[#allocation58_spill] sm:$0xff]  ;;  %4875 = vmatpush.msrb.mxu0 %v3283_v61 }
 0x62e   : > { %4565 = vmatmul.f32.gmra.mxu3 %v11236_v43  ;;  %4748 = vmatpush.msrb.mxu2 %v3073_v5  ;;  %v3367_v42 = vld [vmem:[#allocation8 + $0x1038] sm:$0xff] }
 0x62f   : > { %v9670_v34 = vadd.f32 %v4433_v50, %v4369_v26  ;;  %v11238_v26 = vld [vmem:[#allocation108_spill] sm:$0xff]  ;;  %v3067_v5 = vld [vmem:[#allocation8 + $0x6d8] sm:$0xff]  ;;  %4942 = vmatpush.msrb.mxu1 %v3367_v42 }
 0x630   : > { %v4241_v45 = vpop.f32.mrf.mxu2  ;;  %v4371_v10 = vpop.f32.mrf.mxu0  ;;  %4749 = vmatpush.msrb.mxu2 %v3067_v5  ;;  %v3361_v42 = vld [vmem:[#allocation8 + $0x1008] sm:$0xff] }
 0x631   : > { %v4242_v58 = vadd.f32 %v4241_v45, %v9654_v52  ;;  %v4306_v0 = vpop.f32.mrf.mxu3  ;;  %v4436_v62 = vpop.f32.mrf.mxu1  ;;  %v3061_v5 = vld [vmem:[#allocation8 + $0x6a8] sm:$0xff]  ;;  %4943 = vmatpush.msrb.mxu1 %v3361_v42  ;;  %v3355_v42 = vld [vmem:[#allocation8 + $0xfd8] sm:$0xff] }
 0x632   : > { %4750 = vmatpush.msrb.mxu2 %v3061_v5  ;;  %v3055_v5 = vld [vmem:[#allocation8 + $0x678] sm:$0xff] }
 0x633   : > { %v4307_v49 = vadd.f32 %v4306_v0, %v4242_v58  ;;  %4630 = vmatmul.f32.gmra.mxu0 %v11185_v21  ;;  %v3181_v21 = vld [vmem:[#allocation8 + $0xa68] sm:$0xff]  ;;  %4944 = vmatpush.msrb.mxu1 %v3355_v42 }
 0x634   : > { %4695 = vmatmul.f32.gmra.mxu1 %v11186_v14  ;;  %4811 = vmatpush.msrb.mxu3 %v3181_v21  ;;  %v3277_v21 = vld [vmem:[#allocation8 + $0xd68] sm:$0xff] }
 0x635   : > { %v4372_v50 = vadd.f32 %v4371_v10, %v4307_v49  ;;  %4503 = vmatmul.f32.gmra.mxu2 %v11237_v47  ;;  %v11239_v49 = vld [vmem:[#allocation62_spill] sm:$0xff]  ;;  %4876 = vmatpush.msrb.mxu0 %v3277_v21  ;;  %v3349_v42 = vld [vmem:[#allocation8 + $0xfa8] sm:$0xff] }
 0x636   : > { %4568 = vmatmul.f32.gmra.mxu3 %v11238_v26  ;;  %4751 = vmatpush.msrb.mxu2 %v3055_v5  ;;  %v3049_v5 = vld [vmem:[#allocation8 + $0x648] sm:$0xff] }
 0x637   : > { %v9677_v51 = vadd.f32 %v4436_v62, %v4372_v50  ;;  %v11240_v50 = vld [vmem:[#allocation109_spill] sm:$0xff]  ;;  %4945 = vmatpush.msrb.mxu1 %v3349_v42  ;;  %v3343_v42 = vld [vmem:[#allocation8 + $0xf78] sm:$0xff] }
 0x638   : > { %v4244_v45 = vpop.f32.mrf.mxu2  ;;  %v4374_v36 = vpop.f32.mrf.mxu0  ;;  %4752 = vmatpush.msrb.mxu2 %v3049_v5  ;;  %v3043_v5 = vld [vmem:[#allocation8 + $0x618] sm:$0xff] }
 0x639   : > { %v4245_v56 = vadd.f32 %v4244_v45, %v9654_v52  ;;  %v4309_v58 = vpop.f32.mrf.mxu3  ;;  %v4439_v0 = vpop.f32.mrf.mxu1  ;;  %4946 = vmatpush.msrb.mxu1 %v3343_v42  ;;  %v3337_v42 = vld [vmem:[#allocation8 + $0xf48] sm:$0xff] }
 0x63a   : > { %4753 = vmatpush.msrb.mxu2 %v3043_v5  ;;  %v2942_v5 = vld [vmem:[#allocation8 + $0x2f0] sm:$0xff] }
 0x63b   : > { %v4310_v10 = vadd.f32 %v4309_v58, %v4245_v56  ;;  %4633 = vmatmul.f32.gmra.mxu0 %v11187_v35  ;;  %v3175_v35 = vld [vmem:[#allocation8 + $0xa38] sm:$0xff]  ;;  %4947 = vmatpush.msrb.mxu1 %v3337_v42  ;;  %v2936_v42 = vld [vmem:[#allocation8 + $0x2c0] sm:$0xff] }
 0x63c   : > { %4698 = vmatmul.f32.gmra.mxu1 %v11188_v63  ;;  %4812 = vmatpush.msrb.mxu3 %v3175_v35  ;;  %v3271_v35 = vld [vmem:[#allocation8 + $0xd38] sm:$0xff] }
 0x63d   : > { %v4375_v62 = vadd.f32 %v4374_v36, %v4310_v10  ;;  %4506 = vmatmul.f32.gmra.mxu2 %v11239_v49  ;;  %v11241_v10 = vld [vmem:[#allocation61_spill] sm:$0xff]  ;;  %4877 = vmatpush.msrb.mxu0 %v3271_v35 }
 0x63e   : > { %4571 = vmatmul.f32.gmra.mxu3 %v11240_v50  ;;  %4998 = vmatpush.msra.mxu2 %v2942_v5  ;;  %v3032_v5 = vld [vmem:[#allocation8 + $0x5c0] sm:$0xff] }
 0x63f   : > { %v9684_v14 = vadd.f32 %v4439_v0, %v4375_v62  ;;  %v11242_v62 = vld [vmem:[#allocation110_spill] sm:$0xff] }
 0x640   : > { %v4247_v45 = vpop.f32.mrf.mxu2  ;;  %v4377_v16 = vpop.f32.mrf.mxu0  ;;  %4999 = vmatpush.msra.mxu2 %v2936_v42  ;;  %v3026_v42 = vld [vmem:[#allocation8 + $0x590] sm:$0xff] }
 0x641   : > { %v4248_v23 = vadd.f32 %v4247_v45, %v9654_v52  ;;  %v4312_v56 = vpop.f32.mrf.mxu3  ;;  %v4442_v58 = vpop.f32.mrf.mxu1 }
 0x643   : > { %v4313_v36 = vadd.f32 %v4312_v56, %v4248_v23  ;;  %4636 = vmatmul.f32.gmra.mxu0 %v11190_v44  ;;  %v3169_v44 = vld [vmem:[#allocation8 + $0xa08] sm:$0xff] }
 0x644   : > { %4701 = vmatmul.f32.gmra.mxu1 %v11191_v33  ;;  %4813 = vmatpush.msrb.mxu3 %v3169_v44  ;;  %v3265_v44 = vld [vmem:[#allocation8 + $0xd08] sm:$0xff] }
 0x645   : > { %v4378_v0 = vadd.f32 %v4377_v16, %v4313_v36  ;;  %4509 = vmatmul.f32.gmra.mxu2 %v11241_v10  ;;  %v11243_v36 = vld [vmem:[#allocation68_spill] sm:$0xff]  ;;  %4878 = vmatpush.msrb.mxu0 %v3265_v44 }
 0x646   : > { %4574 = vmatmul.f32.gmra.mxu3 %v11242_v62 }
 0x647   : > { %v9691_v63 = vadd.f32 %v4442_v58, %v4378_v0  ;;  %v11244_v0 = vld [vmem:[#allocation111_spill] sm:$0xff] }
 0x648   : > { %v4250_v45 = vpop.f32.mrf.mxu2  ;;  %v4380_v27 = vpop.f32.mrf.mxu0 }
 0x649   : > { %v4251_v61 = vadd.f32 %v4250_v45, %v9654_v52  ;;  %v4315_v23 = vpop.f32.mrf.mxu3  ;;  %v4445_v56 = vpop.f32.mrf.mxu1 }
 0x64b   : > { %v4316_v16 = vadd.f32 %v4315_v23, %v4251_v61  ;;  %4639 = vmatmul.f32.gmra.mxu0 %v11193_v24  ;;  %v3163_v24 = vld [vmem:[#allocation8 + $0x9d8] sm:$0xff] }
 0x64c   : > { %4704 = vmatmul.f32.gmra.mxu1 %v11194_v8  ;;  %4814 = vmatpush.msrb.mxu3 %v3163_v24  ;;  %v3259_v24 = vld [vmem:[#allocation8 + $0xcd8] sm:$0xff] }
 0x64d   : > { %v4381_v58 = vadd.f32 %v4380_v27, %v4316_v16  ;;  %4512 = vmatmul.f32.gmra.mxu2 %v11243_v36  ;;  %v11245_v16 = vld [vmem:[#allocation64_spill] sm:$0xff]  ;;  %4879 = vmatpush.msrb.mxu0 %v3259_v24 }
 0x64e   : > { %4577 = vmatmul.f32.gmra.mxu3 %v11244_v0 }
 0x64f   : > { %v9698_v33 = vadd.f32 %v4445_v56, %v4381_v58  ;;  %v11246_v58 = vld [vmem:[#allocation56_spill] sm:$0xff] }
 0x650   : > { %v4253_v45 = vpop.f32.mrf.mxu2  ;;  %v4383_v17 = vpop.f32.mrf.mxu0 }
 0x651   : > { %v4254_v21 = vadd.f32 %v4253_v45, %v9654_v52  ;;  %v4318_v61 = vpop.f32.mrf.mxu3  ;;  %v4448_v23 = vpop.f32.mrf.mxu1 }
 0x653   : > { %v4319_v27 = vadd.f32 %v4318_v61, %v4254_v21  ;;  %4642 = vmatmul.f32.gmra.mxu0 %v11196_v40  ;;  %v3157_v40 = vld [vmem:[#allocation8 + $0x9a8] sm:$0xff] }
 0x654   : > { %4707 = vmatmul.f32.gmra.mxu1 %v11197_v31  ;;  %4815 = vmatpush.msrb.mxu3 %v3157_v40  ;;  %v3253_v40 = vld [vmem:[#allocation8 + $0xca8] sm:$0xff] }
 0x655   : > { %v4384_v56 = vadd.f32 %v4383_v17, %v4319_v27  ;;  %4515 = vmatmul.f32.gmra.mxu2 %v11245_v16  ;;  %v11247_v27 = vld [vmem:[#allocation72_spill] sm:$0xff]  ;;  %4880 = vmatpush.msrb.mxu0 %v3253_v40 }
 0x656   : > { %4580 = vmatmul.f32.gmra.mxu3 %v11246_v58 }
 0x657   : > { %v9705_v8 = vadd.f32 %v4448_v23, %v4384_v56  ;;  %v11248_v56 = vld [vmem:[#allocation59_spill] sm:$0xff] }
 0x658   : > { %v4256_v45 = vpop.f32.mrf.mxu2  ;;  %v4386_v0 = vpop.f32.mrf.mxu0 }
 0x659   : > { %v4257_v35 = vadd.f32 %v4256_v45, %v9654_v52  ;;  %v4321_v21 = vpop.f32.mrf.mxu3  ;;  %v4451_v61 = vpop.f32.mrf.mxu1 }
 0x65b   : > { %v4322_v17 = vadd.f32 %v4321_v21, %v4257_v35  ;;  %4645 = vmatmul.f32.gmra.mxu0 %v11199_v2  ;;  %v3151_v2 = vld [vmem:[#allocation8 + $0x978] sm:$0xff] }
 0x65c   : > { %4710 = vmatmul.f32.gmra.mxu1 %v11200_v29  ;;  %4816 = vmatpush.msrb.mxu3 %v3151_v2  ;;  %v3247_v2 = vld [vmem:[#allocation8 + $0xc78] sm:$0xff] }
 0x65d   : > { %v4387_v23 = vadd.f32 %v4386_v0, %v4322_v17  ;;  %4518 = vmatmul.f32.gmra.mxu2 %v11247_v27  ;;  %v11249_v17 = vld [vmem:[#allocation74_spill] sm:$0xff]  ;;  %4881 = vmatpush.msrb.mxu0 %v3247_v2 }
 0x65e   : > { %4583 = vmatmul.f32.gmra.mxu3 %v11248_v56 }
 0x65f   : > { %v9712_v31 = vadd.f32 %v4451_v61, %v4387_v23  ;;  %v11250_v23 = vld [vmem:[#allocation98_spill] sm:$0xff] }
 0x660   : > { %v4259_v45 = vpop.f32.mrf.mxu2  ;;  %v4389_v58 = vpop.f32.mrf.mxu0 }
 0x661   : > { %v4260_v44 = vadd.f32 %v4259_v45, %v9654_v52  ;;  %v4324_v35 = vpop.f32.mrf.mxu3  ;;  %v4454_v21 = vpop.f32.mrf.mxu1 }
 0x663   : > { %v4325_v0 = vadd.f32 %v4324_v35, %v4260_v44  ;;  %4648 = vmatmul.f32.gmra.mxu0 %v11202_v1  ;;  %v3145_v1 = vld [vmem:[#allocation8 + $0x948] sm:$0xff] }
 0x664   : > { %4713 = vmatmul.f32.gmra.mxu1 %v11203_v12  ;;  %4817 = vmatpush.msrb.mxu3 %v3145_v1  ;;  %v3241_v1 = vld [vmem:[#allocation8 + $0xc48] sm:$0xff] }
 0x665   : > { %v4390_v61 = vadd.f32 %v4389_v58, %v4325_v0  ;;  %4521 = vmatmul.f32.gmra.mxu2 %v11249_v17  ;;  %v11251_v0 = vld [vmem:[#allocation81_spill] sm:$0xff]  ;;  %4882 = vmatpush.msrb.mxu0 %v3241_v1 }
 0x666   : > { %4586 = vmatmul.f32.gmra.mxu3 %v11250_v23 }
 0x667   : > { %v9719_v29 = vadd.f32 %v4454_v21, %v4390_v61  ;;  %v11252_v61 = vld [vmem:[#allocation99_spill] sm:$0xff] }
 0x668   : > { %v4262_v45 = vpop.f32.mrf.mxu2  ;;  %v4392_v56 = vpop.f32.mrf.mxu0 }
 0x669   : > { %v4263_v24 = vadd.f32 %v4262_v45, %v9654_v52  ;;  %v4327_v44 = vpop.f32.mrf.mxu3  ;;  %v4457_v35 = vpop.f32.mrf.mxu1 }
 0x66b   : > { %v4328_v58 = vadd.f32 %v4327_v44, %v4263_v24  ;;  %4651 = vmatmul.f32.gmra.mxu0 %v11205_v4  ;;  %v3139_v4 = vld [vmem:[#allocation8 + $0x918] sm:$0xff] }
 0x66c   : > { %4716 = vmatmul.f32.gmra.mxu1 %v11206_v11  ;;  %4818 = vmatpush.msrb.mxu3 %v3139_v4  ;;  %v3038_v4 = vld [vmem:[#allocation8 + $0x5f0] sm:$0xff] }
 0x66d   : > { %v4393_v21 = vadd.f32 %v4392_v56, %v4328_v58  ;;  %4524 = vmatmul.f32.gmra.mxu2 %v11251_v0  ;;  %v11253_v58 = vld [vmem:[#allocation83_spill] sm:$0xff] }
 0x66e   : > { %4589 = vmatmul.f32.gmra.mxu3 %v11252_v61 }
 0x66f   : > { %v9726_v12 = vadd.f32 %v4457_v35, %v4393_v21  ;;  %v11254_v21 = vld [vmem:[#allocation100_spill] sm:$0xff]  ;;  %5063 = vmatpush.msra.mxu3 %v3038_v4 }
 0x670   : > { %v4265_v45 = vpop.f32.mrf.mxu2  ;;  %v4395_v23 = vpop.f32.mrf.mxu0 }
 0x671   : > { %v4266_v40 = vadd.f32 %v4265_v45, %v9654_v52  ;;  %v4330_v24 = vpop.f32.mrf.mxu3  ;;  %v4460_v44 = vpop.f32.mrf.mxu1  ;;  %5064 = vmatpush.msra.mxu3 %v3032_v5  ;;  %v3128_v5 = vld [vmem:[#allocation8 + $0x8c0] sm:$0xff] }
 0x673   : > { %v4331_v56 = vadd.f32 %v4330_v24, %v4266_v40  ;;  %4654 = vmatmul.f32.gmra.mxu0 %v11208_v30  ;;  %v3235_v30 = vld [vmem:[#allocation8 + $0xc18] sm:$0xff]  ;;  %5065 = vmatpush.msra.mxu3 %v3026_v42  ;;  %v3122_v42 = vld [vmem:[#allocation8 + $0x890] sm:$0xff] }
 0x674   : > { %4719 = vmatmul.f32.gmra.mxu1 %v11209_v54  ;;  %4883 = vmatpush.msrb.mxu0 %v3235_v30 }
 0x675   : > { %v4396_v35 = vadd.f32 %v4395_v23, %v4331_v56  ;;  %4527 = vmatmul.f32.gmra.mxu2 %v11253_v58  ;;  %v11255_v56 = vld [vmem:[#allocation86_spill] sm:$0xff] }
 0x676   : > { %4592 = vmatmul.f32.gmra.mxu3 %v11254_v21 }
 0x677   : > { %v9733_v11 = vadd.f32 %v4460_v44, %v4396_v35  ;;  %v11256_v35 = vld [vmem:[#allocation101_spill] sm:$0xff] }
 0x678   : > { %v4268_v45 = vpop.f32.mrf.mxu2  ;;  %v4398_v61 = vpop.f32.mrf.mxu0 }
 0x679   : > { %v4269_v2 = vadd.f32 %v4268_v45, %v9654_v52  ;;  %v4333_v40 = vpop.f32.mrf.mxu3  ;;  %v4463_v24 = vpop.f32.mrf.mxu1 }
 0x67b   : > { %v4334_v23 = vadd.f32 %v4333_v40, %v4269_v2  ;;  %4657 = vmatmul.f32.gmra.mxu0 %v11211_v48  ;;  %v3134_v48 = vld [vmem:[#allocation8 + $0x8f0] sm:$0xff] }
 0x67c   : > { %4722 = vmatmul.f32.gmra.mxu1 %v11212_v59  ;;  %v11258_v59 = vld [vmem:[#allocation102_spill] sm:$0xff]  ;;  %5128 = vmatpush.msra.mxu0 %v3134_v48 }
 0x67d   : > { %v4399_v44 = vadd.f32 %v4398_v61, %v4334_v23  ;;  %4530 = vmatmul.f32.gmra.mxu2 %v11255_v56  ;;  %v3331_v61 = vld [vmem:[#allocation8 + $0xf18] sm:$0xff] }
 0x67e   : > { %4595 = vmatmul.f32.gmra.mxu3 %v11256_v35  ;;  %4948 = vmatpush.msrb.mxu1 %v3331_v61 }
 0x67f   : > { %v9740_v54 = vadd.f32 %v4463_v24, %v4399_v44  ;;  %v11257_v44 = vld [vmem:[#allocation95_spill] sm:$0xff]  ;;  %5129 = vmatpush.msra.mxu0 %v3128_v5 }
 0x680   : > { %v4271_v45 = vpop.f32.mrf.mxu2  ;;  %v4401_v21 = vpop.f32.mrf.mxu0 }
 0x681   : > { %v4272_v1 = vadd.f32 %v4271_v45, %v9654_v52  ;;  %v4336_v2 = vpop.f32.mrf.mxu3  ;;  %v4466_v40 = vpop.f32.mrf.mxu1  ;;  %5130 = vmatpush.msra.mxu0 %v3122_v42 }
 0x683   : > { %v4337_v23 = vadd.f32 %v4336_v2, %v4272_v1  ;;  %4660 = vmatmul.f32.gmra.mxu0 %v11214_v13  ;;  %v3230_v13 = vld [vmem:[#allocation8 + $0xbf0] sm:$0xff] }
 0x684   : > { %4725 = vmatmul.f32.gmra.mxu1 %v11215_v38 }
 0x685   : > { %v4402_v24 = vadd.f32 %v4401_v21, %v4337_v23  ;;  %4533 = vmatmul.f32.gmra.mxu2 %v11257_v44  ;;  %v11259_v23 = vld [vmem:[#allocation96_spill] sm:$0xff]  ;;  %5193 = vmatpush.msra.mxu1 %v3230_v13 }
 0x686   : > { %4598 = vmatmul.f32.gmra.mxu3 %v11258_v59 }
 0x687   : > { %v9747_v45 = vadd.f32 %v4466_v40, %v4402_v24  ;;  %v11260_v40 = vld [vmem:[#allocation103_spill] sm:$0xff]  ;;  %v2930_v24 = vld [vmem:[#allocation8 + $0x290] sm:$0xff] }
 0x688   : > { %v4274_v30 = vpop.f32.mrf.mxu2  ;;  %v4404_v4 = vpop.f32.mrf.mxu0  ;;  %5000 = vmatpush.msra.mxu2 %v2930_v24  ;;  %v3020_v24 = vld [vmem:[#allocation8 + $0x560] sm:$0xff] }
 0x689   : > { %v4275_v1 = vadd.f32 %v4274_v30, %v9654_v52  ;;  %v4339_v2 = vpop.f32.mrf.mxu3  ;;  %v4469_v61 = vpop.f32.mrf.mxu1  ;;  %5066 = vmatpush.msra.mxu3 %v3020_v24 }
 0x68b   : > { %v4340_v38 = vadd.f32 %v4339_v2, %v4275_v1  ;;  %4663 = vmatmul.f32.gmra.mxu0 %v11217_v18  ;;  %v11261_v18 = vld [vmem:[#allocation97_spill] sm:$0xff] }
 0x68c   : > { %4728 = vmatmul.f32.gmra.mxu1 %v11218_v25 }
 0x68d   : > { %v4405_v21 = vadd.f32 %v4404_v4, %v4340_v38  ;;  %4536 = vmatmul.f32.gmra.mxu2 %v11259_v23 }
 0x68e   : > { %4601 = vmatmul.f32.gmra.mxu3 %v11260_v40  ;;  %v3224_v40 = vld [vmem:[#allocation8 + $0xbc0] sm:$0xff] }
 0x68f   : > { %v9754_v48 = vadd.f32 %v4469_v61, %v4405_v21  ;;  %v11262_v61 = vld [vmem:[#allocation104_spill] sm:$0xff]  ;;  %5194 = vmatpush.msra.mxu1 %v3224_v40 }
 0x690   : > { %v4277_v30 = vpop.f32.mrf.mxu2  ;;  %v4407_v1 = vpop.f32.mrf.mxu0  ;;  %v2924_v21 = vld [vmem:[#allocation8 + $0x260] sm:$0xff] }
 0x691   : > { %v4278_v2 = vadd.f32 %v4277_v30, %v9654_v52  ;;  %v4342_v25 = vpop.f32.mrf.mxu3  ;;  %v4472_v38 = vpop.f32.mrf.mxu1  ;;  %5001 = vmatpush.msra.mxu2 %v2924_v21  ;;  %v3116_v21 = vld [vmem:[#allocation8 + $0x860] sm:$0xff] }
 0x692   : > { %5131 = vmatpush.msra.mxu0 %v3116_v21 }
 0x693   : > { %v4343_v4 = vadd.f32 %v4342_v25, %v4278_v2  ;;  %4666 = vmatmul.f32.gmra.mxu0 %v11221_v46  ;;  %v11263_v46 = vld [vmem:[#allocation22_spill] sm:$0xff] }
 0x694   : > { %4731 = vmatmul.f32.gmra.mxu1 %v11222_v53 }
 0x695   : > { %v4408_v13 = vadd.f32 %v4407_v1, %v4343_v4  ;;  %4539 = vmatmul.f32.gmra.mxu2 %v11261_v18 }
 0x696   : > { %4604 = vmatmul.f32.gmra.mxu3 %v11262_v61  ;;  %v3218_v61 = vld [vmem:[#allocation8 + $0xb90] sm:$0xff] }
 0x697   : > { %v9761_v5 = vadd.f32 %v4472_v38, %v4408_v13  ;;  %5195 = vmatpush.msra.mxu1 %v3218_v61  ;;  %v2918_v38 = vld [vmem:[#allocation8 + $0x230] sm:$0xff]  ;;  %v3212_v61 = vld [vmem:[#allocation8 + $0xb60] sm:$0xff] }
 0x698   : > { %v4280_v30 = vpop.f32.mrf.mxu2  ;;  %v4410_v25 = vpop.f32.mrf.mxu0  ;;  %v3014_v13 = vld [vmem:[#allocation8 + $0x530] sm:$0xff]  ;;  %5002 = vmatpush.msra.mxu2 %v2918_v38 }
 0x699   : > { %v4281_v2 = vadd.f32 %v4280_v30, %v9654_v52  ;;  %v4345_v53 = vpop.f32.mrf.mxu3  ;;  %v4475_v1 = vpop.f32.mrf.mxu1  ;;  %5067 = vmatpush.msra.mxu3 %v3014_v13  ;;  %5196 = vmatpush.msra.mxu1 %v3212_v61  ;;  %v3002_v61 = vld [vmem:[#allocation8 + $0x4d0] sm:$0xff] }
 0x69b   : > { %v4346_v4 = vadd.f32 %v4345_v53, %v4281_v2  ;;  %4669 = vmatmul.f32.gmra.mxu0 %v11225_v37  ;;  %v3164_v37 = vld [vmem:[#allocation8 + $0x9e0] sm:$0xff] }
 0x69c   : > { %4734 = vmatmul.f32.gmra.mxu1 %v11226_v7  ;;  %v3068_v7 = vld [vmem:[#allocation8 + $0x6e0] sm:$0xff] }
 0x69d   : > { %v4411_v40 = vadd.f32 %v4410_v25, %v4346_v4  ;;  %4754 = vmatmul.f32.vlgmr.msrb.gmra.mxu2 %v11263_v46  ;;  %v3008_v4 = vld [vmem:[#allocation8 + $0x500] sm:$0xff] }
 0x69e   : > { %4819 = vmatmul.f32.vlgmr.msrb.gmra.mxu3 %v11148_v6 }
 0x69f   : > { %v9768_v24 = vadd.f32 %v4475_v1, %v4411_v40  ;;  %v2912_v1 = vld [vmem:[#allocation8 + $0x200] sm:$0xff]  ;;  %v3110_v40 = vld [vmem:[#allocation8 + $0x830] sm:$0xff]  ;;  %5068 = vmatpush.msra.mxu3 %v3008_v4 }
 0x6a0   : > { %v4495_v53 = vpop.f32.mrf.mxu2  ;;  %v9770_v52 = vpop.f32.mrf.mxu0  ;;  %5003 = vmatpush.msra.mxu2 %v2912_v1  ;;  %5132 = vmatpush.msra.mxu0 %v3110_v40  ;;  %v3104_v1 = vld [vmem:[#allocation8 + $0x800] sm:$0xff] }
 0x6a1   : > { %v4496_v42 = vadd.f32 %v4495_v53, %v9663_v28  ;;  %v4560_v30 = vpop.f32.mrf.mxu3  ;;  %v9773_v25 = vpop.f32.mrf.mxu1  ;;  %5069 = vmatpush.msra.mxu3 %v3002_v61  ;;  %v2996_v61 = vld [vmem:[#allocation8 + $0x4a0] sm:$0xff] }
 0x6a2   : > { %5133 = vmatpush.msra.mxu0 %v3104_v1  ;;  %v3098_v1 = vld [vmem:[#allocation8 + $0x7d0] sm:$0xff] }
 0x6a3   : > { %v4561_v2 = vadd.f32 %v4560_v30, %v4496_v42  ;;  %4884 = vmatmul.f32.vlgmr.msrb.gmra.mxu0 %v11230_v22  ;;  %v3206_v30 = vld [vmem:[#allocation8 + $0xb30] sm:$0xff]  ;;  %5070 = vmatpush.msra.mxu3 %v2996_v61 }
 0x6a4   : > { %4949 = vmatmul.f32.vlgmr.msrb.gmra.mxu1 %v11232_v41  ;;  %5134 = vmatpush.msra.mxu0 %v3098_v1  ;;  %v2990_v61 = vld [vmem:[#allocation8 + $0x470] sm:$0xff]  ;;  %v3092_v1 = vld [vmem:[#allocation8 + $0x7a0] sm:$0xff] }
 0x6a5   : > { %5780 = vst [vmem:[%s9367_s26 + $0x10] sm:$0xff] %v4561_v2  ;;  %4757 = vmatmul.f32.gmra.mxu2 %v11149_v15  ;;  %5197 = vmatpush.msra.mxu1 %v3206_v30  ;;  %v2906_v2 = vld [vmem:[#allocation8 + $0x1d0] sm:$0xff]  ;;  %v3200_v30 = vld [vmem:[#allocation8 + $0xb00] sm:$0xff] }
 0x6a6   : > { %4822 = vmatmul.f32.gmra.mxu3 %v11150_v19  ;;  %5004 = vmatpush.msra.mxu2 %v2906_v2  ;;  %v2900_v2 = vld [vmem:[#allocation8 + $0x1a0] sm:$0xff]  ;;  %v3074_v41 = vld [vmem:[#allocation8 + $0x710] sm:$0xff] }
 0x6a7   : > { %5198 = vmatpush.msra.mxu1 %v3200_v30  ;;  %v11265_v30 = vld [vmem:[#allocation25_spill] sm:$0xff]  ;;  %5071 = vmatpush.msra.mxu3 %v2990_v61  ;;  %v2984_v61 = vld [vmem:[#allocation8 + $0x440] sm:$0xff] }
 0x6a8   : > { %v4498_v28 = vpop.f32.mrf.mxu2  ;;  %v9780_v38 = vpop.f32.mrf.mxu0  ;;  %5005 = vmatpush.msra.mxu2 %v2900_v2  ;;  %v2894_v2 = vld [vmem:[#allocation8 + $0x170] sm:$0xff]  ;;  %5135 = vmatpush.msra.mxu0 %v3092_v1 }
 0x6a9   : > { %v4499_v13 = vadd.f32 %v4498_v28, %v9670_v34  ;;  %v4563_v21 = vpop.f32.mrf.mxu3  ;;  %v9783_v53 = vpop.f32.mrf.mxu1  ;;  %v3086_v1 = vld [vmem:[#allocation8 + $0x770] sm:$0xff]  ;;  %5072 = vmatpush.msra.mxu3 %v2984_v61 }
 0x6aa   : > { %5006 = vmatpush.msra.mxu2 %v2894_v2  ;;  %v2888_v2 = vld [vmem:[#allocation8 + $0x140] sm:$0xff]  ;;  %5136 = vmatpush.msra.mxu0 %v3086_v1  ;;  %v2882_v61 = vld [vmem:[#allocation8 + $0x110] sm:$0xff] }
 0x6ab   : > { %v4564_v42 = vadd.f32 %v4563_v21, %v4499_v13  ;;  %4887 = vmatmul.f32.gmra.mxu0 %v11233_v20  ;;  %v2978_v1 = vld [vmem:[#allocation8 + $0x410] sm:$0xff]  ;;  %v3176_v20 = vld [vmem:[#allocation8 + $0xa40] sm:$0xff] }
 0x6ac   : > { %4952 = vmatmul.f32.gmra.mxu1 %v11234_v60  ;;  %5007 = vmatpush.msra.mxu2 %v2888_v2  ;;  %v11268_v2 = vld [vmem:[#allocation82_spill] sm:$0xff]  ;;  %v3080_v60 = vld [vmem:[#allocation8 + $0x740] sm:$0xff] }
 0x6ad   : > { %5786 = vst [vmem:[%s9367_s26 + $0x40] sm:$0xff] %v4564_v42  ;;  %4760 = vmatmul.f32.gmra.mxu2 %v11151_v3  ;;  %v11264_v42 = vld [vmem:[#allocation29_spill] sm:$0xff]  ;;  %5073 = vmatpush.msra.mxu3 %v2978_v1  ;;  %v2876_v1 = vld [vmem:[#allocation8 + $0xe0] sm:$0xff] }
 0x6ae   : > { %4825 = vmatmul.f32.gmra.mxu3 %v11152_v32  ;;  %5008 = vmatpush.msra.mxu2 %v2882_v61  ;;  %v11271_v61 = vld [vmem:[#allocation84_spill] sm:$0xff]  ;;  %v3170_v22 = vld [vmem:[#allocation8 + $0xa10] sm:$0xff] }
 0x6af   : > { %5137 = vmatpush.msra.mxu0 %v3080_v60  ;;  %v2972_v60 = vld [vmem:[#allocation8 + $0x3e0] sm:$0xff] }
 0x6b0   : > { %v4501_v34 = vpop.f32.mrf.mxu2  ;;  %v9790_v4 = vpop.f32.mrf.mxu0  ;;  %5009 = vmatpush.msra.mxu2 %v2876_v1  ;;  %5074 = vmatpush.msra.mxu3 %v2972_v60  ;;  %v11274_v1 = vld [vmem:[#allocation85_spill] sm:$0xff] }
 0x6b1   : > { %v4502_v40 = vadd.f32 %v4501_v34, %v9677_v51  ;;  %v4566_v28 = vpop.f32.mrf.mxu3  ;;  %v9793_v13 = vpop.f32.mrf.mxu1  ;;  %5138 = vmatpush.msra.mxu0 %v3074_v41  ;;  %v2870_v60 = vld [vmem:[#allocation8 + $0xb0] sm:$0xff] }
 0x6b2   : > { %v2966_v41 = vld [vmem:[#allocation8 + $0x3b0] sm:$0xff]  ;;  %5010 = vmatpush.msra.mxu2 %v2870_v60  ;;  %v11277_v60 = vld [vmem:[#allocation87_spill] sm:$0xff] }
 0x6b3   : > { %v4567_v21 = vadd.f32 %v4566_v28, %v4502_v40  ;;  %4890 = vmatmul.f32.gmra.mxu0 %v11235_v57  ;;  %v3194_v57 = vld [vmem:[#allocation8 + $0xad0] sm:$0xff]  ;;  %5075 = vmatpush.msra.mxu3 %v2966_v41  ;;  %v2864_v41 = vld [vmem:[#allocation8 + $0x80] sm:$0xff] }
 0x6b4   : > { %4955 = vmatmul.f32.gmra.mxu1 %v11236_v43  ;;  %5139 = vmatpush.msra.mxu0 %v3068_v7  ;;  %v2960_v7 = vld [vmem:[#allocation8 + $0x380] sm:$0xff] }
 0x6b5   : > { %5792 = vst [vmem:[%s9367_s26 + $0x70] sm:$0xff] %v4567_v21  ;;  %4763 = vmatmul.f32.gmra.mxu2 %v11264_v42  ;;  %5199 = vmatpush.msra.mxu1 %v3194_v57  ;;  %v11266_v57 = vld [vmem:[#allocation27_spill] sm:$0xff] }
 0x6b6   : > { %4828 = vmatmul.f32.gmra.mxu3 %v11189_v39  ;;  %5011 = vmatpush.msra.mxu2 %v2864_v41  ;;  %v11280_v41 = vld [vmem:[#allocation88_spill] sm:$0xff] }
 0x6b7   : > { %5076 = vmatpush.msra.mxu3 %v2960_v7  ;;  %v2858_v7 = vld [vmem:[#allocation8 + $0x50] sm:$0xff] }
 0x6b8   : > { %v4504_v51 = vpop.f32.mrf.mxu2  ;;  %v9800_v34 = vpop.f32.mrf.mxu0  ;;  %5012 = vmatpush.msra.mxu2 %v2858_v7  ;;  %v11283_v7 = vld [vmem:[#allocation89_spill] sm:$0xff] }
 0x6b9   : > { %v4505_v40 = vadd.f32 %v4504_v51, %v9684_v14  ;;  %v4569_v28 = vpop.f32.mrf.mxu3  ;;  %v9803_v21 = vpop.f32.mrf.mxu1 }
 0x6bb   : > { %v4570_v43 = vadd.f32 %v4569_v28, %v4505_v40  ;;  %4893 = vmatmul.f32.gmra.mxu0 %v11237_v47  ;;  %v3188_v47 = vld [vmem:[#allocation8 + $0xaa0] sm:$0xff] }
 0x6bc   : > { %4958 = vmatmul.f32.gmra.mxu1 %v11238_v26 }
 0x6bd   : > { %5798 = vst [vmem:[%s9367_s26 + $0xa0] sm:$0xff] %v4570_v43  ;;  %4766 = vmatmul.f32.gmra.mxu2 %v11265_v30  ;;  %5200 = vmatpush.msra.mxu1 %v3188_v47  ;;  %v11267_v47 = vld [vmem:[#allocation33_spill] sm:$0xff] }
 0x6be   : > { %4831 = vmatmul.f32.gmra.mxu3 %v11192_v55 }
 0x6c0   : > { %v4507_v14 = vpop.f32.mrf.mxu2  ;;  %v9810_v51 = vpop.f32.mrf.mxu0 }
 0x6c1   : > { %v4508_v40 = vadd.f32 %v4507_v14, %v9691_v63  ;;  %v4572_v28 = vpop.f32.mrf.mxu3  ;;  %v9813_v43 = vpop.f32.mrf.mxu1 }
 0x6c3   : > { %v4573_v26 = vadd.f32 %v4572_v28, %v4508_v40  ;;  %4896 = vmatmul.f32.gmra.mxu0 %v11239_v49  ;;  %v3182_v49 = vld [vmem:[#allocation8 + $0xa70] sm:$0xff] }
 0x6c4   : > { %4961 = vmatmul.f32.gmra.mxu1 %v11240_v50 }
 0x6c5   : > { %5804 = vst [vmem:[%s9367_s26 + $0xd0] sm:$0xff] %v4573_v26  ;;  %4769 = vmatmul.f32.gmra.mxu2 %v11266_v57  ;;  %5201 = vmatpush.msra.mxu1 %v3182_v49  ;;  %v11270_v49 = vld [vmem:[#allocation43_spill] sm:$0xff] }
 0x6c6   : > { %4834 = vmatmul.f32.gmra.mxu3 %v11195_v9 }
 0x6c7   : > { %5202 = vmatpush.msra.mxu1 %v3176_v20  ;;  %v11273_v20 = vld [vmem:[#allocation30_spill] sm:$0xff] }
 0x6c8   : > { %v4510_v63 = vpop.f32.mrf.mxu2  ;;  %v9820_v14 = vpop.f32.mrf.mxu0 }
 0x6c9   : > { %v4511_v40 = vadd.f32 %v4510_v63, %v9698_v33  ;;  %v4575_v28 = vpop.f32.mrf.mxu3  ;;  %v9823_v26 = vpop.f32.mrf.mxu1  ;;  %5203 = vmatpush.msra.mxu1 %v3170_v22  ;;  %v11276_v22 = vld [vmem:[#allocation32_spill] sm:$0xff] }
 0x6cb   : > { %v4576_v50 = vadd.f32 %v4575_v28, %v4511_v40  ;;  %4899 = vmatmul.f32.gmra.mxu0 %v11241_v10  ;;  %v11269_v10 = vld [vmem:[#allocation111_spill] sm:$0xff]  ;;  %5204 = vmatpush.msra.mxu1 %v3164_v37 }
 0x6cc   : > { %4964 = vmatmul.f32.gmra.mxu1 %v11242_v62  ;;  %v11279_v37 = vld [vmem:[#allocation47_spill] sm:$0xff] }
 0x6cd   : > { %5810 = vst [vmem:[%s9367_s26 + $0x100] sm:$0xff] %v4576_v50  ;;  %4772 = vmatmul.f32.gmra.mxu2 %v11267_v47 }
 0x6ce   : > { %4837 = vmatmul.f32.gmra.mxu3 %v11268_v2 }
 0x6d0   : > { %v4513_v33 = vpop.f32.mrf.mxu2  ;;  %v9830_v63 = vpop.f32.mrf.mxu0 }
 0x6d1   : > { %v4514_v40 = vadd.f32 %v4513_v33, %v9705_v8  ;;  %v4578_v28 = vpop.f32.mrf.mxu3  ;;  %v9833_v50 = vpop.f32.mrf.mxu1 }
 0x6d3   : > { %v4579_v62 = vadd.f32 %v4578_v28, %v4514_v40  ;;  %4902 = vmatmul.f32.gmra.mxu0 %v11243_v36  ;;  %v11272_v36 = vld [vmem:[#allocation56_spill] sm:$0xff] }
 0x6d4   : > { %4967 = vmatmul.f32.gmra.mxu1 %v11269_v10 }
 0x6d5   : > { %5816 = vst [vmem:[%s9367_s26 + $0x130] sm:$0xff] %v4579_v62  ;;  %4775 = vmatmul.f32.gmra.mxu2 %v11270_v49 }
 0x6d6   : > { %4840 = vmatmul.f32.gmra.mxu3 %v11271_v61 }
 0x6d8   : > { %v4516_v8 = vpop.f32.mrf.mxu2  ;;  %v9840_v33 = vpop.f32.mrf.mxu0 }
 0x6d9   : > { %v4517_v40 = vadd.f32 %v4516_v8, %v9712_v31  ;;  %v4581_v28 = vpop.f32.mrf.mxu3  ;;  %v9843_v62 = vpop.f32.mrf.mxu1 }
 0x6db   : > { %v4582_v10 = vadd.f32 %v4581_v28, %v4517_v40  ;;  %4905 = vmatmul.f32.gmra.mxu0 %v11245_v16  ;;  %v11275_v16 = vld [vmem:[#allocation59_spill] sm:$0xff] }
 0x6dc   : > { %4970 = vmatmul.f32.gmra.mxu1 %v11272_v36 }
 0x6dd   : > { %5822 = vst [vmem:[%s9367_s26 + $0x160] sm:$0xff] %v4582_v10  ;;  %4778 = vmatmul.f32.gmra.mxu2 %v11273_v20 }
 0x6de   : > { %4843 = vmatmul.f32.gmra.mxu3 %v11274_v1  ;;  %v3062_v1 = vld [vmem:[#allocation8 + $0x6b0] sm:$0xff] }
 0x6df   : > { %5140 = vmatpush.msra.mxu0 %v3062_v1  ;;  %v2954_v1 = vld [vmem:[#allocation8 + $0x350] sm:$0xff] }
 0x6e0   : > { %v4519_v31 = vpop.f32.mrf.mxu2  ;;  %v9850_v8 = vpop.f32.mrf.mxu0  ;;  %5077 = vmatpush.msra.mxu3 %v2954_v1  ;;  %v2852_v1 = vld [vmem:[#allocation8 + $0x20] sm:$0xff] }
 0x6e1   : > { %v4520_v40 = vadd.f32 %v4519_v31, %v9719_v29  ;;  %v4584_v28 = vpop.f32.mrf.mxu3  ;;  %v9853_v10 = vpop.f32.mrf.mxu1  ;;  %5013 = vmatpush.msra.mxu2 %v2852_v1  ;;  %v11286_v1 = vld [vmem:[#allocation90_spill] sm:$0xff] }
 0x6e3   : > { %v4585_v36 = vadd.f32 %v4584_v28, %v4520_v40  ;;  %4908 = vmatmul.f32.gmra.mxu0 %v11247_v27  ;;  %v11278_v27 = vld [vmem:[#allocation98_spill] sm:$0xff] }
 0x6e4   : > { %4973 = vmatmul.f32.gmra.mxu1 %v11275_v16 }
 0x6e5   : > { %5828 = vst [vmem:[%s9367_s26 + $0x190] sm:$0xff] %v4585_v36  ;;  %4781 = vmatmul.f32.gmra.mxu2 %v11276_v22  ;;  %v3056_v22 = vld [vmem:[#allocation8 + $0x680] sm:$0xff] }
 0x6e6   : > { %4846 = vmatmul.f32.gmra.mxu3 %v11277_v60  ;;  %v3158_v60 = vld [vmem:[#allocation8 + $0x9b0] sm:$0xff]  ;;  %5141 = vmatpush.msra.mxu0 %v3056_v22  ;;  %v2948_v22 = vld [vmem:[#allocation8 + $0x320] sm:$0xff] }
 0x6e7   : > { %5205 = vmatpush.msra.mxu1 %v3158_v60  ;;  %v11282_v60 = vld [vmem:[#allocation48_spill] sm:$0xff]  ;;  %5078 = vmatpush.msra.mxu3 %v2948_v22  ;;  %v3326_v22 = vld [vmem:[#allocation8 + $0xef0] sm:$0xff] }
 0x6e8   : > { %v4522_v29 = vpop.f32.mrf.mxu2  ;;  %v9860_v31 = vpop.f32.mrf.mxu0  ;;  %5258 = vmatpush.msrb.mxu2 %v3326_v22  ;;  %v11288_v22 = vld [vmem:[#allocation91_spill] sm:$0xff] }
 0x6e9   : > { %v4523_v40 = vadd.f32 %v4522_v29, %v9726_v12  ;;  %v4587_v28 = vpop.f32.mrf.mxu3  ;;  %v9863_v36 = vpop.f32.mrf.mxu1 }
 0x6eb   : > { %v4588_v16 = vadd.f32 %v4587_v28, %v4523_v40  ;;  %4911 = vmatmul.f32.gmra.mxu0 %v11249_v17  ;;  %v11281_v17 = vld [vmem:[#allocation99_spill] sm:$0xff] }
 0x6ec   : > { %4976 = vmatmul.f32.gmra.mxu1 %v11278_v27 }
 0x6ed   : > { %5834 = vst [vmem:[%s9367_s26 + $0x1c0] sm:$0xff] %v4588_v16  ;;  %4784 = vmatmul.f32.gmra.mxu2 %v11279_v37  ;;  %v3050_v37 = vld [vmem:[#allocation8 + $0x650] sm:$0xff] }
 0x6ee   : > { %4849 = vmatmul.f32.gmra.mxu3 %v11280_v41  ;;  %v3152_v41 = vld [vmem:[#allocation8 + $0x980] sm:$0xff]  ;;  %5142 = vmatpush.msra.mxu0 %v3050_v37 }
 0x6ef   : > { %5206 = vmatpush.msra.mxu1 %v3152_v41  ;;  %v11285_v41 = vld [vmem:[#allocation44_spill] sm:$0xff] }
 0x6f0   : > { %v4525_v12 = vpop.f32.mrf.mxu2  ;;  %v9870_v29 = vpop.f32.mrf.mxu0  ;;  %v3044_v37 = vld [vmem:[#allocation8 + $0x620] sm:$0xff] }
 0x6f1   : > { %v4526_v40 = vadd.f32 %v4525_v12, %v9733_v11  ;;  %v4590_v28 = vpop.f32.mrf.mxu3  ;;  %v9873_v16 = vpop.f32.mrf.mxu1  ;;  %5143 = vmatpush.msra.mxu0 %v3044_v37 }
 0x6f3   : > { %v4591_v27 = vadd.f32 %v4590_v28, %v4526_v40  ;;  %4914 = vmatmul.f32.gmra.mxu0 %v11251_v0  ;;  %v11284_v0 = vld [vmem:[#allocation100_spill] sm:$0xff] }
 0x6f4   : > { %4979 = vmatmul.f32.gmra.mxu1 %v11281_v17 }
 0x6f5   : > { %5840 = vst [vmem:[%s9367_s26 + $0x1f0] sm:$0xff] %v4591_v27  ;;  %4787 = vmatmul.f32.gmra.mxu2 %v11282_v60  ;;  %v3422_v60 = vld [vmem:[#allocation8 + $0x11f0] sm:$0xff] }
 0x6f6   : > { %4852 = vmatmul.f32.gmra.mxu3 %v11283_v7  ;;  %v3146_v7 = vld [vmem:[#allocation8 + $0x950] sm:$0xff] }
 0x6f7   : > { %5207 = vmatpush.msra.mxu1 %v3146_v7  ;;  %5323 = vmatpush.msrb.mxu3 %v3422_v60  ;;  %v11287_v7 = vld [vmem:[#allocation46_spill] sm:$0xff] }
 0x6f8   : > { %v4528_v11 = vpop.f32.mrf.mxu2  ;;  %v9880_v12 = vpop.f32.mrf.mxu0 }
 0x6f9   : > { %v4529_v40 = vadd.f32 %v4528_v11, %v9740_v54  ;;  %v4593_v28 = vpop.f32.mrf.mxu3  ;;  %v9883_v27 = vpop.f32.mrf.mxu1 }
 0x6fb   : > { %v4594_v17 = vadd.f32 %v4593_v28, %v4529_v40  ;;  %4917 = vmatmul.f32.gmra.mxu0 %v11253_v58 }
 0x6fc   : > { %4982 = vmatmul.f32.gmra.mxu1 %v11284_v0  ;;  %v3140_v0 = vld [vmem:[#allocation8 + $0x920] sm:$0xff] }
 0x6fd   : > { %5846 = vst [vmem:[%s9367_s26 + $0x220] sm:$0xff] %v4594_v17  ;;  %4790 = vmatmul.f32.gmra.mxu2 %v11285_v41  ;;  %5208 = vmatpush.msra.mxu1 %v3140_v0 }
 0x6fe   : > { %4855 = vmatmul.f32.gmra.mxu3 %v11286_v1 }
 0x700   : > { %v4531_v54 = vpop.f32.mrf.mxu2  ;;  %v9890_v11 = vpop.f32.mrf.mxu0 }
 0x701   : > { %v4532_v40 = vadd.f32 %v4531_v54, %v9747_v45  ;;  %v4596_v28 = vpop.f32.mrf.mxu3  ;;  %v9893_v17 = vpop.f32.mrf.mxu1 }
 0x703   : > { %v4597_v58 = vadd.f32 %v4596_v28, %v4532_v40  ;;  %4920 = vmatmul.f32.gmra.mxu0 %v11255_v56  ;;  %v3320_v40 = vld [vmem:[#allocation8 + $0xec0] sm:$0xff]  ;;  %v2943_v56 = vld [vmem:[#allocation8 + $0x2f8] sm:$0xff] }
 0x704   : > { %4985 = vmatmul.f32.gmra.mxu1 %v11256_v35  ;;  %v3416_v28 = vld [vmem:[#allocation8 + $0x11c0] sm:$0xff]  ;;  %5259 = vmatpush.msrb.mxu2 %v3320_v40 }
 0x705   : > { %5852 = vst [vmem:[%s9367_s26 + $0x250] sm:$0xff] %v4597_v58  ;;  %4793 = vmatmul.f32.gmra.mxu2 %v11287_v7  ;;  %5324 = vmatpush.msrb.mxu3 %v3416_v28  ;;  %v11289_v58 = vld [vmem:[#allocation52_spill] sm:$0xff]  ;;  %v3410_v28 = vld [vmem:[#allocation8 + $0x1190] sm:$0xff] }
 0x706   : > { %4858 = vmatmul.f32.gmra.mxu3 %v11288_v22  ;;  %5388 = vmatpush.msrb.mxu0 %v2943_v56  ;;  %v11290_v35 = vld [vmem:[#allocation92_spill] sm:$0xff] }
 0x707   : > { %v2937_v56 = vld [vmem:[#allocation8 + $0x2c8] sm:$0xff]  ;;  %5325 = vmatpush.msrb.mxu3 %v3410_v28 }
 0x708   : > { %v4534_v37 = vpop.f32.mrf.mxu2  ;;  %v9900_v60 = vpop.f32.mrf.mxu0  ;;  %5389 = vmatpush.msrb.mxu0 %v2937_v56  ;;  %v3033_v56 = vld [vmem:[#allocation8 + $0x5c8] sm:$0xff] }
 0x709   : > { %v4535_v45 = vadd.f32 %v4534_v37, %v9754_v48  ;;  %v4599_v54 = vpop.f32.mrf.mxu3  ;;  %v9903_v1 = vpop.f32.mrf.mxu1 }
 0x70b   : > { %v4600_v0 = vadd.f32 %v4599_v54, %v4535_v45  ;;  %4923 = vmatmul.f32.gmra.mxu0 %v11257_v44  ;;  %v3039_v45 = vld [vmem:[#allocation8 + $0x5f8] sm:$0xff]  ;;  %v3314_v54 = vld [vmem:[#allocation8 + $0xe90] sm:$0xff] }
 0x70c   : > { %4988 = vmatmul.f32.gmra.mxu1 %v11258_v59  ;;  %5260 = vmatpush.msrb.mxu2 %v3314_v54  ;;  %v11292_v59 = vld [vmem:[#allocation103_spill] sm:$0xff]  ;;  %v11293_v44 = vld [vmem:[#allocation53_spill] sm:$0xff] }
 0x70d   : > { %5858 = vst [vmem:[%s9367_s26 + $0x280] sm:$0xff] %v4600_v0  ;;  %4796 = vmatmul.f32.gmra.mxu2 %v11289_v58  ;;  %5453 = vmatpush.msrb.mxu1 %v3039_v45 }
 0x70e   : > { %4861 = vmatmul.f32.gmra.mxu3 %v11290_v35 }
 0x70f   : > { %5454 = vmatpush.msrb.mxu1 %v3033_v56 }
 0x710   : > { %v4537_v48 = vpop.f32.mrf.mxu2  ;;  %v9910_v37 = vpop.f32.mrf.mxu0 }
 0x711   : > { %v4538_v22 = vadd.f32 %v4537_v48, %v9761_v5  ;;  %v4602_v7 = vpop.f32.mrf.mxu3  ;;  %v9913_v40 = vpop.f32.mrf.mxu1  ;;  %v11294_v5 = vld [vmem:[#allocation93_spill] sm:$0xff]  ;;  %v9920_v48 = vld [vmem:[#allocation10] sm:$0x3f] }
 0x712   : > { %11291 = vst [vmem:[#allocation54_spill] sm:$0xff] %v9913_v40  ;;  %v9923_v35 = vperm.slane %v9920_v48, 3 }
 0x713   : > { %v4603_v0 = vadd.f32 %v4602_v7, %v4538_v22  ;;  %4926 = vmatmul.f32.gmra.mxu0 %v11259_v23  ;;  %11295 = vst [vmem:[#allocation28_spill] sm:$0xff] %v9920_v48  ;;  %v2931_v23 = vld [vmem:[#allocation8 + $0x298] sm:$0xff] }
 0x714   : > { %4991 = vmatmul.f32.gmra.mxu1 %v11292_v59  ;;  %v3404_v59 = vld [vmem:[#allocation8 + $0x1160] sm:$0xff]  ;;  %5390 = vmatpush.msrb.mxu0 %v2931_v23  ;;  %v4629_v23 = vadd.f32 %v9780_v38, %v9923_v35 }
 0x715   : > { %5864 = vst [vmem:[%s9367_s26 + $0x2b0] sm:$0xff] %v4603_v0  ;;  %4799 = vmatmul.f32.gmra.mxu2 %v11293_v44  ;;  %v3308_v0 = vld [vmem:[#allocation8 + $0xe60] sm:$0xff]  ;;  %5326 = vmatpush.msrb.mxu3 %v3404_v59  ;;  %v2925_v59 = vld [vmem:[#allocation8 + $0x268] sm:$0xff] }
 0x716   : > { %4864 = vmatmul.f32.gmra.mxu3 %v11294_v5  ;;  %5261 = vmatpush.msrb.mxu2 %v3308_v0  ;;  %v4626_v5 = vadd.f32 %v9770_v52, %v9923_v35  ;;  %v11298_v44 = vld [vmem:[#allocation104_spill] sm:$0xff]  ;;  %v3027_v52 = vld [vmem:[#allocation8 + $0x598] sm:$0xff] }
 0x717   : > { %5455 = vmatpush.msrb.mxu1 %v3027_v52  ;;  %5391 = vmatpush.msrb.mxu0 %v2925_v59  ;;  %v4632_v59 = vadd.f32 %v9790_v4, %v9923_v35 }
 0x718   : > { %v4540_v45 = vpop.f32.mrf.mxu2  ;;  %v9925_v54 = vpop.f32.mrf.mxu0 }
 0x719   : > { %11296 = vst [vmem:[#allocation63_spill] sm:$0xff] %v9925_v54  ;;  %v4541_v7 = vadd.f32 %v4540_v45, %v9768_v24  ;;  %v4605_v22 = vpop.f32.mrf.mxu3  ;;  %v9928_v28 = vpop.f32.mrf.mxu1  ;;  %v11299_v24 = vld [vmem:[#allocation34_spill] sm:$0xff] }
 0x71a   : > { %11297 = vst [vmem:[#allocation67_spill] sm:$0xff] %v9928_v28  ;;  %v11300_v45 = vld [vmem:[#allocation26_spill] sm:$0xff]  ;;  %v4691_v28 = vadd.f32 %v9773_v25, %v4626_v5  ;;  %v11301_v5 = vld [vmem:[#allocation35_spill] sm:$0xff] }
 0x71b   : > { %v4606_v48 = vadd.f32 %v4605_v22, %v4541_v7  ;;  %4929 = vmatmul.f32.gmra.mxu0 %v11261_v18  ;;  %v3302_v7 = vld [vmem:[#allocation8 + $0xe30] sm:$0xff] }
 0x71c   : > { %4994 = vmatmul.f32.gmra.mxu1 %v11298_v44  ;;  %v3398_v22 = vld [vmem:[#allocation8 + $0x1130] sm:$0xff]  ;;  %5262 = vmatpush.msrb.mxu2 %v3302_v7 }
 0x71d   : > { %5870 = vst [vmem:[%s9367_s26 + $0x2e0] sm:$0xff] %v4606_v48  ;;  %5014 = vmatmul.f32.vlgmr.msra.gmra.mxu2 %v11299_v24  ;;  %5327 = vmatpush.msrb.mxu3 %v3398_v22  ;;  %v3392_v22 = vld [vmem:[#allocation8 + $0x1100] sm:$0xff] }
 0x71e   : > { %5079 = vmatmul.f32.vlgmr.msra.gmra.mxu3 %v11300_v45 }
 0x71f   : > { %5328 = vmatpush.msrb.mxu3 %v3392_v22  ;;  %v3386_v22 = vld [vmem:[#allocation8 + $0x10d0] sm:$0xff] }
 0x720   : > { %v4755_v56 = vpop.f32.mrf.mxu2  ;;  %v4885_v0 = vpop.f32.mrf.mxu0 }
 0x721   : > { %v4756_v58 = vadd.f32 %v4755_v56, %v4691_v28  ;;  %v4820_v54 = vpop.f32.mrf.mxu3  ;;  %v4950_v40 = vpop.f32.mrf.mxu1  ;;  %v11302_v28 = vld [vmem:[#allocation31_spill] sm:$0xff]  ;;  %v4694_v56 = vadd.f32 %v9783_v53, %v4629_v23  ;;  %v11304_v23 = vld [vmem:[#allocation45_spill] sm:$0xff]  ;;  %5329 = vmatpush.msrb.mxu3 %v3386_v22 }
 0x722   : > { %v3380_v22 = vld [vmem:[#allocation8 + $0x10a0] sm:$0xff] }
 0x723   : > { %v4821_v48 = vadd.f32 %v4820_v54, %v4756_v58  ;;  %5144 = vmatmul.f32.vlgmr.msra.gmra.mxu0 %v11263_v46  ;;  %v3021_v54 = vld [vmem:[#allocation8 + $0x568] sm:$0xff]  ;;  %v3296_v46 = vld [vmem:[#allocation8 + $0xe00] sm:$0xff]  ;;  %5330 = vmatpush.msrb.mxu3 %v3380_v22  ;;  %v3374_v22 = vld [vmem:[#allocation8 + $0x1070] sm:$0xff] }
 0x724   : > { %5209 = vmatmul.f32.vlgmr.msra.gmra.mxu1 %v11148_v6  ;;  %5263 = vmatpush.msrb.mxu2 %v3296_v46 }
 0x725   : > { %v4886_v25 = vadd.f32 %v4885_v0, %v4821_v48  ;;  %5017 = vmatmul.f32.gmra.mxu2 %v11301_v5  ;;  %5456 = vmatpush.msrb.mxu1 %v3021_v54  ;;  %v2919_v0 = vld [vmem:[#allocation8 + $0x238] sm:$0xff]  ;;  %v3290_v54 = vld [vmem:[#allocation8 + $0xdd0] sm:$0xff] }
 0x726   : > { %5082 = vmatmul.f32.gmra.mxu3 %v11302_v28  ;;  %5392 = vmatpush.msrb.mxu0 %v2919_v0  ;;  %v4635_v0 = vadd.f32 %v9800_v34, %v9923_v35 }
 0x727   : > { %v4951_v52 = vadd.f32 %v4950_v40, %v4886_v25  ;;  %v11303_v40 = vld [vmem:[#allocation36_spill] sm:$0xff]  ;;  %v4697_v25 = vadd.f32 %v9793_v13, %v4632_v59  ;;  %5264 = vmatpush.msrb.mxu2 %v3290_v54  ;;  %v11306_v59 = vld [vmem:[#allocation50_spill] sm:$0xff]  ;;  %5331 = vmatpush.msrb.mxu3 %v3374_v22 }
 0x728   : > { %v4758_v7 = vpop.f32.mrf.mxu2  ;;  %v4888_v44 = vpop.f32.mrf.mxu0  ;;  %v3284_v54 = vld [vmem:[#allocation8 + $0xda0] sm:$0xff] }
 0x729   : > { %5781 = vst [vmem:[%s9367_s26 + $0x18] sm:$0xff] %v4951_v52  ;;  %v4759_v18 = vadd.f32 %v4758_v7, %v4694_v56  ;;  %v4823_v38 = vpop.f32.mrf.mxu3  ;;  %v4953_v58 = vpop.f32.mrf.mxu1  ;;  %5265 = vmatpush.msrb.mxu2 %v3284_v54  ;;  %v3278_v54 = vld [vmem:[#allocation8 + $0xd70] sm:$0xff]  ;;  %v3368_v22 = vld [vmem:[#allocation8 + $0x1040] sm:$0xff] }
 0x72a   : > { %5332 = vmatpush.msrb.mxu3 %v3368_v22  ;;  %v3362_v22 = vld [vmem:[#allocation8 + $0x1010] sm:$0xff] }
 0x72b   : > { %v4824_v48 = vadd.f32 %v4823_v38, %v4759_v18  ;;  %5147 = vmatmul.f32.gmra.mxu0 %v11149_v15  ;;  %v3015_v38 = vld [vmem:[#allocation8 + $0x538] sm:$0xff]  ;;  %5266 = vmatpush.msrb.mxu2 %v3278_v54  ;;  %v3272_v54 = vld [vmem:[#allocation8 + $0xd40] sm:$0xff] }
 0x72c   : > { %5212 = vmatmul.f32.gmra.mxu1 %v11150_v19  ;;  %5333 = vmatpush.msrb.mxu3 %v3362_v22  ;;  %v3356_v22 = vld [vmem:[#allocation8 + $0xfe0] sm:$0xff] }
 0x72d   : > { %v4889_v53 = vadd.f32 %v4888_v44, %v4824_v48  ;;  %5020 = vmatmul.f32.gmra.mxu2 %v11303_v40  ;;  %5457 = vmatpush.msrb.mxu1 %v3015_v38  ;;  %v2913_v44 = vld [vmem:[#allocation8 + $0x208] sm:$0xff] }
 0x72e   : > { %5085 = vmatmul.f32.gmra.mxu3 %v11304_v23  ;;  %5393 = vmatpush.msrb.mxu0 %v2913_v44  ;;  %v4638_v44 = vadd.f32 %v9810_v51, %v9923_v35 }
 0x72f   : > { %v4954_v56 = vadd.f32 %v4953_v58, %v4889_v53  ;;  %v11305_v58 = vld [vmem:[#allocation37_spill] sm:$0xff]  ;;  %v4700_v53 = vadd.f32 %v9803_v21, %v4635_v0  ;;  %v11308_v0 = vld [vmem:[#allocation55_spill] sm:$0xff]  ;;  %5267 = vmatpush.msrb.mxu2 %v3272_v54  ;;  %5334 = vmatpush.msrb.mxu3 %v3356_v22 }
 0x730   : > { %v4761_v46 = vpop.f32.mrf.mxu2  ;;  %v4891_v52 = vpop.f32.mrf.mxu0  ;;  %v3266_v54 = vld [vmem:[#allocation8 + $0xd10] sm:$0xff] }
 0x731   : > { %5787 = vst [vmem:[%s9367_s26 + $0x48] sm:$0xff] %v4954_v56  ;;  %v4762_v7 = vadd.f32 %v4761_v46, %v4697_v25  ;;  %v4826_v4 = vpop.f32.mrf.mxu3  ;;  %v4956_v18 = vpop.f32.mrf.mxu1  ;;  %5268 = vmatpush.msrb.mxu2 %v3266_v54  ;;  %v3260_v54 = vld [vmem:[#allocation8 + $0xce0] sm:$0xff]  ;;  %v3350_v22 = vld [vmem:[#allocation8 + $0xfb0] sm:$0xff] }
 0x732   : > { %5335 = vmatpush.msrb.mxu3 %v3350_v22  ;;  %v3344_v22 = vld [vmem:[#allocation8 + $0xf80] sm:$0xff] }
 0x733   : > { %v4827_v48 = vadd.f32 %v4826_v4, %v4762_v7  ;;  %5150 = vmatmul.f32.gmra.mxu0 %v11151_v3  ;;  %v3009_v4 = vld [vmem:[#allocation8 + $0x508] sm:$0xff]  ;;  %5269 = vmatpush.msrb.mxu2 %v3260_v54  ;;  %v3254_v54 = vld [vmem:[#allocation8 + $0xcb0] sm:$0xff] }
 0x734   : > { %5215 = vmatmul.f32.gmra.mxu1 %v11152_v32  ;;  %5336 = vmatpush.msrb.mxu3 %v3344_v22  ;;  %v3338_v22 = vld [vmem:[#allocation8 + $0xf50] sm:$0xff] }
 0x735   : > { %v4892_v13 = vadd.f32 %v4891_v52, %v4827_v48  ;;  %5023 = vmatmul.f32.gmra.mxu2 %v11305_v58  ;;  %5458 = vmatpush.msrb.mxu1 %v3009_v4  ;;  %v2907_v52 = vld [vmem:[#allocation8 + $0x1d8] sm:$0xff] }
 0x736   : > { %5088 = vmatmul.f32.gmra.mxu3 %v11306_v59  ;;  %5394 = vmatpush.msrb.mxu0 %v2907_v52  ;;  %v4641_v52 = vadd.f32 %v9820_v14, %v9923_v35 }
 0x737   : > { %v4957_v25 = vadd.f32 %v4956_v18, %v4892_v13  ;;  %v11307_v18 = vld [vmem:[#allocation38_spill] sm:$0xff]  ;;  %v4703_v13 = vadd.f32 %v9813_v43, %v4638_v44  ;;  %v11310_v44 = vld [vmem:[#allocation60_spill] sm:$0xff]  ;;  %5270 = vmatpush.msrb.mxu2 %v3254_v54  ;;  %5337 = vmatpush.msrb.mxu3 %v3338_v22 }
 0x738   : > { %v4764_v56 = vpop.f32.mrf.mxu2  ;;  %v4894_v46 = vpop.f32.mrf.mxu0  ;;  %v3332_v22 = vld [vmem:[#allocation8 + $0xf20] sm:$0xff] }
 0x739   : > { %5793 = vst [vmem:[%s9367_s26 + $0x78] sm:$0xff] %v4957_v25  ;;  %v4765_v38 = vadd.f32 %v4764_v56, %v4700_v53  ;;  %v4829_v34 = vpop.f32.mrf.mxu3  ;;  %v4959_v7 = vpop.f32.mrf.mxu1  ;;  %5338 = vmatpush.msrb.mxu3 %v3332_v22  ;;  %v3135_v22 = vld [vmem:[#allocation8 + $0x8f8] sm:$0xff] }
 0x73b   : > { %v4830_v48 = vadd.f32 %v4829_v34, %v4765_v38  ;;  %5153 = vmatmul.f32.gmra.mxu0 %v11264_v42  ;;  %v3003_v34 = vld [vmem:[#allocation8 + $0x4d8] sm:$0xff] }
 0x73c   : > { %5218 = vmatmul.f32.gmra.mxu1 %v11189_v39 }
 0x73d   : > { %v4895_v21 = vadd.f32 %v4894_v46, %v4830_v48  ;;  %5026 = vmatmul.f32.gmra.mxu2 %v11307_v18  ;;  %5459 = vmatpush.msrb.mxu1 %v3003_v34  ;;  %v2901_v46 = vld [vmem:[#allocation8 + $0x1a8] sm:$0xff] }
 0x73e   : > { %5091 = vmatmul.f32.gmra.mxu3 %v11308_v0  ;;  %5395 = vmatpush.msrb.mxu0 %v2901_v46  ;;  %v4644_v46 = vadd.f32 %v9830_v63, %v9923_v35 }
 0x73f   : > { %v4960_v53 = vadd.f32 %v4959_v7, %v4895_v21  ;;  %v11309_v7 = vld [vmem:[#allocation39_spill] sm:$0xff]  ;;  %v4706_v21 = vadd.f32 %v9823_v26, %v4641_v52  ;;  %v11312_v52 = vld [vmem:[#allocation65_spill] sm:$0xff] }
 0x740   : > { %v4767_v25 = vpop.f32.mrf.mxu2  ;;  %v4897_v56 = vpop.f32.mrf.mxu0 }
 0x741   : > { %5799 = vst [vmem:[%s9367_s26 + $0xa8] sm:$0xff] %v4960_v53  ;;  %v4768_v4 = vadd.f32 %v4767_v25, %v4703_v13  ;;  %v4832_v51 = vpop.f32.mrf.mxu3  ;;  %v4962_v38 = vpop.f32.mrf.mxu1 }
 0x743   : > { %v4833_v48 = vadd.f32 %v4832_v51, %v4768_v4  ;;  %5156 = vmatmul.f32.gmra.mxu0 %v11265_v30  ;;  %v2997_v51 = vld [vmem:[#allocation8 + $0x4a8] sm:$0xff] }
 0x744   : > { %5221 = vmatmul.f32.gmra.mxu1 %v11192_v55 }
 0x745   : > { %v4898_v43 = vadd.f32 %v4897_v56, %v4833_v48  ;;  %5029 = vmatmul.f32.gmra.mxu2 %v11309_v7  ;;  %5460 = vmatpush.msrb.mxu1 %v2997_v51  ;;  %v2895_v56 = vld [vmem:[#allocation8 + $0x178] sm:$0xff] }
 0x746   : > { %5094 = vmatmul.f32.gmra.mxu3 %v11310_v44  ;;  %5396 = vmatpush.msrb.mxu0 %v2895_v56  ;;  %v4647_v56 = vadd.f32 %v9840_v33, %v9923_v35 }
 0x747   : > { %v4963_v13 = vadd.f32 %v4962_v38, %v4898_v43  ;;  %v11311_v38 = vld [vmem:[#allocation40_spill] sm:$0xff]  ;;  %v4709_v43 = vadd.f32 %v9833_v50, %v4644_v46  ;;  %v11314_v46 = vld [vmem:[#allocation69_spill] sm:$0xff] }
 0x748   : > { %v4770_v53 = vpop.f32.mrf.mxu2  ;;  %v4900_v25 = vpop.f32.mrf.mxu0 }
 0x749   : > { %5805 = vst [vmem:[%s9367_s26 + $0xd8] sm:$0xff] %v4963_v13  ;;  %v4771_v34 = vadd.f32 %v4770_v53, %v4706_v21  ;;  %v4835_v14 = vpop.f32.mrf.mxu3  ;;  %v4965_v4 = vpop.f32.mrf.mxu1 }
 0x74b   : > { %v4836_v48 = vadd.f32 %v4835_v14, %v4771_v34  ;;  %5159 = vmatmul.f32.gmra.mxu0 %v11266_v57  ;;  %v2991_v14 = vld [vmem:[#allocation8 + $0x478] sm:$0xff] }
 0x74c   : > { %5224 = vmatmul.f32.gmra.mxu1 %v11195_v9 }
 0x74d   : > { %v4901_v26 = vadd.f32 %v4900_v25, %v4836_v48  ;;  %5032 = vmatmul.f32.gmra.mxu2 %v11311_v38  ;;  %5461 = vmatpush.msrb.mxu1 %v2991_v14  ;;  %v2889_v25 = vld [vmem:[#allocation8 + $0x148] sm:$0xff] }
 0x74e   : > { %5097 = vmatmul.f32.gmra.mxu3 %v11312_v52  ;;  %5397 = vmatpush.msrb.mxu0 %v2889_v25  ;;  %v4650_v25 = vadd.f32 %v9850_v8, %v9923_v35 }
 0x74f   : > { %v4966_v21 = vadd.f32 %v4965_v4, %v4901_v26  ;;  %v11313_v4 = vld [vmem:[#allocation41_spill] sm:$0xff]  ;;  %v4712_v26 = vadd.f32 %v9843_v62, %v4647_v56  ;;  %v11316_v56 = vld [vmem:[#allocation70_spill] sm:$0xff] }
 0x750   : > { %v4773_v13 = vpop.f32.mrf.mxu2  ;;  %v4903_v53 = vpop.f32.mrf.mxu0 }
 0x751   : > { %5811 = vst [vmem:[%s9367_s26 + $0x108] sm:$0xff] %v4966_v21  ;;  %v4774_v51 = vadd.f32 %v4773_v13, %v4709_v43  ;;  %v4838_v63 = vpop.f32.mrf.mxu3  ;;  %v4968_v34 = vpop.f32.mrf.mxu1 }
 0x753   : > { %v4839_v48 = vadd.f32 %v4838_v63, %v4774_v51  ;;  %5162 = vmatmul.f32.gmra.mxu0 %v11267_v47  ;;  %v2985_v63 = vld [vmem:[#allocation8 + $0x448] sm:$0xff] }
 0x754   : > { %5227 = vmatmul.f32.gmra.mxu1 %v11268_v2 }
 0x755   : > { %v4904_v50 = vadd.f32 %v4903_v53, %v4839_v48  ;;  %5035 = vmatmul.f32.gmra.mxu2 %v11313_v4  ;;  %5462 = vmatpush.msrb.mxu1 %v2985_v63  ;;  %v2883_v53 = vld [vmem:[#allocation8 + $0x118] sm:$0xff] }
 0x756   : > { %5100 = vmatmul.f32.gmra.mxu3 %v11314_v46  ;;  %5398 = vmatpush.msrb.mxu0 %v2883_v53  ;;  %v4653_v53 = vadd.f32 %v9860_v31, %v9923_v35 }
 0x757   : > { %v4969_v43 = vadd.f32 %v4968_v34, %v4904_v50  ;;  %v11315_v34 = vld [vmem:[#allocation42_spill] sm:$0xff]  ;;  %v4715_v50 = vadd.f32 %v9853_v10, %v4650_v25  ;;  %v11317_v10 = vld [vmem:[#allocation85_spill] sm:$0xff]  ;;  %v11318_v25 = vld [vmem:[#allocation16_spill] sm:$0xff] }
 0x758   : > { %v4776_v21 = vpop.f32.mrf.mxu2  ;;  %v4906_v13 = vpop.f32.mrf.mxu0 }
 0x759   : > { %5817 = vst [vmem:[%s9367_s26 + $0x138] sm:$0xff] %v4969_v43  ;;  %v4777_v14 = vadd.f32 %v4776_v21, %v4712_v26  ;;  %v4841_v33 = vpop.f32.mrf.mxu3  ;;  %v4971_v51 = vpop.f32.mrf.mxu1 }
 0x75b   : > { %v4842_v48 = vadd.f32 %v4841_v33, %v4777_v14  ;;  %5165 = vmatmul.f32.gmra.mxu0 %v11270_v49  ;;  %v2979_v33 = vld [vmem:[#allocation8 + $0x418] sm:$0xff] }
 0x75c   : > { %5230 = vmatmul.f32.gmra.mxu1 %v11271_v61 }
 0x75d   : > { %v4907_v62 = vadd.f32 %v4906_v13, %v4842_v48  ;;  %5038 = vmatmul.f32.gmra.mxu2 %v11315_v34  ;;  %5463 = vmatpush.msrb.mxu1 %v2979_v33  ;;  %v2877_v13 = vld [vmem:[#allocation8 + $0xe8] sm:$0xff] }
 0x75e   : > { %5103 = vmatmul.f32.gmra.mxu3 %v11316_v56  ;;  %5399 = vmatpush.msrb.mxu0 %v2877_v13  ;;  %v4656_v13 = vadd.f32 %v9870_v29, %v9923_v35 }
 0x75f   : > { %v4972_v26 = vadd.f32 %v4971_v51, %v4907_v62  ;;  %v11319_v62 = vld [vmem:[#allocation71_spill] sm:$0xff] }
 0x760   : > { %v4779_v43 = vpop.f32.mrf.mxu2  ;;  %v4909_v21 = vpop.f32.mrf.mxu0 }
 0x761   : > { %5823 = vst [vmem:[%s9367_s26 + $0x168] sm:$0xff] %v4972_v26  ;;  %v4780_v63 = vadd.f32 %v4779_v43, %v4715_v50  ;;  %v4844_v8 = vpop.f32.mrf.mxu3  ;;  %v4974_v14 = vpop.f32.mrf.mxu1  ;;  %v4718_v50 = vadd.f32 %v9863_v36, %v4653_v53  ;;  %v11321_v36 = vld [vmem:[#allocation87_spill] sm:$0xff]  ;;  %v11322_v53 = vld [vmem:[#allocation17_spill] sm:$0xff] }
 0x763   : > { %v4845_v48 = vadd.f32 %v4844_v8, %v4780_v63  ;;  %5168 = vmatmul.f32.gmra.mxu0 %v11273_v20  ;;  %v2973_v8 = vld [vmem:[#allocation8 + $0x3e8] sm:$0xff]  ;;  %v3248_v20 = vld [vmem:[#allocation8 + $0xc80] sm:$0xff] }
 0x764   : > { %5233 = vmatmul.f32.gmra.mxu1 %v11317_v10  ;;  %5271 = vmatpush.msrb.mxu2 %v3248_v20  ;;  %v11320_v10 = vld [vmem:[#allocation32_spill] sm:$0xff] }
 0x765   : > { %v4910_v51 = vadd.f32 %v4909_v21, %v4845_v48  ;;  %5041 = vmatmul.f32.gmra.mxu2 %v11318_v25  ;;  %5464 = vmatpush.msrb.mxu1 %v2973_v8  ;;  %v2871_v21 = vld [vmem:[#allocation8 + $0xb8] sm:$0xff] }
 0x766   : > { %5106 = vmatmul.f32.gmra.mxu3 %v11319_v62  ;;  %5400 = vmatpush.msrb.mxu0 %v2871_v21  ;;  %v4659_v21 = vadd.f32 %v9880_v12, %v9923_v35 }
 0x767   : > { %v4975_v26 = vadd.f32 %v4974_v14, %v4910_v51  ;;  %v11323_v51 = vld [vmem:[#allocation73_spill] sm:$0xff] }
 0x768   : > { %v4782_v43 = vpop.f32.mrf.mxu2  ;;  %v4912_v33 = vpop.f32.mrf.mxu0 }
 0x769   : > { %5829 = vst [vmem:[%s9367_s26 + $0x198] sm:$0xff] %v4975_v26  ;;  %v4783_v54 = vadd.f32 %v4782_v43, %v4718_v50  ;;  %v4847_v31 = vpop.f32.mrf.mxu3  ;;  %v4977_v63 = vpop.f32.mrf.mxu1  ;;  %v4721_v50 = vadd.f32 %v9873_v16, %v4656_v13  ;;  %v11325_v16 = vld [vmem:[#allocation88_spill] sm:$0xff]  ;;  %v11326_v13 = vld [vmem:[#allocation18_spill] sm:$0xff] }
 0x76b   : > { %v4848_v48 = vadd.f32 %v4847_v31, %v4783_v54  ;;  %5171 = vmatmul.f32.gmra.mxu0 %v11320_v10  ;;  %v2967_v31 = vld [vmem:[#allocation8 + $0x3b8] sm:$0xff]  ;;  %v3242_v10 = vld [vmem:[#allocation8 + $0xc50] sm:$0xff] }
 0x76c   : > { %5236 = vmatmul.f32.gmra.mxu1 %v11321_v36  ;;  %5272 = vmatpush.msrb.mxu2 %v3242_v10  ;;  %v11324_v36 = vld [vmem:[#allocation47_spill] sm:$0xff] }
 0x76d   : > { %v4913_v14 = vadd.f32 %v4912_v33, %v4848_v48  ;;  %5044 = vmatmul.f32.gmra.mxu2 %v11322_v53  ;;  %5465 = vmatpush.msrb.mxu1 %v2967_v31  ;;  %v2865_v33 = vld [vmem:[#allocation8 + $0x88] sm:$0xff] }
 0x76e   : > { %5109 = vmatmul.f32.gmra.mxu3 %v11323_v51  ;;  %5401 = vmatpush.msrb.mxu0 %v2865_v33  ;;  %v4662_v33 = vadd.f32 %v9890_v11, %v9923_v35 }
 0x76f   : > { %v4978_v26 = vadd.f32 %v4977_v63, %v4913_v14  ;;  %v11327_v14 = vld [vmem:[#allocation75_spill] sm:$0xff] }
 0x770   : > { %v4785_v20 = vpop.f32.mrf.mxu2  ;;  %v4915_v43 = vpop.f32.mrf.mxu0 }
 0x771   : > { %5835 = vst [vmem:[%s9367_s26 + $0x1c8] sm:$0xff] %v4978_v26  ;;  %v4786_v8 = vadd.f32 %v4785_v20, %v4721_v50  ;;  %v4850_v29 = vpop.f32.mrf.mxu3  ;;  %v4980_v54 = vpop.f32.mrf.mxu1  ;;  %v4724_v50 = vadd.f32 %v9883_v27, %v4659_v21  ;;  %v11329_v27 = vld [vmem:[#allocation89_spill] sm:$0xff]  ;;  %v11330_v21 = vld [vmem:[#allocation19_spill] sm:$0xff] }
 0x773   : > { %v4851_v48 = vadd.f32 %v4850_v29, %v4786_v8  ;;  %5174 = vmatmul.f32.gmra.mxu0 %v11324_v36  ;;  %v2961_v29 = vld [vmem:[#allocation8 + $0x388] sm:$0xff]  ;;  %v3236_v36 = vld [vmem:[#allocation8 + $0xc20] sm:$0xff] }
 0x774   : > { %5239 = vmatmul.f32.gmra.mxu1 %v11325_v16  ;;  %5273 = vmatpush.msrb.mxu2 %v3236_v36  ;;  %v11328_v16 = vld [vmem:[#allocation48_spill] sm:$0xff] }
 0x775   : > { %v4916_v63 = vadd.f32 %v4915_v43, %v4851_v48  ;;  %5047 = vmatmul.f32.gmra.mxu2 %v11326_v13  ;;  %5466 = vmatpush.msrb.mxu1 %v2961_v29  ;;  %v2859_v43 = vld [vmem:[#allocation8 + $0x58] sm:$0xff] }
 0x776   : > { %5112 = vmatmul.f32.gmra.mxu3 %v11327_v14  ;;  %5402 = vmatpush.msrb.mxu0 %v2859_v43  ;;  %v2955_v29 = vld [vmem:[#allocation8 + $0x358] sm:$0xff]  ;;  %v4665_v43 = vadd.f32 %v9900_v60, %v9923_v35 }
 0x777   : > { %v4981_v26 = vadd.f32 %v4980_v54, %v4916_v63  ;;  %v11331_v63 = vld [vmem:[#allocation76_spill] sm:$0xff]  ;;  %5467 = vmatpush.msrb.mxu1 %v2955_v29  ;;  %5518 = vmatpush.msra.mxu2 %v3135_v22  ;;  %v3327_v29 = vld [vmem:[#allocation8 + $0xef8] sm:$0xff] }
 0x778   : > { %v4788_v10 = vpop.f32.mrf.mxu2  ;;  %v4918_v20 = vpop.f32.mrf.mxu0 }
 0x779   : > { %5841 = vst [vmem:[%s9367_s26 + $0x1f8] sm:$0xff] %v4981_v26  ;;  %v4789_v31 = vadd.f32 %v4788_v10, %v4724_v50  ;;  %v4853_v12 = vpop.f32.mrf.mxu3  ;;  %v4983_v8 = vpop.f32.mrf.mxu1  ;;  %v4727_v50 = vadd.f32 %v9893_v17, %v4662_v33  ;;  %v11332_v17 = vld [vmem:[#allocation90_spill] sm:$0xff]  ;;  %v11333_v33 = vld [vmem:[#allocation20_spill] sm:$0xff] }
 0x77b   : > { %v4854_v48 = vadd.f32 %v4853_v12, %v4789_v31  ;;  %5177 = vmatmul.f32.gmra.mxu0 %v11328_v16  ;;  %v2853_v16 = vld [vmem:[#allocation8 + $0x28] sm:$0xff] }
 0x77c   : > { %5242 = vmatmul.f32.gmra.mxu1 %v11329_v27  ;;  %v3231_v27 = vld [vmem:[#allocation8 + $0xbf8] sm:$0xff]  ;;  %5403 = vmatpush.msrb.mxu0 %v2853_v16 }
 0x77d   : > { %v4919_v54 = vadd.f32 %v4918_v20, %v4854_v48  ;;  %5050 = vmatmul.f32.gmra.mxu2 %v11330_v21  ;;  %v2949_v20 = vld [vmem:[#allocation8 + $0x328] sm:$0xff]  ;;  %5583 = vmatpush.msra.mxu3 %v3231_v27 }
 0x77e   : > { %5115 = vmatmul.f32.gmra.mxu3 %v11331_v63  ;;  %5468 = vmatpush.msrb.mxu1 %v2949_v20 }
 0x77f   : > { %v4984_v36 = vadd.f32 %v4983_v8, %v4919_v54  ;;  %v11334_v54 = vld [vmem:[#allocation77_spill] sm:$0xff]  ;;  %5648 = vmatpush.msra.mxu0 %v3327_v29  ;;  %v3219_v29 = vld [vmem:[#allocation8 + $0xb98] sm:$0xff] }
 0x780   : > { %v4791_v26 = vpop.f32.mrf.mxu2  ;;  %v4921_v10 = vpop.f32.mrf.mxu0 }
 0x781   : > { %5847 = vst [vmem:[%s9367_s26 + $0x228] sm:$0xff] %v4984_v36  ;;  %v4792_v11 = vadd.f32 %v4791_v26, %v4727_v50  ;;  %v4856_v31 = vpop.f32.mrf.mxu3  ;;  %v4986_v12 = vpop.f32.mrf.mxu1  ;;  %v4730_v50 = vadd.f32 %v9903_v1, %v4665_v43  ;;  %v3129_v36 = vld [vmem:[#allocation8 + $0x8c8] sm:$0xff]  ;;  %v11336_v1 = vld [vmem:[#allocation91_spill] sm:$0xff] }
 0x782   : > { %v3225_v26 = vld [vmem:[#allocation8 + $0xbc8] sm:$0xff]  ;;  %5519 = vmatpush.msra.mxu2 %v3129_v36  ;;  %v11339_v36 = vld [vmem:[#allocation54_spill] sm:$0xff] }
 0x783   : > { %v4857_v48 = vadd.f32 %v4856_v31, %v4792_v11  ;;  %5180 = vmatmul.f32.gmra.mxu0 %v11285_v41  ;;  %5584 = vmatpush.msra.mxu3 %v3225_v26  ;;  %v11337_v43 = vld [vmem:[#allocation21_spill] sm:$0xff]  ;;  %v3423_v26 = vld [vmem:[#allocation8 + $0x11f8] sm:$0xff] }
 0x784   : > { %5245 = vmatmul.f32.gmra.mxu1 %v11332_v17 }
 0x785   : > { %v4922_v8 = vadd.f32 %v4921_v10, %v4857_v48  ;;  %5053 = vmatmul.f32.gmra.mxu2 %v11333_v33  ;;  %v4668_v10 = vadd.f32 %v9910_v37, %v9923_v35  ;;  %v11335_v48 = vld [vmem:[#allocation46_spill] sm:$0xff]  ;;  %5713 = vmatpush.msra.mxu1 %v3423_v26  ;;  %v3321_v37 = vld [vmem:[#allocation8 + $0xec8] sm:$0xff]  ;;  %v11344_v26 = vld [vmem:[#allocation79_spill] sm:$0xff] }
 0x786   : > { %5118 = vmatmul.f32.gmra.mxu3 %v11334_v54  ;;  %5649 = vmatpush.msra.mxu0 %v3321_v37  ;;  %v3213_v37 = vld [vmem:[#allocation8 + $0xb68] sm:$0xff] }
 0x787   : > { %v4987_v16 = vadd.f32 %v4986_v12, %v4922_v8  ;;  %v11338_v8 = vld [vmem:[#allocation78_spill] sm:$0xff]  ;;  %5585 = vmatpush.msra.mxu3 %v3219_v29  ;;  %v3117_v29 = vld [vmem:[#allocation8 + $0x868] sm:$0xff] }
 0x788   : > { %v4794_v60 = vpop.f32.mrf.mxu2  ;;  %v4924_v11 = vpop.f32.mrf.mxu0 }
 0x789   : > { %5853 = vst [vmem:[%s9367_s26 + $0x258] sm:$0xff] %v4987_v16  ;;  %v4795_v27 = vadd.f32 %v4794_v60, %v4730_v50  ;;  %v4859_v31 = vpop.f32.mrf.mxu3  ;;  %v4989_v22 = vpop.f32.mrf.mxu1  ;;  %v4733_v16 = vadd.f32 %v11339_v36, %v4668_v10  ;;  %v3123_v60 = vld [vmem:[#allocation8 + $0x898] sm:$0xff]  ;;  %v11341_v10 = vld [vmem:[#allocation52_spill] sm:$0xff]  ;;  %5586 = vmatpush.msra.mxu3 %v3213_v37 }
 0x78a   : > { %5520 = vmatpush.msra.mxu2 %v3123_v60  ;;  %v11343_v36 = vld [vmem:[#allocation23_spill] sm:$0xff]  ;;  %v3417_v60 = vld [vmem:[#allocation8 + $0x11c8] sm:$0xff] }
 0x78b   : > { %v4860_v20 = vadd.f32 %v4859_v31, %v4795_v27  ;;  %5183 = vmatmul.f32.gmra.mxu0 %v11335_v48  ;;  %5714 = vmatpush.msra.mxu1 %v3417_v60  ;;  %v11350_v60 = vld [vmem:[#allocation105_spill] sm:$0xff] }
 0x78c   : > { %5248 = vmatmul.f32.gmra.mxu1 %v11336_v1  ;;  %5521 = vmatpush.msra.mxu2 %v3117_v29  ;;  %v3207_v29 = vld [vmem:[#allocation8 + $0xb38] sm:$0xff] }
 0x78d   : > { %v4925_v12 = vadd.f32 %v4924_v11, %v4860_v20  ;;  %5056 = vmatmul.f32.gmra.mxu2 %v11337_v43  ;;  %v11340_v11 = vld [vmem:[#allocation63_spill] sm:$0xff]  ;;  %5587 = vmatpush.msra.mxu3 %v3207_v29 }
 0x78e   : > { %5121 = vmatmul.f32.gmra.mxu3 %v11338_v8  ;;  %v4671_v20 = vadd.f32 %v11340_v11, %v9923_v35  ;;  %v3315_v35 = vld [vmem:[#allocation8 + $0xe98] sm:$0xff] }
 0x78f   : > { %v4990_v50 = vadd.f32 %v4989_v22, %v4925_v12  ;;  %v11342_v22 = vld [vmem:[#allocation92_spill] sm:$0xff]  ;;  %5650 = vmatpush.msra.mxu0 %v3315_v35  ;;  %v3303_v29 = vld [vmem:[#allocation8 + $0xe38] sm:$0xff] }
 0x790   : > { %v4797_v17 = vpop.f32.mrf.mxu2  ;;  %v4927_v41 = vpop.f32.mrf.mxu0 }
 0x791   : > { %5859 = vst [vmem:[%s9367_s26 + $0x288] sm:$0xff] %v4990_v50  ;;  %v4798_v27 = vadd.f32 %v4797_v17, %v4733_v16  ;;  %v4862_v31 = vpop.f32.mrf.mxu3  ;;  %v4992_v1 = vpop.f32.mrf.mxu1  ;;  %v11345_v50 = vld [vmem:[#allocation67_spill] sm:$0xff] }
 0x792   : > { %v4736_v17 = vadd.f32 %v11345_v50, %v4671_v20  ;;  %v11347_v20 = vld [vmem:[#allocation93_spill] sm:$0xff]  ;;  %v11349_v50 = vld [vmem:[#allocation28_spill] sm:$0xff] }
 0x793   : > { %v4863_v48 = vadd.f32 %v4862_v31, %v4798_v27  ;;  %5186 = vmatmul.f32.gmra.mxu0 %v11341_v10 }
 0x794   : > { %5251 = vmatmul.f32.gmra.mxu1 %v11342_v22  ;;  %v10062_v22 = vperm.slane %v11349_v50, 4 }
 0x795   : > { %v4928_v12 = vadd.f32 %v4927_v41, %v4863_v48  ;;  %5059 = vmatmul.f32.gmra.mxu2 %v11343_v36  ;;  %v11346_v48 = vld [vmem:[#allocation53_spill] sm:$0xff] }
 0x796   : > { %5124 = vmatmul.f32.gmra.mxu3 %v11344_v26 }
 0x797   : > { %v4993_v16 = vadd.f32 %v4992_v1, %v4928_v12  ;;  %v11348_v12 = vld [vmem:[#allocation94_spill] sm:$0xff] }
 0x798   : > { %v4800_v61 = vpop.f32.mrf.mxu2  ;;  %v4930_v49 = vpop.f32.mrf.mxu0 }
 0x799   : > { %5865 = vst [vmem:[%s9367_s26 + $0x2b8] sm:$0xff] %v4993_v16  ;;  %v4801_v27 = vadd.f32 %v4800_v61, %v4736_v17  ;;  %v4865_v31 = vpop.f32.mrf.mxu3  ;;  %v4995_v11 = vpop.f32.mrf.mxu1  ;;  %v3411_v61 = vld [vmem:[#allocation8 + $0x1198] sm:$0xff] }
 0x79a   : > { %v3111_v17 = vld [vmem:[#allocation8 + $0x838] sm:$0xff]  ;;  %5715 = vmatpush.msra.mxu1 %v3411_v61 }
 0x79b   : > { %v4866_v41 = vadd.f32 %v4865_v31, %v4801_v27  ;;  %5189 = vmatmul.f32.gmra.mxu0 %v11346_v48  ;;  %5522 = vmatpush.msra.mxu2 %v3111_v17  ;;  %v3309_v27 = vld [vmem:[#allocation8 + $0xe68] sm:$0xff] }
 0x79c   : > { %5254 = vmatmul.f32.gmra.mxu1 %v11347_v20  ;;  %5651 = vmatpush.msra.mxu0 %v3309_v27  ;;  %v11352_v20 = vld [vmem:[#allocation106_spill] sm:$0xff]  ;;  %v3405_v17 = vld [vmem:[#allocation8 + $0x1168] sm:$0xff] }
 0x79d   : > { %v4931_v1 = vadd.f32 %v4930_v49, %v4866_v41  ;;  %5274 = vmatmul.f32.vlgmr.msrb.gmra.mxu2 %v11348_v12  ;;  %v3201_v48 = vld [vmem:[#allocation8 + $0xb08] sm:$0xff]  ;;  %5716 = vmatpush.msra.mxu1 %v3405_v17  ;;  %v3099_v17 = vld [vmem:[#allocation8 + $0x7d8] sm:$0xff] }
 0x79e   : > { %5339 = vmatmul.f32.vlgmr.msrb.gmra.mxu3 %v11350_v60  ;;  %5652 = vmatpush.msra.mxu0 %v3303_v29 }
 0x79f   : > { %v4996_v16 = vadd.f32 %v4995_v11, %v4931_v1  ;;  %v11351_v1 = vld [vmem:[#allocation49_spill] sm:$0xff]  ;;  %5588 = vmatpush.msra.mxu3 %v3201_v48 }
 0x7a0   : > { %v5015_v37 = vpop.f32.mrf.mxu2  ;;  %v5145_v35 = vpop.f32.mrf.mxu0  ;;  %v3297_v48 = vld [vmem:[#allocation8 + $0xe08] sm:$0xff] }
 0x7a1   : > { %5871 = vst [vmem:[%s9367_s26 + $0x2e8] sm:$0xff] %v4996_v16  ;;  %v5016_v31 = vadd.f32 %v5015_v37, %v10062_v22  ;;  %v5080_v49 = vpop.f32.mrf.mxu3  ;;  %v5210_v41 = vpop.f32.mrf.mxu1  ;;  %v3105_v16 = vld [vmem:[#allocation8 + $0x808] sm:$0xff]  ;;  %5653 = vmatpush.msra.mxu0 %v3297_v48 }
 0x7a2   : > { %5523 = vmatpush.msra.mxu2 %v3105_v16  ;;  %v3195_v16 = vld [vmem:[#allocation8 + $0xad8] sm:$0xff] }
 0x7a3   : > { %v5081_v50 = vadd.f32 %v5080_v49, %v5016_v31  ;;  %5404 = vmatmul.f32.vlgmr.msrb.gmra.mxu0 %v11299_v24  ;;  %v11353_v49 = vld [vmem:[#allocation57_spill] sm:$0xff]  ;;  %5589 = vmatpush.msra.mxu3 %v3195_v16  ;;  %v3291_v16 = vld [vmem:[#allocation8 + $0xdd8] sm:$0xff] }
 0x7a4   : > { %5469 = vmatmul.f32.vlgmr.msrb.gmra.mxu1 %v11300_v45  ;;  %5524 = vmatpush.msra.mxu2 %v3099_v17  ;;  %v3189_v17 = vld [vmem:[#allocation8 + $0xaa8] sm:$0xff] }
 0x7a5   : > { %v5146_v11 = vadd.f32 %v5145_v35, %v5081_v50  ;;  %5277 = vmatmul.f32.gmra.mxu2 %v11351_v1  ;;  %5590 = vmatpush.msra.mxu3 %v3189_v17  ;;  %v3285_v17 = vld [vmem:[#allocation8 + $0xda8] sm:$0xff] }
 0x7a6   : > { %5342 = vmatmul.f32.gmra.mxu3 %v11352_v20  ;;  %5654 = vmatpush.msra.mxu0 %v3291_v16 }
 0x7a7   : > { %v10071_v61 = vadd.f32 %v5210_v41, %v5146_v11  ;;  %v11354_v41 = vld [vmem:[#allocation107_spill] sm:$0xff] }
 0x7a8   : > { %v5018_v37 = vpop.f32.mrf.mxu2  ;;  %v5148_v10 = vpop.f32.mrf.mxu0  ;;  %v3399_v11 = vld [vmem:[#allocation8 + $0x1138] sm:$0xff]  ;;  %5655 = vmatpush.msra.mxu0 %v3285_v17 }
 0x7a9   : > { %v5019_v27 = vadd.f32 %v5018_v37, %v10062_v22  ;;  %v5083_v24 = vpop.f32.mrf.mxu3  ;;  %v5213_v31 = vpop.f32.mrf.mxu1  ;;  %5717 = vmatpush.msra.mxu1 %v3399_v11  ;;  %v3093_v11 = vld [vmem:[#allocation8 + $0x7a8] sm:$0xff] }
 0x7aa   : > { %5525 = vmatpush.msra.mxu2 %v3093_v11  ;;  %v3183_v11 = vld [vmem:[#allocation8 + $0xa78] sm:$0xff] }
 0x7ab   : > { %v5084_v45 = vadd.f32 %v5083_v24, %v5019_v27  ;;  %5407 = vmatmul.f32.gmra.mxu0 %v11301_v5  ;;  %v11355_v24 = vld [vmem:[#allocation58_spill] sm:$0xff]  ;;  %5591 = vmatpush.msra.mxu3 %v3183_v11 }
 0x7ac   : > { %5472 = vmatmul.f32.gmra.mxu1 %v11302_v28  ;;  %v3279_v11 = vld [vmem:[#allocation8 + $0xd78] sm:$0xff] }
 0x7ad   : > { %v5149_v35 = vadd.f32 %v5148_v10, %v5084_v45  ;;  %5280 = vmatmul.f32.gmra.mxu2 %v11353_v49  ;;  %5656 = vmatpush.msra.mxu0 %v3279_v11 }
 0x7ae   : > { %5345 = vmatmul.f32.gmra.mxu3 %v11354_v41 }
 0x7af   : > { %v10078_v50 = vadd.f32 %v5213_v31, %v5149_v35  ;;  %v11356_v31 = vld [vmem:[#allocation108_spill] sm:$0xff] }
 0x7b0   : > { %v5021_v37 = vpop.f32.mrf.mxu2  ;;  %v5151_v2 = vpop.f32.mrf.mxu0  ;;  %v3393_v35 = vld [vmem:[#allocation8 + $0x1108] sm:$0xff] }
 0x7b1   : > { %v5022_v29 = vadd.f32 %v5021_v37, %v10062_v22  ;;  %v5086_v5 = vpop.f32.mrf.mxu3  ;;  %v5216_v27 = vpop.f32.mrf.mxu1  ;;  %5718 = vmatpush.msra.mxu1 %v3393_v35  ;;  %v3087_v35 = vld [vmem:[#allocation8 + $0x778] sm:$0xff] }
 0x7b2   : > { %5526 = vmatpush.msra.mxu2 %v3087_v35  ;;  %v3177_v35 = vld [vmem:[#allocation8 + $0xa48] sm:$0xff] }
 0x7b3   : > { %v5087_v28 = vadd.f32 %v5086_v5, %v5022_v29  ;;  %5410 = vmatmul.f32.gmra.mxu0 %v11303_v40  ;;  %v11357_v5 = vld [vmem:[#allocation62_spill] sm:$0xff]  ;;  %5592 = vmatpush.msra.mxu3 %v3177_v35  ;;  %v3273_v35 = vld [vmem:[#allocation8 + $0xd48] sm:$0xff] }
 0x7b4   : > { %5475 = vmatmul.f32.gmra.mxu1 %v11304_v23  ;;  %5657 = vmatpush.msra.mxu0 %v3273_v35 }
 0x7b5   : > { %v5152_v10 = vadd.f32 %v5151_v2, %v5087_v28  ;;  %5283 = vmatmul.f32.gmra.mxu2 %v11355_v24 }
 0x7b6   : > { %5348 = vmatmul.f32.gmra.mxu3 %v11356_v31 }
 0x7b7   : > { %v10085_v45 = vadd.f32 %v5216_v27, %v5152_v10  ;;  %v11358_v27 = vld [vmem:[#allocation109_spill] sm:$0xff]  ;;  %v3387_v10 = vld [vmem:[#allocation8 + $0x10d8] sm:$0xff] }
 0x7b8   : > { %v5024_v37 = vpop.f32.mrf.mxu2  ;;  %v5154_v47 = vpop.f32.mrf.mxu0  ;;  %5719 = vmatpush.msra.mxu1 %v3387_v10  ;;  %v3081_v10 = vld [vmem:[#allocation8 + $0x748] sm:$0xff] }
 0x7b9   : > { %v5025_v48 = vadd.f32 %v5024_v37, %v10062_v22  ;;  %v5089_v40 = vpop.f32.mrf.mxu3  ;;  %v5219_v29 = vpop.f32.mrf.mxu1  ;;  %5527 = vmatpush.msra.mxu2 %v3081_v10  ;;  %v3171_v10 = vld [vmem:[#allocation8 + $0xa18] sm:$0xff] }
 0x7ba   : > { %5593 = vmatpush.msra.mxu3 %v3171_v10  ;;  %v3267_v10 = vld [vmem:[#allocation8 + $0xd18] sm:$0xff] }
 0x7bb   : > { %v5090_v2 = vadd.f32 %v5089_v40, %v5025_v48  ;;  %5413 = vmatmul.f32.gmra.mxu0 %v11305_v58  ;;  %v11359_v40 = vld [vmem:[#allocation61_spill] sm:$0xff] }
 0x7bc   : > { %5478 = vmatmul.f32.gmra.mxu1 %v11306_v59  ;;  %5658 = vmatpush.msra.mxu0 %v3267_v10 }
 0x7bd   : > { %v5155_v23 = vadd.f32 %v5154_v47, %v5090_v2  ;;  %5286 = vmatmul.f32.gmra.mxu2 %v11357_v5 }
 0x7be   : > { %5351 = vmatmul.f32.gmra.mxu3 %v11358_v27 }
 0x7bf   : > { %v10092_v28 = vadd.f32 %v5219_v29, %v5155_v23  ;;  %v11360_v29 = vld [vmem:[#allocation110_spill] sm:$0xff]  ;;  %v3381_v23 = vld [vmem:[#allocation8 + $0x10a8] sm:$0xff] }
 0x7c0   : > { %v5027_v37 = vpop.f32.mrf.mxu2  ;;  %v5157_v9 = vpop.f32.mrf.mxu0  ;;  %5720 = vmatpush.msra.mxu1 %v3381_v23  ;;  %v3075_v23 = vld [vmem:[#allocation8 + $0x718] sm:$0xff] }
 0x7c1   : > { %v5028_v16 = vadd.f32 %v5027_v37, %v10062_v22  ;;  %v5092_v58 = vpop.f32.mrf.mxu3  ;;  %v5222_v48 = vpop.f32.mrf.mxu1  ;;  %5528 = vmatpush.msra.mxu2 %v3075_v23  ;;  %v3165_v23 = vld [vmem:[#allocation8 + $0x9e8] sm:$0xff] }
 0x7c2   : > { %5594 = vmatpush.msra.mxu3 %v3165_v23  ;;  %v3261_v23 = vld [vmem:[#allocation8 + $0xce8] sm:$0xff] }
 0x7c3   : > { %v5093_v47 = vadd.f32 %v5092_v58, %v5028_v16  ;;  %5416 = vmatmul.f32.gmra.mxu0 %v11307_v18  ;;  %v11361_v58 = vld [vmem:[#allocation68_spill] sm:$0xff] }
 0x7c4   : > { %5481 = vmatmul.f32.gmra.mxu1 %v11308_v0  ;;  %5659 = vmatpush.msra.mxu0 %v3261_v23 }
 0x7c5   : > { %v5158_v59 = vadd.f32 %v5157_v9, %v5093_v47  ;;  %5289 = vmatmul.f32.gmra.mxu2 %v11359_v40 }
 0x7c6   : > { %5354 = vmatmul.f32.gmra.mxu3 %v11360_v29 }
 0x7c7   : > { %v10099_v2 = vadd.f32 %v5222_v48, %v5158_v59  ;;  %v11362_v48 = vld [vmem:[#allocation111_spill] sm:$0xff] }
 0x7c8   : > { %v5030_v37 = vpop.f32.mrf.mxu2  ;;  %v5160_v57 = vpop.f32.mrf.mxu0  ;;  %v3375_v59 = vld [vmem:[#allocation8 + $0x1078] sm:$0xff] }
 0x7c9   : > { %v5031_v17 = vadd.f32 %v5030_v37, %v10062_v22  ;;  %v5095_v18 = vpop.f32.mrf.mxu3  ;;  %v5225_v16 = vpop.f32.mrf.mxu1  ;;  %5721 = vmatpush.msra.mxu1 %v3375_v59  ;;  %v3069_v59 = vld [vmem:[#allocation8 + $0x6e8] sm:$0xff] }
 0x7ca   : > { %5529 = vmatpush.msra.mxu2 %v3069_v59  ;;  %v3159_v59 = vld [vmem:[#allocation8 + $0x9b8] sm:$0xff] }
 0x7cb   : > { %v5096_v9 = vadd.f32 %v5095_v18, %v5031_v17  ;;  %5419 = vmatmul.f32.gmra.mxu0 %v11309_v7  ;;  %v11363_v18 = vld [vmem:[#allocation64_spill] sm:$0xff]  ;;  %5595 = vmatpush.msra.mxu3 %v3159_v59  ;;  %v3255_v59 = vld [vmem:[#allocation8 + $0xcb8] sm:$0xff] }
 0x7cc   : > { %5484 = vmatmul.f32.gmra.mxu1 %v11310_v44  ;;  %5660 = vmatpush.msra.mxu0 %v3255_v59 }
 0x7cd   : > { %v5161_v0 = vadd.f32 %v5160_v57, %v5096_v9  ;;  %5292 = vmatmul.f32.gmra.mxu2 %v11361_v58 }
 0x7ce   : > { %5357 = vmatmul.f32.gmra.mxu3 %v11362_v48 }
 0x7cf   : > { %v10106_v47 = vadd.f32 %v5225_v16, %v5161_v0  ;;  %v11364_v16 = vld [vmem:[#allocation56_spill] sm:$0xff] }
 0x7d0   : > { %v5033_v37 = vpop.f32.mrf.mxu2  ;;  %v5163_v29 = vpop.f32.mrf.mxu0  ;;  %v3369_v0 = vld [vmem:[#allocation8 + $0x1048] sm:$0xff] }
 0x7d1   : > { %v5034_v11 = vadd.f32 %v5033_v37, %v10062_v22  ;;  %v5098_v7 = vpop.f32.mrf.mxu3  ;;  %v5228_v17 = vpop.f32.mrf.mxu1  ;;  %5722 = vmatpush.msra.mxu1 %v3369_v0  ;;  %v3063_v0 = vld [vmem:[#allocation8 + $0x6b8] sm:$0xff] }
 0x7d2   : > { %5530 = vmatpush.msra.mxu2 %v3063_v0  ;;  %v3153_v0 = vld [vmem:[#allocation8 + $0x988] sm:$0xff] }
 0x7d3   : > { %v5099_v57 = vadd.f32 %v5098_v7, %v5034_v11  ;;  %5422 = vmatmul.f32.gmra.mxu0 %v11311_v38  ;;  %v11365_v7 = vld [vmem:[#allocation72_spill] sm:$0xff]  ;;  %5596 = vmatpush.msra.mxu3 %v3153_v0 }
 0x7d4   : > { %5487 = vmatmul.f32.gmra.mxu1 %v11312_v52  ;;  %v3249_v0 = vld [vmem:[#allocation8 + $0xc88] sm:$0xff] }
 0x7d5   : > { %v5164_v44 = vadd.f32 %v5163_v29, %v5099_v57  ;;  %5295 = vmatmul.f32.gmra.mxu2 %v11363_v18  ;;  %5661 = vmatpush.msra.mxu0 %v3249_v0 }
 0x7d6   : > { %5360 = vmatmul.f32.gmra.mxu3 %v11364_v16 }
 0x7d7   : > { %v10113_v9 = vadd.f32 %v5228_v17, %v5164_v44  ;;  %v11366_v17 = vld [vmem:[#allocation59_spill] sm:$0xff] }
 0x7d8   : > { %v5036_v37 = vpop.f32.mrf.mxu2  ;;  %v5166_v48 = vpop.f32.mrf.mxu0  ;;  %v3363_v44 = vld [vmem:[#allocation8 + $0x1018] sm:$0xff] }
 0x7d9   : > { %v5037_v35 = vadd.f32 %v5036_v37, %v10062_v22  ;;  %v5101_v38 = vpop.f32.mrf.mxu3  ;;  %v5231_v11 = vpop.f32.mrf.mxu1  ;;  %5723 = vmatpush.msra.mxu1 %v3363_v44  ;;  %v3057_v44 = vld [vmem:[#allocation8 + $0x688] sm:$0xff] }
 0x7da   : > { %5531 = vmatpush.msra.mxu2 %v3057_v44  ;;  %v3147_v44 = vld [vmem:[#allocation8 + $0x958] sm:$0xff] }
 0x7db   : > { %v5102_v52 = vadd.f32 %v5101_v38, %v5037_v35  ;;  %5425 = vmatmul.f32.gmra.mxu0 %v11313_v4  ;;  %v11367_v38 = vld [vmem:[#allocation74_spill] sm:$0xff]  ;;  %5597 = vmatpush.msra.mxu3 %v3147_v44 }
 0x7dc   : > { %5490 = vmatmul.f32.gmra.mxu1 %v11314_v46  ;;  %v3243_v44 = vld [vmem:[#allocation8 + $0xc58] sm:$0xff] }
 0x7dd   : > { %v5167_v29 = vadd.f32 %v5166_v48, %v5102_v52  ;;  %5298 = vmatmul.f32.gmra.mxu2 %v11365_v7  ;;  %5662 = vmatpush.msra.mxu0 %v3243_v44 }
 0x7de   : > { %5363 = vmatmul.f32.gmra.mxu3 %v11366_v17 }
 0x7df   : > { %v10120_v57 = vadd.f32 %v5231_v11, %v5167_v29  ;;  %v11368_v11 = vld [vmem:[#allocation98_spill] sm:$0xff]  ;;  %v3357_v29 = vld [vmem:[#allocation8 + $0xfe8] sm:$0xff] }
 0x7e0   : > { %v5039_v37 = vpop.f32.mrf.mxu2  ;;  %v5169_v16 = vpop.f32.mrf.mxu0  ;;  %5724 = vmatpush.msra.mxu1 %v3357_v29  ;;  %v3051_v29 = vld [vmem:[#allocation8 + $0x658] sm:$0xff] }
 0x7e1   : > { %v5040_v10 = vadd.f32 %v5039_v37, %v10062_v22  ;;  %v5104_v4 = vpop.f32.mrf.mxu3  ;;  %v5234_v35 = vpop.f32.mrf.mxu1  ;;  %5532 = vmatpush.msra.mxu2 %v3051_v29  ;;  %v3141_v29 = vld [vmem:[#allocation8 + $0x928] sm:$0xff] }
 0x7e2   : > { %5598 = vmatpush.msra.mxu3 %v3141_v29 }
 0x7e3   : > { %v5105_v46 = vadd.f32 %v5104_v4, %v5040_v10  ;;  %5428 = vmatmul.f32.gmra.mxu0 %v11315_v34  ;;  %v11369_v4 = vld [vmem:[#allocation81_spill] sm:$0xff] }
 0x7e4   : > { %5493 = vmatmul.f32.gmra.mxu1 %v11316_v56 }
 0x7e5   : > { %v5170_v48 = vadd.f32 %v5169_v16, %v5105_v46  ;;  %5301 = vmatmul.f32.gmra.mxu2 %v11367_v38 }
 0x7e6   : > { %5366 = vmatmul.f32.gmra.mxu3 %v11368_v11 }
 0x7e7   : > { %v10127_v52 = vadd.f32 %v5234_v35, %v5170_v48  ;;  %v11370_v35 = vld [vmem:[#allocation99_spill] sm:$0xff] }
 0x7e8   : > { %v5042_v37 = vpop.f32.mrf.mxu2  ;;  %v5172_v17 = vpop.f32.mrf.mxu0  ;;  %v3351_v48 = vld [vmem:[#allocation8 + $0xfb8] sm:$0xff] }
 0x7e9   : > { %v5043_v23 = vadd.f32 %v5042_v37, %v10062_v22  ;;  %v5107_v34 = vpop.f32.mrf.mxu3  ;;  %v5237_v10 = vpop.f32.mrf.mxu1  ;;  %5725 = vmatpush.msra.mxu1 %v3351_v48  ;;  %v3045_v48 = vld [vmem:[#allocation8 + $0x628] sm:$0xff] }
 0x7ea   : > { %5533 = vmatpush.msra.mxu2 %v3045_v48 }
 0x7eb   : > { %v5108_v56 = vadd.f32 %v5107_v34, %v5043_v23  ;;  %5431 = vmatmul.f32.gmra.mxu0 %v11318_v25  ;;  %v11371_v34 = vld [vmem:[#allocation83_spill] sm:$0xff] }
 0x7ec   : > { %5496 = vmatmul.f32.gmra.mxu1 %v11319_v62 }
 0x7ed   : > { %v5173_v16 = vadd.f32 %v5172_v17, %v5108_v56  ;;  %5304 = vmatmul.f32.gmra.mxu2 %v11369_v4 }
 0x7ee   : > { %5369 = vmatmul.f32.gmra.mxu3 %v11370_v35 }
 0x7ef   : > { %v10134_v46 = vadd.f32 %v5237_v10, %v5173_v16  ;;  %v11372_v10 = vld [vmem:[#allocation100_spill] sm:$0xff] }
 0x7f0   : > { %v5045_v37 = vpop.f32.mrf.mxu2  ;;  %v5175_v11 = vpop.f32.mrf.mxu0  ;;  %v3345_v16 = vld [vmem:[#allocation8 + $0xf88] sm:$0xff] }
 0x7f1   : > { %v5046_v59 = vadd.f32 %v5045_v37, %v10062_v22  ;;  %v5110_v25 = vpop.f32.mrf.mxu3  ;;  %v5240_v23 = vpop.f32.mrf.mxu1  ;;  %5726 = vmatpush.msra.mxu1 %v3345_v16  ;;  %v3237_v16 = vld [vmem:[#allocation8 + $0xc28] sm:$0xff] }
 0x7f2   : > { %5663 = vmatpush.msra.mxu0 %v3237_v16 }
 0x7f3   : > { %v5111_v62 = vadd.f32 %v5110_v25, %v5046_v59  ;;  %5434 = vmatmul.f32.gmra.mxu0 %v11322_v53  ;;  %v11373_v25 = vld [vmem:[#allocation86_spill] sm:$0xff] }
 0x7f4   : > { %5499 = vmatmul.f32.gmra.mxu1 %v11323_v51 }
 0x7f5   : > { %v5176_v17 = vadd.f32 %v5175_v11, %v5111_v62  ;;  %5307 = vmatmul.f32.gmra.mxu2 %v11371_v34 }
 0x7f6   : > { %5372 = vmatmul.f32.gmra.mxu3 %v11372_v10 }
 0x7f7   : > { %v10141_v56 = vadd.f32 %v5240_v23, %v5176_v17  ;;  %v11374_v23 = vld [vmem:[#allocation101_spill] sm:$0xff]  ;;  %v3339_v17 = vld [vmem:[#allocation8 + $0xf58] sm:$0xff] }
 0x7f8   : > { %v5048_v37 = vpop.f32.mrf.mxu2  ;;  %v5178_v35 = vpop.f32.mrf.mxu0  ;;  %5727 = vmatpush.msra.mxu1 %v3339_v17 }
 0x7f9   : > { %v5049_v0 = vadd.f32 %v5048_v37, %v10062_v22  ;;  %v5113_v53 = vpop.f32.mrf.mxu3  ;;  %v5243_v59 = vpop.f32.mrf.mxu1 }
 0x7fb   : > { %v5114_v51 = vadd.f32 %v5113_v53, %v5049_v0  ;;  %5437 = vmatmul.f32.gmra.mxu0 %v11326_v13  ;;  %v3333_v13 = vld [vmem:[#allocation8 + $0xf28] sm:$0xff] }
 0x7fc   : > { %5502 = vmatmul.f32.gmra.mxu1 %v11327_v14 }
 0x7fd   : > { %v5179_v11 = vadd.f32 %v5178_v35, %v5114_v51  ;;  %5310 = vmatmul.f32.gmra.mxu2 %v11373_v25  ;;  %5728 = vmatpush.msra.mxu1 %v3333_v13  ;;  %v11375_v35 = vld [vmem:[#allocation95_spill] sm:$0xff] }
 0x7fe   : > { %5375 = vmatmul.f32.gmra.mxu3 %v11374_v23 }
 0x7ff   : > { %v10148_v62 = vadd.f32 %v5243_v59, %v5179_v11  ;;  %v11376_v59 = vld [vmem:[#allocation102_spill] sm:$0xff] }
 0x800   : > { %v5051_v48 = vpop.f32.mrf.mxu2  ;;  %v5181_v37 = vpop.f32.mrf.mxu0 }
 0x801   : > { %v5052_v29 = vadd.f32 %v5051_v48, %v10062_v22  ;;  %v5116_v44 = vpop.f32.mrf.mxu3  ;;  %v5246_v0 = vpop.f32.mrf.mxu1 }
 0x803   : > { %v5117_v53 = vadd.f32 %v5116_v44, %v5052_v29  ;;  %5440 = vmatmul.f32.gmra.mxu0 %v11330_v21 }
 0x804   : > { %5505 = vmatmul.f32.gmra.mxu1 %v11331_v63  ;;  %v11377_v63 = vld [vmem:[#allocation96_spill] sm:$0xff] }
 0x805   : > { %v5182_v14 = vadd.f32 %v5181_v37, %v5117_v53  ;;  %5313 = vmatmul.f32.gmra.mxu2 %v11375_v35  ;;  %v11378_v37 = vld [vmem:[#allocation103_spill] sm:$0xff] }
 0x806   : > { %5378 = vmatmul.f32.gmra.mxu3 %v11376_v59 }
 0x807   : > { %v10155_v51 = vadd.f32 %v5246_v0, %v5182_v14 }
 0x808   : > { %v5054_v11 = vpop.f32.mrf.mxu2  ;;  %v5184_v17 = vpop.f32.mrf.mxu0 }
 0x809   : > { %v5055_v16 = vadd.f32 %v5054_v11, %v10062_v22  ;;  %v5119_v48 = vpop.f32.mrf.mxu3  ;;  %v5249_v23 = vpop.f32.mrf.mxu1 }
 0x80b   : > { %v5120_v25 = vadd.f32 %v5119_v48, %v5055_v16  ;;  %5443 = vmatmul.f32.gmra.mxu0 %v11333_v33 }
 0x80c   : > { %5508 = vmatmul.f32.gmra.mxu1 %v11334_v54  ;;  %v11379_v54 = vld [vmem:[#allocation97_spill] sm:$0xff] }
 0x80d   : > { %v5185_v21 = vadd.f32 %v5184_v17, %v5120_v25  ;;  %5316 = vmatmul.f32.gmra.mxu2 %v11377_v63  ;;  %v11380_v25 = vld [vmem:[#allocation104_spill] sm:$0xff] }
 0x80e   : > { %5381 = vmatmul.f32.gmra.mxu3 %v11378_v37 }
 0x80f   : > { %v10162_v29 = vadd.f32 %v5249_v23, %v5185_v21 }
 0x810   : > { %v5057_v44 = vpop.f32.mrf.mxu2  ;;  %v5187_v0 = vpop.f32.mrf.mxu0 }
 0x811   : > { %v5058_v13 = vadd.f32 %v5057_v44, %v10062_v22  ;;  %v5122_v53 = vpop.f32.mrf.mxu3  ;;  %v5252_v14 = vpop.f32.mrf.mxu1 }
 0x813   : > { %v5123_v11 = vadd.f32 %v5122_v53, %v5058_v13  ;;  %5446 = vmatmul.f32.gmra.mxu0 %v11337_v43 }
 0x814   : > { %5511 = vmatmul.f32.gmra.mxu1 %v11338_v8  ;;  %v11381_v8 = vld [vmem:[#allocation22_spill] sm:$0xff] }
 0x815   : > { %v5188_v33 = vadd.f32 %v5187_v0, %v5123_v11  ;;  %5319 = vmatmul.f32.gmra.mxu2 %v11379_v54 }
 0x816   : > { %5384 = vmatmul.f32.gmra.mxu3 %v11380_v25 }
 0x817   : > { %v10169_v17 = vadd.f32 %v5252_v14, %v5188_v33 }
 0x818   : > { %v5060_v23 = vpop.f32.mrf.mxu2  ;;  %v5190_v16 = vpop.f32.mrf.mxu0 }
 0x819   : > { %v5061_v48 = vadd.f32 %v5060_v23, %v10062_v22  ;;  %v5125_v21 = vpop.f32.mrf.mxu3  ;;  %v5255_v44 = vpop.f32.mrf.mxu1 }
 0x81b   : > { %v5126_v37 = vadd.f32 %v5125_v21, %v5061_v48  ;;  %5449 = vmatmul.f32.gmra.mxu0 %v11343_v36 }
 0x81c   : > { %5514 = vmatmul.f32.gmra.mxu1 %v11344_v26 }
 0x81d   : > { %v5191_v43 = vadd.f32 %v5190_v16, %v5126_v37  ;;  %5534 = vmatmul.f32.vlgmr.msra.gmra.mxu2 %v11381_v8 }
 0x81e   : > { %5599 = vmatmul.f32.vlgmr.msra.gmra.mxu3 %v11148_v6 }
 0x81f   : > { %v10176_v0 = vadd.f32 %v5255_v44, %v5191_v43 }
 0x820   : > { %v5275_v13 = vpop.f32.mrf.mxu2  ;;  %v10178_v53 = vpop.f32.mrf.mxu0 }
 0x821   : > { %v5276_v22 = vadd.f32 %v5275_v13, %v10071_v61  ;;  %v5340_v14 = vpop.f32.mrf.mxu3  ;;  %v10181_v11 = vpop.f32.mrf.mxu1  ;;  %v11386_v13 = vld [vmem:[#allocation82_spill] sm:$0xff] }
 0x823   : > { %v5341_v33 = vadd.f32 %v5340_v14, %v5276_v22  ;;  %5664 = vmatmul.f32.vlgmr.msra.gmra.mxu0 %v11348_v12 }
 0x824   : > { %5729 = vmatmul.f32.vlgmr.msra.gmra.mxu1 %v11350_v60 }
 0x825   : > { %5782 = vst [vmem:[%s9367_s26 + $0x20] sm:$0xff] %v5341_v33  ;;  %5537 = vmatmul.f32.gmra.mxu2 %v11149_v15 }
 0x826   : > { %5602 = vmatmul.f32.gmra.mxu3 %v11150_v19 }
 0x828   : > { %v5278_v6 = vpop.f32.mrf.mxu2  ;;  %v10188_v36 = vpop.f32.mrf.mxu0 }
 0x829   : > { %v5279_v26 = vadd.f32 %v5278_v6, %v10078_v50  ;;  %v5343_v61 = vpop.f32.mrf.mxu3  ;;  %v10191_v37 = vpop.f32.mrf.mxu1 }
 0x82b   : > { %v5344_v23 = vadd.f32 %v5343_v61, %v5279_v26  ;;  %5667 = vmatmul.f32.gmra.mxu0 %v11351_v1  ;;  %v11388_v61 = vld [vmem:[#allocation43_spill] sm:$0xff] }
 0x82c   : > { %5732 = vmatmul.f32.gmra.mxu1 %v11352_v20 }
 0x82d   : > { %5788 = vst [vmem:[%s9367_s26 + $0x50] sm:$0xff] %v5344_v23  ;;  %5540 = vmatmul.f32.gmra.mxu2 %v11151_v3  ;;  %v11389_v23 = vld [vmem:[#allocation84_spill] sm:$0xff] }
 0x82e   : > { %5605 = vmatmul.f32.gmra.mxu3 %v11152_v32 }
 0x830   : > { %v5281_v15 = vpop.f32.mrf.mxu2  ;;  %v10198_v19 = vpop.f32.mrf.mxu0 }
 0x831   : > { %v5282_v12 = vadd.f32 %v5281_v15, %v10085_v45  ;;  %v5346_v60 = vpop.f32.mrf.mxu3  ;;  %v10201_v50 = vpop.f32.mrf.mxu1 }
 0x833   : > { %v5347_v16 = vadd.f32 %v5346_v60, %v5282_v12  ;;  %5670 = vmatmul.f32.gmra.mxu0 %v11353_v49 }
 0x834   : > { %5735 = vmatmul.f32.gmra.mxu1 %v11354_v41 }
 0x835   : > { %5794 = vst [vmem:[%s9367_s26 + $0x80] sm:$0xff] %v5347_v16  ;;  %5543 = vmatmul.f32.gmra.mxu2 %v11264_v42 }
 0x836   : > { %5608 = vmatmul.f32.gmra.mxu3 %v11189_v39 }
 0x838   : > { %v5284_v3 = vpop.f32.mrf.mxu2  ;;  %v10208_v32 = vpop.f32.mrf.mxu0 }
 0x839   : > { %v5285_v20 = vadd.f32 %v5284_v3, %v10092_v28  ;;  %v5349_v1 = vpop.f32.mrf.mxu3  ;;  %v10211_v45 = vpop.f32.mrf.mxu1 }
 0x83b   : > { %v5350_v48 = vadd.f32 %v5349_v1, %v5285_v20  ;;  %5673 = vmatmul.f32.gmra.mxu0 %v11355_v24  ;;  %v11382_v24 = vld [vmem:[#allocation27_spill] sm:$0xff]  ;;  %v11390_v20 = vld [vmem:[#allocation56_spill] sm:$0xff]  ;;  %v11392_v1 = vld [vmem:[#allocation85_spill] sm:$0xff] }
 0x83c   : > { %5738 = vmatmul.f32.gmra.mxu1 %v11356_v31 }
 0x83d   : > { %5800 = vst [vmem:[%s9367_s26 + $0xb0] sm:$0xff] %v5350_v48  ;;  %5546 = vmatmul.f32.gmra.mxu2 %v11265_v30  ;;  %v11383_v30 = vld [vmem:[#allocation80_spill] sm:$0xff]  ;;  %v6393_v48 = vld [vmem:[#allocation10] sm:$0x3f] }
 0x83e   : > { %5611 = vmatmul.f32.gmra.mxu3 %v11192_v55 }
 0x840   : > { %v5287_v39 = vpop.f32.mrf.mxu2  ;;  %v10218_v42 = vpop.f32.mrf.mxu0 }
 0x841   : > { %v5288_v49 = vadd.f32 %v5287_v39, %v10099_v2  ;;  %v5352_v41 = vpop.f32.mrf.mxu3  ;;  %v10221_v28 = vpop.f32.mrf.mxu1  ;;  %v10258_v39 = vperm.slane %v6393_v48, 5  ;;  %v11401_v48 = vld [vmem:[#allocation89_spill] sm:$0xff] }
 0x843   : > { %v5353_v21 = vadd.f32 %v5352_v41, %v5288_v49  ;;  %5676 = vmatmul.f32.gmra.mxu0 %v11357_v5  ;;  %v11384_v5 = vld [vmem:[#allocation110_spill] sm:$0xff] }
 0x844   : > { %5741 = vmatmul.f32.gmra.mxu1 %v11358_v27  ;;  %v11385_v27 = vld [vmem:[#allocation33_spill] sm:$0xff] }
 0x845   : > { %5806 = vst [vmem:[%s9367_s26 + $0xe0] sm:$0xff] %v5353_v21  ;;  %5549 = vmatmul.f32.gmra.mxu2 %v11382_v24 }
 0x846   : > { %5614 = vmatmul.f32.gmra.mxu3 %v11383_v30 }
 0x848   : > { %v5290_v55 = vpop.f32.mrf.mxu2  ;;  %v10228_v31 = vpop.f32.mrf.mxu0 }
 0x849   : > { %v5291_v44 = vadd.f32 %v5290_v55, %v10106_v47  ;;  %v5355_v2 = vpop.f32.mrf.mxu3  ;;  %v10231_v43 = vpop.f32.mrf.mxu1 }
 0x84b   : > { %v5356_v8 = vadd.f32 %v5355_v2, %v5291_v44  ;;  %5679 = vmatmul.f32.gmra.mxu0 %v11359_v40  ;;  %v11387_v40 = vld [vmem:[#allocation111_spill] sm:$0xff]  ;;  %v11394_v2 = vld [vmem:[#allocation32_spill] sm:$0xff] }
 0x84c   : > { %5744 = vmatmul.f32.gmra.mxu1 %v11384_v5  ;;  %v11393_v44 = vld [vmem:[#allocation59_spill] sm:$0xff] }
 0x84d   : > { %5812 = vst [vmem:[%s9367_s26 + $0x110] sm:$0xff] %v5356_v8  ;;  %5552 = vmatmul.f32.gmra.mxu2 %v11385_v27  ;;  %v11395_v8 = vld [vmem:[#allocation87_spill] sm:$0xff] }
 0x84e   : > { %5617 = vmatmul.f32.gmra.mxu3 %v11386_v13 }
 0x850   : > { %v5293_v22 = vpop.f32.mrf.mxu2  ;;  %v10238_v14 = vpop.f32.mrf.mxu0 }
 0x851   : > { %v5294_v33 = vadd.f32 %v5293_v22, %v10113_v9  ;;  %v5358_v47 = vpop.f32.mrf.mxu3  ;;  %v10241_v6 = vpop.f32.mrf.mxu1 }
 0x853   : > { %v5359_v26 = vadd.f32 %v5358_v47, %v5294_v33  ;;  %5682 = vmatmul.f32.gmra.mxu0 %v11361_v58  ;;  %v11391_v58 = vld [vmem:[#allocation30_spill] sm:$0xff] }
 0x854   : > { %5747 = vmatmul.f32.gmra.mxu1 %v11387_v40  ;;  %v11397_v40 = vld [vmem:[#allocation47_spill] sm:$0xff] }
 0x855   : > { %5818 = vst [vmem:[%s9367_s26 + $0x140] sm:$0xff] %v5359_v26  ;;  %5555 = vmatmul.f32.gmra.mxu2 %v11388_v61  ;;  %v11398_v61 = vld [vmem:[#allocation88_spill] sm:$0xff] }
 0x856   : > { %5620 = vmatmul.f32.gmra.mxu3 %v11389_v23 }
 0x858   : > { %v5296_v15 = vpop.f32.mrf.mxu2  ;;  %v10248_v12 = vpop.f32.mrf.mxu0 }
 0x859   : > { %v5297_v60 = vadd.f32 %v5296_v15, %v10120_v57  ;;  %v5361_v9 = vpop.f32.mrf.mxu3  ;;  %v10251_v16 = vpop.f32.mrf.mxu1 }
 0x85b   : > { %v5362_v3 = vadd.f32 %v5361_v9, %v5297_v60  ;;  %5685 = vmatmul.f32.gmra.mxu0 %v11363_v18 }
 0x85c   : > { %5750 = vmatmul.f32.gmra.mxu1 %v11390_v20 }
 0x85d   : > { %5824 = vst [vmem:[%s9367_s26 + $0x170] sm:$0xff] %v5362_v3  ;;  %5558 = vmatmul.f32.gmra.mxu2 %v11391_v58 }
 0x85e   : > { %5623 = vmatmul.f32.gmra.mxu3 %v11392_v1  ;;  %v11400_v1 = vld [vmem:[#allocation48_spill] sm:$0xff] }
 0x860   : > { %v5299_v49 = vpop.f32.mrf.mxu2  ;;  %v5429_v41 = vpop.f32.mrf.mxu0 }
 0x861   : > { %v5300_v57 = vadd.f32 %v5299_v49, %v10127_v52  ;;  %v5364_v21 = vpop.f32.mrf.mxu3  ;;  %v5430_v24 = vadd.f32 %v5429_v41, %v10258_v39  ;;  %v5494_v30 = vpop.f32.mrf.mxu1 }
 0x863   : > { %v5365_v18 = vadd.f32 %v5364_v21, %v5300_v57  ;;  %v10262_v55 = vadd.f32 %v5494_v30, %v5430_v24  ;;  %5688 = vmatmul.f32.gmra.mxu0 %v11365_v7  ;;  %v11396_v7 = vld [vmem:[#allocation98_spill] sm:$0xff] }
 0x864   : > { %5753 = vmatmul.f32.gmra.mxu1 %v11393_v44  ;;  %v11403_v44 = vld [vmem:[#allocation90_spill] sm:$0xff] }
 0x865   : > { %5830 = vst [vmem:[%s9367_s26 + $0x1a0] sm:$0xff] %v5365_v18  ;;  %5561 = vmatmul.f32.gmra.mxu2 %v11394_v2 }
 0x866   : > { %5626 = vmatmul.f32.gmra.mxu3 %v11395_v8 }
 0x868   : > { %v5302_v5 = vpop.f32.mrf.mxu2  ;;  %v5432_v27 = vpop.f32.mrf.mxu0 }
 0x869   : > { %v5303_v52 = vadd.f32 %v5302_v5, %v10134_v46  ;;  %v5367_v13 = vpop.f32.mrf.mxu3  ;;  %v5433_v22 = vadd.f32 %v5432_v27, %v10258_v39  ;;  %v5497_v33 = vpop.f32.mrf.mxu1 }
 0x86b   : > { %v5368_v47 = vadd.f32 %v5367_v13, %v5303_v52  ;;  %v10271_v26 = vadd.f32 %v5497_v33, %v5433_v22  ;;  %5691 = vmatmul.f32.gmra.mxu0 %v11367_v38  ;;  %v11399_v38 = vld [vmem:[#allocation99_spill] sm:$0xff]  ;;  %v11404_v33 = vld [vmem:[#allocation86_spill] sm:$0xff] }
 0x86c   : > { %5756 = vmatmul.f32.gmra.mxu1 %v11396_v7 }
 0x86d   : > { %5836 = vst [vmem:[%s9367_s26 + $0x1d0] sm:$0xff] %v5368_v47  ;;  %5564 = vmatmul.f32.gmra.mxu2 %v11397_v40  ;;  %v11407_v47 = vld [vmem:[#allocation91_spill] sm:$0xff] }
 0x86e   : > { %5629 = vmatmul.f32.gmra.mxu3 %v11398_v61 }
 0x870   : > { %v5305_v23 = vpop.f32.mrf.mxu2  ;;  %v5435_v15 = vpop.f32.mrf.mxu0 }
 0x871   : > { %v5306_v46 = vadd.f32 %v5305_v23, %v10141_v56  ;;  %v5370_v60 = vpop.f32.mrf.mxu3  ;;  %v5436_v9 = vadd.f32 %v5435_v15, %v10258_v39  ;;  %v5500_v3 = vpop.f32.mrf.mxu1 }
 0x873   : > { %v5371_v20 = vadd.f32 %v5370_v60, %v5306_v46  ;;  %v10280_v58 = vadd.f32 %v5500_v3, %v5436_v9  ;;  %5694 = vmatmul.f32.gmra.mxu0 %v11369_v4  ;;  %v11402_v4 = vld [vmem:[#allocation44_spill] sm:$0xff] }
 0x874   : > { %5759 = vmatmul.f32.gmra.mxu1 %v11399_v38  ;;  %v11408_v9 = vld [vmem:[#allocation52_spill] sm:$0xff] }
 0x875   : > { %5842 = vst [vmem:[%s9367_s26 + $0x200] sm:$0xff] %v5371_v20  ;;  %5567 = vmatmul.f32.gmra.mxu2 %v11400_v1  ;;  %v11409_v3 = vld [vmem:[#allocation92_spill] sm:$0xff] }
 0x876   : > { %5632 = vmatmul.f32.gmra.mxu3 %v11401_v48 }
 0x878   : > { %v5308_v49 = vpop.f32.mrf.mxu2  ;;  %v5438_v41 = vpop.f32.mrf.mxu0 }
 0x879   : > { %v5309_v56 = vadd.f32 %v5308_v49, %v10148_v62  ;;  %v5373_v57 = vpop.f32.mrf.mxu3  ;;  %v5439_v21 = vadd.f32 %v5438_v41, %v10258_v39  ;;  %v5503_v24 = vpop.f32.mrf.mxu1 }
 0x87b   : > { %v5374_v30 = vadd.f32 %v5373_v57, %v5309_v56  ;;  %v10289_v18 = vadd.f32 %v5503_v24, %v5439_v21  ;;  %5697 = vmatmul.f32.gmra.mxu0 %v11371_v34  ;;  %v11405_v34 = vld [vmem:[#allocation101_spill] sm:$0xff] }
 0x87c   : > { %5762 = vmatmul.f32.gmra.mxu1 %v11372_v10  ;;  %v11406_v10 = vld [vmem:[#allocation46_spill] sm:$0xff]  ;;  %v11412_v57 = vld [vmem:[#allocation93_spill] sm:$0xff] }
 0x87d   : > { %5848 = vst [vmem:[%s9367_s26 + $0x230] sm:$0xff] %v5374_v30  ;;  %5570 = vmatmul.f32.gmra.mxu2 %v11402_v4 }
 0x87e   : > { %5635 = vmatmul.f32.gmra.mxu3 %v11403_v44 }
 0x880   : > { %v5311_v2 = vpop.f32.mrf.mxu2  ;;  %v5441_v8 = vpop.f32.mrf.mxu0 }
 0x881   : > { %v5312_v62 = vadd.f32 %v5311_v2, %v10155_v51  ;;  %v5376_v5 = vpop.f32.mrf.mxu3  ;;  %v5442_v27 = vadd.f32 %v5441_v8, %v10258_v39  ;;  %v5506_v52 = vpop.f32.mrf.mxu1  ;;  %v5406_v2 = vadd.f32 %v10178_v53, %v10258_v39 }
 0x883   : > { %v5377_v13 = vadd.f32 %v5376_v5, %v5312_v62  ;;  %v10298_v22 = vadd.f32 %v5506_v52, %v5442_v27  ;;  %5700 = vmatmul.f32.gmra.mxu0 %v11404_v33  ;;  %v5471_v62 = vadd.f32 %v10181_v11, %v5406_v2  ;;  %v5409_v33 = vadd.f32 %v10188_v36, %v10258_v39 }
 0x884   : > { %5765 = vmatmul.f32.gmra.mxu1 %v11405_v34 }
 0x885   : > { %5854 = vst [vmem:[%s9367_s26 + $0x260] sm:$0xff] %v5377_v13  ;;  %5573 = vmatmul.f32.gmra.mxu2 %v11406_v10  ;;  %v5474_v10 = vadd.f32 %v10191_v37, %v5409_v33 }
 0x886   : > { %5638 = vmatmul.f32.gmra.mxu3 %v11407_v47 }
 0x888   : > { %v5314_v7 = vpop.f32.mrf.mxu2  ;;  %v5444_v40 = vpop.f32.mrf.mxu0 }
 0x889   : > { %v5315_v51 = vadd.f32 %v5314_v7, %v10162_v29  ;;  %v5379_v61 = vpop.f32.mrf.mxu3  ;;  %v5445_v23 = vadd.f32 %v5444_v40, %v10258_v39  ;;  %v5509_v15 = vpop.f32.mrf.mxu1 }
 0x88b   : > { %v5380_v46 = vadd.f32 %v5379_v61, %v5315_v51  ;;  %v10307_v60 = vadd.f32 %v5509_v15, %v5445_v23  ;;  %5703 = vmatmul.f32.gmra.mxu0 %v11375_v35  ;;  %v11410_v35 = vld [vmem:[#allocation103_spill] sm:$0xff]  ;;  %v5412_v51 = vadd.f32 %v10198_v19, %v10258_v39 }
 0x88c   : > { %5768 = vmatmul.f32.gmra.mxu1 %v11376_v59  ;;  %v11411_v59 = vld [vmem:[#allocation53_spill] sm:$0xff] }
 0x88d   : > { %5860 = vst [vmem:[%s9367_s26 + $0x290] sm:$0xff] %v5380_v46  ;;  %5576 = vmatmul.f32.gmra.mxu2 %v11408_v9  ;;  %v5477_v36 = vadd.f32 %v10201_v50, %v5412_v51 }
 0x88e   : > { %5641 = vmatmul.f32.gmra.mxu3 %v11409_v3 }
 0x890   : > { %v5317_v20 = vpop.f32.mrf.mxu2  ;;  %v5447_v38 = vpop.f32.mrf.mxu0 }
 0x891   : > { %v5318_v29 = vadd.f32 %v5317_v20, %v10169_v17  ;;  %v5382_v1 = vpop.f32.mrf.mxu3  ;;  %v5448_v48 = vadd.f32 %v5447_v38, %v10258_v39  ;;  %v5512_v49 = vpop.f32.mrf.mxu1  ;;  %v5415_v38 = vadd.f32 %v10208_v32, %v10258_v39 }
 0x893   : > { %v5383_v41 = vadd.f32 %v5382_v1, %v5318_v29  ;;  %v10316_v56 = vadd.f32 %v5512_v49, %v5448_v48  ;;  %5706 = vmatmul.f32.gmra.mxu0 %v11377_v63  ;;  %v5480_v19 = vadd.f32 %v10211_v45, %v5415_v38 }
 0x894   : > { %5771 = vmatmul.f32.gmra.mxu1 %v11410_v35 }
 0x895   : > { %5866 = vst [vmem:[%s9367_s26 + $0x2c0] sm:$0xff] %v5383_v41  ;;  %5579 = vmatmul.f32.gmra.mxu2 %v11411_v59 }
 0x896   : > { %5644 = vmatmul.f32.gmra.mxu3 %v11412_v57  ;;  %v5418_v57 = vadd.f32 %v10218_v42, %v10258_v39 }
 0x898   : > { %v5320_v21 = vpop.f32.mrf.mxu2  ;;  %v5450_v24 = vpop.f32.mrf.mxu0  ;;  %v5483_v32 = vadd.f32 %v10221_v28, %v5418_v57 }
 0x899   : > { %v5321_v17 = vadd.f32 %v5320_v21, %v10176_v0  ;;  %v5385_v30 = vpop.f32.mrf.mxu3  ;;  %v5451_v4 = vadd.f32 %v5450_v24, %v10258_v39  ;;  %v5515_v44 = vpop.f32.mrf.mxu1 }
 0x89b   : > { %v5386_v63 = vadd.f32 %v5385_v30, %v5321_v17  ;;  %v10327_v8 = vadd.f32 %v5515_v44, %v5451_v4  ;;  %5709 = vmatmul.f32.gmra.mxu0 %v11379_v54 }
 0x89c   : > { %5774 = vmatmul.f32.gmra.mxu1 %v11380_v25 }
 0x89d   : > { %5872 = vst [vmem:[%s9367_s26 + $0x2f0] sm:$0xff] %v5386_v63  ;;  %v5421_v63 = vadd.f32 %v10228_v31, %v10258_v39 }
 0x89f   : > { %v5486_v42 = vadd.f32 %v10231_v43, %v5421_v63 }
 0x8a0   : > { %v5535_v5 = vpop.f32.mrf.mxu2  ;;  %v5665_v0 = vpop.f32.mrf.mxu0 }
 0x8a1   : > { %v5536_v27 = vadd.f32 %v5535_v5, %v5471_v62  ;;  %v5600_v52 = vpop.f32.mrf.mxu3  ;;  %v5730_v13 = vpop.f32.mrf.mxu1 }
 0x8a3   : > { %v5601_v53 = vadd.f32 %v5600_v52, %v5536_v27 }
 0x8a5   : > { %v5666_v34 = vadd.f32 %v5665_v0, %v5601_v53  ;;  %v5424_v53 = vadd.f32 %v10238_v14, %v10258_v39 }
 0x8a7   : > { %v5731_v54 = vadd.f32 %v5730_v13, %v5666_v34  ;;  %v5489_v31 = vadd.f32 %v10241_v6, %v5424_v53 }
 0x8a8   : > { %v5538_v47 = vpop.f32.mrf.mxu2  ;;  %v5668_v7 = vpop.f32.mrf.mxu0 }
 0x8a9   : > { %5783 = vst [vmem:[%s9367_s26 + $0x28] sm:$0xff] %v5731_v54  ;;  %v5539_v25 = vadd.f32 %v5538_v47, %v5474_v10  ;;  %v5603_v40 = vpop.f32.mrf.mxu3  ;;  %v5733_v11 = vpop.f32.mrf.mxu1 }
 0x8ab   : > { %v5604_v61 = vadd.f32 %v5603_v40, %v5539_v25 }
 0x8ad   : > { %v5669_v23 = vadd.f32 %v5668_v7, %v5604_v61 }
 0x8af   : > { %v5734_v15 = vadd.f32 %v5733_v11, %v5669_v23  ;;  %v5427_v11 = vadd.f32 %v10248_v12, %v10258_v39 }
 0x8b0   : > { %v5541_v46 = vpop.f32.mrf.mxu2  ;;  %v5671_v9 = vpop.f32.mrf.mxu0 }
 0x8b1   : > { %5789 = vst [vmem:[%s9367_s26 + $0x58] sm:$0xff] %v5734_v15  ;;  %v5542_v37 = vadd.f32 %v5541_v46, %v5477_v36  ;;  %v5606_v3 = vpop.f32.mrf.mxu3  ;;  %v5736_v20 = vpop.f32.mrf.mxu1  ;;  %v5492_v14 = vadd.f32 %v10251_v16, %v5427_v11 }
 0x8b3   : > { %v5607_v29 = vadd.f32 %v5606_v3, %v5542_v37 }
 0x8b5   : > { %v5672_v1 = vadd.f32 %v5671_v9, %v5607_v29 }
 0x8b7   : > { %v5737_v48 = vadd.f32 %v5736_v20, %v5672_v1 }
 0x8b8   : > { %v5544_v49 = vpop.f32.mrf.mxu2  ;;  %v5674_v41 = vpop.f32.mrf.mxu0 }
 0x8b9   : > { %5795 = vst [vmem:[%s9367_s26 + $0x88] sm:$0xff] %v5737_v48  ;;  %v5545_v50 = vadd.f32 %v5544_v49, %v5480_v19  ;;  %v5609_v35 = vpop.f32.mrf.mxu3  ;;  %v5739_v59 = vpop.f32.mrf.mxu1 }
 0x8bb   : > { %v5610_v21 = vadd.f32 %v5609_v35, %v5545_v50 }
 0x8bd   : > { %v5675_v24 = vadd.f32 %v5674_v41, %v5610_v21 }
 0x8bf   : > { %v5740_v17 = vadd.f32 %v5739_v59, %v5675_v24 }
 0x8c0   : > { %v5547_v30 = vpop.f32.mrf.mxu2  ;;  %v5677_v4 = vpop.f32.mrf.mxu0 }
 0x8c1   : > { %5801 = vst [vmem:[%s9367_s26 + $0xb8] sm:$0xff] %v5740_v17  ;;  %v5548_v45 = vadd.f32 %v5547_v30, %v5483_v32  ;;  %v5612_v44 = vpop.f32.mrf.mxu3  ;;  %v5742_v2 = vpop.f32.mrf.mxu1 }
 0x8c3   : > { %v5613_v62 = vadd.f32 %v5612_v44, %v5548_v45 }
 0x8c5   : > { %v5678_v5 = vadd.f32 %v5677_v4, %v5613_v62 }
 0x8c7   : > { %v5743_v0 = vadd.f32 %v5742_v2, %v5678_v5 }
 0x8c8   : > { %v5550_v27 = vpop.f32.mrf.mxu2  ;;  %v5680_v52 = vpop.f32.mrf.mxu0 }
 0x8c9   : > { %5807 = vst [vmem:[%s9367_s26 + $0xe8] sm:$0xff] %v5743_v0  ;;  %v5551_v28 = vadd.f32 %v5550_v27, %v5486_v42  ;;  %v5615_v13 = vpop.f32.mrf.mxu3  ;;  %v5745_v33 = vpop.f32.mrf.mxu1 }
 0x8cb   : > { %v5616_v34 = vadd.f32 %v5615_v13, %v5551_v28 }
 0x8cd   : > { %v5681_v10 = vadd.f32 %v5680_v52, %v5616_v34 }
 0x8cf   : > { %v5746_v54 = vadd.f32 %v5745_v33, %v5681_v10 }
 0x8d0   : > { %v5553_v47 = vpop.f32.mrf.mxu2  ;;  %v5683_v7 = vpop.f32.mrf.mxu0 }
 0x8d1   : > { %5813 = vst [vmem:[%s9367_s26 + $0x118] sm:$0xff] %v5746_v54  ;;  %v5554_v43 = vadd.f32 %v5553_v47, %v5489_v31  ;;  %v5618_v25 = vpop.f32.mrf.mxu3  ;;  %v5748_v40 = vpop.f32.mrf.mxu1 }
 0x8d3   : > { %v5619_v51 = vadd.f32 %v5618_v25, %v5554_v43 }
 0x8d5   : > { %v5684_v61 = vadd.f32 %v5683_v7, %v5619_v51 }
 0x8d7   : > { %v5749_v23 = vadd.f32 %v5748_v40, %v5684_v61 }
 0x8d8   : > { %v5556_v36 = vpop.f32.mrf.mxu2  ;;  %v5686_v15 = vpop.f32.mrf.mxu0 }
 0x8d9   : > { %5819 = vst [vmem:[%s9367_s26 + $0x148] sm:$0xff] %v5749_v23  ;;  %v5557_v6 = vadd.f32 %v5556_v36, %v5492_v14  ;;  %v5621_v46 = vpop.f32.mrf.mxu3  ;;  %v5751_v9 = vpop.f32.mrf.mxu1 }
 0x8db   : > { %v5622_v37 = vadd.f32 %v5621_v46, %v5557_v6 }
 0x8dd   : > { %v5687_v3 = vadd.f32 %v5686_v15, %v5622_v37 }
 0x8df   : > { %v5752_v20 = vadd.f32 %v5751_v9, %v5687_v3 }
 0x8e0   : > { %v5559_v38 = vpop.f32.mrf.mxu2  ;;  %v5689_v29 = vpop.f32.mrf.mxu0 }
 0x8e1   : > { %5825 = vst [vmem:[%s9367_s26 + $0x178] sm:$0xff] %v5752_v20  ;;  %v5560_v12 = vadd.f32 %v5559_v38, %v10262_v55  ;;  %v5624_v39 = vpop.f32.mrf.mxu3  ;;  %v5754_v1 = vpop.f32.mrf.mxu1 }
 0x8e3   : > { %v5625_v16 = vadd.f32 %v5624_v39, %v5560_v12 }
 0x8e5   : > { %v5690_v19 = vadd.f32 %v5689_v29, %v5625_v16 }
 0x8e7   : > { %v5755_v48 = vadd.f32 %v5754_v1, %v5690_v19 }
 0x8e8   : > { %v5562_v49 = vpop.f32.mrf.mxu2  ;;  %v5692_v41 = vpop.f32.mrf.mxu0 }
 0x8e9   : > { %5831 = vst [vmem:[%s9367_s26 + $0x1a8] sm:$0xff] %v5755_v48  ;;  %v5563_v50 = vadd.f32 %v5562_v49, %v10271_v26  ;;  %v5627_v35 = vpop.f32.mrf.mxu3  ;;  %v5757_v59 = vpop.f32.mrf.mxu1 }
 0x8eb   : > { %v5628_v57 = vadd.f32 %v5627_v35, %v5563_v50 }
 0x8ed   : > { %v5693_v21 = vadd.f32 %v5692_v41, %v5628_v57 }
 0x8ef   : > { %v5758_v24 = vadd.f32 %v5757_v59, %v5693_v21 }
 0x8f0   : > { %v5565_v32 = vpop.f32.mrf.mxu2  ;;  %v5695_v17 = vpop.f32.mrf.mxu0 }
 0x8f1   : > { %5837 = vst [vmem:[%s9367_s26 + $0x1d8] sm:$0xff] %v5758_v24  ;;  %v5566_v55 = vadd.f32 %v5565_v32, %v10280_v58  ;;  %v5630_v30 = vpop.f32.mrf.mxu3  ;;  %v5760_v4 = vpop.f32.mrf.mxu1 }
 0x8f3   : > { %v5631_v45 = vadd.f32 %v5630_v30, %v5566_v55 }
 0x8f5   : > { %v5696_v44 = vadd.f32 %v5695_v17, %v5631_v45 }
 0x8f7   : > { %v5761_v2 = vadd.f32 %v5760_v4, %v5696_v44 }
 0x8f8   : > { %v5568_v63 = vpop.f32.mrf.mxu2  ;;  %v5698_v62 = vpop.f32.mrf.mxu0 }
 0x8f9   : > { %5843 = vst [vmem:[%s9367_s26 + $0x208] sm:$0xff] %v5761_v2  ;;  %v5569_v26 = vadd.f32 %v5568_v63, %v10289_v18  ;;  %v5633_v5 = vpop.f32.mrf.mxu3  ;;  %v5763_v42 = vpop.f32.mrf.mxu1 }
 0x8fb   : > { %v5634_v0 = vadd.f32 %v5633_v5, %v5569_v26 }
 0x8fd   : > { %v5699_v27 = vadd.f32 %v5698_v62, %v5634_v0 }
 0x8ff   : > { %v5764_v52 = vadd.f32 %v5763_v42, %v5699_v27 }
 0x900   : > { %v5571_v28 = vpop.f32.mrf.mxu2  ;;  %v5701_v13 = vpop.f32.mrf.mxu0 }
 0x901   : > { %5849 = vst [vmem:[%s9367_s26 + $0x238] sm:$0xff] %v5764_v52  ;;  %v5572_v58 = vadd.f32 %v5571_v28, %v10298_v22  ;;  %v5636_v33 = vpop.f32.mrf.mxu3  ;;  %v5766_v53 = vpop.f32.mrf.mxu1 }
 0x903   : > { %v5637_v34 = vadd.f32 %v5636_v33, %v5572_v58 }
 0x905   : > { %v5702_v10 = vadd.f32 %v5701_v13, %v5637_v34 }
 0x907   : > { %v5767_v31 = vadd.f32 %v5766_v53, %v5702_v10 }
 0x908   : > { %v5574_v54 = vpop.f32.mrf.mxu2  ;;  %v5704_v18 = vpop.f32.mrf.mxu0 }
 0x909   : > { %5855 = vst [vmem:[%s9367_s26 + $0x268] sm:$0xff] %v5767_v31  ;;  %v5575_v47 = vadd.f32 %v5574_v54, %v10307_v60  ;;  %v5639_v7 = vpop.f32.mrf.mxu3  ;;  %v5769_v43 = vpop.f32.mrf.mxu1 }
 0x90b   : > { %v5640_v25 = vadd.f32 %v5639_v7, %v5575_v47 }
 0x90d   : > { %v5705_v40 = vadd.f32 %v5704_v18, %v5640_v25 }
 0x90f   : > { %v5770_v11 = vadd.f32 %v5769_v43, %v5705_v40 }
 0x910   : > { %v5577_v51 = vpop.f32.mrf.mxu2  ;;  %v5707_v14 = vpop.f32.mrf.mxu0 }
 0x911   : > { %5861 = vst [vmem:[%s9367_s26 + $0x298] sm:$0xff] %v5770_v11  ;;  %v5578_v22 = vadd.f32 %v5577_v51, %v10316_v56  ;;  %v5642_v61 = vpop.f32.mrf.mxu3  ;;  %v5772_v36 = vpop.f32.mrf.mxu1 }
 0x913   : > { %v5643_v23 = vadd.f32 %v5642_v61, %v5578_v22 }
 0x915   : > { %v5708_v15 = vadd.f32 %v5707_v14, %v5643_v23 }
 0x917   : > { %v5773_v6 = vadd.f32 %v5772_v36, %v5708_v15 }
 0x918   : > { %v5580_v60 = vpop.f32.mrf.mxu2  ;;  %v5710_v37 = vpop.f32.mrf.mxu0 }
 0x919   : > { %5867 = vst [vmem:[%s9367_s26 + $0x2c8] sm:$0xff] %v5773_v6  ;;  %v5581_v46 = vadd.f32 %v5580_v60, %v10327_v8  ;;  %v5645_v9 = vpop.f32.mrf.mxu3  ;;  %v5775_v20 = vpop.f32.mrf.mxu1 }
 0x91b   : > { %v5646_v56 = vadd.f32 %v5645_v9, %v5581_v46 }
 0x91d   : > { %v5711_v3 = vadd.f32 %v5710_v37, %v5646_v56 }
 0x91f   : > { %v5776_v38 = vadd.f32 %v5775_v20, %v5711_v3 }
 0x921   : > { %5873 = vst [vmem:[%s9367_s26 + $0x2f8] sm:$0xff] %v5776_v38 }
 0x922   : > { %6571 = shalt.err (!%p6568_p12)
}
 0x923   : > { %s6628_s20 = smov 768   ;;  %s6629_s26 = smov 48  }
 0x924   : > { %6188 = dma.vmem_to_hbm [thread:$0]  (%p6749_p3), %s5889_s11, 12288, %s5891_s17, %s5875_s25, %s6628_s20, %s6628_s20, %s6629_s26  }
 0x925 PF: > { %s5905_s29 = sand.u32 1, %s6606_s21   ;;  %p11413_p13 = scmp.ge.s32.totalorder %s6618_s24, 2 }
 0x926   : > { %s5906_s30 = scalar_lea.sflag [#allocation4], %s5905_s29 }
 0x927   : > { %p6208_p0 = pnand %p11413_p13, %p6700_p6 }
 0x929   : > { %p6209_p5 = pneg %p6208_p0 }
 0x92b   : > { %6601 = dma.done.wait (%p6209_p5), %s5906_s30, 12288  }
 0x92c   : > { %6603 = vsyncadd (%p6209_p5), %s5906_s30, 4294955008  ;;  %p21_p7 = scmp.ge.s32.totalorder %s6739_s14, 4   ;;  %s11414_s21 = smov %s6610_s22 }
 0x92d   : > { %s11415_s22 = smov %s6614_s23  ;;  %s11416_s23 = smov %s6755_s15 }
 0x92e   : > { %s11417_s24 = smov %s6739_s14  ;;  %23 = sbr.rel (!%p21_p7) target bundleno = 7 (0x7), region = 108 }
 0x933   :  { %5912 = vsyncpa [#allocation3], 1 }
 0x934   :  { %5914 = vsyncpa [#allocation3 + $0x1], 1 }
 0x935   :  { %5915 = vsyncpa [#allocation6], 1 }
 0x936   :  { %5916 = vsyncpa [#allocation9], 1 }
 0x937   :  { %5917 = vsyncpa [#allocation4], 1 }
 0x938   :  { %5919 = vsyncpa [#allocation4 + $0x1], 1 }

</bundles_post_ra>
